<compile_context>
chip_gen: v6e
topology: v6e:2x2x1
jax: 0.10.0
libtpu: 0.0.40
codegen_flags: <defaults>
</compile_context>

<pallas_src>
import functools

import numpy as np
import jax
import jax.numpy as jnp
from jax.experimental import pallas as pl
from jax.experimental.pallas import tpu as pltpu

K = 5
STRIDE = 2


def _round_up(v, m):
    return (v + m - 1) // m * m


# ----------------------------------------------------------------------------
# Pallas kernel: TQ input rows -> 2*TQ interleaved output rows, fused IGDN /
# sigmoid.  Layout inside the kernel is (N, H, C, W): channels on sublanes,
# width on lanes.
# ----------------------------------------------------------------------------
def _poly_deconv_kernel(x_ref, we_ref, wo_ref, b_ref, beta_ref, gamma_ref,
                        se_ref, so_ref, o_ref, *, mode):
    # x_ref    : (1, Hin+2, Cin_p, Win+2) 1-px padded input, (N,H,C,W) layout
    # we_ref   : (2*Cout_p, 9*Cin_p)      taps for even output columns
    # wo_ref   : (2*Cout_p, 9*Cin_p)      taps for odd  output columns
    #            row blocks = [even output row ; odd output row]
    #            col index  = adx*(3*Cin_p) + ady*Cin_p + ci   (window offsets)
    # b_ref    : (2*Cout_p, 1)            bias (tiled over the 2 row phases)
    # beta_ref : (2*Cout_p, 1)            IGDN beta  (zeros for sigmoid layer)
    # gamma_ref: (2*Cout_p, 2*Cout_p)     block-diag IGDN gamma
    # se_ref   : (Win, Wout)              0/1 scatter: column p -> 2p
    # so_ref   : (Win, Wout)              0/1 scatter: column p -> 2p+1
    # o_ref    : (1, 2*TQ, Cout_p, Wout)  output slab (interleaved, lane-dense)
    cout = o_ref.shape[2]
    win = se_ref.shape[0]
    wp = x_ref.shape[3]
    cin = x_ref.shape[2]
    tq = o_ref.shape[1] // 2

    base = pl.multiple_of(pl.program_id(1) * tq, tq)
    rows = x_ref[0, pl.ds(base, tq + 2)]              # (TQ+2, Cin_p, Wp)

    w_e = we_ref[...]
    w_o = wo_ref[...]
    b2 = b_ref[...]
    se = se_ref[...]
    so = so_ref[...]
    if mode == "igdn":
        gamma2 = gamma_ref[...]
        beta2 = beta_ref[...]

    # Build the 3x3 polyphase tap stack for every input row of this slab and
    # lane-concatenate them, so both weight matmuls run once per grid step
    # (2 wide MXU pushes) instead of once per row (2*TQ narrow pushes).
    a_blocks = []
    for q in range(tq):
        r3 = rows[q:q + 3].reshape(3 * cin, wp)       # sublane-major merge, no relayout
        a_blocks.append(jnp.concatenate(
            [r3[:, 0:win], r3[:, 1:1 + win], r3[:, 2:2 + win]], axis=0))
    a_all = jnp.concatenate(a_blocks, axis=1)         # (9*Cin_p, TQ*Win)

    # even-x / odd-x output columns, both y-phases, all TQ rows at once.
    r_e_all = jnp.dot(w_e, a_all, preferred_element_type=jnp.float32)
    r_o_all = jnp.dot(w_o, a_all, preferred_element_type=jnp.float32)

    for q in range(tq):
        r_e = r_e_all[:, q * win:(q + 1) * win]        # (2*Cout, Win), static slice
        r_o = r_o_all[:, q * win:(q + 1) * win]

        # interleave even/odd columns with exact 0/1 scatter matmuls so both
        # output rows come out already lane-dense in their final layout.
        r_out = (jnp.dot(r_e, se, preferred_element_type=jnp.float32)
                 + jnp.dot(r_o, so, preferred_element_type=jnp.float32)
                 + b2)                                 # (2*Cout, Wout)

        if mode == "igdn":
            # inverse GDN: y = x * sqrt(beta + gamma @ x^2)  (per pixel)
            nrm = jnp.dot(gamma2, r_out * r_out,
                          preferred_element_type=jnp.float32) + beta2
            r_out = r_out * jnp.sqrt(nrm)
        else:                                          # "sigmoid"
            r_out = jax.nn.sigmoid(r_out)

        o_ref[0, 2 * q] = r_out[:cout].astype(o_ref.dtype)       # even row
        o_ref[0, 2 * q + 1] = r_out[cout:].astype(o_ref.dtype)   # odd row


# ----------------------------------------------------------------------------
# Wrapper: polyphase weight layout + pallas_call (input/output stay in NHCW)
# ----------------------------------------------------------------------------
def _build_poly_weights(w_t):
    """w_t (Cin_p, Cout_p, K, K) -> (W_even_x, W_odd_x), each (2*Cout_p, 9*Cin_p)."""
    cin_p, cout_p = w_t.shape[0], w_t.shape[1]

    def phase_block(ry, rx):
        taps = []
        for adx in range(3):            # padded-input column offset
            for ady in range(3):        # padded-input row offset
                ky = (4 - 2 * ady) if ry == 0 else (5 - 2 * ady)
                kx = (4 - 2 * adx) if rx == 0 else (5 - 2 * adx)
                if 0 <= ky < K and 0 <= kx < K:
                    taps.append(jnp.transpose(w_t[:, :, ky, kx]))   # (Cout_p, Cin_p)
                else:
                    taps.append(jnp.zeros((cout_p, cin_p), jnp.float32))
        return jnp.concatenate(taps, axis=1)                        # (Cout_p, 9*Cin_p)

    w_e = jnp.concatenate([phase_block(0, 0), phase_block(1, 0)], axis=0)
    w_o = jnp.concatenate([phase_block(0, 1), phase_block(1, 1)], axis=0)
    return w_e, w_o


def _prep_layer(w_t, b, beta, gamma, cin_p, cout_p):
    cin, cout = w_t.shape[0], w_t.shape[1]
    w_p = jnp.pad(w_t.astype(jnp.float32),
                  ((0, cin_p - cin), (0, cout_p - cout), (0, 0), (0, 0)))
    b_p = jnp.pad(b.astype(jnp.float32), (0, cout_p - cout))
    w_e, w_o = _build_poly_weights(w_p)
    b2 = jnp.tile(b_p.reshape(cout_p, 1), (2, 1))
    if beta is None:                                 # sigmoid layer (dummies)
        beta2 = jnp.zeros((2 * cout_p, 1), jnp.float32)
        gamma2 = jnp.zeros((2 * cout_p, 2 * cout_p), jnp.float32)
    else:
        beta_p = jnp.pad(beta.astype(jnp.float32), (0, cout_p - cout))
        gamma_p = jnp.pad(gamma.astype(jnp.float32),
                          ((0, cout_p - cout), (0, cout_p - cout)))
        beta2 = jnp.tile(beta_p.reshape(cout_p, 1), (2, 1))
        gamma2 = jnp.kron(jnp.eye(2, dtype=jnp.float32), gamma_p)
    return w_e, w_o, b2, beta2, gamma2


def deconv_igdn_layer(x_nhcw, w_t, b, beta, gamma, mode):
    """x_nhcw: (N, Hin, Cin, Win) -> (N, 2*Hin, Cout, 2*Win), NHCW layout."""
    N, Hin, Cin, Win = x_nhcw.shape
    cout = w_t.shape[1]
    cin_p = _round_up(Cin, 8)
    cout_p = _round_up(cout, 8)
    Hout, Wout = STRIDE * Hin, STRIDE * Win
    Hp, Wp = Hin + 2, Win + 2

    # 1-pixel spatial halo (polyphase boundary) + channel pad to a sublane tile
    xp = jnp.pad(x_nhcw.astype(jnp.float32),
                 ((0, 0), (1, 1), (0, cin_p - Cin), (1, 1)))

    w_e, w_o, b2, beta2, gamma2 = _prep_layer(w_t, b, beta, gamma, cin_p, cout_p)

    # exact 0/1 column-scatter matrices (constants, shapes are static)
    se_np = np.zeros((Win, Wout), np.float32)
    so_np = np.zeros((Win, Wout), np.float32)
    se_np[np.arange(Win), 2 * np.arange(Win)] = 1.0
    so_np[np.arange(Win), 2 * np.arange(Win) + 1] = 1.0
    se, so = jnp.asarray(se_np), jnp.asarray(so_np)

    tq = next(t for t in (8, 4, 2, 1) if Hin % t == 0)
    grid = (N, Hin // tq)

    kern = functools.partial(_poly_deconv_kernel, mode=mode)
    out = pl.pallas_call(
        kern,
        out_shape=jax.ShapeDtypeStruct((N, Hout, cout_p, Wout), jnp.float32),
        grid=grid,
        in_specs=[
            pl.BlockSpec((1, Hp, cin_p, Wp), lambda n, qb: (n, 0, 0, 0)),
            pl.BlockSpec((2 * cout_p, 9 * cin_p), lambda n, qb: (0, 0)),
            pl.BlockSpec((2 * cout_p, 9 * cin_p), lambda n, qb: (0, 0)),
            pl.BlockSpec((2 * cout_p, 1), lambda n, qb: (0, 0)),
            pl.BlockSpec((2 * cout_p, 1), lambda n, qb: (0, 0)),
            pl.BlockSpec((2 * cout_p, 2 * cout_p), lambda n, qb: (0, 0)),
            pl.BlockSpec((Win, Wout), lambda n, qb: (0, 0)),
            pl.BlockSpec((Win, Wout), lambda n, qb: (0, 0)),
        ],
        out_specs=pl.BlockSpec((1, 2 * tq, cout_p, Wout),
                               lambda n, qb: (n, qb, 0, 0)),
        compiler_params=pltpu.CompilerParams(
            dimension_semantics=("parallel", "parallel")),
    )(xp, w_e, w_o, b2, beta2, gamma2, se, so)

    if cout_p != cout:
        out = out[:, :, :cout, :]
    return out


def image_synthesis_forward(x_nchw, params):
    x = jnp.transpose(x_nchw, (0, 2, 1, 3))      # NCHW -> NHCW  (once)
    for i, p in enumerate(params):
        mode = "igdn" if i < len(params) - 1 else "sigmoid"
        x = deconv_igdn_layer(x, p["w"], p["b"], p["beta"], p["gamma"], mode)
    return jnp.transpose(x, (0, 2, 1, 3))        # NHCW -> NCHW  (once)


# ----------------------------------------------------------------------------
# Pure-JAX reference (for verification)
# ----------------------------------------------------------------------------
def _ref_deconv(x, w_t, b):
    w_conv = jnp.transpose(w_t, (1, 0, 2, 3))[:, :, ::-1, ::-1]   # OIHW, flipped
    y = jax.lax.conv_general_dilated(
        x, w_conv, window_strides=(1, 1),
        padding=[(2, 3), (2, 3)], lhs_dilation=(STRIDE, STRIDE),
        dimension_numbers=("NCHW", "OIHW", "NCHW"))
    return y + b[None, :, None, None]


def _ref_igdn(x, beta, gamma):
    norm = jnp.einsum("cj,njhw->nchw", gamma, x * x) + beta[None, :, None, None]
    return x * jnp.sqrt(norm)


def image_synthesis_reference(x, params):
    for i, p in enumerate(params):
        x = _ref_deconv(x, p["w"], p["b"])
        if i < len(params) - 1:
            x = _ref_igdn(x, p["beta"], p["gamma"])
        else:
            x = jax.nn.sigmoid(x)
    return x


# ----------------------------------------------------------------------------
# Deterministic parameter init (synthetic; same shapes as the PyTorch module)
# ----------------------------------------------------------------------------
def init_params(key, network_channels, compression_channels):
    chans = [(compression_channels, network_channels),
             (network_channels, network_channels),
             (network_channels, network_channels),
             (network_channels, 3)]
    params = []
    for i, (cin, cout) in enumerate(chans):
        key, kw, kb, kbeta, kgamma = jax.random.split(key, 5)
        scale = 0.3 / np.sqrt(cin * K * K)
        w = scale * jax.random.normal(kw, (cin, cout, K, K), jnp.float32)
        b = 0.05 * jax.random.normal(kb, (cout,), jnp.float32)
        if i < len(chans) - 1:
            beta = 1.0 + 0.1 * jax.random.uniform(kbeta, (cout,), jnp.float32)
            gamma = (0.1 * jnp.eye(cout, dtype=jnp.float32)
                     + 0.01 * jax.random.uniform(kgamma, (cout, cout), jnp.float32))
        else:
            beta, gamma = None, None
        params.append(dict(w=w, b=b, beta=beta, gamma=gamma))
    return params


if __name__ == "__main__":
    network_channels = 8
    compression_channels = 4

    key = jax.random.PRNGKey(0)
    key, kx = jax.random.split(key)
    x = jax.random.normal(kx, (2, compression_channels, 8, 8), jnp.float32)  # NCHW

    params = init_params(key, network_channels, compression_channels)

    fwd = jax.jit(image_synthesis_forward)
    out = jax.block_until_ready(fwd(x, params))
    assert out.shape == (2, 3, 128, 128), out.shape

    ref = jax.block_until_ready(image_synthesis_reference(x, params))
    np.testing.assert_allclose(np.asarray(out), np.asarray(ref),
                               rtol=1e-3, atol=1e-4)

    print("KERNEL_OK")
</pallas_src>

<mosaic_0001>
module attributes {stable_mosaic.version = 11 : i64} {
  func.func @_poly_deconv_kernel(%arg0: i32, %arg1: i32, %arg2: memref<1x10x8x10xf32, #tpu.memory_space<vmem>>, %arg3: memref<16x72xf32, #tpu.memory_space<vmem>>, %arg4: memref<16x72xf32, #tpu.memory_space<vmem>>, %arg5: memref<16x1xf32, #tpu.memory_space<vmem>>, %arg6: memref<16x1xf32, #tpu.memory_space<vmem>>, %arg7: memref<16x16xf32, #tpu.memory_space<vmem>>, %arg8: memref<8x16xf32, #tpu.memory_space<vmem>>, %arg9: memref<8x16xf32, #tpu.memory_space<vmem>>, %arg10: memref<1x16x8x16xf32, #tpu.memory_space<vmem>>) attributes {dimension_semantics = [#tpu.dimension_semantics<parallel>, #tpu.dimension_semantics<parallel>], iteration_bounds = array<i64: 2, 1>, scalar_prefetch = 0 : i64, scratch_operands = 0 : i64, tpu.core_type = #tpu.core_type<tc>, window_params = [{transform_indices = @transform_0, window_bounds = array<i64: 1, 10, 8, 10>}, {pipeline_mode = #tpu.pipeline_mode<synchronous>, transform_indices = @transform_1, window_bounds = array<i64: 16, 72>}, {pipeline_mode = #tpu.pipeline_mode<synchronous>, transform_indices = @transform_2, window_bounds = array<i64: 16, 72>}, {pipeline_mode = #tpu.pipeline_mode<synchronous>, transform_indices = @transform_3, window_bounds = array<i64: 16, 1>}, {pipeline_mode = #tpu.pipeline_mode<synchronous>, transform_indices = @transform_4, window_bounds = array<i64: 16, 1>}, {pipeline_mode = #tpu.pipeline_mode<synchronous>, transform_indices = @transform_5, window_bounds = array<i64: 16, 16>}, {pipeline_mode = #tpu.pipeline_mode<synchronous>, transform_indices = @transform_6, window_bounds = array<i64: 8, 16>}, {pipeline_mode = #tpu.pipeline_mode<synchronous>, transform_indices = @transform_7, window_bounds = array<i64: 8, 16>}, {transform_indices = @transform_8, window_bounds = array<i64: 1, 16, 8, 16>}]} {
    %c8_i32 = arith.constant 8 : i32
    %0 = arith.muli %arg1, %c8_i32 : i32
    %1 = tpu.assume_multiple %0, 8 : i32
    %c0 = arith.constant 0 : index
    %2 = arith.index_cast %1 : i32 to index
    %c0_0 = arith.constant 0 : index
    %c0_1 = arith.constant 0 : index
    %3 = vector.load %arg2[%c0, %2, %c0_0, %c0_1] : memref<1x10x8x10xf32, #tpu.memory_space<vmem>>, vector<1x10x8x10xf32>
    %4 = vector.shape_cast %3 : vector<1x10x8x10xf32> to vector<10x8x10xf32>
    %c0_2 = arith.constant 0 : index
    %c0_3 = arith.constant 0 : index
    %5 = vector.load %arg3[%c0_2, %c0_3] : memref<16x72xf32, #tpu.memory_space<vmem>>, vector<16x72xf32>
    %c0_4 = arith.constant 0 : index
    %c0_5 = arith.constant 0 : index
    %6 = vector.load %arg4[%c0_4, %c0_5] : memref<16x72xf32, #tpu.memory_space<vmem>>, vector<16x72xf32>
    %c0_6 = arith.constant 0 : index
    %c0_7 = arith.constant 0 : index
    %7 = vector.load %arg5[%c0_6, %c0_7] : memref<16x1xf32, #tpu.memory_space<vmem>>, vector<16x1xf32>
    %c0_8 = arith.constant 0 : index
    %c0_9 = arith.constant 0 : index
    %8 = vector.load %arg8[%c0_8, %c0_9] : memref<8x16xf32, #tpu.memory_space<vmem>>, vector<8x16xf32>
    %c0_10 = arith.constant 0 : index
    %c0_11 = arith.constant 0 : index
    %9 = vector.load %arg9[%c0_10, %c0_11] : memref<8x16xf32, #tpu.memory_space<vmem>>, vector<8x16xf32>
    %c0_12 = arith.constant 0 : index
    %c0_13 = arith.constant 0 : index
    %10 = vector.load %arg7[%c0_12, %c0_13] : memref<16x16xf32, #tpu.memory_space<vmem>>, vector<16x16xf32>
    %c0_14 = arith.constant 0 : index
    %c0_15 = arith.constant 0 : index
    %11 = vector.load %arg6[%c0_14, %c0_15] : memref<16x1xf32, #tpu.memory_space<vmem>>, vector<16x1xf32>
    %12 = vector.extract_strided_slice %4 {offsets = [0, 0, 0], sizes = [3, 8, 10], strides = [1, 1, 1]} : vector<10x8x10xf32> to vector<3x8x10xf32>
    %13 = vector.shape_cast %12 : vector<3x8x10xf32> to vector<24x10xf32>
    %14 = vector.extract_strided_slice %13 {offsets = [0, 0], sizes = [24, 8], strides = [1, 1]} : vector<24x10xf32> to vector<24x8xf32>
    %15 = vector.extract_strided_slice %13 {offsets = [0, 1], sizes = [24, 8], strides = [1, 1]} : vector<24x10xf32> to vector<24x8xf32>
    %16 = vector.extract_strided_slice %13 {offsets = [0, 2], sizes = [24, 8], strides = [1, 1]} : vector<24x10xf32> to vector<24x8xf32>
    %17 = tpu.concatenate %14, %15, %16 in 0 : vector<24x8xf32>, vector<24x8xf32>, vector<24x8xf32> -> vector<72x8xf32>
    %18 = vector.extract_strided_slice %4 {offsets = [1, 0, 0], sizes = [3, 8, 10], strides = [1, 1, 1]} : vector<10x8x10xf32> to vector<3x8x10xf32>
    %19 = vector.shape_cast %18 : vector<3x8x10xf32> to vector<24x10xf32>
    %20 = vector.extract_strided_slice %19 {offsets = [0, 0], sizes = [24, 8], strides = [1, 1]} : vector<24x10xf32> to vector<24x8xf32>
    %21 = vector.extract_strided_slice %19 {offsets = [0, 1], sizes = [24, 8], strides = [1, 1]} : vector<24x10xf32> to vector<24x8xf32>
    %22 = vector.extract_strided_slice %19 {offsets = [0, 2], sizes = [24, 8], strides = [1, 1]} : vector<24x10xf32> to vector<24x8xf32>
    %23 = tpu.concatenate %20, %21, %22 in 0 : vector<24x8xf32>, vector<24x8xf32>, vector<24x8xf32> -> vector<72x8xf32>
    %24 = vector.extract_strided_slice %4 {offsets = [2, 0, 0], sizes = [3, 8, 10], strides = [1, 1, 1]} : vector<10x8x10xf32> to vector<3x8x10xf32>
    %25 = vector.shape_cast %24 : vector<3x8x10xf32> to vector<24x10xf32>
    %26 = vector.extract_strided_slice %25 {offsets = [0, 0], sizes = [24, 8], strides = [1, 1]} : vector<24x10xf32> to vector<24x8xf32>
    %27 = vector.extract_strided_slice %25 {offsets = [0, 1], sizes = [24, 8], strides = [1, 1]} : vector<24x10xf32> to vector<24x8xf32>
    %28 = vector.extract_strided_slice %25 {offsets = [0, 2], sizes = [24, 8], strides = [1, 1]} : vector<24x10xf32> to vector<24x8xf32>
    %29 = tpu.concatenate %26, %27, %28 in 0 : vector<24x8xf32>, vector<24x8xf32>, vector<24x8xf32> -> vector<72x8xf32>
    %30 = vector.extract_strided_slice %4 {offsets = [3, 0, 0], sizes = [3, 8, 10], strides = [1, 1, 1]} : vector<10x8x10xf32> to vector<3x8x10xf32>
    %31 = vector.shape_cast %30 : vector<3x8x10xf32> to vector<24x10xf32>
    %32 = vector.extract_strided_slice %31 {offsets = [0, 0], sizes = [24, 8], strides = [1, 1]} : vector<24x10xf32> to vector<24x8xf32>
    %33 = vector.extract_strided_slice %31 {offsets = [0, 1], sizes = [24, 8], strides = [1, 1]} : vector<24x10xf32> to vector<24x8xf32>
    %34 = vector.extract_strided_slice %31 {offsets = [0, 2], sizes = [24, 8], strides = [1, 1]} : vector<24x10xf32> to vector<24x8xf32>
    %35 = tpu.concatenate %32, %33, %34 in 0 : vector<24x8xf32>, vector<24x8xf32>, vector<24x8xf32> -> vector<72x8xf32>
    %36 = vector.extract_strided_slice %4 {offsets = [4, 0, 0], sizes = [3, 8, 10], strides = [1, 1, 1]} : vector<10x8x10xf32> to vector<3x8x10xf32>
    %37 = vector.shape_cast %36 : vector<3x8x10xf32> to vector<24x10xf32>
    %38 = vector.extract_strided_slice %37 {offsets = [0, 0], sizes = [24, 8], strides = [1, 1]} : vector<24x10xf32> to vector<24x8xf32>
    %39 = vector.extract_strided_slice %37 {offsets = [0, 1], sizes = [24, 8], strides = [1, 1]} : vector<24x10xf32> to vector<24x8xf32>
    %40 = vector.extract_strided_slice %37 {offsets = [0, 2], sizes = [24, 8], strides = [1, 1]} : vector<24x10xf32> to vector<24x8xf32>
    %41 = tpu.concatenate %38, %39, %40 in 0 : vector<24x8xf32>, vector<24x8xf32>, vector<24x8xf32> -> vector<72x8xf32>
    %42 = vector.extract_strided_slice %4 {offsets = [5, 0, 0], sizes = [3, 8, 10], strides = [1, 1, 1]} : vector<10x8x10xf32> to vector<3x8x10xf32>
    %43 = vector.shape_cast %42 : vector<3x8x10xf32> to vector<24x10xf32>
    %44 = vector.extract_strided_slice %43 {offsets = [0, 0], sizes = [24, 8], strides = [1, 1]} : vector<24x10xf32> to vector<24x8xf32>
    %45 = vector.extract_strided_slice %43 {offsets = [0, 1], sizes = [24, 8], strides = [1, 1]} : vector<24x10xf32> to vector<24x8xf32>
    %46 = vector.extract_strided_slice %43 {offsets = [0, 2], sizes = [24, 8], strides = [1, 1]} : vector<24x10xf32> to vector<24x8xf32>
    %47 = tpu.concatenate %44, %45, %46 in 0 : vector<24x8xf32>, vector<24x8xf32>, vector<24x8xf32> -> vector<72x8xf32>
    %48 = vector.extract_strided_slice %4 {offsets = [6, 0, 0], sizes = [3, 8, 10], strides = [1, 1, 1]} : vector<10x8x10xf32> to vector<3x8x10xf32>
    %49 = vector.shape_cast %48 : vector<3x8x10xf32> to vector<24x10xf32>
    %50 = vector.extract_strided_slice %49 {offsets = [0, 0], sizes = [24, 8], strides = [1, 1]} : vector<24x10xf32> to vector<24x8xf32>
    %51 = vector.extract_strided_slice %49 {offsets = [0, 1], sizes = [24, 8], strides = [1, 1]} : vector<24x10xf32> to vector<24x8xf32>
    %52 = vector.extract_strided_slice %49 {offsets = [0, 2], sizes = [24, 8], strides = [1, 1]} : vector<24x10xf32> to vector<24x8xf32>
    %53 = tpu.concatenate %50, %51, %52 in 0 : vector<24x8xf32>, vector<24x8xf32>, vector<24x8xf32> -> vector<72x8xf32>
    %54 = vector.extract_strided_slice %4 {offsets = [7, 0, 0], sizes = [3, 8, 10], strides = [1, 1, 1]} : vector<10x8x10xf32> to vector<3x8x10xf32>
    %55 = vector.shape_cast %54 : vector<3x8x10xf32> to vector<24x10xf32>
    %56 = vector.extract_strided_slice %55 {offsets = [0, 0], sizes = [24, 8], strides = [1, 1]} : vector<24x10xf32> to vector<24x8xf32>
    %57 = vector.extract_strided_slice %55 {offsets = [0, 1], sizes = [24, 8], strides = [1, 1]} : vector<24x10xf32> to vector<24x8xf32>
    %58 = vector.extract_strided_slice %55 {offsets = [0, 2], sizes = [24, 8], strides = [1, 1]} : vector<24x10xf32> to vector<24x8xf32>
    %59 = tpu.concatenate %56, %57, %58 in 0 : vector<24x8xf32>, vector<24x8xf32>, vector<24x8xf32> -> vector<72x8xf32>
    %60 = tpu.concatenate %17, %23, %29, %35, %41, %47, %53, %59 in 1 : vector<72x8xf32>, vector<72x8xf32>, vector<72x8xf32>, vector<72x8xf32>, vector<72x8xf32>, vector<72x8xf32>, vector<72x8xf32>, vector<72x8xf32> -> vector<72x64xf32>
    %cst = arith.constant dense<0.000000e+00> : vector<16x64xf32>
    %61 = tpu.matmul %5, %60, %cst {dimension_numbers = #tpu.dot_dimension_numbers<[1], [0], [0], [1], [0, 0, 1, 1], [], []>} : vector<16x72xf32>, vector<72x64xf32>, vector<16x64xf32> -> vector<16x64xf32>
    %cst_16 = arith.constant dense<0.000000e+00> : vector<16x64xf32>
    %62 = tpu.matmul %6, %60, %cst_16 {dimension_numbers = #tpu.dot_dimension_numbers<[1], [0], [0], [1], [0, 0, 1, 1], [], []>} : vector<16x72xf32>, vector<72x64xf32>, vector<16x64xf32> -> vector<16x64xf32>
    %63 = vector.extract_strided_slice %61 {offsets = [0, 0], sizes = [16, 8], strides = [1, 1]} : vector<16x64xf32> to vector<16x8xf32>
    %64 = vector.extract_strided_slice %62 {offsets = [0, 0], sizes = [16, 8], strides = [1, 1]} : vector<16x64xf32> to vector<16x8xf32>
    %cst_17 = arith.constant dense<0.000000e+00> : vector<16x16xf32>
    %65 = tpu.matmul %63, %8, %cst_17 {dimension_numbers = #tpu.dot_dimension_numbers<[1], [0], [0], [1], [0, 0, 1, 1], [], []>} : vector<16x8xf32>, vector<8x16xf32>, vector<16x16xf32> -> vector<16x16xf32>
    %cst_18 = arith.constant dense<0.000000e+00> : vector<16x16xf32>
    %66 = tpu.matmul %64, %9, %cst_18 {dimension_numbers = #tpu.dot_dimension_numbers<[1], [0], [0], [1], [0, 0, 1, 1], [], []>} : vector<16x8xf32>, vector<8x16xf32>, vector<16x16xf32> -> vector<16x16xf32>
    %67 = arith.addf %65, %66 : vector<16x16xf32>
    %68 = vector.broadcast %7 : vector<16x1xf32> to vector<16x16xf32>
    %69 = arith.addf %67, %68 : vector<16x16xf32>
    %70 = arith.mulf %69, %69 : vector<16x16xf32>
    %cst_19 = arith.constant dense<0.000000e+00> : vector<16x16xf32>
    %71 = tpu.matmul %10, %70, %cst_19 {dimension_numbers = #tpu.dot_dimension_numbers<[1], [0], [0], [1], [0, 0, 1, 1], [], []>} : vector<16x16xf32>, vector<16x16xf32>, vector<16x16xf32> -> vector<16x16xf32>
    %72 = vector.broadcast %11 : vector<16x1xf32> to vector<16x16xf32>
    %73 = arith.addf %71, %72 : vector<16x16xf32>
    %74 = math.sqrt %73 : vector<16x16xf32>
    %75 = arith.mulf %69, %74 : vector<16x16xf32>
    %76 = vector.extract_strided_slice %75 {offsets = [0, 0], sizes = [8, 16], strides = [1, 1]} : vector<16x16xf32> to vector<8x16xf32>
    %c0_20 = arith.constant 0 : index
    %c0_21 = arith.constant 0 : index
    %c0_22 = arith.constant 0 : index
    %c0_23 = arith.constant 0 : index
    %77 = vector.load %arg10[%c0_20, %c0_21, %c0_22, %c0_23] : memref<1x16x8x16xf32, #tpu.memory_space<vmem>>, vector<1x1x8x16xf32>
    %78 = vector.shape_cast %77 : vector<1x1x8x16xf32> to vector<8x16xf32>
    %79 = vector.shape_cast %76 : vector<8x16xf32> to vector<1x1x8x16xf32>
    tpu.vector_store %arg10[%c0_20, %c0_21, %c0_22, %c0_23], %79 {strides = array<i32>} : memref<1x16x8x16xf32, #tpu.memory_space<vmem>>, vector<1x1x8x16xf32>,
    %80 = vector.extract_strided_slice %75 {offsets = [8, 0], sizes = [8, 16], strides = [1, 1]} : vector<16x16xf32> to vector<8x16xf32>
    %c0_24 = arith.constant 0 : index
    %c1 = arith.constant 1 : index
    %c0_25 = arith.constant 0 : index
    %c0_26 = arith.constant 0 : index
    %81 = vector.load %arg10[%c0_24, %c1, %c0_25, %c0_26] : memref<1x16x8x16xf32, #tpu.memory_space<vmem>>, vector<1x1x8x16xf32>
    %82 = vector.shape_cast %81 : vector<1x1x8x16xf32> to vector<8x16xf32>
    %83 = vector.shape_cast %80 : vector<8x16xf32> to vector<1x1x8x16xf32>
    tpu.vector_store %arg10[%c0_24, %c1, %c0_25, %c0_26], %83 {strides = array<i32>} : memref<1x16x8x16xf32, #tpu.memory_space<vmem>>, vector<1x1x8x16xf32>,
    %84 = vector.extract_strided_slice %61 {offsets = [0, 8], sizes = [16, 8], strides = [1, 1]} : vector<16x64xf32> to vector<16x8xf32>
    %85 = vector.extract_strided_slice %62 {offsets = [0, 8], sizes = [16, 8], strides = [1, 1]} : vector<16x64xf32> to vector<16x8xf32>
    %cst_27 = arith.constant dense<0.000000e+00> : vector<16x16xf32>
    %86 = tpu.matmul %84, %8, %cst_27 {dimension_numbers = #tpu.dot_dimension_numbers<[1], [0], [0], [1], [0, 0, 1, 1], [], []>} : vector<16x8xf32>, vector<8x16xf32>, vector<16x16xf32> -> vector<16x16xf32>
    %cst_28 = arith.constant dense<0.000000e+00> : vector<16x16xf32>
    %87 = tpu.matmul %85, %9, %cst_28 {dimension_numbers = #tpu.dot_dimension_numbers<[1], [0], [0], [1], [0, 0, 1, 1], [], []>} : vector<16x8xf32>, vector<8x16xf32>, vector<16x16xf32> -> vector<16x16xf32>
    %88 = arith.addf %86, %87 : vector<16x16xf32>
    %89 = vector.broadcast %7 : vector<16x1xf32> to vector<16x16xf32>
    %90 = arith.addf %88, %89 : vector<16x16xf32>
    %91 = arith.mulf %90, %90 : vector<16x16xf32>
    %cst_29 = arith.constant dense<0.000000e+00> : vector<16x16xf32>
    %92 = tpu.matmul %10, %91, %cst_29 {dimension_numbers = #tpu.dot_dimension_numbers<[1], [0], [0], [1], [0, 0, 1, 1], [], []>} : vector<16x16xf32>, vector<16x16xf32>, vector<16x16xf32> -> vector<16x16xf32>
    %93 = vector.broadcast %11 : vector<16x1xf32> to vector<16x16xf32>
    %94 = arith.addf %92, %93 : vector<16x16xf32>
    %95 = math.sqrt %94 : vector<16x16xf32>
    %96 = arith.mulf %90, %95 : vector<16x16xf32>
    %97 = vector.extract_strided_slice %96 {offsets = [0, 0], sizes = [8, 16], strides = [1, 1]} : vector<16x16xf32> to vector<8x16xf32>
    %c0_30 = arith.constant 0 : index
    %c2 = arith.constant 2 : index
    %c0_31 = arith.constant 0 : index
    %c0_32 = arith.constant 0 : index
    %98 = vector.load %arg10[%c0_30, %c2, %c0_31, %c0_32] : memref<1x16x8x16xf32, #tpu.memory_space<vmem>>, vector<1x1x8x16xf32>
    %99 = vector.shape_cast %98 : vector<1x1x8x16xf32> to vector<8x16xf32>
    %100 = vector.shape_cast %97 : vector<8x16xf32> to vector<1x1x8x16xf32>
    tpu.vector_store %arg10[%c0_30, %c2, %c0_31, %c0_32], %100 {strides = array<i32>} : memref<1x16x8x16xf32, #tpu.memory_space<vmem>>, vector<1x1x8x16xf32>,
    %101 = vector.extract_strided_slice %96 {offsets = [8, 0], sizes = [8, 16], strides = [1, 1]} : vector<16x16xf32> to vector<8x16xf32>
    %c0_33 = arith.constant 0 : index
    %c3 = arith.constant 3 : index
    %c0_34 = arith.constant 0 : index
    %c0_35 = arith.constant 0 : index
    %102 = vector.load %arg10[%c0_33, %c3, %c0_34, %c0_35] : memref<1x16x8x16xf32, #tpu.memory_space<vmem>>, vector<1x1x8x16xf32>
    %103 = vector.shape_cast %102 : vector<1x1x8x16xf32> to vector<8x16xf32>
    %104 = vector.shape_cast %101 : vector<8x16xf32> to vector<1x1x8x16xf32>
    tpu.vector_store %arg10[%c0_33, %c3, %c0_34, %c0_35], %104 {strides = array<i32>} : memref<1x16x8x16xf32, #tpu.memory_space<vmem>>, vector<1x1x8x16xf32>,
    %105 = vector.extract_strided_slice %61 {offsets = [0, 16], sizes = [16, 8], strides = [1, 1]} : vector<16x64xf32> to vector<16x8xf32>
    %106 = vector.extract_strided_slice %62 {offsets = [0, 16], sizes = [16, 8], strides = [1, 1]} : vector<16x64xf32> to vector<16x8xf32>
    %cst_36 = arith.constant dense<0.000000e+00> : vector<16x16xf32>
    %107 = tpu.matmul %105, %8, %cst_36 {dimension_numbers = #tpu.dot_dimension_numbers<[1], [0], [0], [1], [0, 0, 1, 1], [], []>} : vector<16x8xf32>, vector<8x16xf32>, vector<16x16xf32> -> vector<16x16xf32>
    %cst_37 = arith.constant dense<0.000000e+00> : vector<16x16xf32>
    %108 = tpu.matmul %106, %9, %cst_37 {dimension_numbers = #tpu.dot_dimension_numbers<[1], [0], [0], [1], [0, 0, 1, 1], [], []>} : vector<16x8xf32>, vector<8x16xf32>, vector<16x16xf32> -> vector<16x16xf32>
    %109 = arith.addf %107, %108 : vector<16x16xf32>
    %110 = vector.broadcast %7 : vector<16x1xf32> to vector<16x16xf32>
    %111 = arith.addf %109, %110 : vector<16x16xf32>
    %112 = arith.mulf %111, %111 : vector<16x16xf32>
    %cst_38 = arith.constant dense<0.000000e+00> : vector<16x16xf32>
    %113 = tpu.matmul %10, %112, %cst_38 {dimension_numbers = #tpu.dot_dimension_numbers<[1], [0], [0], [1], [0, 0, 1, 1], [], []>} : vector<16x16xf32>, vector<16x16xf32>, vector<16x16xf32> -> vector<16x16xf32>
    %114 = vector.broadcast %11 : vector<16x1xf32> to vector<16x16xf32>
    %115 = arith.addf %113, %114 : vector<16x16xf32>
    %116 = math.sqrt %115 : vector<16x16xf32>
    %117 = arith.mulf %111, %116 : vector<16x16xf32>
    %118 = vector.extract_strided_slice %117 {offsets = [0, 0], sizes = [8, 16], strides = [1, 1]} : vector<16x16xf32> to vector<8x16xf32>
    %c0_39 = arith.constant 0 : index
    %c4 = arith.constant 4 : index
    %c0_40 = arith.constant 0 : index
    %c0_41 = arith.constant 0 : index
    %119 = vector.load %arg10[%c0_39, %c4, %c0_40, %c0_41] : memref<1x16x8x16xf32, #tpu.memory_space<vmem>>, vector<1x1x8x16xf32>
    %120 = vector.shape_cast %119 : vector<1x1x8x16xf32> to vector<8x16xf32>
    %121 = vector.shape_cast %118 : vector<8x16xf32> to vector<1x1x8x16xf32>
    tpu.vector_store %arg10[%c0_39, %c4, %c0_40, %c0_41], %121 {strides = array<i32>} : memref<1x16x8x16xf32, #tpu.memory_space<vmem>>, vector<1x1x8x16xf32>,
    %122 = vector.extract_strided_slice %117 {offsets = [8, 0], sizes = [8, 16], strides = [1, 1]} : vector<16x16xf32> to vector<8x16xf32>
    %c0_42 = arith.constant 0 : index
    %c5 = arith.constant 5 : index
    %c0_43 = arith.constant 0 : index
    %c0_44 = arith.constant 0 : index
    %123 = vector.load %arg10[%c0_42, %c5, %c0_43, %c0_44] : memref<1x16x8x16xf32, #tpu.memory_space<vmem>>, vector<1x1x8x16xf32>
    %124 = vector.shape_cast %123 : vector<1x1x8x16xf32> to vector<8x16xf32>
    %125 = vector.shape_cast %122 : vector<8x16xf32> to vector<1x1x8x16xf32>
    tpu.vector_store %arg10[%c0_42, %c5, %c0_43, %c0_44], %125 {strides = array<i32>} : memref<1x16x8x16xf32, #tpu.memory_space<vmem>>, vector<1x1x8x16xf32>,
    %126 = vector.extract_strided_slice %61 {offsets = [0, 24], sizes = [16, 8], strides = [1, 1]} : vector<16x64xf32> to vector<16x8xf32>
    %127 = vector.extract_strided_slice %62 {offsets = [0, 24], sizes = [16, 8], strides = [1, 1]} : vector<16x64xf32> to vector<16x8xf32>
    %cst_45 = arith.constant dense<0.000000e+00> : vector<16x16xf32>
    %128 = tpu.matmul %126, %8, %cst_45 {dimension_numbers = #tpu.dot_dimension_numbers<[1], [0], [0], [1], [0, 0, 1, 1], [], []>} : vector<16x8xf32>, vector<8x16xf32>, vector<16x16xf32> -> vector<16x16xf32>
    %cst_46 = arith.constant dense<0.000000e+00> : vector<16x16xf32>
    %129 = tpu.matmul %127, %9, %cst_46 {dimension_numbers = #tpu.dot_dimension_numbers<[1], [0], [0], [1], [0, 0, 1, 1], [], []>} : vector<16x8xf32>, vector<8x16xf32>, vector<16x16xf32> -> vector<16x16xf32>
    %130 = arith.addf %128, %129 : vector<16x16xf32>
    %131 = vector.broadcast %7 : vector<16x1xf32> to vector<16x16xf32>
    %132 = arith.addf %130, %131 : vector<16x16xf32>
    %133 = arith.mulf %132, %132 : vector<16x16xf32>
    %cst_47 = arith.constant dense<0.000000e+00> : vector<16x16xf32>
    %134 = tpu.matmul %10, %133, %cst_47 {dimension_numbers = #tpu.dot_dimension_numbers<[1], [0], [0], [1], [0, 0, 1, 1], [], []>} : vector<16x16xf32>, vector<16x16xf32>, vector<16x16xf32> -> vector<16x16xf32>
    %135 = vector.broadcast %11 : vector<16x1xf32> to vector<16x16xf32>
    %136 = arith.addf %134, %135 : vector<16x16xf32>
    %137 = math.sqrt %136 : vector<16x16xf32>
    %138 = arith.mulf %132, %137 : vector<16x16xf32>
    %139 = vector.extract_strided_slice %138 {offsets = [0, 0], sizes = [8, 16], strides = [1, 1]} : vector<16x16xf32> to vector<8x16xf32>
    %c0_48 = arith.constant 0 : index
    %c6 = arith.constant 6 : index
    %c0_49 = arith.constant 0 : index
    %c0_50 = arith.constant 0 : index
    %140 = vector.load %arg10[%c0_48, %c6, %c0_49, %c0_50] : memref<1x16x8x16xf32, #tpu.memory_space<vmem>>, vector<1x1x8x16xf32>
    %141 = vector.shape_cast %140 : vector<1x1x8x16xf32> to vector<8x16xf32>
    %142 = vector.shape_cast %139 : vector<8x16xf32> to vector<1x1x8x16xf32>
    tpu.vector_store %arg10[%c0_48, %c6, %c0_49, %c0_50], %142 {strides = array<i32>} : memref<1x16x8x16xf32, #tpu.memory_space<vmem>>, vector<1x1x8x16xf32>,
    %143 = vector.extract_strided_slice %138 {offsets = [8, 0], sizes = [8, 16], strides = [1, 1]} : vector<16x16xf32> to vector<8x16xf32>
    %c0_51 = arith.constant 0 : index
    %c7 = arith.constant 7 : index
    %c0_52 = arith.constant 0 : index
    %c0_53 = arith.constant 0 : index
    %144 = vector.load %arg10[%c0_51, %c7, %c0_52, %c0_53] : memref<1x16x8x16xf32, #tpu.memory_space<vmem>>, vector<1x1x8x16xf32>
    %145 = vector.shape_cast %144 : vector<1x1x8x16xf32> to vector<8x16xf32>
    %146 = vector.shape_cast %143 : vector<8x16xf32> to vector<1x1x8x16xf32>
    tpu.vector_store %arg10[%c0_51, %c7, %c0_52, %c0_53], %146 {strides = array<i32>} : memref<1x16x8x16xf32, #tpu.memory_space<vmem>>, vector<1x1x8x16xf32>,
    %147 = vector.extract_strided_slice %61 {offsets = [0, 32], sizes = [16, 8], strides = [1, 1]} : vector<16x64xf32> to vector<16x8xf32>
    %148 = vector.extract_strided_slice %62 {offsets = [0, 32], sizes = [16, 8], strides = [1, 1]} : vector<16x64xf32> to vector<16x8xf32>
    %cst_54 = arith.constant dense<0.000000e+00> : vector<16x16xf32>
    %149 = tpu.matmul %147, %8, %cst_54 {dimension_numbers = #tpu.dot_dimension_numbers<[1], [0], [0], [1], [0, 0, 1, 1], [], []>} : vector<16x8xf32>, vector<8x16xf32>, vector<16x16xf32> -> vector<16x16xf32>
    %cst_55 = arith.constant dense<0.000000e+00> : vector<16x16xf32>
    %150 = tpu.matmul %148, %9, %cst_55 {dimension_numbers = #tpu.dot_dimension_numbers<[1], [0], [0], [1], [0, 0, 1, 1], [], []>} : vector<16x8xf32>, vector<8x16xf32>, vector<16x16xf32> -> vector<16x16xf32>
    %151 = arith.addf %149, %150 : vector<16x16xf32>
    %152 = vector.broadcast %7 : vector<16x1xf32> to vector<16x16xf32>
    %153 = arith.addf %151, %152 : vector<16x16xf32>
    %154 = arith.mulf %153, %153 : vector<16x16xf32>
    %cst_56 = arith.constant dense<0.000000e+00> : vector<16x16xf32>
    %155 = tpu.matmul %10, %154, %cst_56 {dimension_numbers = #tpu.dot_dimension_numbers<[1], [0], [0], [1], [0, 0, 1, 1], [], []>} : vector<16x16xf32>, vector<16x16xf32>, vector<16x16xf32> -> vector<16x16xf32>
    %156 = vector.broadcast %11 : vector<16x1xf32> to vector<16x16xf32>
    %157 = arith.addf %155, %156 : vector<16x16xf32>
    %158 = math.sqrt %157 : vector<16x16xf32>
    %159 = arith.mulf %153, %158 : vector<16x16xf32>
    %160 = vector.extract_strided_slice %159 {offsets = [0, 0], sizes = [8, 16], strides = [1, 1]} : vector<16x16xf32> to vector<8x16xf32>
    %c0_57 = arith.constant 0 : index
    %c8 = arith.constant 8 : index
    %c0_58 = arith.constant 0 : index
    %c0_59 = arith.constant 0 : index
    %161 = vector.load %arg10[%c0_57, %c8, %c0_58, %c0_59] : memref<1x16x8x16xf32, #tpu.memory_space<vmem>>, vector<1x1x8x16xf32>
    %162 = vector.shape_cast %161 : vector<1x1x8x16xf32> to vector<8x16xf32>
    %163 = vector.shape_cast %160 : vector<8x16xf32> to vector<1x1x8x16xf32>
    tpu.vector_store %arg10[%c0_57, %c8, %c0_58, %c0_59], %163 {strides = array<i32>} : memref<1x16x8x16xf32, #tpu.memory_space<vmem>>, vector<1x1x8x16xf32>,
    %164 = vector.extract_strided_slice %159 {offsets = [8, 0], sizes = [8, 16], strides = [1, 1]} : vector<16x16xf32> to vector<8x16xf32>
    %c0_60 = arith.constant 0 : index
    %c9 = arith.constant 9 : index
    %c0_61 = arith.constant 0 : index
    %c0_62 = arith.constant 0 : index
    %165 = vector.load %arg10[%c0_60, %c9, %c0_61, %c0_62] : memref<1x16x8x16xf32, #tpu.memory_space<vmem>>, vector<1x1x8x16xf32>
    %166 = vector.shape_cast %165 : vector<1x1x8x16xf32> to vector<8x16xf32>
    %167 = vector.shape_cast %164 : vector<8x16xf32> to vector<1x1x8x16xf32>
    tpu.vector_store %arg10[%c0_60, %c9, %c0_61, %c0_62], %167 {strides = array<i32>} : memref<1x16x8x16xf32, #tpu.memory_space<vmem>>, vector<1x1x8x16xf32>,
    %168 = vector.extract_strided_slice %61 {offsets = [0, 40], sizes = [16, 8], strides = [1, 1]} : vector<16x64xf32> to vector<16x8xf32>
    %169 = vector.extract_strided_slice %62 {offsets = [0, 40], sizes = [16, 8], strides = [1, 1]} : vector<16x64xf32> to vector<16x8xf32>
    %cst_63 = arith.constant dense<0.000000e+00> : vector<16x16xf32>
    %170 = tpu.matmul %168, %8, %cst_63 {dimension_numbers = #tpu.dot_dimension_numbers<[1], [0], [0], [1], [0, 0, 1, 1], [], []>} : vector<16x8xf32>, vector<8x16xf32>, vector<16x16xf32> -> vector<16x16xf32>
    %cst_64 = arith.constant dense<0.000000e+00> : vector<16x16xf32>
    %171 = tpu.matmul %169, %9, %cst_64 {dimension_numbers = #tpu.dot_dimension_numbers<[1], [0], [0], [1], [0, 0, 1, 1], [], []>} : vector<16x8xf32>, vector<8x16xf32>, vector<16x16xf32> -> vector<16x16xf32>
    %172 = arith.addf %170, %171 : vector<16x16xf32>
    %173 = vector.broadcast %7 : vector<16x1xf32> to vector<16x16xf32>
    %174 = arith.addf %172, %173 : vector<16x16xf32>
    %175 = arith.mulf %174, %174 : vector<16x16xf32>
    %cst_65 = arith.constant dense<0.000000e+00> : vector<16x16xf32>
    %176 = tpu.matmul %10, %175, %cst_65 {dimension_numbers = #tpu.dot_dimension_numbers<[1], [0], [0], [1], [0, 0, 1, 1], [], []>} : vector<16x16xf32>, vector<16x16xf32>, vector<16x16xf32> -> vector<16x16xf32>
    %177 = vector.broadcast %11 : vector<16x1xf32> to vector<16x16xf32>
    %178 = arith.addf %176, %177 : vector<16x16xf32>
    %179 = math.sqrt %178 : vector<16x16xf32>
    %180 = arith.mulf %174, %179 : vector<16x16xf32>
    %181 = vector.extract_strided_slice %180 {offsets = [0, 0], sizes = [8, 16], strides = [1, 1]} : vector<16x16xf32> to vector<8x16xf32>
    %c0_66 = arith.constant 0 : index
    %c10 = arith.constant 10 : index
    %c0_67 = arith.constant 0 : index
    %c0_68 = arith.constant 0 : index
    %182 = vector.load %arg10[%c0_66, %c10, %c0_67, %c0_68] : memref<1x16x8x16xf32, #tpu.memory_space<vmem>>, vector<1x1x8x16xf32>
    %183 = vector.shape_cast %182 : vector<1x1x8x16xf32> to vector<8x16xf32>
    %184 = vector.shape_cast %181 : vector<8x16xf32> to vector<1x1x8x16xf32>
    tpu.vector_store %arg10[%c0_66, %c10, %c0_67, %c0_68], %184 {strides = array<i32>} : memref<1x16x8x16xf32, #tpu.memory_space<vmem>>, vector<1x1x8x16xf32>,
    %185 = vector.extract_strided_slice %180 {offsets = [8, 0], sizes = [8, 16], strides = [1, 1]} : vector<16x16xf32> to vector<8x16xf32>
    %c0_69 = arith.constant 0 : index
    %c11 = arith.constant 11 : index
    %c0_70 = arith.constant 0 : index
    %c0_71 = arith.constant 0 : index
    %186 = vector.load %arg10[%c0_69, %c11, %c0_70, %c0_71] : memref<1x16x8x16xf32, #tpu.memory_space<vmem>>, vector<1x1x8x16xf32>
    %187 = vector.shape_cast %186 : vector<1x1x8x16xf32> to vector<8x16xf32>
    %188 = vector.shape_cast %185 : vector<8x16xf32> to vector<1x1x8x16xf32>
    tpu.vector_store %arg10[%c0_69, %c11, %c0_70, %c0_71], %188 {strides = array<i32>} : memref<1x16x8x16xf32, #tpu.memory_space<vmem>>, vector<1x1x8x16xf32>,
    %189 = vector.extract_strided_slice %61 {offsets = [0, 48], sizes = [16, 8], strides = [1, 1]} : vector<16x64xf32> to vector<16x8xf32>
    %190 = vector.extract_strided_slice %62 {offsets = [0, 48], sizes = [16, 8], strides = [1, 1]} : vector<16x64xf32> to vector<16x8xf32>
    %cst_72 = arith.constant dense<0.000000e+00> : vector<16x16xf32>
    %191 = tpu.matmul %189, %8, %cst_72 {dimension_numbers = #tpu.dot_dimension_numbers<[1], [0], [0], [1], [0, 0, 1, 1], [], []>} : vector<16x8xf32>, vector<8x16xf32>, vector<16x16xf32> -> vector<16x16xf32>
    %cst_73 = arith.constant dense<0.000000e+00> : vector<16x16xf32>
    %192 = tpu.matmul %190, %9, %cst_73 {dimension_numbers = #tpu.dot_dimension_numbers<[1], [0], [0], [1], [0, 0, 1, 1], [], []>} : vector<16x8xf32>, vector<8x16xf32>, vector<16x16xf32> -> vector<16x16xf32>
    %193 = arith.addf %191, %192 : vector<16x16xf32>
    %194 = vector.broadcast %7 : vector<16x1xf32> to vector<16x16xf32>
    %195 = arith.addf %193, %194 : vector<16x16xf32>
    %196 = arith.mulf %195, %195 : vector<16x16xf32>
    %cst_74 = arith.constant dense<0.000000e+00> : vector<16x16xf32>
    %197 = tpu.matmul %10, %196, %cst_74 {dimension_numbers = #tpu.dot_dimension_numbers<[1], [0], [0], [1], [0, 0, 1, 1], [], []>} : vector<16x16xf32>, vector<16x16xf32>, vector<16x16xf32> -> vector<16x16xf32>
    %198 = vector.broadcast %11 : vector<16x1xf32> to vector<16x16xf32>
    %199 = arith.addf %197, %198 : vector<16x16xf32>
    %200 = math.sqrt %199 : vector<16x16xf32>
    %201 = arith.mulf %195, %200 : vector<16x16xf32>
    %202 = vector.extract_strided_slice %201 {offsets = [0, 0], sizes = [8, 16], strides = [1, 1]} : vector<16x16xf32> to vector<8x16xf32>
    %c0_75 = arith.constant 0 : index
    %c12 = arith.constant 12 : index
    %c0_76 = arith.constant 0 : index
    %c0_77 = arith.constant 0 : index
    %203 = vector.load %arg10[%c0_75, %c12, %c0_76, %c0_77] : memref<1x16x8x16xf32, #tpu.memory_space<vmem>>, vector<1x1x8x16xf32>
    %204 = vector.shape_cast %203 : vector<1x1x8x16xf32> to vector<8x16xf32>
    %205 = vector.shape_cast %202 : vector<8x16xf32> to vector<1x1x8x16xf32>
    tpu.vector_store %arg10[%c0_75, %c12, %c0_76, %c0_77], %205 {strides = array<i32>} : memref<1x16x8x16xf32, #tpu.memory_space<vmem>>, vector<1x1x8x16xf32>,
    %206 = vector.extract_strided_slice %201 {offsets = [8, 0], sizes = [8, 16], strides = [1, 1]} : vector<16x16xf32> to vector<8x16xf32>
    %c0_78 = arith.constant 0 : index
    %c13 = arith.constant 13 : index
    %c0_79 = arith.constant 0 : index
    %c0_80 = arith.constant 0 : index
    %207 = vector.load %arg10[%c0_78, %c13, %c0_79, %c0_80] : memref<1x16x8x16xf32, #tpu.memory_space<vmem>>, vector<1x1x8x16xf32>
    %208 = vector.shape_cast %207 : vector<1x1x8x16xf32> to vector<8x16xf32>
    %209 = vector.shape_cast %206 : vector<8x16xf32> to vector<1x1x8x16xf32>
    tpu.vector_store %arg10[%c0_78, %c13, %c0_79, %c0_80], %209 {strides = array<i32>} : memref<1x16x8x16xf32, #tpu.memory_space<vmem>>, vector<1x1x8x16xf32>,
    %210 = vector.extract_strided_slice %61 {offsets = [0, 56], sizes = [16, 8], strides = [1, 1]} : vector<16x64xf32> to vector<16x8xf32>
    %211 = vector.extract_strided_slice %62 {offsets = [0, 56], sizes = [16, 8], strides = [1, 1]} : vector<16x64xf32> to vector<16x8xf32>
    %cst_81 = arith.constant dense<0.000000e+00> : vector<16x16xf32>
    %212 = tpu.matmul %210, %8, %cst_81 {dimension_numbers = #tpu.dot_dimension_numbers<[1], [0], [0], [1], [0, 0, 1, 1], [], []>} : vector<16x8xf32>, vector<8x16xf32>, vector<16x16xf32> -> vector<16x16xf32>
    %cst_82 = arith.constant dense<0.000000e+00> : vector<16x16xf32>
    %213 = tpu.matmul %211, %9, %cst_82 {dimension_numbers = #tpu.dot_dimension_numbers<[1], [0], [0], [1], [0, 0, 1, 1], [], []>} : vector<16x8xf32>, vector<8x16xf32>, vector<16x16xf32> -> vector<16x16xf32>
    %214 = arith.addf %212, %213 : vector<16x16xf32>
    %215 = vector.broadcast %7 : vector<16x1xf32> to vector<16x16xf32>
    %216 = arith.addf %214, %215 : vector<16x16xf32>
    %217 = arith.mulf %216, %216 : vector<16x16xf32>
    %cst_83 = arith.constant dense<0.000000e+00> : vector<16x16xf32>
    %218 = tpu.matmul %10, %217, %cst_83 {dimension_numbers = #tpu.dot_dimension_numbers<[1], [0], [0], [1], [0, 0, 1, 1], [], []>} : vector<16x16xf32>, vector<16x16xf32>, vector<16x16xf32> -> vector<16x16xf32>
    %219 = vector.broadcast %11 : vector<16x1xf32> to vector<16x16xf32>
    %220 = arith.addf %218, %219 : vector<16x16xf32>
    %221 = math.sqrt %220 : vector<16x16xf32>
    %222 = arith.mulf %216, %221 : vector<16x16xf32>
    %223 = vector.extract_strided_slice %222 {offsets = [0, 0], sizes = [8, 16], strides = [1, 1]} : vector<16x16xf32> to vector<8x16xf32>
    %c0_84 = arith.constant 0 : index
    %c14 = arith.constant 14 : index
    %c0_85 = arith.constant 0 : index
    %c0_86 = arith.constant 0 : index
    %224 = vector.load %arg10[%c0_84, %c14, %c0_85, %c0_86] : memref<1x16x8x16xf32, #tpu.memory_space<vmem>>, vector<1x1x8x16xf32>
    %225 = vector.shape_cast %224 : vector<1x1x8x16xf32> to vector<8x16xf32>
    %226 = vector.shape_cast %223 : vector<8x16xf32> to vector<1x1x8x16xf32>
    tpu.vector_store %arg10[%c0_84, %c14, %c0_85, %c0_86], %226 {strides = array<i32>} : memref<1x16x8x16xf32, #tpu.memory_space<vmem>>, vector<1x1x8x16xf32>,
    %227 = vector.extract_strided_slice %222 {offsets = [8, 0], sizes = [8, 16], strides = [1, 1]} : vector<16x16xf32> to vector<8x16xf32>
    %c0_87 = arith.constant 0 : index
    %c15 = arith.constant 15 : index
    %c0_88 = arith.constant 0 : index
    %c0_89 = arith.constant 0 : index
    %228 = vector.load %arg10[%c0_87, %c15, %c0_88, %c0_89] : memref<1x16x8x16xf32, #tpu.memory_space<vmem>>, vector<1x1x8x16xf32>
    %229 = vector.shape_cast %228 : vector<1x1x8x16xf32> to vector<8x16xf32>
    %230 = vector.shape_cast %227 : vector<8x16xf32> to vector<1x1x8x16xf32>
    tpu.vector_store %arg10[%c0_87, %c15, %c0_88, %c0_89], %230 {strides = array<i32>} : memref<1x16x8x16xf32, #tpu.memory_space<vmem>>, vector<1x1x8x16xf32>,
    return
  }
  func.func @transform_0(%arg0: i32, %arg1: i32) -> (i32, i32, i32, i32) {
    %c0_i32 = arith.constant 0 : i32
    %c0_i32_0 = arith.constant 0 : i32
    %c0_i32_1 = arith.constant 0 : i32
    %c0_i32_2 = arith.constant 0 : i32
    return %arg0, %c0_i32, %c0_i32_0, %c0_i32_1 : i32, i32, i32, i32
  }
  func.func @transform_1(%arg0: i32, %arg1: i32) -> (i32, i32) {
    %c0_i32 = arith.constant 0 : i32
    %c0_i32_0 = arith.constant 0 : i32
    %c0_i32_1 = arith.constant 0 : i32
    return %c0_i32, %c0_i32_0 : i32, i32
  }
  func.func @transform_2(%arg0: i32, %arg1: i32) -> (i32, i32) {
    %c0_i32 = arith.constant 0 : i32
    %c0_i32_0 = arith.constant 0 : i32
    %c0_i32_1 = arith.constant 0 : i32
    return %c0_i32, %c0_i32_0 : i32, i32
  }
  func.func @transform_3(%arg0: i32, %arg1: i32) -> (i32, i32) {
    %c0_i32 = arith.constant 0 : i32
    %c0_i32_0 = arith.constant 0 : i32
    %c0_i32_1 = arith.constant 0 : i32
    return %c0_i32, %c0_i32_0 : i32, i32
  }
  func.func @transform_4(%arg0: i32, %arg1: i32) -> (i32, i32) {
    %c0_i32 = arith.constant 0 : i32
    %c0_i32_0 = arith.constant 0 : i32
    %c0_i32_1 = arith.constant 0 : i32
    return %c0_i32, %c0_i32_0 : i32, i32
  }
  func.func @transform_5(%arg0: i32, %arg1: i32) -> (i32, i32) {
    %c0_i32 = arith.constant 0 : i32
    %c0_i32_0 = arith.constant 0 : i32
    %c0_i32_1 = arith.constant 0 : i32
    return %c0_i32, %c0_i32_0 : i32, i32
  }
  func.func @transform_6(%arg0: i32, %arg1: i32) -> (i32, i32) {
    %c0_i32 = arith.constant 0 : i32
    %c0_i32_0 = arith.constant 0 : i32
    %c0_i32_1 = arith.constant 0 : i32
    return %c0_i32, %c0_i32_0 : i32, i32
  }
  func.func @transform_7(%arg0: i32, %arg1: i32) -> (i32, i32) {
    %c0_i32 = arith.constant 0 : i32
    %c0_i32_0 = arith.constant 0 : i32
    %c0_i32_1 = arith.constant 0 : i32
    return %c0_i32, %c0_i32_0 : i32, i32
  }
  func.func @transform_8(%arg0: i32, %arg1: i32) -> (i32, i32, i32, i32) {
    %c0_i32 = arith.constant 0 : i32
    %c0_i32_0 = arith.constant 0 : i32
    %c0_i32_1 = arith.constant 0 : i32
    return %arg0, %arg1, %c0_i32, %c0_i32_0 : i32, i32, i32, i32
  }
}

module attributes {stable_mosaic.version = 11 : i64} {
  func.func @_poly_deconv_kernel(%arg0: i32, %arg1: i32, %arg2: memref<1x18x8x18xf32, #tpu.memory_space<vmem>>, %arg3: memref<16x72xf32, #tpu.memory_space<vmem>>, %arg4: memref<16x72xf32, #tpu.memory_space<vmem>>, %arg5: memref<16x1xf32, #tpu.memory_space<vmem>>, %arg6: memref<16x1xf32, #tpu.memory_space<vmem>>, %arg7: memref<16x16xf32, #tpu.memory_space<vmem>>, %arg8: memref<16x32xf32, #tpu.memory_space<vmem>>, %arg9: memref<16x32xf32, #tpu.memory_space<vmem>>, %arg10: memref<1x16x8x32xf32, #tpu.memory_space<vmem>>) attributes {dimension_semantics = [#tpu.dimension_semantics<parallel>, #tpu.dimension_semantics<parallel>], iteration_bounds = array<i64: 2, 2>, scalar_prefetch = 0 : i64, scratch_operands = 0 : i64, tpu.core_type = #tpu.core_type<tc>, window_params = [{transform_indices = @transform_0, window_bounds = array<i64: 1, 18, 8, 18>}, {pipeline_mode = #tpu.pipeline_mode<synchronous>, transform_indices = @transform_1, window_bounds = array<i64: 16, 72>}, {pipeline_mode = #tpu.pipeline_mode<synchronous>, transform_indices = @transform_2, window_bounds = array<i64: 16, 72>}, {pipeline_mode = #tpu.pipeline_mode<synchronous>, transform_indices = @transform_3, window_bounds = array<i64: 16, 1>}, {pipeline_mode = #tpu.pipeline_mode<synchronous>, transform_indices = @transform_4, window_bounds = array<i64: 16, 1>}, {pipeline_mode = #tpu.pipeline_mode<synchronous>, transform_indices = @transform_5, window_bounds = array<i64: 16, 16>}, {pipeline_mode = #tpu.pipeline_mode<synchronous>, transform_indices = @transform_6, window_bounds = array<i64: 16, 32>}, {pipeline_mode = #tpu.pipeline_mode<synchronous>, transform_indices = @transform_7, window_bounds = array<i64: 16, 32>}, {transform_indices = @transform_8, window_bounds = array<i64: 1, 16, 8, 32>}]} {
    %c8_i32 = arith.constant 8 : i32
    %0 = arith.muli %arg1, %c8_i32 : i32
    %1 = tpu.assume_multiple %0, 8 : i32
    %c0 = arith.constant 0 : index
    %2 = arith.index_cast %1 : i32 to index
    %c0_0 = arith.constant 0 : index
    %c0_1 = arith.constant 0 : index
    %3 = vector.load %arg2[%c0, %2, %c0_0, %c0_1] : memref<1x18x8x18xf32, #tpu.memory_space<vmem>>, vector<1x10x8x18xf32>
    %4 = vector.shape_cast %3 : vector<1x10x8x18xf32> to vector<10x8x18xf32>
    %c0_2 = arith.constant 0 : index
    %c0_3 = arith.constant 0 : index
    %5 = vector.load %arg3[%c0_2, %c0_3] : memref<16x72xf32, #tpu.memory_space<vmem>>, vector<16x72xf32>
    %c0_4 = arith.constant 0 : index
    %c0_5 = arith.constant 0 : index
    %6 = vector.load %arg4[%c0_4, %c0_5] : memref<16x72xf32, #tpu.memory_space<vmem>>, vector<16x72xf32>
    %c0_6 = arith.constant 0 : index
    %c0_7 = arith.constant 0 : index
    %7 = vector.load %arg5[%c0_6, %c0_7] : memref<16x1xf32, #tpu.memory_space<vmem>>, vector<16x1xf32>
    %c0_8 = arith.constant 0 : index
    %c0_9 = arith.constant 0 : index
    %8 = vector.load %arg8[%c0_8, %c0_9] : memref<16x32xf32, #tpu.memory_space<vmem>>, vector<16x32xf32>
    %c0_10 = arith.constant 0 : index
    %c0_11 = arith.constant 0 : index
    %9 = vector.load %arg9[%c0_10, %c0_11] : memref<16x32xf32, #tpu.memory_space<vmem>>, vector<16x32xf32>
    %c0_12 = arith.constant 0 : index
    %c0_13 = arith.constant 0 : index
    %10 = vector.load %arg7[%c0_12, %c0_13] : memref<16x16xf32, #tpu.memory_space<vmem>>, vector<16x16xf32>
    %c0_14 = arith.constant 0 : index
    %c0_15 = arith.constant 0 : index
    %11 = vector.load %arg6[%c0_14, %c0_15] : memref<16x1xf32, #tpu.memory_space<vmem>>, vector<16x1xf32>
    %12 = vector.extract_strided_slice %4 {offsets = [0, 0, 0], sizes = [3, 8, 18], strides = [1, 1, 1]} : vector<10x8x18xf32> to vector<3x8x18xf32>
    %13 = vector.shape_cast %12 : vector<3x8x18xf32> to vector<24x18xf32>
    %14 = vector.extract_strided_slice %13 {offsets = [0, 0], sizes = [24, 16], strides = [1, 1]} : vector<24x18xf32> to vector<24x16xf32>
    %15 = vector.extract_strided_slice %13 {offsets = [0, 1], sizes = [24, 16], strides = [1, 1]} : vector<24x18xf32> to vector<24x16xf32>
    %16 = vector.extract_strided_slice %13 {offsets = [0, 2], sizes = [24, 16], strides = [1, 1]} : vector<24x18xf32> to vector<24x16xf32>
    %17 = tpu.concatenate %14, %15, %16 in 0 : vector<24x16xf32>, vector<24x16xf32>, vector<24x16xf32> -> vector<72x16xf32>
    %18 = vector.extract_strided_slice %4 {offsets = [1, 0, 0], sizes = [3, 8, 18], strides = [1, 1, 1]} : vector<10x8x18xf32> to vector<3x8x18xf32>
    %19 = vector.shape_cast %18 : vector<3x8x18xf32> to vector<24x18xf32>
    %20 = vector.extract_strided_slice %19 {offsets = [0, 0], sizes = [24, 16], strides = [1, 1]} : vector<24x18xf32> to vector<24x16xf32>
    %21 = vector.extract_strided_slice %19 {offsets = [0, 1], sizes = [24, 16], strides = [1, 1]} : vector<24x18xf32> to vector<24x16xf32>
    %22 = vector.extract_strided_slice %19 {offsets = [0, 2], sizes = [24, 16], strides = [1, 1]} : vector<24x18xf32> to vector<24x16xf32>
    %23 = tpu.concatenate %20, %21, %22 in 0 : vector<24x16xf32>, vector<24x16xf32>, vector<24x16xf32> -> vector<72x16xf32>
    %24 = vector.extract_strided_slice %4 {offsets = [2, 0, 0], sizes = [3, 8, 18], strides = [1, 1, 1]} : vector<10x8x18xf32> to vector<3x8x18xf32>
    %25 = vector.shape_cast %24 : vector<3x8x18xf32> to vector<24x18xf32>
    %26 = vector.extract_strided_slice %25 {offsets = [0, 0], sizes = [24, 16], strides = [1, 1]} : vector<24x18xf32> to vector<24x16xf32>
    %27 = vector.extract_strided_slice %25 {offsets = [0, 1], sizes = [24, 16], strides = [1, 1]} : vector<24x18xf32> to vector<24x16xf32>
    %28 = vector.extract_strided_slice %25 {offsets = [0, 2], sizes = [24, 16], strides = [1, 1]} : vector<24x18xf32> to vector<24x16xf32>
    %29 = tpu.concatenate %26, %27, %28 in 0 : vector<24x16xf32>, vector<24x16xf32>, vector<24x16xf32> -> vector<72x16xf32>
    %30 = vector.extract_strided_slice %4 {offsets = [3, 0, 0], sizes = [3, 8, 18], strides = [1, 1, 1]} : vector<10x8x18xf32> to vector<3x8x18xf32>
    %31 = vector.shape_cast %30 : vector<3x8x18xf32> to vector<24x18xf32>
    %32 = vector.extract_strided_slice %31 {offsets = [0, 0], sizes = [24, 16], strides = [1, 1]} : vector<24x18xf32> to vector<24x16xf32>
    %33 = vector.extract_strided_slice %31 {offsets = [0, 1], sizes = [24, 16], strides = [1, 1]} : vector<24x18xf32> to vector<24x16xf32>
    %34 = vector.extract_strided_slice %31 {offsets = [0, 2], sizes = [24, 16], strides = [1, 1]} : vector<24x18xf32> to vector<24x16xf32>
    %35 = tpu.concatenate %32, %33, %34 in 0 : vector<24x16xf32>, vector<24x16xf32>, vector<24x16xf32> -> vector<72x16xf32>
    %36 = vector.extract_strided_slice %4 {offsets = [4, 0, 0], sizes = [3, 8, 18], strides = [1, 1, 1]} : vector<10x8x18xf32> to vector<3x8x18xf32>
    %37 = vector.shape_cast %36 : vector<3x8x18xf32> to vector<24x18xf32>
    %38 = vector.extract_strided_slice %37 {offsets = [0, 0], sizes = [24, 16], strides = [1, 1]} : vector<24x18xf32> to vector<24x16xf32>
    %39 = vector.extract_strided_slice %37 {offsets = [0, 1], sizes = [24, 16], strides = [1, 1]} : vector<24x18xf32> to vector<24x16xf32>
    %40 = vector.extract_strided_slice %37 {offsets = [0, 2], sizes = [24, 16], strides = [1, 1]} : vector<24x18xf32> to vector<24x16xf32>
    %41 = tpu.concatenate %38, %39, %40 in 0 : vector<24x16xf32>, vector<24x16xf32>, vector<24x16xf32> -> vector<72x16xf32>
    %42 = vector.extract_strided_slice %4 {offsets = [5, 0, 0], sizes = [3, 8, 18], strides = [1, 1, 1]} : vector<10x8x18xf32> to vector<3x8x18xf32>
    %43 = vector.shape_cast %42 : vector<3x8x18xf32> to vector<24x18xf32>
    %44 = vector.extract_strided_slice %43 {offsets = [0, 0], sizes = [24, 16], strides = [1, 1]} : vector<24x18xf32> to vector<24x16xf32>
    %45 = vector.extract_strided_slice %43 {offsets = [0, 1], sizes = [24, 16], strides = [1, 1]} : vector<24x18xf32> to vector<24x16xf32>
    %46 = vector.extract_strided_slice %43 {offsets = [0, 2], sizes = [24, 16], strides = [1, 1]} : vector<24x18xf32> to vector<24x16xf32>
    %47 = tpu.concatenate %44, %45, %46 in 0 : vector<24x16xf32>, vector<24x16xf32>, vector<24x16xf32> -> vector<72x16xf32>
    %48 = vector.extract_strided_slice %4 {offsets = [6, 0, 0], sizes = [3, 8, 18], strides = [1, 1, 1]} : vector<10x8x18xf32> to vector<3x8x18xf32>
    %49 = vector.shape_cast %48 : vector<3x8x18xf32> to vector<24x18xf32>
    %50 = vector.extract_strided_slice %49 {offsets = [0, 0], sizes = [24, 16], strides = [1, 1]} : vector<24x18xf32> to vector<24x16xf32>
    %51 = vector.extract_strided_slice %49 {offsets = [0, 1], sizes = [24, 16], strides = [1, 1]} : vector<24x18xf32> to vector<24x16xf32>
    %52 = vector.extract_strided_slice %49 {offsets = [0, 2], sizes = [24, 16], strides = [1, 1]} : vector<24x18xf32> to vector<24x16xf32>
    %53 = tpu.concatenate %50, %51, %52 in 0 : vector<24x16xf32>, vector<24x16xf32>, vector<24x16xf32> -> vector<72x16xf32>
    %54 = vector.extract_strided_slice %4 {offsets = [7, 0, 0], sizes = [3, 8, 18], strides = [1, 1, 1]} : vector<10x8x18xf32> to vector<3x8x18xf32>
    %55 = vector.shape_cast %54 : vector<3x8x18xf32> to vector<24x18xf32>
    %56 = vector.extract_strided_slice %55 {offsets = [0, 0], sizes = [24, 16], strides = [1, 1]} : vector<24x18xf32> to vector<24x16xf32>
    %57 = vector.extract_strided_slice %55 {offsets = [0, 1], sizes = [24, 16], strides = [1, 1]} : vector<24x18xf32> to vector<24x16xf32>
    %58 = vector.extract_strided_slice %55 {offsets = [0, 2], sizes = [24, 16], strides = [1, 1]} : vector<24x18xf32> to vector<24x16xf32>
    %59 = tpu.concatenate %56, %57, %58 in 0 : vector<24x16xf32>, vector<24x16xf32>, vector<24x16xf32> -> vector<72x16xf32>
    %60 = tpu.concatenate %17, %23, %29, %35, %41, %47, %53, %59 in 1 : vector<72x16xf32>, vector<72x16xf32>, vector<72x16xf32>, vector<72x16xf32>, vector<72x16xf32>, vector<72x16xf32>, vector<72x16xf32>, vector<72x16xf32> -> vector<72x128xf32>
    %cst = arith.constant dense<0.000000e+00> : vector<16x128xf32>
    %61 = tpu.matmul %5, %60, %cst {dimension_numbers = #tpu.dot_dimension_numbers<[1], [0], [0], [1], [0, 0, 1, 1], [], []>} : vector<16x72xf32>, vector<72x128xf32>, vector<16x128xf32> -> vector<16x128xf32>
    %cst_16 = arith.constant dense<0.000000e+00> : vector<16x128xf32>
    %62 = tpu.matmul %6, %60, %cst_16 {dimension_numbers = #tpu.dot_dimension_numbers<[1], [0], [0], [1], [0, 0, 1, 1], [], []>} : vector<16x72xf32>, vector<72x128xf32>, vector<16x128xf32> -> vector<16x128xf32>
    %63 = vector.extract_strided_slice %61 {offsets = [0, 0], sizes = [16, 16], strides = [1, 1]} : vector<16x128xf32> to vector<16x16xf32>
    %64 = vector.extract_strided_slice %62 {offsets = [0, 0], sizes = [16, 16], strides = [1, 1]} : vector<16x128xf32> to vector<16x16xf32>
    %cst_17 = arith.constant dense<0.000000e+00> : vector<16x32xf32>
    %65 = tpu.matmul %63, %8, %cst_17 {dimension_numbers = #tpu.dot_dimension_numbers<[1], [0], [0], [1], [0, 0, 1, 1], [], []>} : vector<16x16xf32>, vector<16x32xf32>, vector<16x32xf32> -> vector<16x32xf32>
    %cst_18 = arith.constant dense<0.000000e+00> : vector<16x32xf32>
    %66 = tpu.matmul %64, %9, %cst_18 {dimension_numbers = #tpu.dot_dimension_numbers<[1], [0], [0], [1], [0, 0, 1, 1], [], []>} : vector<16x16xf32>, vector<16x32xf32>, vector<16x32xf32> -> vector<16x32xf32>
    %67 = arith.addf %65, %66 : vector<16x32xf32>
    %68 = vector.broadcast %7 : vector<16x1xf32> to vector<16x32xf32>
    %69 = arith.addf %67, %68 : vector<16x32xf32>
    %70 = arith.mulf %69, %69 : vector<16x32xf32>
    %cst_19 = arith.constant dense<0.000000e+00> : vector<16x32xf32>
    %71 = tpu.matmul %10, %70, %cst_19 {dimension_numbers = #tpu.dot_dimension_numbers<[1], [0], [0], [1], [0, 0, 1, 1], [], []>} : vector<16x16xf32>, vector<16x32xf32>, vector<16x32xf32> -> vector<16x32xf32>
    %72 = vector.broadcast %11 : vector<16x1xf32> to vector<16x32xf32>
    %73 = arith.addf %71, %72 : vector<16x32xf32>
    %74 = math.sqrt %73 : vector<16x32xf32>
    %75 = arith.mulf %69, %74 : vector<16x32xf32>
    %76 = vector.extract_strided_slice %75 {offsets = [0, 0], sizes = [8, 32], strides = [1, 1]} : vector<16x32xf32> to vector<8x32xf32>
    %c0_20 = arith.constant 0 : index
    %c0_21 = arith.constant 0 : index
    %c0_22 = arith.constant 0 : index
    %c0_23 = arith.constant 0 : index
    %77 = vector.load %arg10[%c0_20, %c0_21, %c0_22, %c0_23] : memref<1x16x8x32xf32, #tpu.memory_space<vmem>>, vector<1x1x8x32xf32>
    %78 = vector.shape_cast %77 : vector<1x1x8x32xf32> to vector<8x32xf32>
    %79 = vector.shape_cast %76 : vector<8x32xf32> to vector<1x1x8x32xf32>
    tpu.vector_store %arg10[%c0_20, %c0_21, %c0_22, %c0_23], %79 {strides = array<i32>} : memref<1x16x8x32xf32, #tpu.memory_space<vmem>>, vector<1x1x8x32xf32>,
    %80 = vector.extract_strided_slice %75 {offsets = [8, 0], sizes = [8, 32], strides = [1, 1]} : vector<16x32xf32> to vector<8x32xf32>
    %c0_24 = arith.constant 0 : index
    %c1 = arith.constant 1 : index
    %c0_25 = arith.constant 0 : index
    %c0_26 = arith.constant 0 : index
    %81 = vector.load %arg10[%c0_24, %c1, %c0_25, %c0_26] : memref<1x16x8x32xf32, #tpu.memory_space<vmem>>, vector<1x1x8x32xf32>
    %82 = vector.shape_cast %81 : vector<1x1x8x32xf32> to vector<8x32xf32>
    %83 = vector.shape_cast %80 : vector<8x32xf32> to vector<1x1x8x32xf32>
    tpu.vector_store %arg10[%c0_24, %c1, %c0_25, %c0_26], %83 {strides = array<i32>} : memref<1x16x8x32xf32, #tpu.memory_space<vmem>>, vector<1x1x8x32xf32>,
    %84 = vector.extract_strided_slice %61 {offsets = [0, 16], sizes = [16, 16], strides = [1, 1]} : vector<16x128xf32> to vector<16x16xf32>
    %85 = vector.extract_strided_slice %62 {offsets = [0, 16], sizes = [16, 16], strides = [1, 1]} : vector<16x128xf32> to vector<16x16xf32>
    %cst_27 = arith.constant dense<0.000000e+00> : vector<16x32xf32>
    %86 = tpu.matmul %84, %8, %cst_27 {dimension_numbers = #tpu.dot_dimension_numbers<[1], [0], [0], [1], [0, 0, 1, 1], [], []>} : vector<16x16xf32>, vector<16x32xf32>, vector<16x32xf32> -> vector<16x32xf32>
    %cst_28 = arith.constant dense<0.000000e+00> : vector<16x32xf32>
    %87 = tpu.matmul %85, %9, %cst_28 {dimension_numbers = #tpu.dot_dimension_numbers<[1], [0], [0], [1], [0, 0, 1, 1], [], []>} : vector<16x16xf32>, vector<16x32xf32>, vector<16x32xf32> -> vector<16x32xf32>
    %88 = arith.addf %86, %87 : vector<16x32xf32>
    %89 = vector.broadcast %7 : vector<16x1xf32> to vector<16x32xf32>
    %90 = arith.addf %88, %89 : vector<16x32xf32>
    %91 = arith.mulf %90, %90 : vector<16x32xf32>
    %cst_29 = arith.constant dense<0.000000e+00> : vector<16x32xf32>
    %92 = tpu.matmul %10, %91, %cst_29 {dimension_numbers = #tpu.dot_dimension_numbers<[1], [0], [0], [1], [0, 0, 1, 1], [], []>} : vector<16x16xf32>, vector<16x32xf32>, vector<16x32xf32> -> vector<16x32xf32>
    %93 = vector.broadcast %11 : vector<16x1xf32> to vector<16x32xf32>
    %94 = arith.addf %92, %93 : vector<16x32xf32>
    %95 = math.sqrt %94 : vector<16x32xf32>
    %96 = arith.mulf %90, %95 : vector<16x32xf32>
    %97 = vector.extract_strided_slice %96 {offsets = [0, 0], sizes = [8, 32], strides = [1, 1]} : vector<16x32xf32> to vector<8x32xf32>
    %c0_30 = arith.constant 0 : index
    %c2 = arith.constant 2 : index
    %c0_31 = arith.constant 0 : index
    %c0_32 = arith.constant 0 : index
    %98 = vector.load %arg10[%c0_30, %c2, %c0_31, %c0_32] : memref<1x16x8x32xf32, #tpu.memory_space<vmem>>, vector<1x1x8x32xf32>
    %99 = vector.shape_cast %98 : vector<1x1x8x32xf32> to vector<8x32xf32>
    %100 = vector.shape_cast %97 : vector<8x32xf32> to vector<1x1x8x32xf32>
    tpu.vector_store %arg10[%c0_30, %c2, %c0_31, %c0_32], %100 {strides = array<i32>} : memref<1x16x8x32xf32, #tpu.memory_space<vmem>>, vector<1x1x8x32xf32>,
    %101 = vector.extract_strided_slice %96 {offsets = [8, 0], sizes = [8, 32], strides = [1, 1]} : vector<16x32xf32> to vector<8x32xf32>
    %c0_33 = arith.constant 0 : index
    %c3 = arith.constant 3 : index
    %c0_34 = arith.constant 0 : index
    %c0_35 = arith.constant 0 : index
    %102 = vector.load %arg10[%c0_33, %c3, %c0_34, %c0_35] : memref<1x16x8x32xf32, #tpu.memory_space<vmem>>, vector<1x1x8x32xf32>
    %103 = vector.shape_cast %102 : vector<1x1x8x32xf32> to vector<8x32xf32>
    %104 = vector.shape_cast %101 : vector<8x32xf32> to vector<1x1x8x32xf32>
    tpu.vector_store %arg10[%c0_33, %c3, %c0_34, %c0_35], %104 {strides = array<i32>} : memref<1x16x8x32xf32, #tpu.memory_space<vmem>>, vector<1x1x8x32xf32>,
    %105 = vector.extract_strided_slice %61 {offsets = [0, 32], sizes = [16, 16], strides = [1, 1]} : vector<16x128xf32> to vector<16x16xf32>
    %106 = vector.extract_strided_slice %62 {offsets = [0, 32], sizes = [16, 16], strides = [1, 1]} : vector<16x128xf32> to vector<16x16xf32>
    %cst_36 = arith.constant dense<0.000000e+00> : vector<16x32xf32>
    %107 = tpu.matmul %105, %8, %cst_36 {dimension_numbers = #tpu.dot_dimension_numbers<[1], [0], [0], [1], [0, 0, 1, 1], [], []>} : vector<16x16xf32>, vector<16x32xf32>, vector<16x32xf32> -> vector<16x32xf32>
    %cst_37 = arith.constant dense<0.000000e+00> : vector<16x32xf32>
    %108 = tpu.matmul %106, %9, %cst_37 {dimension_numbers = #tpu.dot_dimension_numbers<[1], [0], [0], [1], [0, 0, 1, 1], [], []>} : vector<16x16xf32>, vector<16x32xf32>, vector<16x32xf32> -> vector<16x32xf32>
    %109 = arith.addf %107, %108 : vector<16x32xf32>
    %110 = vector.broadcast %7 : vector<16x1xf32> to vector<16x32xf32>
    %111 = arith.addf %109, %110 : vector<16x32xf32>
    %112 = arith.mulf %111, %111 : vector<16x32xf32>
    %cst_38 = arith.constant dense<0.000000e+00> : vector<16x32xf32>
    %113 = tpu.matmul %10, %112, %cst_38 {dimension_numbers = #tpu.dot_dimension_numbers<[1], [0], [0], [1], [0, 0, 1, 1], [], []>} : vector<16x16xf32>, vector<16x32xf32>, vector<16x32xf32> -> vector<16x32xf32>
    %114 = vector.broadcast %11 : vector<16x1xf32> to vector<16x32xf32>
    %115 = arith.addf %113, %114 : vector<16x32xf32>
    %116 = math.sqrt %115 : vector<16x32xf32>
    %117 = arith.mulf %111, %116 : vector<16x32xf32>
    %118 = vector.extract_strided_slice %117 {offsets = [0, 0], sizes = [8, 32], strides = [1, 1]} : vector<16x32xf32> to vector<8x32xf32>
    %c0_39 = arith.constant 0 : index
    %c4 = arith.constant 4 : index
    %c0_40 = arith.constant 0 : index
    %c0_41 = arith.constant 0 : index
    %119 = vector.load %arg10[%c0_39, %c4, %c0_40, %c0_41] : memref<1x16x8x32xf32, #tpu.memory_space<vmem>>, vector<1x1x8x32xf32>
    %120 = vector.shape_cast %119 : vector<1x1x8x32xf32> to vector<8x32xf32>
    %121 = vector.shape_cast %118 : vector<8x32xf32> to vector<1x1x8x32xf32>
    tpu.vector_store %arg10[%c0_39, %c4, %c0_40, %c0_41], %121 {strides = array<i32>} : memref<1x16x8x32xf32, #tpu.memory_space<vmem>>, vector<1x1x8x32xf32>,
    %122 = vector.extract_strided_slice %117 {offsets = [8, 0], sizes = [8, 32], strides = [1, 1]} : vector<16x32xf32> to vector<8x32xf32>
    %c0_42 = arith.constant 0 : index
    %c5 = arith.constant 5 : index
    %c0_43 = arith.constant 0 : index
    %c0_44 = arith.constant 0 : index
    %123 = vector.load %arg10[%c0_42, %c5, %c0_43, %c0_44] : memref<1x16x8x32xf32, #tpu.memory_space<vmem>>, vector<1x1x8x32xf32>
    %124 = vector.shape_cast %123 : vector<1x1x8x32xf32> to vector<8x32xf32>
    %125 = vector.shape_cast %122 : vector<8x32xf32> to vector<1x1x8x32xf32>
    tpu.vector_store %arg10[%c0_42, %c5, %c0_43, %c0_44], %125 {strides = array<i32>} : memref<1x16x8x32xf32, #tpu.memory_space<vmem>>, vector<1x1x8x32xf32>,
    %126 = vector.extract_strided_slice %61 {offsets = [0, 48], sizes = [16, 16], strides = [1, 1]} : vector<16x128xf32> to vector<16x16xf32>
    %127 = vector.extract_strided_slice %62 {offsets = [0, 48], sizes = [16, 16], strides = [1, 1]} : vector<16x128xf32> to vector<16x16xf32>
    %cst_45 = arith.constant dense<0.000000e+00> : vector<16x32xf32>
    %128 = tpu.matmul %126, %8, %cst_45 {dimension_numbers = #tpu.dot_dimension_numbers<[1], [0], [0], [1], [0, 0, 1, 1], [], []>} : vector<16x16xf32>, vector<16x32xf32>, vector<16x32xf32> -> vector<16x32xf32>
    %cst_46 = arith.constant dense<0.000000e+00> : vector<16x32xf32>
    %129 = tpu.matmul %127, %9, %cst_46 {dimension_numbers = #tpu.dot_dimension_numbers<[1], [0], [0], [1], [0, 0, 1, 1], [], []>} : vector<16x16xf32>, vector<16x32xf32>, vector<16x32xf32> -> vector<16x32xf32>
    %130 = arith.addf %128, %129 : vector<16x32xf32>
    %131 = vector.broadcast %7 : vector<16x1xf32> to vector<16x32xf32>
    %132 = arith.addf %130, %131 : vector<16x32xf32>
    %133 = arith.mulf %132, %132 : vector<16x32xf32>
    %cst_47 = arith.constant dense<0.000000e+00> : vector<16x32xf32>
    %134 = tpu.matmul %10, %133, %cst_47 {dimension_numbers = #tpu.dot_dimension_numbers<[1], [0], [0], [1], [0, 0, 1, 1], [], []>} : vector<16x16xf32>, vector<16x32xf32>, vector<16x32xf32> -> vector<16x32xf32>
    %135 = vector.broadcast %11 : vector<16x1xf32> to vector<16x32xf32>
    %136 = arith.addf %134, %135 : vector<16x32xf32>
    %137 = math.sqrt %136 : vector<16x32xf32>
    %138 = arith.mulf %132, %137 : vector<16x32xf32>
    %139 = vector.extract_strided_slice %138 {offsets = [0, 0], sizes = [8, 32], strides = [1, 1]} : vector<16x32xf32> to vector<8x32xf32>
    %c0_48 = arith.constant 0 : index
    %c6 = arith.constant 6 : index
    %c0_49 = arith.constant 0 : index
    %c0_50 = arith.constant 0 : index
    %140 = vector.load %arg10[%c0_48, %c6, %c0_49, %c0_50] : memref<1x16x8x32xf32, #tpu.memory_space<vmem>>, vector<1x1x8x32xf32>
    %141 = vector.shape_cast %140 : vector<1x1x8x32xf32> to vector<8x32xf32>
    %142 = vector.shape_cast %139 : vector<8x32xf32> to vector<1x1x8x32xf32>
    tpu.vector_store %arg10[%c0_48, %c6, %c0_49, %c0_50], %142 {strides = array<i32>} : memref<1x16x8x32xf32, #tpu.memory_space<vmem>>, vector<1x1x8x32xf32>,
    %143 = vector.extract_strided_slice %138 {offsets = [8, 0], sizes = [8, 32], strides = [1, 1]} : vector<16x32xf32> to vector<8x32xf32>
    %c0_51 = arith.constant 0 : index
    %c7 = arith.constant 7 : index
    %c0_52 = arith.constant 0 : index
    %c0_53 = arith.constant 0 : index
    %144 = vector.load %arg10[%c0_51, %c7, %c0_52, %c0_53] : memref<1x16x8x32xf32, #tpu.memory_space<vmem>>, vector<1x1x8x32xf32>
    %145 = vector.shape_cast %144 : vector<1x1x8x32xf32> to vector<8x32xf32>
    %146 = vector.shape_cast %143 : vector<8x32xf32> to vector<1x1x8x32xf32>
    tpu.vector_store %arg10[%c0_51, %c7, %c0_52, %c0_53], %146 {strides = array<i32>} : memref<1x16x8x32xf32, #tpu.memory_space<vmem>>, vector<1x1x8x32xf32>,
    %147 = vector.extract_strided_slice %61 {offsets = [0, 64], sizes = [16, 16], strides = [1, 1]} : vector<16x128xf32> to vector<16x16xf32>
    %148 = vector.extract_strided_slice %62 {offsets = [0, 64], sizes = [16, 16], strides = [1, 1]} : vector<16x128xf32> to vector<16x16xf32>
    %cst_54 = arith.constant dense<0.000000e+00> : vector<16x32xf32>
    %149 = tpu.matmul %147, %8, %cst_54 {dimension_numbers = #tpu.dot_dimension_numbers<[1], [0], [0], [1], [0, 0, 1, 1], [], []>} : vector<16x16xf32>, vector<16x32xf32>, vector<16x32xf32> -> vector<16x32xf32>
    %cst_55 = arith.constant dense<0.000000e+00> : vector<16x32xf32>
    %150 = tpu.matmul %148, %9, %cst_55 {dimension_numbers = #tpu.dot_dimension_numbers<[1], [0], [0], [1], [0, 0, 1, 1], [], []>} : vector<16x16xf32>, vector<16x32xf32>, vector<16x32xf32> -> vector<16x32xf32>
    %151 = arith.addf %149, %150 : vector<16x32xf32>
    %152 = vector.broadcast %7 : vector<16x1xf32> to vector<16x32xf32>
    %153 = arith.addf %151, %152 : vector<16x32xf32>
    %154 = arith.mulf %153, %153 : vector<16x32xf32>
    %cst_56 = arith.constant dense<0.000000e+00> : vector<16x32xf32>
    %155 = tpu.matmul %10, %154, %cst_56 {dimension_numbers = #tpu.dot_dimension_numbers<[1], [0], [0], [1], [0, 0, 1, 1], [], []>} : vector<16x16xf32>, vector<16x32xf32>, vector<16x32xf32> -> vector<16x32xf32>
    %156 = vector.broadcast %11 : vector<16x1xf32> to vector<16x32xf32>
    %157 = arith.addf %155, %156 : vector<16x32xf32>
    %158 = math.sqrt %157 : vector<16x32xf32>
    %159 = arith.mulf %153, %158 : vector<16x32xf32>
    %160 = vector.extract_strided_slice %159 {offsets = [0, 0], sizes = [8, 32], strides = [1, 1]} : vector<16x32xf32> to vector<8x32xf32>
    %c0_57 = arith.constant 0 : index
    %c8 = arith.constant 8 : index
    %c0_58 = arith.constant 0 : index
    %c0_59 = arith.constant 0 : index
    %161 = vector.load %arg10[%c0_57, %c8, %c0_58, %c0_59] : memref<1x16x8x32xf32, #tpu.memory_space<vmem>>, vector<1x1x8x32xf32>
    %162 = vector.shape_cast %161 : vector<1x1x8x32xf32> to vector<8x32xf32>
    %163 = vector.shape_cast %160 : vector<8x32xf32> to vector<1x1x8x32xf32>
    tpu.vector_store %arg10[%c0_57, %c8, %c0_58, %c0_59], %163 {strides = array<i32>} : memref<1x16x8x32xf32, #tpu.memory_space<vmem>>, vector<1x1x8x32xf32>,
    %164 = vector.extract_strided_slice %159 {offsets = [8, 0], sizes = [8, 32], strides = [1, 1]} : vector<16x32xf32> to vector<8x32xf32>
    %c0_60 = arith.constant 0 : index
    %c9 = arith.constant 9 : index
    %c0_61 = arith.constant 0 : index
    %c0_62 = arith.constant 0 : index
    %165 = vector.load %arg10[%c0_60, %c9, %c0_61, %c0_62] : memref<1x16x8x32xf32, #tpu.memory_space<vmem>>, vector<1x1x8x32xf32>
    %166 = vector.shape_cast %165 : vector<1x1x8x32xf32> to vector<8x32xf32>
    %167 = vector.shape_cast %164 : vector<8x32xf32> to vector<1x1x8x32xf32>
    tpu.vector_store %arg10[%c0_60, %c9, %c0_61, %c0_62], %167 {strides = array<i32>} : memref<1x16x8x32xf32, #tpu.memory_space<vmem>>, vector<1x1x8x32xf32>,
    %168 = vector.extract_strided_slice %61 {offsets = [0, 80], sizes = [16, 16], strides = [1, 1]} : vector<16x128xf32> to vector<16x16xf32>
    %169 = vector.extract_strided_slice %62 {offsets = [0, 80], sizes = [16, 16], strides = [1, 1]} : vector<16x128xf32> to vector<16x16xf32>
    %cst_63 = arith.constant dense<0.000000e+00> : vector<16x32xf32>
    %170 = tpu.matmul %168, %8, %cst_63 {dimension_numbers = #tpu.dot_dimension_numbers<[1], [0], [0], [1], [0, 0, 1, 1], [], []>} : vector<16x16xf32>, vector<16x32xf32>, vector<16x32xf32> -> vector<16x32xf32>
    %cst_64 = arith.constant dense<0.000000e+00> : vector<16x32xf32>
    %171 = tpu.matmul %169, %9, %cst_64 {dimension_numbers = #tpu.dot_dimension_numbers<[1], [0], [0], [1], [0, 0, 1, 1], [], []>} : vector<16x16xf32>, vector<16x32xf32>, vector<16x32xf32> -> vector<16x32xf32>
    %172 = arith.addf %170, %171 : vector<16x32xf32>
    %173 = vector.broadcast %7 : vector<16x1xf32> to vector<16x32xf32>
    %174 = arith.addf %172, %173 : vector<16x32xf32>
    %175 = arith.mulf %174, %174 : vector<16x32xf32>
    %cst_65 = arith.constant dense<0.000000e+00> : vector<16x32xf32>
    %176 = tpu.matmul %10, %175, %cst_65 {dimension_numbers = #tpu.dot_dimension_numbers<[1], [0], [0], [1], [0, 0, 1, 1], [], []>} : vector<16x16xf32>, vector<16x32xf32>, vector<16x32xf32> -> vector<16x32xf32>
    %177 = vector.broadcast %11 : vector<16x1xf32> to vector<16x32xf32>
    %178 = arith.addf %176, %177 : vector<16x32xf32>
    %179 = math.sqrt %178 : vector<16x32xf32>
    %180 = arith.mulf %174, %179 : vector<16x32xf32>
    %181 = vector.extract_strided_slice %180 {offsets = [0, 0], sizes = [8, 32], strides = [1, 1]} : vector<16x32xf32> to vector<8x32xf32>
    %c0_66 = arith.constant 0 : index
    %c10 = arith.constant 10 : index
    %c0_67 = arith.constant 0 : index
    %c0_68 = arith.constant 0 : index
    %182 = vector.load %arg10[%c0_66, %c10, %c0_67, %c0_68] : memref<1x16x8x32xf32, #tpu.memory_space<vmem>>, vector<1x1x8x32xf32>
    %183 = vector.shape_cast %182 : vector<1x1x8x32xf32> to vector<8x32xf32>
    %184 = vector.shape_cast %181 : vector<8x32xf32> to vector<1x1x8x32xf32>
    tpu.vector_store %arg10[%c0_66, %c10, %c0_67, %c0_68], %184 {strides = array<i32>} : memref<1x16x8x32xf32, #tpu.memory_space<vmem>>, vector<1x1x8x32xf32>,
    %185 = vector.extract_strided_slice %180 {offsets = [8, 0], sizes = [8, 32], strides = [1, 1]} : vector<16x32xf32> to vector<8x32xf32>
    %c0_69 = arith.constant 0 : index
    %c11 = arith.constant 11 : index
    %c0_70 = arith.constant 0 : index
    %c0_71 = arith.constant 0 : index
    %186 = vector.load %arg10[%c0_69, %c11, %c0_70, %c0_71] : memref<1x16x8x32xf32, #tpu.memory_space<vmem>>, vector<1x1x8x32xf32>
    %187 = vector.shape_cast %186 : vector<1x1x8x32xf32> to vector<8x32xf32>
    %188 = vector.shape_cast %185 : vector<8x32xf32> to vector<1x1x8x32xf32>
    tpu.vector_store %arg10[%c0_69, %c11, %c0_70, %c0_71], %188 {strides = array<i32>} : memref<1x16x8x32xf32, #tpu.memory_space<vmem>>, vector<1x1x8x32xf32>,
    %189 = vector.extract_strided_slice %61 {offsets = [0, 96], sizes = [16, 16], strides = [1, 1]} : vector<16x128xf32> to vector<16x16xf32>
    %190 = vector.extract_strided_slice %62 {offsets = [0, 96], sizes = [16, 16], strides = [1, 1]} : vector<16x128xf32> to vector<16x16xf32>
    %cst_72 = arith.constant dense<0.000000e+00> : vector<16x32xf32>
    %191 = tpu.matmul %189, %8, %cst_72 {dimension_numbers = #tpu.dot_dimension_numbers<[1], [0], [0], [1], [0, 0, 1, 1], [], []>} : vector<16x16xf32>, vector<16x32xf32>, vector<16x32xf32> -> vector<16x32xf32>
    %cst_73 = arith.constant dense<0.000000e+00> : vector<16x32xf32>
    %192 = tpu.matmul %190, %9, %cst_73 {dimension_numbers = #tpu.dot_dimension_numbers<[1], [0], [0], [1], [0, 0, 1, 1], [], []>} : vector<16x16xf32>, vector<16x32xf32>, vector<16x32xf32> -> vector<16x32xf32>
    %193 = arith.addf %191, %192 : vector<16x32xf32>
    %194 = vector.broadcast %7 : vector<16x1xf32> to vector<16x32xf32>
    %195 = arith.addf %193, %194 : vector<16x32xf32>
    %196 = arith.mulf %195, %195 : vector<16x32xf32>
    %cst_74 = arith.constant dense<0.000000e+00> : vector<16x32xf32>
    %197 = tpu.matmul %10, %196, %cst_74 {dimension_numbers = #tpu.dot_dimension_numbers<[1], [0], [0], [1], [0, 0, 1, 1], [], []>} : vector<16x16xf32>, vector<16x32xf32>, vector<16x32xf32> -> vector<16x32xf32>
    %198 = vector.broadcast %11 : vector<16x1xf32> to vector<16x32xf32>
    %199 = arith.addf %197, %198 : vector<16x32xf32>
    %200 = math.sqrt %199 : vector<16x32xf32>
    %201 = arith.mulf %195, %200 : vector<16x32xf32>
    %202 = vector.extract_strided_slice %201 {offsets = [0, 0], sizes = [8, 32], strides = [1, 1]} : vector<16x32xf32> to vector<8x32xf32>
    %c0_75 = arith.constant 0 : index
    %c12 = arith.constant 12 : index
    %c0_76 = arith.constant 0 : index
    %c0_77 = arith.constant 0 : index
    %203 = vector.load %arg10[%c0_75, %c12, %c0_76, %c0_77] : memref<1x16x8x32xf32, #tpu.memory_space<vmem>>, vector<1x1x8x32xf32>
    %204 = vector.shape_cast %203 : vector<1x1x8x32xf32> to vector<8x32xf32>
    %205 = vector.shape_cast %202 : vector<8x32xf32> to vector<1x1x8x32xf32>
    tpu.vector_store %arg10[%c0_75, %c12, %c0_76, %c0_77], %205 {strides = array<i32>} : memref<1x16x8x32xf32, #tpu.memory_space<vmem>>, vector<1x1x8x32xf32>,
    %206 = vector.extract_strided_slice %201 {offsets = [8, 0], sizes = [8, 32], strides = [1, 1]} : vector<16x32xf32> to vector<8x32xf32>
    %c0_78 = arith.constant 0 : index
    %c13 = arith.constant 13 : index
    %c0_79 = arith.constant 0 : index
    %c0_80 = arith.constant 0 : index
    %207 = vector.load %arg10[%c0_78, %c13, %c0_79, %c0_80] : memref<1x16x8x32xf32, #tpu.memory_space<vmem>>, vector<1x1x8x32xf32>
    %208 = vector.shape_cast %207 : vector<1x1x8x32xf32> to vector<8x32xf32>
    %209 = vector.shape_cast %206 : vector<8x32xf32> to vector<1x1x8x32xf32>
    tpu.vector_store %arg10[%c0_78, %c13, %c0_79, %c0_80], %209 {strides = array<i32>} : memref<1x16x8x32xf32, #tpu.memory_space<vmem>>, vector<1x1x8x32xf32>,
    %210 = vector.extract_strided_slice %61 {offsets = [0, 112], sizes = [16, 16], strides = [1, 1]} : vector<16x128xf32> to vector<16x16xf32>
    %211 = vector.extract_strided_slice %62 {offsets = [0, 112], sizes = [16, 16], strides = [1, 1]} : vector<16x128xf32> to vector<16x16xf32>
    %cst_81 = arith.constant dense<0.000000e+00> : vector<16x32xf32>
    %212 = tpu.matmul %210, %8, %cst_81 {dimension_numbers = #tpu.dot_dimension_numbers<[1], [0], [0], [1], [0, 0, 1, 1], [], []>} : vector<16x16xf32>, vector<16x32xf32>, vector<16x32xf32> -> vector<16x32xf32>
    %cst_82 = arith.constant dense<0.000000e+00> : vector<16x32xf32>
    %213 = tpu.matmul %211, %9, %cst_82 {dimension_numbers = #tpu.dot_dimension_numbers<[1], [0], [0], [1], [0, 0, 1, 1], [], []>} : vector<16x16xf32>, vector<16x32xf32>, vector<16x32xf32> -> vector<16x32xf32>
    %214 = arith.addf %212, %213 : vector<16x32xf32>
    %215 = vector.broadcast %7 : vector<16x1xf32> to vector<16x32xf32>
    %216 = arith.addf %214, %215 : vector<16x32xf32>
    %217 = arith.mulf %216, %216 : vector<16x32xf32>
    %cst_83 = arith.constant dense<0.000000e+00> : vector<16x32xf32>
    %218 = tpu.matmul %10, %217, %cst_83 {dimension_numbers = #tpu.dot_dimension_numbers<[1], [0], [0], [1], [0, 0, 1, 1], [], []>} : vector<16x16xf32>, vector<16x32xf32>, vector<16x32xf32> -> vector<16x32xf32>
    %219 = vector.broadcast %11 : vector<16x1xf32> to vector<16x32xf32>
    %220 = arith.addf %218, %219 : vector<16x32xf32>
    %221 = math.sqrt %220 : vector<16x32xf32>
    %222 = arith.mulf %216, %221 : vector<16x32xf32>
    %223 = vector.extract_strided_slice %222 {offsets = [0, 0], sizes = [8, 32], strides = [1, 1]} : vector<16x32xf32> to vector<8x32xf32>
    %c0_84 = arith.constant 0 : index
    %c14 = arith.constant 14 : index
    %c0_85 = arith.constant 0 : index
    %c0_86 = arith.constant 0 : index
    %224 = vector.load %arg10[%c0_84, %c14, %c0_85, %c0_86] : memref<1x16x8x32xf32, #tpu.memory_space<vmem>>, vector<1x1x8x32xf32>
    %225 = vector.shape_cast %224 : vector<1x1x8x32xf32> to vector<8x32xf32>
    %226 = vector.shape_cast %223 : vector<8x32xf32> to vector<1x1x8x32xf32>
    tpu.vector_store %arg10[%c0_84, %c14, %c0_85, %c0_86], %226 {strides = array<i32>} : memref<1x16x8x32xf32, #tpu.memory_space<vmem>>, vector<1x1x8x32xf32>,
    %227 = vector.extract_strided_slice %222 {offsets = [8, 0], sizes = [8, 32], strides = [1, 1]} : vector<16x32xf32> to vector<8x32xf32>
    %c0_87 = arith.constant 0 : index
    %c15 = arith.constant 15 : index
    %c0_88 = arith.constant 0 : index
    %c0_89 = arith.constant 0 : index
    %228 = vector.load %arg10[%c0_87, %c15, %c0_88, %c0_89] : memref<1x16x8x32xf32, #tpu.memory_space<vmem>>, vector<1x1x8x32xf32>
    %229 = vector.shape_cast %228 : vector<1x1x8x32xf32> to vector<8x32xf32>
    %230 = vector.shape_cast %227 : vector<8x32xf32> to vector<1x1x8x32xf32>
    tpu.vector_store %arg10[%c0_87, %c15, %c0_88, %c0_89], %230 {strides = array<i32>} : memref<1x16x8x32xf32, #tpu.memory_space<vmem>>, vector<1x1x8x32xf32>,
    return
  }
  func.func @transform_0(%arg0: i32, %arg1: i32) -> (i32, i32, i32, i32) {
    %c0_i32 = arith.constant 0 : i32
    %c0_i32_0 = arith.constant 0 : i32
    %c0_i32_1 = arith.constant 0 : i32
    %c0_i32_2 = arith.constant 0 : i32
    return %arg0, %c0_i32, %c0_i32_0, %c0_i32_1 : i32, i32, i32, i32
  }
  func.func @transform_1(%arg0: i32, %arg1: i32) -> (i32, i32) {
    %c0_i32 = arith.constant 0 : i32
    %c0_i32_0 = arith.constant 0 : i32
    %c0_i32_1 = arith.constant 0 : i32
    return %c0_i32, %c0_i32_0 : i32, i32
  }
  func.func @transform_2(%arg0: i32, %arg1: i32) -> (i32, i32) {
    %c0_i32 = arith.constant 0 : i32
    %c0_i32_0 = arith.constant 0 : i32
    %c0_i32_1 = arith.constant 0 : i32
    return %c0_i32, %c0_i32_0 : i32, i32
  }
  func.func @transform_3(%arg0: i32, %arg1: i32) -> (i32, i32) {
    %c0_i32 = arith.constant 0 : i32
    %c0_i32_0 = arith.constant 0 : i32
    %c0_i32_1 = arith.constant 0 : i32
    return %c0_i32, %c0_i32_0 : i32, i32
  }
  func.func @transform_4(%arg0: i32, %arg1: i32) -> (i32, i32) {
    %c0_i32 = arith.constant 0 : i32
    %c0_i32_0 = arith.constant 0 : i32
    %c0_i32_1 = arith.constant 0 : i32
    return %c0_i32, %c0_i32_0 : i32, i32
  }
  func.func @transform_5(%arg0: i32, %arg1: i32) -> (i32, i32) {
    %c0_i32 = arith.constant 0 : i32
    %c0_i32_0 = arith.constant 0 : i32
    %c0_i32_1 = arith.constant 0 : i32
    return %c0_i32, %c0_i32_0 : i32, i32
  }
  func.func @transform_6(%arg0: i32, %arg1: i32) -> (i32, i32) {
    %c0_i32 = arith.constant 0 : i32
    %c0_i32_0 = arith.constant 0 : i32
    %c0_i32_1 = arith.constant 0 : i32
    return %c0_i32, %c0_i32_0 : i32, i32
  }
  func.func @transform_7(%arg0: i32, %arg1: i32) -> (i32, i32) {
    %c0_i32 = arith.constant 0 : i32
    %c0_i32_0 = arith.constant 0 : i32
    %c0_i32_1 = arith.constant 0 : i32
    return %c0_i32, %c0_i32_0 : i32, i32
  }
  func.func @transform_8(%arg0: i32, %arg1: i32) -> (i32, i32, i32, i32) {
    %c0_i32 = arith.constant 0 : i32
    %c0_i32_0 = arith.constant 0 : i32
    %c0_i32_1 = arith.constant 0 : i32
    return %arg0, %arg1, %c0_i32, %c0_i32_0 : i32, i32, i32, i32
  }
}

module attributes {stable_mosaic.version = 11 : i64} {
  func.func @_poly_deconv_kernel(%arg0: i32, %arg1: i32, %arg2: memref<1x34x8x34xf32, #tpu.memory_space<vmem>>, %arg3: memref<16x72xf32, #tpu.memory_space<vmem>>, %arg4: memref<16x72xf32, #tpu.memory_space<vmem>>, %arg5: memref<16x1xf32, #tpu.memory_space<vmem>>, %arg6: memref<16x1xf32, #tpu.memory_space<vmem>>, %arg7: memref<16x16xf32, #tpu.memory_space<vmem>>, %arg8: memref<32x64xf32, #tpu.memory_space<vmem>>, %arg9: memref<32x64xf32, #tpu.memory_space<vmem>>, %arg10: memref<1x16x8x64xf32, #tpu.memory_space<vmem>>) attributes {dimension_semantics = [#tpu.dimension_semantics<parallel>, #tpu.dimension_semantics<parallel>], iteration_bounds = array<i64: 2, 4>, scalar_prefetch = 0 : i64, scratch_operands = 0 : i64, tpu.core_type = #tpu.core_type<tc>, window_params = [{transform_indices = @transform_0, window_bounds = array<i64: 1, 34, 8, 34>}, {pipeline_mode = #tpu.pipeline_mode<synchronous>, transform_indices = @transform_1, window_bounds = array<i64: 16, 72>}, {pipeline_mode = #tpu.pipeline_mode<synchronous>, transform_indices = @transform_2, window_bounds = array<i64: 16, 72>}, {pipeline_mode = #tpu.pipeline_mode<synchronous>, transform_indices = @transform_3, window_bounds = array<i64: 16, 1>}, {pipeline_mode = #tpu.pipeline_mode<synchronous>, transform_indices = @transform_4, window_bounds = array<i64: 16, 1>}, {pipeline_mode = #tpu.pipeline_mode<synchronous>, transform_indices = @transform_5, window_bounds = array<i64: 16, 16>}, {pipeline_mode = #tpu.pipeline_mode<synchronous>, transform_indices = @transform_6, window_bounds = array<i64: 32, 64>}, {pipeline_mode = #tpu.pipeline_mode<synchronous>, transform_indices = @transform_7, window_bounds = array<i64: 32, 64>}, {transform_indices = @transform_8, window_bounds = array<i64: 1, 16, 8, 64>}]} {
    %c8_i32 = arith.constant 8 : i32
    %0 = arith.muli %arg1, %c8_i32 : i32
    %1 = tpu.assume_multiple %0, 8 : i32
    %c0 = arith.constant 0 : index
    %2 = arith.index_cast %1 : i32 to index
    %c0_0 = arith.constant 0 : index
    %c0_1 = arith.constant 0 : index
    %3 = vector.load %arg2[%c0, %2, %c0_0, %c0_1] : memref<1x34x8x34xf32, #tpu.memory_space<vmem>>, vector<1x10x8x34xf32>
    %4 = vector.shape_cast %3 : vector<1x10x8x34xf32> to vector<10x8x34xf32>
    %c0_2 = arith.constant 0 : index
    %c0_3 = arith.constant 0 : index
    %5 = vector.load %arg3[%c0_2, %c0_3] : memref<16x72xf32, #tpu.memory_space<vmem>>, vector<16x72xf32>
    %c0_4 = arith.constant 0 : index
    %c0_5 = arith.constant 0 : index
    %6 = vector.load %arg4[%c0_4, %c0_5] : memref<16x72xf32, #tpu.memory_space<vmem>>, vector<16x72xf32>
    %c0_6 = arith.constant 0 : index
    %c0_7 = arith.constant 0 : index
    %7 = vector.load %arg5[%c0_6, %c0_7] : memref<16x1xf32, #tpu.memory_space<vmem>>, vector<16x1xf32>
    %c0_8 = arith.constant 0 : index
    %c0_9 = arith.constant 0 : index
    %8 = vector.load %arg8[%c0_8, %c0_9] : memref<32x64xf32, #tpu.memory_space<vmem>>, vector<32x64xf32>
    %c0_10 = arith.constant 0 : index
    %c0_11 = arith.constant 0 : index
    %9 = vector.load %arg9[%c0_10, %c0_11] : memref<32x64xf32, #tpu.memory_space<vmem>>, vector<32x64xf32>
    %c0_12 = arith.constant 0 : index
    %c0_13 = arith.constant 0 : index
    %10 = vector.load %arg7[%c0_12, %c0_13] : memref<16x16xf32, #tpu.memory_space<vmem>>, vector<16x16xf32>
    %c0_14 = arith.constant 0 : index
    %c0_15 = arith.constant 0 : index
    %11 = vector.load %arg6[%c0_14, %c0_15] : memref<16x1xf32, #tpu.memory_space<vmem>>, vector<16x1xf32>
    %12 = vector.extract_strided_slice %4 {offsets = [0, 0, 0], sizes = [3, 8, 34], strides = [1, 1, 1]} : vector<10x8x34xf32> to vector<3x8x34xf32>
    %13 = vector.shape_cast %12 : vector<3x8x34xf32> to vector<24x34xf32>
    %14 = vector.extract_strided_slice %13 {offsets = [0, 0], sizes = [24, 32], strides = [1, 1]} : vector<24x34xf32> to vector<24x32xf32>
    %15 = vector.extract_strided_slice %13 {offsets = [0, 1], sizes = [24, 32], strides = [1, 1]} : vector<24x34xf32> to vector<24x32xf32>
    %16 = vector.extract_strided_slice %13 {offsets = [0, 2], sizes = [24, 32], strides = [1, 1]} : vector<24x34xf32> to vector<24x32xf32>
    %17 = tpu.concatenate %14, %15, %16 in 0 : vector<24x32xf32>, vector<24x32xf32>, vector<24x32xf32> -> vector<72x32xf32>
    %18 = vector.extract_strided_slice %4 {offsets = [1, 0, 0], sizes = [3, 8, 34], strides = [1, 1, 1]} : vector<10x8x34xf32> to vector<3x8x34xf32>
    %19 = vector.shape_cast %18 : vector<3x8x34xf32> to vector<24x34xf32>
    %20 = vector.extract_strided_slice %19 {offsets = [0, 0], sizes = [24, 32], strides = [1, 1]} : vector<24x34xf32> to vector<24x32xf32>
    %21 = vector.extract_strided_slice %19 {offsets = [0, 1], sizes = [24, 32], strides = [1, 1]} : vector<24x34xf32> to vector<24x32xf32>
    %22 = vector.extract_strided_slice %19 {offsets = [0, 2], sizes = [24, 32], strides = [1, 1]} : vector<24x34xf32> to vector<24x32xf32>
    %23 = tpu.concatenate %20, %21, %22 in 0 : vector<24x32xf32>, vector<24x32xf32>, vector<24x32xf32> -> vector<72x32xf32>
    %24 = vector.extract_strided_slice %4 {offsets = [2, 0, 0], sizes = [3, 8, 34], strides = [1, 1, 1]} : vector<10x8x34xf32> to vector<3x8x34xf32>
    %25 = vector.shape_cast %24 : vector<3x8x34xf32> to vector<24x34xf32>
    %26 = vector.extract_strided_slice %25 {offsets = [0, 0], sizes = [24, 32], strides = [1, 1]} : vector<24x34xf32> to vector<24x32xf32>
    %27 = vector.extract_strided_slice %25 {offsets = [0, 1], sizes = [24, 32], strides = [1, 1]} : vector<24x34xf32> to vector<24x32xf32>
    %28 = vector.extract_strided_slice %25 {offsets = [0, 2], sizes = [24, 32], strides = [1, 1]} : vector<24x34xf32> to vector<24x32xf32>
    %29 = tpu.concatenate %26, %27, %28 in 0 : vector<24x32xf32>, vector<24x32xf32>, vector<24x32xf32> -> vector<72x32xf32>
    %30 = vector.extract_strided_slice %4 {offsets = [3, 0, 0], sizes = [3, 8, 34], strides = [1, 1, 1]} : vector<10x8x34xf32> to vector<3x8x34xf32>
    %31 = vector.shape_cast %30 : vector<3x8x34xf32> to vector<24x34xf32>
    %32 = vector.extract_strided_slice %31 {offsets = [0, 0], sizes = [24, 32], strides = [1, 1]} : vector<24x34xf32> to vector<24x32xf32>
    %33 = vector.extract_strided_slice %31 {offsets = [0, 1], sizes = [24, 32], strides = [1, 1]} : vector<24x34xf32> to vector<24x32xf32>
    %34 = vector.extract_strided_slice %31 {offsets = [0, 2], sizes = [24, 32], strides = [1, 1]} : vector<24x34xf32> to vector<24x32xf32>
    %35 = tpu.concatenate %32, %33, %34 in 0 : vector<24x32xf32>, vector<24x32xf32>, vector<24x32xf32> -> vector<72x32xf32>
    %36 = vector.extract_strided_slice %4 {offsets = [4, 0, 0], sizes = [3, 8, 34], strides = [1, 1, 1]} : vector<10x8x34xf32> to vector<3x8x34xf32>
    %37 = vector.shape_cast %36 : vector<3x8x34xf32> to vector<24x34xf32>
    %38 = vector.extract_strided_slice %37 {offsets = [0, 0], sizes = [24, 32], strides = [1, 1]} : vector<24x34xf32> to vector<24x32xf32>
    %39 = vector.extract_strided_slice %37 {offsets = [0, 1], sizes = [24, 32], strides = [1, 1]} : vector<24x34xf32> to vector<24x32xf32>
    %40 = vector.extract_strided_slice %37 {offsets = [0, 2], sizes = [24, 32], strides = [1, 1]} : vector<24x34xf32> to vector<24x32xf32>
    %41 = tpu.concatenate %38, %39, %40 in 0 : vector<24x32xf32>, vector<24x32xf32>, vector<24x32xf32> -> vector<72x32xf32>
    %42 = vector.extract_strided_slice %4 {offsets = [5, 0, 0], sizes = [3, 8, 34], strides = [1, 1, 1]} : vector<10x8x34xf32> to vector<3x8x34xf32>
    %43 = vector.shape_cast %42 : vector<3x8x34xf32> to vector<24x34xf32>
    %44 = vector.extract_strided_slice %43 {offsets = [0, 0], sizes = [24, 32], strides = [1, 1]} : vector<24x34xf32> to vector<24x32xf32>
    %45 = vector.extract_strided_slice %43 {offsets = [0, 1], sizes = [24, 32], strides = [1, 1]} : vector<24x34xf32> to vector<24x32xf32>
    %46 = vector.extract_strided_slice %43 {offsets = [0, 2], sizes = [24, 32], strides = [1, 1]} : vector<24x34xf32> to vector<24x32xf32>
    %47 = tpu.concatenate %44, %45, %46 in 0 : vector<24x32xf32>, vector<24x32xf32>, vector<24x32xf32> -> vector<72x32xf32>
    %48 = vector.extract_strided_slice %4 {offsets = [6, 0, 0], sizes = [3, 8, 34], strides = [1, 1, 1]} : vector<10x8x34xf32> to vector<3x8x34xf32>
    %49 = vector.shape_cast %48 : vector<3x8x34xf32> to vector<24x34xf32>
    %50 = vector.extract_strided_slice %49 {offsets = [0, 0], sizes = [24, 32], strides = [1, 1]} : vector<24x34xf32> to vector<24x32xf32>
    %51 = vector.extract_strided_slice %49 {offsets = [0, 1], sizes = [24, 32], strides = [1, 1]} : vector<24x34xf32> to vector<24x32xf32>
    %52 = vector.extract_strided_slice %49 {offsets = [0, 2], sizes = [24, 32], strides = [1, 1]} : vector<24x34xf32> to vector<24x32xf32>
    %53 = tpu.concatenate %50, %51, %52 in 0 : vector<24x32xf32>, vector<24x32xf32>, vector<24x32xf32> -> vector<72x32xf32>
    %54 = vector.extract_strided_slice %4 {offsets = [7, 0, 0], sizes = [3, 8, 34], strides = [1, 1, 1]} : vector<10x8x34xf32> to vector<3x8x34xf32>
    %55 = vector.shape_cast %54 : vector<3x8x34xf32> to vector<24x34xf32>
    %56 = vector.extract_strided_slice %55 {offsets = [0, 0], sizes = [24, 32], strides = [1, 1]} : vector<24x34xf32> to vector<24x32xf32>
    %57 = vector.extract_strided_slice %55 {offsets = [0, 1], sizes = [24, 32], strides = [1, 1]} : vector<24x34xf32> to vector<24x32xf32>
    %58 = vector.extract_strided_slice %55 {offsets = [0, 2], sizes = [24, 32], strides = [1, 1]} : vector<24x34xf32> to vector<24x32xf32>
    %59 = tpu.concatenate %56, %57, %58 in 0 : vector<24x32xf32>, vector<24x32xf32>, vector<24x32xf32> -> vector<72x32xf32>
    %60 = tpu.concatenate %17, %23, %29, %35, %41, %47, %53, %59 in 1 : vector<72x32xf32>, vector<72x32xf32>, vector<72x32xf32>, vector<72x32xf32>, vector<72x32xf32>, vector<72x32xf32>, vector<72x32xf32>, vector<72x32xf32> -> vector<72x256xf32>
    %cst = arith.constant dense<0.000000e+00> : vector<16x256xf32>
    %61 = tpu.matmul %5, %60, %cst {dimension_numbers = #tpu.dot_dimension_numbers<[1], [0], [0], [1], [0, 0, 1, 1], [], []>} : vector<16x72xf32>, vector<72x256xf32>, vector<16x256xf32> -> vector<16x256xf32>
    %cst_16 = arith.constant dense<0.000000e+00> : vector<16x256xf32>
    %62 = tpu.matmul %6, %60, %cst_16 {dimension_numbers = #tpu.dot_dimension_numbers<[1], [0], [0], [1], [0, 0, 1, 1], [], []>} : vector<16x72xf32>, vector<72x256xf32>, vector<16x256xf32> -> vector<16x256xf32>
    %63 = vector.extract_strided_slice %61 {offsets = [0, 0], sizes = [16, 32], strides = [1, 1]} : vector<16x256xf32> to vector<16x32xf32>
    %64 = vector.extract_strided_slice %62 {offsets = [0, 0], sizes = [16, 32], strides = [1, 1]} : vector<16x256xf32> to vector<16x32xf32>
    %cst_17 = arith.constant dense<0.000000e+00> : vector<16x64xf32>
    %65 = tpu.matmul %63, %8, %cst_17 {dimension_numbers = #tpu.dot_dimension_numbers<[1], [0], [0], [1], [0, 0, 1, 1], [], []>} : vector<16x32xf32>, vector<32x64xf32>, vector<16x64xf32> -> vector<16x64xf32>
    %cst_18 = arith.constant dense<0.000000e+00> : vector<16x64xf32>
    %66 = tpu.matmul %64, %9, %cst_18 {dimension_numbers = #tpu.dot_dimension_numbers<[1], [0], [0], [1], [0, 0, 1, 1], [], []>} : vector<16x32xf32>, vector<32x64xf32>, vector<16x64xf32> -> vector<16x64xf32>
    %67 = arith.addf %65, %66 : vector<16x64xf32>
    %68 = vector.broadcast %7 : vector<16x1xf32> to vector<16x64xf32>
    %69 = arith.addf %67, %68 : vector<16x64xf32>
    %70 = arith.mulf %69, %69 : vector<16x64xf32>
    %cst_19 = arith.constant dense<0.000000e+00> : vector<16x64xf32>
    %71 = tpu.matmul %10, %70, %cst_19 {dimension_numbers = #tpu.dot_dimension_numbers<[1], [0], [0], [1], [0, 0, 1, 1], [], []>} : vector<16x16xf32>, vector<16x64xf32>, vector<16x64xf32> -> vector<16x64xf32>
    %72 = vector.broadcast %11 : vector<16x1xf32> to vector<16x64xf32>
    %73 = arith.addf %71, %72 : vector<16x64xf32>
    %74 = math.sqrt %73 : vector<16x64xf32>
    %75 = arith.mulf %69, %74 : vector<16x64xf32>
    %76 = vector.extract_strided_slice %75 {offsets = [0, 0], sizes = [8, 64], strides = [1, 1]} : vector<16x64xf32> to vector<8x64xf32>
    %c0_20 = arith.constant 0 : index
    %c0_21 = arith.constant 0 : index
    %c0_22 = arith.constant 0 : index
    %c0_23 = arith.constant 0 : index
    %77 = vector.load %arg10[%c0_20, %c0_21, %c0_22, %c0_23] : memref<1x16x8x64xf32, #tpu.memory_space<vmem>>, vector<1x1x8x64xf32>
    %78 = vector.shape_cast %77 : vector<1x1x8x64xf32> to vector<8x64xf32>
    %79 = vector.shape_cast %76 : vector<8x64xf32> to vector<1x1x8x64xf32>
    tpu.vector_store %arg10[%c0_20, %c0_21, %c0_22, %c0_23], %79 {strides = array<i32>} : memref<1x16x8x64xf32, #tpu.memory_space<vmem>>, vector<1x1x8x64xf32>,
    %80 = vector.extract_strided_slice %75 {offsets = [8, 0], sizes = [8, 64], strides = [1, 1]} : vector<16x64xf32> to vector<8x64xf32>
    %c0_24 = arith.constant 0 : index
    %c1 = arith.constant 1 : index
    %c0_25 = arith.constant 0 : index
    %c0_26 = arith.constant 0 : index
    %81 = vector.load %arg10[%c0_24, %c1, %c0_25, %c0_26] : memref<1x16x8x64xf32, #tpu.memory_space<vmem>>, vector<1x1x8x64xf32>
    %82 = vector.shape_cast %81 : vector<1x1x8x64xf32> to vector<8x64xf32>
    %83 = vector.shape_cast %80 : vector<8x64xf32> to vector<1x1x8x64xf32>
    tpu.vector_store %arg10[%c0_24, %c1, %c0_25, %c0_26], %83 {strides = array<i32>} : memref<1x16x8x64xf32, #tpu.memory_space<vmem>>, vector<1x1x8x64xf32>,
    %84 = vector.extract_strided_slice %61 {offsets = [0, 32], sizes = [16, 32], strides = [1, 1]} : vector<16x256xf32> to vector<16x32xf32>
    %85 = vector.extract_strided_slice %62 {offsets = [0, 32], sizes = [16, 32], strides = [1, 1]} : vector<16x256xf32> to vector<16x32xf32>
    %cst_27 = arith.constant dense<0.000000e+00> : vector<16x64xf32>
    %86 = tpu.matmul %84, %8, %cst_27 {dimension_numbers = #tpu.dot_dimension_numbers<[1], [0], [0], [1], [0, 0, 1, 1], [], []>} : vector<16x32xf32>, vector<32x64xf32>, vector<16x64xf32> -> vector<16x64xf32>
    %cst_28 = arith.constant dense<0.000000e+00> : vector<16x64xf32>
    %87 = tpu.matmul %85, %9, %cst_28 {dimension_numbers = #tpu.dot_dimension_numbers<[1], [0], [0], [1], [0, 0, 1, 1], [], []>} : vector<16x32xf32>, vector<32x64xf32>, vector<16x64xf32> -> vector<16x64xf32>
    %88 = arith.addf %86, %87 : vector<16x64xf32>
    %89 = vector.broadcast %7 : vector<16x1xf32> to vector<16x64xf32>
    %90 = arith.addf %88, %89 : vector<16x64xf32>
    %91 = arith.mulf %90, %90 : vector<16x64xf32>
    %cst_29 = arith.constant dense<0.000000e+00> : vector<16x64xf32>
    %92 = tpu.matmul %10, %91, %cst_29 {dimension_numbers = #tpu.dot_dimension_numbers<[1], [0], [0], [1], [0, 0, 1, 1], [], []>} : vector<16x16xf32>, vector<16x64xf32>, vector<16x64xf32> -> vector<16x64xf32>
    %93 = vector.broadcast %11 : vector<16x1xf32> to vector<16x64xf32>
    %94 = arith.addf %92, %93 : vector<16x64xf32>
    %95 = math.sqrt %94 : vector<16x64xf32>
    %96 = arith.mulf %90, %95 : vector<16x64xf32>
    %97 = vector.extract_strided_slice %96 {offsets = [0, 0], sizes = [8, 64], strides = [1, 1]} : vector<16x64xf32> to vector<8x64xf32>
    %c0_30 = arith.constant 0 : index
    %c2 = arith.constant 2 : index
    %c0_31 = arith.constant 0 : index
    %c0_32 = arith.constant 0 : index
    %98 = vector.load %arg10[%c0_30, %c2, %c0_31, %c0_32] : memref<1x16x8x64xf32, #tpu.memory_space<vmem>>, vector<1x1x8x64xf32>
    %99 = vector.shape_cast %98 : vector<1x1x8x64xf32> to vector<8x64xf32>
    %100 = vector.shape_cast %97 : vector<8x64xf32> to vector<1x1x8x64xf32>
    tpu.vector_store %arg10[%c0_30, %c2, %c0_31, %c0_32], %100 {strides = array<i32>} : memref<1x16x8x64xf32, #tpu.memory_space<vmem>>, vector<1x1x8x64xf32>,
    %101 = vector.extract_strided_slice %96 {offsets = [8, 0], sizes = [8, 64], strides = [1, 1]} : vector<16x64xf32> to vector<8x64xf32>
    %c0_33 = arith.constant 0 : index
    %c3 = arith.constant 3 : index
    %c0_34 = arith.constant 0 : index
    %c0_35 = arith.constant 0 : index
    %102 = vector.load %arg10[%c0_33, %c3, %c0_34, %c0_35] : memref<1x16x8x64xf32, #tpu.memory_space<vmem>>, vector<1x1x8x64xf32>
    %103 = vector.shape_cast %102 : vector<1x1x8x64xf32> to vector<8x64xf32>
    %104 = vector.shape_cast %101 : vector<8x64xf32> to vector<1x1x8x64xf32>
    tpu.vector_store %arg10[%c0_33, %c3, %c0_34, %c0_35], %104 {strides = array<i32>} : memref<1x16x8x64xf32, #tpu.memory_space<vmem>>, vector<1x1x8x64xf32>,
    %105 = vector.extract_strided_slice %61 {offsets = [0, 64], sizes = [16, 32], strides = [1, 1]} : vector<16x256xf32> to vector<16x32xf32>
    %106 = vector.extract_strided_slice %62 {offsets = [0, 64], sizes = [16, 32], strides = [1, 1]} : vector<16x256xf32> to vector<16x32xf32>
    %cst_36 = arith.constant dense<0.000000e+00> : vector<16x64xf32>
    %107 = tpu.matmul %105, %8, %cst_36 {dimension_numbers = #tpu.dot_dimension_numbers<[1], [0], [0], [1], [0, 0, 1, 1], [], []>} : vector<16x32xf32>, vector<32x64xf32>, vector<16x64xf32> -> vector<16x64xf32>
    %cst_37 = arith.constant dense<0.000000e+00> : vector<16x64xf32>
    %108 = tpu.matmul %106, %9, %cst_37 {dimension_numbers = #tpu.dot_dimension_numbers<[1], [0], [0], [1], [0, 0, 1, 1], [], []>} : vector<16x32xf32>, vector<32x64xf32>, vector<16x64xf32> -> vector<16x64xf32>
    %109 = arith.addf %107, %108 : vector<16x64xf32>
    %110 = vector.broadcast %7 : vector<16x1xf32> to vector<16x64xf32>
    %111 = arith.addf %109, %110 : vector<16x64xf32>
    %112 = arith.mulf %111, %111 : vector<16x64xf32>
    %cst_38 = arith.constant dense<0.000000e+00> : vector<16x64xf32>
    %113 = tpu.matmul %10, %112, %cst_38 {dimension_numbers = #tpu.dot_dimension_numbers<[1], [0], [0], [1], [0, 0, 1, 1], [], []>} : vector<16x16xf32>, vector<16x64xf32>, vector<16x64xf32> -> vector<16x64xf32>
    %114 = vector.broadcast %11 : vector<16x1xf32> to vector<16x64xf32>
    %115 = arith.addf %113, %114 : vector<16x64xf32>
    %116 = math.sqrt %115 : vector<16x64xf32>
    %117 = arith.mulf %111, %116 : vector<16x64xf32>
    %118 = vector.extract_strided_slice %117 {offsets = [0, 0], sizes = [8, 64], strides = [1, 1]} : vector<16x64xf32> to vector<8x64xf32>
    %c0_39 = arith.constant 0 : index
    %c4 = arith.constant 4 : index
    %c0_40 = arith.constant 0 : index
    %c0_41 = arith.constant 0 : index
    %119 = vector.load %arg10[%c0_39, %c4, %c0_40, %c0_41] : memref<1x16x8x64xf32, #tpu.memory_space<vmem>>, vector<1x1x8x64xf32>
    %120 = vector.shape_cast %119 : vector<1x1x8x64xf32> to vector<8x64xf32>
    %121 = vector.shape_cast %118 : vector<8x64xf32> to vector<1x1x8x64xf32>
    tpu.vector_store %arg10[%c0_39, %c4, %c0_40, %c0_41], %121 {strides = array<i32>} : memref<1x16x8x64xf32, #tpu.memory_space<vmem>>, vector<1x1x8x64xf32>,
    %122 = vector.extract_strided_slice %117 {offsets = [8, 0], sizes = [8, 64], strides = [1, 1]} : vector<16x64xf32> to vector<8x64xf32>
    %c0_42 = arith.constant 0 : index
    %c5 = arith.constant 5 : index
    %c0_43 = arith.constant 0 : index
    %c0_44 = arith.constant 0 : index
    %123 = vector.load %arg10[%c0_42, %c5, %c0_43, %c0_44] : memref<1x16x8x64xf32, #tpu.memory_space<vmem>>, vector<1x1x8x64xf32>
    %124 = vector.shape_cast %123 : vector<1x1x8x64xf32> to vector<8x64xf32>
    %125 = vector.shape_cast %122 : vector<8x64xf32> to vector<1x1x8x64xf32>
    tpu.vector_store %arg10[%c0_42, %c5, %c0_43, %c0_44], %125 {strides = array<i32>} : memref<1x16x8x64xf32, #tpu.memory_space<vmem>>, vector<1x1x8x64xf32>,
    %126 = vector.extract_strided_slice %61 {offsets = [0, 96], sizes = [16, 32], strides = [1, 1]} : vector<16x256xf32> to vector<16x32xf32>
    %127 = vector.extract_strided_slice %62 {offsets = [0, 96], sizes = [16, 32], strides = [1, 1]} : vector<16x256xf32> to vector<16x32xf32>
    %cst_45 = arith.constant dense<0.000000e+00> : vector<16x64xf32>
    %128 = tpu.matmul %126, %8, %cst_45 {dimension_numbers = #tpu.dot_dimension_numbers<[1], [0], [0], [1], [0, 0, 1, 1], [], []>} : vector<16x32xf32>, vector<32x64xf32>, vector<16x64xf32> -> vector<16x64xf32>
    %cst_46 = arith.constant dense<0.000000e+00> : vector<16x64xf32>
    %129 = tpu.matmul %127, %9, %cst_46 {dimension_numbers = #tpu.dot_dimension_numbers<[1], [0], [0], [1], [0, 0, 1, 1], [], []>} : vector<16x32xf32>, vector<32x64xf32>, vector<16x64xf32> -> vector<16x64xf32>
    %130 = arith.addf %128, %129 : vector<16x64xf32>
    %131 = vector.broadcast %7 : vector<16x1xf32> to vector<16x64xf32>
    %132 = arith.addf %130, %131 : vector<16x64xf32>
    %133 = arith.mulf %132, %132 : vector<16x64xf32>
    %cst_47 = arith.constant dense<0.000000e+00> : vector<16x64xf32>
    %134 = tpu.matmul %10, %133, %cst_47 {dimension_numbers = #tpu.dot_dimension_numbers<[1], [0], [0], [1], [0, 0, 1, 1], [], []>} : vector<16x16xf32>, vector<16x64xf32>, vector<16x64xf32> -> vector<16x64xf32>
    %135 = vector.broadcast %11 : vector<16x1xf32> to vector<16x64xf32>
    %136 = arith.addf %134, %135 : vector<16x64xf32>
    %137 = math.sqrt %136 : vector<16x64xf32>
    %138 = arith.mulf %132, %137 : vector<16x64xf32>
    %139 = vector.extract_strided_slice %138 {offsets = [0, 0], sizes = [8, 64], strides = [1, 1]} : vector<16x64xf32> to vector<8x64xf32>
    %c0_48 = arith.constant 0 : index
    %c6 = arith.constant 6 : index
    %c0_49 = arith.constant 0 : index
    %c0_50 = arith.constant 0 : index
    %140 = vector.load %arg10[%c0_48, %c6, %c0_49, %c0_50] : memref<1x16x8x64xf32, #tpu.memory_space<vmem>>, vector<1x1x8x64xf32>
    %141 = vector.shape_cast %140 : vector<1x1x8x64xf32> to vector<8x64xf32>
    %142 = vector.shape_cast %139 : vector<8x64xf32> to vector<1x1x8x64xf32>
    tpu.vector_store %arg10[%c0_48, %c6, %c0_49, %c0_50], %142 {strides = array<i32>} : memref<1x16x8x64xf32, #tpu.memory_space<vmem>>, vector<1x1x8x64xf32>,
    %143 = vector.extract_strided_slice %138 {offsets = [8, 0], sizes = [8, 64], strides = [1, 1]} : vector<16x64xf32> to vector<8x64xf32>
    %c0_51 = arith.constant 0 : index
    %c7 = arith.constant 7 : index
    %c0_52 = arith.constant 0 : index
    %c0_53 = arith.constant 0 : index
    %144 = vector.load %arg10[%c0_51, %c7, %c0_52, %c0_53] : memref<1x16x8x64xf32, #tpu.memory_space<vmem>>, vector<1x1x8x64xf32>
    %145 = vector.shape_cast %144 : vector<1x1x8x64xf32> to vector<8x64xf32>
    %146 = vector.shape_cast %143 : vector<8x64xf32> to vector<1x1x8x64xf32>
    tpu.vector_store %arg10[%c0_51, %c7, %c0_52, %c0_53], %146 {strides = array<i32>} : memref<1x16x8x64xf32, #tpu.memory_space<vmem>>, vector<1x1x8x64xf32>,
    %147 = vector.extract_strided_slice %61 {offsets = [0, 128], sizes = [16, 32], strides = [1, 1]} : vector<16x256xf32> to vector<16x32xf32>
    %148 = vector.extract_strided_slice %62 {offsets = [0, 128], sizes = [16, 32], strides = [1, 1]} : vector<16x256xf32> to vector<16x32xf32>
    %cst_54 = arith.constant dense<0.000000e+00> : vector<16x64xf32>
    %149 = tpu.matmul %147, %8, %cst_54 {dimension_numbers = #tpu.dot_dimension_numbers<[1], [0], [0], [1], [0, 0, 1, 1], [], []>} : vector<16x32xf32>, vector<32x64xf32>, vector<16x64xf32> -> vector<16x64xf32>
    %cst_55 = arith.constant dense<0.000000e+00> : vector<16x64xf32>
    %150 = tpu.matmul %148, %9, %cst_55 {dimension_numbers = #tpu.dot_dimension_numbers<[1], [0], [0], [1], [0, 0, 1, 1], [], []>} : vector<16x32xf32>, vector<32x64xf32>, vector<16x64xf32> -> vector<16x64xf32>
    %151 = arith.addf %149, %150 : vector<16x64xf32>
    %152 = vector.broadcast %7 : vector<16x1xf32> to vector<16x64xf32>
    %153 = arith.addf %151, %152 : vector<16x64xf32>
    %154 = arith.mulf %153, %153 : vector<16x64xf32>
    %cst_56 = arith.constant dense<0.000000e+00> : vector<16x64xf32>
    %155 = tpu.matmul %10, %154, %cst_56 {dimension_numbers = #tpu.dot_dimension_numbers<[1], [0], [0], [1], [0, 0, 1, 1], [], []>} : vector<16x16xf32>, vector<16x64xf32>, vector<16x64xf32> -> vector<16x64xf32>
    %156 = vector.broadcast %11 : vector<16x1xf32> to vector<16x64xf32>
    %157 = arith.addf %155, %156 : vector<16x64xf32>
    %158 = math.sqrt %157 : vector<16x64xf32>
    %159 = arith.mulf %153, %158 : vector<16x64xf32>
    %160 = vector.extract_strided_slice %159 {offsets = [0, 0], sizes = [8, 64], strides = [1, 1]} : vector<16x64xf32> to vector<8x64xf32>
    %c0_57 = arith.constant 0 : index
    %c8 = arith.constant 8 : index
    %c0_58 = arith.constant 0 : index
    %c0_59 = arith.constant 0 : index
    %161 = vector.load %arg10[%c0_57, %c8, %c0_58, %c0_59] : memref<1x16x8x64xf32, #tpu.memory_space<vmem>>, vector<1x1x8x64xf32>
    %162 = vector.shape_cast %161 : vector<1x1x8x64xf32> to vector<8x64xf32>
    %163 = vector.shape_cast %160 : vector<8x64xf32> to vector<1x1x8x64xf32>
    tpu.vector_store %arg10[%c0_57, %c8, %c0_58, %c0_59], %163 {strides = array<i32>} : memref<1x16x8x64xf32, #tpu.memory_space<vmem>>, vector<1x1x8x64xf32>,
    %164 = vector.extract_strided_slice %159 {offsets = [8, 0], sizes = [8, 64], strides = [1, 1]} : vector<16x64xf32> to vector<8x64xf32>
    %c0_60 = arith.constant 0 : index
    %c9 = arith.constant 9 : index
    %c0_61 = arith.constant 0 : index
    %c0_62 = arith.constant 0 : index
    %165 = vector.load %arg10[%c0_60, %c9, %c0_61, %c0_62] : memref<1x16x8x64xf32, #tpu.memory_space<vmem>>, vector<1x1x8x64xf32>
    %166 = vector.shape_cast %165 : vector<1x1x8x64xf32> to vector<8x64xf32>
    %167 = vector.shape_cast %164 : vector<8x64xf32> to vector<1x1x8x64xf32>
    tpu.vector_store %arg10[%c0_60, %c9, %c0_61, %c0_62], %167 {strides = array<i32>} : memref<1x16x8x64xf32, #tpu.memory_space<vmem>>, vector<1x1x8x64xf32>,
    %168 = vector.extract_strided_slice %61 {offsets = [0, 160], sizes = [16, 32], strides = [1, 1]} : vector<16x256xf32> to vector<16x32xf32>
    %169 = vector.extract_strided_slice %62 {offsets = [0, 160], sizes = [16, 32], strides = [1, 1]} : vector<16x256xf32> to vector<16x32xf32>
    %cst_63 = arith.constant dense<0.000000e+00> : vector<16x64xf32>
    %170 = tpu.matmul %168, %8, %cst_63 {dimension_numbers = #tpu.dot_dimension_numbers<[1], [0], [0], [1], [0, 0, 1, 1], [], []>} : vector<16x32xf32>, vector<32x64xf32>, vector<16x64xf32> -> vector<16x64xf32>
    %cst_64 = arith.constant dense<0.000000e+00> : vector<16x64xf32>
    %171 = tpu.matmul %169, %9, %cst_64 {dimension_numbers = #tpu.dot_dimension_numbers<[1], [0], [0], [1], [0, 0, 1, 1], [], []>} : vector<16x32xf32>, vector<32x64xf32>, vector<16x64xf32> -> vector<16x64xf32>
    %172 = arith.addf %170, %171 : vector<16x64xf32>
    %173 = vector.broadcast %7 : vector<16x1xf32> to vector<16x64xf32>
    %174 = arith.addf %172, %173 : vector<16x64xf32>
    %175 = arith.mulf %174, %174 : vector<16x64xf32>
    %cst_65 = arith.constant dense<0.000000e+00> : vector<16x64xf32>
    %176 = tpu.matmul %10, %175, %cst_65 {dimension_numbers = #tpu.dot_dimension_numbers<[1], [0], [0], [1], [0, 0, 1, 1], [], []>} : vector<16x16xf32>, vector<16x64xf32>, vector<16x64xf32> -> vector<16x64xf32>
    %177 = vector.broadcast %11 : vector<16x1xf32> to vector<16x64xf32>
    %178 = arith.addf %176, %177 : vector<16x64xf32>
    %179 = math.sqrt %178 : vector<16x64xf32>
    %180 = arith.mulf %174, %179 : vector<16x64xf32>
    %181 = vector.extract_strided_slice %180 {offsets = [0, 0], sizes = [8, 64], strides = [1, 1]} : vector<16x64xf32> to vector<8x64xf32>
    %c0_66 = arith.constant 0 : index
    %c10 = arith.constant 10 : index
    %c0_67 = arith.constant 0 : index
    %c0_68 = arith.constant 0 : index
    %182 = vector.load %arg10[%c0_66, %c10, %c0_67, %c0_68] : memref<1x16x8x64xf32, #tpu.memory_space<vmem>>, vector<1x1x8x64xf32>
    %183 = vector.shape_cast %182 : vector<1x1x8x64xf32> to vector<8x64xf32>
    %184 = vector.shape_cast %181 : vector<8x64xf32> to vector<1x1x8x64xf32>
    tpu.vector_store %arg10[%c0_66, %c10, %c0_67, %c0_68], %184 {strides = array<i32>} : memref<1x16x8x64xf32, #tpu.memory_space<vmem>>, vector<1x1x8x64xf32>,
    %185 = vector.extract_strided_slice %180 {offsets = [8, 0], sizes = [8, 64], strides = [1, 1]} : vector<16x64xf32> to vector<8x64xf32>
    %c0_69 = arith.constant 0 : index
    %c11 = arith.constant 11 : index
    %c0_70 = arith.constant 0 : index
    %c0_71 = arith.constant 0 : index
    %186 = vector.load %arg10[%c0_69, %c11, %c0_70, %c0_71] : memref<1x16x8x64xf32, #tpu.memory_space<vmem>>, vector<1x1x8x64xf32>
    %187 = vector.shape_cast %186 : vector<1x1x8x64xf32> to vector<8x64xf32>
    %188 = vector.shape_cast %185 : vector<8x64xf32> to vector<1x1x8x64xf32>
    tpu.vector_store %arg10[%c0_69, %c11, %c0_70, %c0_71], %188 {strides = array<i32>} : memref<1x16x8x64xf32, #tpu.memory_space<vmem>>, vector<1x1x8x64xf32>,
    %189 = vector.extract_strided_slice %61 {offsets = [0, 192], sizes = [16, 32], strides = [1, 1]} : vector<16x256xf32> to vector<16x32xf32>
    %190 = vector.extract_strided_slice %62 {offsets = [0, 192], sizes = [16, 32], strides = [1, 1]} : vector<16x256xf32> to vector<16x32xf32>
    %cst_72 = arith.constant dense<0.000000e+00> : vector<16x64xf32>
    %191 = tpu.matmul %189, %8, %cst_72 {dimension_numbers = #tpu.dot_dimension_numbers<[1], [0], [0], [1], [0, 0, 1, 1], [], []>} : vector<16x32xf32>, vector<32x64xf32>, vector<16x64xf32> -> vector<16x64xf32>
    %cst_73 = arith.constant dense<0.000000e+00> : vector<16x64xf32>
    %192 = tpu.matmul %190, %9, %cst_73 {dimension_numbers = #tpu.dot_dimension_numbers<[1], [0], [0], [1], [0, 0, 1, 1], [], []>} : vector<16x32xf32>, vector<32x64xf32>, vector<16x64xf32> -> vector<16x64xf32>
    %193 = arith.addf %191, %192 : vector<16x64xf32>
    %194 = vector.broadcast %7 : vector<16x1xf32> to vector<16x64xf32>
    %195 = arith.addf %193, %194 : vector<16x64xf32>
    %196 = arith.mulf %195, %195 : vector<16x64xf32>
    %cst_74 = arith.constant dense<0.000000e+00> : vector<16x64xf32>
    %197 = tpu.matmul %10, %196, %cst_74 {dimension_numbers = #tpu.dot_dimension_numbers<[1], [0], [0], [1], [0, 0, 1, 1], [], []>} : vector<16x16xf32>, vector<16x64xf32>, vector<16x64xf32> -> vector<16x64xf32>
    %198 = vector.broadcast %11 : vector<16x1xf32> to vector<16x64xf32>
    %199 = arith.addf %197, %198 : vector<16x64xf32>
    %200 = math.sqrt %199 : vector<16x64xf32>
    %201 = arith.mulf %195, %200 : vector<16x64xf32>
    %202 = vector.extract_strided_slice %201 {offsets = [0, 0], sizes = [8, 64], strides = [1, 1]} : vector<16x64xf32> to vector<8x64xf32>
    %c0_75 = arith.constant 0 : index
    %c12 = arith.constant 12 : index
    %c0_76 = arith.constant 0 : index
    %c0_77 = arith.constant 0 : index
    %203 = vector.load %arg10[%c0_75, %c12, %c0_76, %c0_77] : memref<1x16x8x64xf32, #tpu.memory_space<vmem>>, vector<1x1x8x64xf32>
    %204 = vector.shape_cast %203 : vector<1x1x8x64xf32> to vector<8x64xf32>
    %205 = vector.shape_cast %202 : vector<8x64xf32> to vector<1x1x8x64xf32>
    tpu.vector_store %arg10[%c0_75, %c12, %c0_76, %c0_77], %205 {strides = array<i32>} : memref<1x16x8x64xf32, #tpu.memory_space<vmem>>, vector<1x1x8x64xf32>,
    %206 = vector.extract_strided_slice %201 {offsets = [8, 0], sizes = [8, 64], strides = [1, 1]} : vector<16x64xf32> to vector<8x64xf32>
    %c0_78 = arith.constant 0 : index
    %c13 = arith.constant 13 : index
    %c0_79 = arith.constant 0 : index
    %c0_80 = arith.constant 0 : index
    %207 = vector.load %arg10[%c0_78, %c13, %c0_79, %c0_80] : memref<1x16x8x64xf32, #tpu.memory_space<vmem>>, vector<1x1x8x64xf32>
    %208 = vector.shape_cast %207 : vector<1x1x8x64xf32> to vector<8x64xf32>
    %209 = vector.shape_cast %206 : vector<8x64xf32> to vector<1x1x8x64xf32>
    tpu.vector_store %arg10[%c0_78, %c13, %c0_79, %c0_80], %209 {strides = array<i32>} : memref<1x16x8x64xf32, #tpu.memory_space<vmem>>, vector<1x1x8x64xf32>,
    %210 = vector.extract_strided_slice %61 {offsets = [0, 224], sizes = [16, 32], strides = [1, 1]} : vector<16x256xf32> to vector<16x32xf32>
    %211 = vector.extract_strided_slice %62 {offsets = [0, 224], sizes = [16, 32], strides = [1, 1]} : vector<16x256xf32> to vector<16x32xf32>
    %cst_81 = arith.constant dense<0.000000e+00> : vector<16x64xf32>
    %212 = tpu.matmul %210, %8, %cst_81 {dimension_numbers = #tpu.dot_dimension_numbers<[1], [0], [0], [1], [0, 0, 1, 1], [], []>} : vector<16x32xf32>, vector<32x64xf32>, vector<16x64xf32> -> vector<16x64xf32>
    %cst_82 = arith.constant dense<0.000000e+00> : vector<16x64xf32>
    %213 = tpu.matmul %211, %9, %cst_82 {dimension_numbers = #tpu.dot_dimension_numbers<[1], [0], [0], [1], [0, 0, 1, 1], [], []>} : vector<16x32xf32>, vector<32x64xf32>, vector<16x64xf32> -> vector<16x64xf32>
    %214 = arith.addf %212, %213 : vector<16x64xf32>
    %215 = vector.broadcast %7 : vector<16x1xf32> to vector<16x64xf32>
    %216 = arith.addf %214, %215 : vector<16x64xf32>
    %217 = arith.mulf %216, %216 : vector<16x64xf32>
    %cst_83 = arith.constant dense<0.000000e+00> : vector<16x64xf32>
    %218 = tpu.matmul %10, %217, %cst_83 {dimension_numbers = #tpu.dot_dimension_numbers<[1], [0], [0], [1], [0, 0, 1, 1], [], []>} : vector<16x16xf32>, vector<16x64xf32>, vector<16x64xf32> -> vector<16x64xf32>
    %219 = vector.broadcast %11 : vector<16x1xf32> to vector<16x64xf32>
    %220 = arith.addf %218, %219 : vector<16x64xf32>
    %221 = math.sqrt %220 : vector<16x64xf32>
    %222 = arith.mulf %216, %221 : vector<16x64xf32>
    %223 = vector.extract_strided_slice %222 {offsets = [0, 0], sizes = [8, 64], strides = [1, 1]} : vector<16x64xf32> to vector<8x64xf32>
    %c0_84 = arith.constant 0 : index
    %c14 = arith.constant 14 : index
    %c0_85 = arith.constant 0 : index
    %c0_86 = arith.constant 0 : index
    %224 = vector.load %arg10[%c0_84, %c14, %c0_85, %c0_86] : memref<1x16x8x64xf32, #tpu.memory_space<vmem>>, vector<1x1x8x64xf32>
    %225 = vector.shape_cast %224 : vector<1x1x8x64xf32> to vector<8x64xf32>
    %226 = vector.shape_cast %223 : vector<8x64xf32> to vector<1x1x8x64xf32>
    tpu.vector_store %arg10[%c0_84, %c14, %c0_85, %c0_86], %226 {strides = array<i32>} : memref<1x16x8x64xf32, #tpu.memory_space<vmem>>, vector<1x1x8x64xf32>,
    %227 = vector.extract_strided_slice %222 {offsets = [8, 0], sizes = [8, 64], strides = [1, 1]} : vector<16x64xf32> to vector<8x64xf32>
    %c0_87 = arith.constant 0 : index
    %c15 = arith.constant 15 : index
    %c0_88 = arith.constant 0 : index
    %c0_89 = arith.constant 0 : index
    %228 = vector.load %arg10[%c0_87, %c15, %c0_88, %c0_89] : memref<1x16x8x64xf32, #tpu.memory_space<vmem>>, vector<1x1x8x64xf32>
    %229 = vector.shape_cast %228 : vector<1x1x8x64xf32> to vector<8x64xf32>
    %230 = vector.shape_cast %227 : vector<8x64xf32> to vector<1x1x8x64xf32>
    tpu.vector_store %arg10[%c0_87, %c15, %c0_88, %c0_89], %230 {strides = array<i32>} : memref<1x16x8x64xf32, #tpu.memory_space<vmem>>, vector<1x1x8x64xf32>,
    return
  }
  func.func @transform_0(%arg0: i32, %arg1: i32) -> (i32, i32, i32, i32) {
    %c0_i32 = arith.constant 0 : i32
    %c0_i32_0 = arith.constant 0 : i32
    %c0_i32_1 = arith.constant 0 : i32
    %c0_i32_2 = arith.constant 0 : i32
    return %arg0, %c0_i32, %c0_i32_0, %c0_i32_1 : i32, i32, i32, i32
  }
  func.func @transform_1(%arg0: i32, %arg1: i32) -> (i32, i32) {
    %c0_i32 = arith.constant 0 : i32
    %c0_i32_0 = arith.constant 0 : i32
    %c0_i32_1 = arith.constant 0 : i32
    return %c0_i32, %c0_i32_0 : i32, i32
  }
  func.func @transform_2(%arg0: i32, %arg1: i32) -> (i32, i32) {
    %c0_i32 = arith.constant 0 : i32
    %c0_i32_0 = arith.constant 0 : i32
    %c0_i32_1 = arith.constant 0 : i32
    return %c0_i32, %c0_i32_0 : i32, i32
  }
  func.func @transform_3(%arg0: i32, %arg1: i32) -> (i32, i32) {
    %c0_i32 = arith.constant 0 : i32
    %c0_i32_0 = arith.constant 0 : i32
    %c0_i32_1 = arith.constant 0 : i32
    return %c0_i32, %c0_i32_0 : i32, i32
  }
  func.func @transform_4(%arg0: i32, %arg1: i32) -> (i32, i32) {
    %c0_i32 = arith.constant 0 : i32
    %c0_i32_0 = arith.constant 0 : i32
    %c0_i32_1 = arith.constant 0 : i32
    return %c0_i32, %c0_i32_0 : i32, i32
  }
  func.func @transform_5(%arg0: i32, %arg1: i32) -> (i32, i32) {
    %c0_i32 = arith.constant 0 : i32
    %c0_i32_0 = arith.constant 0 : i32
    %c0_i32_1 = arith.constant 0 : i32
    return %c0_i32, %c0_i32_0 : i32, i32
  }
  func.func @transform_6(%arg0: i32, %arg1: i32) -> (i32, i32) {
    %c0_i32 = arith.constant 0 : i32
    %c0_i32_0 = arith.constant 0 : i32
    %c0_i32_1 = arith.constant 0 : i32
    return %c0_i32, %c0_i32_0 : i32, i32
  }
  func.func @transform_7(%arg0: i32, %arg1: i32) -> (i32, i32) {
    %c0_i32 = arith.constant 0 : i32
    %c0_i32_0 = arith.constant 0 : i32
    %c0_i32_1 = arith.constant 0 : i32
    return %c0_i32, %c0_i32_0 : i32, i32
  }
  func.func @transform_8(%arg0: i32, %arg1: i32) -> (i32, i32, i32, i32) {
    %c0_i32 = arith.constant 0 : i32
    %c0_i32_0 = arith.constant 0 : i32
    %c0_i32_1 = arith.constant 0 : i32
    return %arg0, %arg1, %c0_i32, %c0_i32_0 : i32, i32, i32, i32
  }
}

module attributes {stable_mosaic.version = 11 : i64} {
  func.func @_poly_deconv_kernel(%arg0: i32, %arg1: i32, %arg2: memref<1x66x8x66xf32, #tpu.memory_space<vmem>>, %arg3: memref<16x72xf32, #tpu.memory_space<vmem>>, %arg4: memref<16x72xf32, #tpu.memory_space<vmem>>, %arg5: memref<16x1xf32, #tpu.memory_space<vmem>>, %arg6: memref<16x1xf32, #tpu.memory_space<vmem>>, %arg7: memref<16x16xf32, #tpu.memory_space<vmem>>, %arg8: memref<64x128xf32, #tpu.memory_space<vmem>>, %arg9: memref<64x128xf32, #tpu.memory_space<vmem>>, %arg10: memref<1x16x8x128xf32, #tpu.memory_space<vmem>>) attributes {dimension_semantics = [#tpu.dimension_semantics<parallel>, #tpu.dimension_semantics<parallel>], iteration_bounds = array<i64: 2, 8>, scalar_prefetch = 0 : i64, scratch_operands = 0 : i64, tpu.core_type = #tpu.core_type<tc>, window_params = [{transform_indices = @transform_0, window_bounds = array<i64: 1, 66, 8, 66>}, {pipeline_mode = #tpu.pipeline_mode<synchronous>, transform_indices = @transform_1, window_bounds = array<i64: 16, 72>}, {pipeline_mode = #tpu.pipeline_mode<synchronous>, transform_indices = @transform_2, window_bounds = array<i64: 16, 72>}, {pipeline_mode = #tpu.pipeline_mode<synchronous>, transform_indices = @transform_3, window_bounds = array<i64: 16, 1>}, {pipeline_mode = #tpu.pipeline_mode<synchronous>, transform_indices = @transform_4, window_bounds = array<i64: 16, 1>}, {pipeline_mode = #tpu.pipeline_mode<synchronous>, transform_indices = @transform_5, window_bounds = array<i64: 16, 16>}, {pipeline_mode = #tpu.pipeline_mode<synchronous>, transform_indices = @transform_6, window_bounds = array<i64: 64, 128>}, {pipeline_mode = #tpu.pipeline_mode<synchronous>, transform_indices = @transform_7, window_bounds = array<i64: 64, 128>}, {transform_indices = @transform_8, window_bounds = array<i64: 1, 16, 8, 128>}]} {
    %c8_i32 = arith.constant 8 : i32
    %0 = arith.muli %arg1, %c8_i32 : i32
    %1 = tpu.assume_multiple %0, 8 : i32
    %c0 = arith.constant 0 : index
    %2 = arith.index_cast %1 : i32 to index
    %c0_0 = arith.constant 0 : index
    %c0_1 = arith.constant 0 : index
    %3 = vector.load %arg2[%c0, %2, %c0_0, %c0_1] : memref<1x66x8x66xf32, #tpu.memory_space<vmem>>, vector<1x10x8x66xf32>
    %4 = vector.shape_cast %3 : vector<1x10x8x66xf32> to vector<10x8x66xf32>
    %c0_2 = arith.constant 0 : index
    %c0_3 = arith.constant 0 : index
    %5 = vector.load %arg3[%c0_2, %c0_3] : memref<16x72xf32, #tpu.memory_space<vmem>>, vector<16x72xf32>
    %c0_4 = arith.constant 0 : index
    %c0_5 = arith.constant 0 : index
    %6 = vector.load %arg4[%c0_4, %c0_5] : memref<16x72xf32, #tpu.memory_space<vmem>>, vector<16x72xf32>
    %c0_6 = arith.constant 0 : index
    %c0_7 = arith.constant 0 : index
    %7 = vector.load %arg5[%c0_6, %c0_7] : memref<16x1xf32, #tpu.memory_space<vmem>>, vector<16x1xf32>
    %c0_8 = arith.constant 0 : index
    %c0_9 = arith.constant 0 : index
    %8 = vector.load %arg8[%c0_8, %c0_9] : memref<64x128xf32, #tpu.memory_space<vmem>>, vector<64x128xf32>
    %c0_10 = arith.constant 0 : index
    %c0_11 = arith.constant 0 : index
    %9 = vector.load %arg9[%c0_10, %c0_11] : memref<64x128xf32, #tpu.memory_space<vmem>>, vector<64x128xf32>
    %10 = vector.extract_strided_slice %4 {offsets = [0, 0, 0], sizes = [3, 8, 66], strides = [1, 1, 1]} : vector<10x8x66xf32> to vector<3x8x66xf32>
    %11 = vector.shape_cast %10 : vector<3x8x66xf32> to vector<24x66xf32>
    %12 = vector.extract_strided_slice %11 {offsets = [0, 0], sizes = [24, 64], strides = [1, 1]} : vector<24x66xf32> to vector<24x64xf32>
    %13 = vector.extract_strided_slice %11 {offsets = [0, 1], sizes = [24, 64], strides = [1, 1]} : vector<24x66xf32> to vector<24x64xf32>
    %14 = vector.extract_strided_slice %11 {offsets = [0, 2], sizes = [24, 64], strides = [1, 1]} : vector<24x66xf32> to vector<24x64xf32>
    %15 = tpu.concatenate %12, %13, %14 in 0 : vector<24x64xf32>, vector<24x64xf32>, vector<24x64xf32> -> vector<72x64xf32>
    %16 = vector.extract_strided_slice %4 {offsets = [1, 0, 0], sizes = [3, 8, 66], strides = [1, 1, 1]} : vector<10x8x66xf32> to vector<3x8x66xf32>
    %17 = vector.shape_cast %16 : vector<3x8x66xf32> to vector<24x66xf32>
    %18 = vector.extract_strided_slice %17 {offsets = [0, 0], sizes = [24, 64], strides = [1, 1]} : vector<24x66xf32> to vector<24x64xf32>
    %19 = vector.extract_strided_slice %17 {offsets = [0, 1], sizes = [24, 64], strides = [1, 1]} : vector<24x66xf32> to vector<24x64xf32>
    %20 = vector.extract_strided_slice %17 {offsets = [0, 2], sizes = [24, 64], strides = [1, 1]} : vector<24x66xf32> to vector<24x64xf32>
    %21 = tpu.concatenate %18, %19, %20 in 0 : vector<24x64xf32>, vector<24x64xf32>, vector<24x64xf32> -> vector<72x64xf32>
    %22 = vector.extract_strided_slice %4 {offsets = [2, 0, 0], sizes = [3, 8, 66], strides = [1, 1, 1]} : vector<10x8x66xf32> to vector<3x8x66xf32>
    %23 = vector.shape_cast %22 : vector<3x8x66xf32> to vector<24x66xf32>
    %24 = vector.extract_strided_slice %23 {offsets = [0, 0], sizes = [24, 64], strides = [1, 1]} : vector<24x66xf32> to vector<24x64xf32>
    %25 = vector.extract_strided_slice %23 {offsets = [0, 1], sizes = [24, 64], strides = [1, 1]} : vector<24x66xf32> to vector<24x64xf32>
    %26 = vector.extract_strided_slice %23 {offsets = [0, 2], sizes = [24, 64], strides = [1, 1]} : vector<24x66xf32> to vector<24x64xf32>
    %27 = tpu.concatenate %24, %25, %26 in 0 : vector<24x64xf32>, vector<24x64xf32>, vector<24x64xf32> -> vector<72x64xf32>
    %28 = vector.extract_strided_slice %4 {offsets = [3, 0, 0], sizes = [3, 8, 66], strides = [1, 1, 1]} : vector<10x8x66xf32> to vector<3x8x66xf32>
    %29 = vector.shape_cast %28 : vector<3x8x66xf32> to vector<24x66xf32>
    %30 = vector.extract_strided_slice %29 {offsets = [0, 0], sizes = [24, 64], strides = [1, 1]} : vector<24x66xf32> to vector<24x64xf32>
    %31 = vector.extract_strided_slice %29 {offsets = [0, 1], sizes = [24, 64], strides = [1, 1]} : vector<24x66xf32> to vector<24x64xf32>
    %32 = vector.extract_strided_slice %29 {offsets = [0, 2], sizes = [24, 64], strides = [1, 1]} : vector<24x66xf32> to vector<24x64xf32>
    %33 = tpu.concatenate %30, %31, %32 in 0 : vector<24x64xf32>, vector<24x64xf32>, vector<24x64xf32> -> vector<72x64xf32>
    %34 = vector.extract_strided_slice %4 {offsets = [4, 0, 0], sizes = [3, 8, 66], strides = [1, 1, 1]} : vector<10x8x66xf32> to vector<3x8x66xf32>
    %35 = vector.shape_cast %34 : vector<3x8x66xf32> to vector<24x66xf32>
    %36 = vector.extract_strided_slice %35 {offsets = [0, 0], sizes = [24, 64], strides = [1, 1]} : vector<24x66xf32> to vector<24x64xf32>
    %37 = vector.extract_strided_slice %35 {offsets = [0, 1], sizes = [24, 64], strides = [1, 1]} : vector<24x66xf32> to vector<24x64xf32>
    %38 = vector.extract_strided_slice %35 {offsets = [0, 2], sizes = [24, 64], strides = [1, 1]} : vector<24x66xf32> to vector<24x64xf32>
    %39 = tpu.concatenate %36, %37, %38 in 0 : vector<24x64xf32>, vector<24x64xf32>, vector<24x64xf32> -> vector<72x64xf32>
    %40 = vector.extract_strided_slice %4 {offsets = [5, 0, 0], sizes = [3, 8, 66], strides = [1, 1, 1]} : vector<10x8x66xf32> to vector<3x8x66xf32>
    %41 = vector.shape_cast %40 : vector<3x8x66xf32> to vector<24x66xf32>
    %42 = vector.extract_strided_slice %41 {offsets = [0, 0], sizes = [24, 64], strides = [1, 1]} : vector<24x66xf32> to vector<24x64xf32>
    %43 = vector.extract_strided_slice %41 {offsets = [0, 1], sizes = [24, 64], strides = [1, 1]} : vector<24x66xf32> to vector<24x64xf32>
    %44 = vector.extract_strided_slice %41 {offsets = [0, 2], sizes = [24, 64], strides = [1, 1]} : vector<24x66xf32> to vector<24x64xf32>
    %45 = tpu.concatenate %42, %43, %44 in 0 : vector<24x64xf32>, vector<24x64xf32>, vector<24x64xf32> -> vector<72x64xf32>
    %46 = vector.extract_strided_slice %4 {offsets = [6, 0, 0], sizes = [3, 8, 66], strides = [1, 1, 1]} : vector<10x8x66xf32> to vector<3x8x66xf32>
    %47 = vector.shape_cast %46 : vector<3x8x66xf32> to vector<24x66xf32>
    %48 = vector.extract_strided_slice %47 {offsets = [0, 0], sizes = [24, 64], strides = [1, 1]} : vector<24x66xf32> to vector<24x64xf32>
    %49 = vector.extract_strided_slice %47 {offsets = [0, 1], sizes = [24, 64], strides = [1, 1]} : vector<24x66xf32> to vector<24x64xf32>
    %50 = vector.extract_strided_slice %47 {offsets = [0, 2], sizes = [24, 64], strides = [1, 1]} : vector<24x66xf32> to vector<24x64xf32>
    %51 = tpu.concatenate %48, %49, %50 in 0 : vector<24x64xf32>, vector<24x64xf32>, vector<24x64xf32> -> vector<72x64xf32>
    %52 = vector.extract_strided_slice %4 {offsets = [7, 0, 0], sizes = [3, 8, 66], strides = [1, 1, 1]} : vector<10x8x66xf32> to vector<3x8x66xf32>
    %53 = vector.shape_cast %52 : vector<3x8x66xf32> to vector<24x66xf32>
    %54 = vector.extract_strided_slice %53 {offsets = [0, 0], sizes = [24, 64], strides = [1, 1]} : vector<24x66xf32> to vector<24x64xf32>
    %55 = vector.extract_strided_slice %53 {offsets = [0, 1], sizes = [24, 64], strides = [1, 1]} : vector<24x66xf32> to vector<24x64xf32>
    %56 = vector.extract_strided_slice %53 {offsets = [0, 2], sizes = [24, 64], strides = [1, 1]} : vector<24x66xf32> to vector<24x64xf32>
    %57 = tpu.concatenate %54, %55, %56 in 0 : vector<24x64xf32>, vector<24x64xf32>, vector<24x64xf32> -> vector<72x64xf32>
    %58 = tpu.concatenate %15, %21, %27, %33, %39, %45, %51, %57 in 1 : vector<72x64xf32>, vector<72x64xf32>, vector<72x64xf32>, vector<72x64xf32>, vector<72x64xf32>, vector<72x64xf32>, vector<72x64xf32>, vector<72x64xf32> -> vector<72x512xf32>
    %cst = arith.constant dense<0.000000e+00> : vector<16x512xf32>
    %59 = tpu.matmul %5, %58, %cst {dimension_numbers = #tpu.dot_dimension_numbers<[1], [0], [0], [1], [0, 0, 1, 1], [], []>} : vector<16x72xf32>, vector<72x512xf32>, vector<16x512xf32> -> vector<16x512xf32>
    %cst_12 = arith.constant dense<0.000000e+00> : vector<16x512xf32>
    %60 = tpu.matmul %6, %58, %cst_12 {dimension_numbers = #tpu.dot_dimension_numbers<[1], [0], [0], [1], [0, 0, 1, 1], [], []>} : vector<16x72xf32>, vector<72x512xf32>, vector<16x512xf32> -> vector<16x512xf32>
    %61 = vector.extract_strided_slice %59 {offsets = [0, 0], sizes = [16, 64], strides = [1, 1]} : vector<16x512xf32> to vector<16x64xf32>
    %62 = vector.extract_strided_slice %60 {offsets = [0, 0], sizes = [16, 64], strides = [1, 1]} : vector<16x512xf32> to vector<16x64xf32>
    %cst_13 = arith.constant dense<0.000000e+00> : vector<16x128xf32>
    %63 = tpu.matmul %61, %8, %cst_13 {dimension_numbers = #tpu.dot_dimension_numbers<[1], [0], [0], [1], [0, 0, 1, 1], [], []>} : vector<16x64xf32>, vector<64x128xf32>, vector<16x128xf32> -> vector<16x128xf32>
    %cst_14 = arith.constant dense<0.000000e+00> : vector<16x128xf32>
    %64 = tpu.matmul %62, %9, %cst_14 {dimension_numbers = #tpu.dot_dimension_numbers<[1], [0], [0], [1], [0, 0, 1, 1], [], []>} : vector<16x64xf32>, vector<64x128xf32>, vector<16x128xf32> -> vector<16x128xf32>
    %65 = arith.addf %63, %64 : vector<16x128xf32>
    %66 = vector.broadcast %7 : vector<16x1xf32> to vector<16x128xf32>
    %67 = arith.addf %65, %66 : vector<16x128xf32>
    %68 = arith.negf %67 : vector<16x128xf32>
    %69 = math.exp %68 : vector<16x128xf32>
    %cst_15 = arith.constant 1.000000e+00 : f32
    %70 = vector.broadcast %cst_15 : f32 to vector<16x128xf32>
    %71 = arith.addf %70, %69 : vector<16x128xf32>
    %72 = arith.divf %70, %71 : vector<16x128xf32>
    %73 = vector.extract_strided_slice %72 {offsets = [0, 0], sizes = [8, 128], strides = [1, 1]} : vector<16x128xf32> to vector<8x128xf32>
    %c0_16 = arith.constant 0 : index
    %c0_17 = arith.constant 0 : index
    %c0_18 = arith.constant 0 : index
    %c0_19 = arith.constant 0 : index
    %74 = vector.load %arg10[%c0_16, %c0_17, %c0_18, %c0_19] : memref<1x16x8x128xf32, #tpu.memory_space<vmem>>, vector<1x1x8x128xf32>
    %75 = vector.shape_cast %74 : vector<1x1x8x128xf32> to vector<8x128xf32>
    %76 = vector.shape_cast %73 : vector<8x128xf32> to vector<1x1x8x128xf32>
    tpu.vector_store %arg10[%c0_16, %c0_17, %c0_18, %c0_19], %76 {strides = array<i32>} : memref<1x16x8x128xf32, #tpu.memory_space<vmem>>, vector<1x1x8x128xf32>,
    %77 = vector.extract_strided_slice %72 {offsets = [8, 0], sizes = [8, 128], strides = [1, 1]} : vector<16x128xf32> to vector<8x128xf32>
    %c0_20 = arith.constant 0 : index
    %c1 = arith.constant 1 : index
    %c0_21 = arith.constant 0 : index
    %c0_22 = arith.constant 0 : index
    %78 = vector.load %arg10[%c0_20, %c1, %c0_21, %c0_22] : memref<1x16x8x128xf32, #tpu.memory_space<vmem>>, vector<1x1x8x128xf32>
    %79 = vector.shape_cast %78 : vector<1x1x8x128xf32> to vector<8x128xf32>
    %80 = vector.shape_cast %77 : vector<8x128xf32> to vector<1x1x8x128xf32>
    tpu.vector_store %arg10[%c0_20, %c1, %c0_21, %c0_22], %80 {strides = array<i32>} : memref<1x16x8x128xf32, #tpu.memory_space<vmem>>, vector<1x1x8x128xf32>,
    %81 = vector.extract_strided_slice %59 {offsets = [0, 64], sizes = [16, 64], strides = [1, 1]} : vector<16x512xf32> to vector<16x64xf32>
    %82 = vector.extract_strided_slice %60 {offsets = [0, 64], sizes = [16, 64], strides = [1, 1]} : vector<16x512xf32> to vector<16x64xf32>
    %cst_23 = arith.constant dense<0.000000e+00> : vector<16x128xf32>
    %83 = tpu.matmul %81, %8, %cst_23 {dimension_numbers = #tpu.dot_dimension_numbers<[1], [0], [0], [1], [0, 0, 1, 1], [], []>} : vector<16x64xf32>, vector<64x128xf32>, vector<16x128xf32> -> vector<16x128xf32>
    %cst_24 = arith.constant dense<0.000000e+00> : vector<16x128xf32>
    %84 = tpu.matmul %82, %9, %cst_24 {dimension_numbers = #tpu.dot_dimension_numbers<[1], [0], [0], [1], [0, 0, 1, 1], [], []>} : vector<16x64xf32>, vector<64x128xf32>, vector<16x128xf32> -> vector<16x128xf32>
    %85 = arith.addf %83, %84 : vector<16x128xf32>
    %86 = vector.broadcast %7 : vector<16x1xf32> to vector<16x128xf32>
    %87 = arith.addf %85, %86 : vector<16x128xf32>
    %88 = arith.negf %87 : vector<16x128xf32>
    %89 = math.exp %88 : vector<16x128xf32>
    %cst_25 = arith.constant 1.000000e+00 : f32
    %90 = vector.broadcast %cst_25 : f32 to vector<16x128xf32>
    %91 = arith.addf %90, %89 : vector<16x128xf32>
    %92 = arith.divf %90, %91 : vector<16x128xf32>
    %93 = vector.extract_strided_slice %92 {offsets = [0, 0], sizes = [8, 128], strides = [1, 1]} : vector<16x128xf32> to vector<8x128xf32>
    %c0_26 = arith.constant 0 : index
    %c2 = arith.constant 2 : index
    %c0_27 = arith.constant 0 : index
    %c0_28 = arith.constant 0 : index
    %94 = vector.load %arg10[%c0_26, %c2, %c0_27, %c0_28] : memref<1x16x8x128xf32, #tpu.memory_space<vmem>>, vector<1x1x8x128xf32>
    %95 = vector.shape_cast %94 : vector<1x1x8x128xf32> to vector<8x128xf32>
    %96 = vector.shape_cast %93 : vector<8x128xf32> to vector<1x1x8x128xf32>
    tpu.vector_store %arg10[%c0_26, %c2, %c0_27, %c0_28], %96 {strides = array<i32>} : memref<1x16x8x128xf32, #tpu.memory_space<vmem>>, vector<1x1x8x128xf32>,
    %97 = vector.extract_strided_slice %92 {offsets = [8, 0], sizes = [8, 128], strides = [1, 1]} : vector<16x128xf32> to vector<8x128xf32>
    %c0_29 = arith.constant 0 : index
    %c3 = arith.constant 3 : index
    %c0_30 = arith.constant 0 : index
    %c0_31 = arith.constant 0 : index
    %98 = vector.load %arg10[%c0_29, %c3, %c0_30, %c0_31] : memref<1x16x8x128xf32, #tpu.memory_space<vmem>>, vector<1x1x8x128xf32>
    %99 = vector.shape_cast %98 : vector<1x1x8x128xf32> to vector<8x128xf32>
    %100 = vector.shape_cast %97 : vector<8x128xf32> to vector<1x1x8x128xf32>
    tpu.vector_store %arg10[%c0_29, %c3, %c0_30, %c0_31], %100 {strides = array<i32>} : memref<1x16x8x128xf32, #tpu.memory_space<vmem>>, vector<1x1x8x128xf32>,
    %101 = vector.extract_strided_slice %59 {offsets = [0, 128], sizes = [16, 64], strides = [1, 1]} : vector<16x512xf32> to vector<16x64xf32>
    %102 = vector.extract_strided_slice %60 {offsets = [0, 128], sizes = [16, 64], strides = [1, 1]} : vector<16x512xf32> to vector<16x64xf32>
    %cst_32 = arith.constant dense<0.000000e+00> : vector<16x128xf32>
    %103 = tpu.matmul %101, %8, %cst_32 {dimension_numbers = #tpu.dot_dimension_numbers<[1], [0], [0], [1], [0, 0, 1, 1], [], []>} : vector<16x64xf32>, vector<64x128xf32>, vector<16x128xf32> -> vector<16x128xf32>
    %cst_33 = arith.constant dense<0.000000e+00> : vector<16x128xf32>
    %104 = tpu.matmul %102, %9, %cst_33 {dimension_numbers = #tpu.dot_dimension_numbers<[1], [0], [0], [1], [0, 0, 1, 1], [], []>} : vector<16x64xf32>, vector<64x128xf32>, vector<16x128xf32> -> vector<16x128xf32>
    %105 = arith.addf %103, %104 : vector<16x128xf32>
    %106 = vector.broadcast %7 : vector<16x1xf32> to vector<16x128xf32>
    %107 = arith.addf %105, %106 : vector<16x128xf32>
    %108 = arith.negf %107 : vector<16x128xf32>
    %109 = math.exp %108 : vector<16x128xf32>
    %cst_34 = arith.constant 1.000000e+00 : f32
    %110 = vector.broadcast %cst_34 : f32 to vector<16x128xf32>
    %111 = arith.addf %110, %109 : vector<16x128xf32>
    %112 = arith.divf %110, %111 : vector<16x128xf32>
    %113 = vector.extract_strided_slice %112 {offsets = [0, 0], sizes = [8, 128], strides = [1, 1]} : vector<16x128xf32> to vector<8x128xf32>
    %c0_35 = arith.constant 0 : index
    %c4 = arith.constant 4 : index
    %c0_36 = arith.constant 0 : index
    %c0_37 = arith.constant 0 : index
    %114 = vector.load %arg10[%c0_35, %c4, %c0_36, %c0_37] : memref<1x16x8x128xf32, #tpu.memory_space<vmem>>, vector<1x1x8x128xf32>
    %115 = vector.shape_cast %114 : vector<1x1x8x128xf32> to vector<8x128xf32>
    %116 = vector.shape_cast %113 : vector<8x128xf32> to vector<1x1x8x128xf32>
    tpu.vector_store %arg10[%c0_35, %c4, %c0_36, %c0_37], %116 {strides = array<i32>} : memref<1x16x8x128xf32, #tpu.memory_space<vmem>>, vector<1x1x8x128xf32>,
    %117 = vector.extract_strided_slice %112 {offsets = [8, 0], sizes = [8, 128], strides = [1, 1]} : vector<16x128xf32> to vector<8x128xf32>
    %c0_38 = arith.constant 0 : index
    %c5 = arith.constant 5 : index
    %c0_39 = arith.constant 0 : index
    %c0_40 = arith.constant 0 : index
    %118 = vector.load %arg10[%c0_38, %c5, %c0_39, %c0_40] : memref<1x16x8x128xf32, #tpu.memory_space<vmem>>, vector<1x1x8x128xf32>
    %119 = vector.shape_cast %118 : vector<1x1x8x128xf32> to vector<8x128xf32>
    %120 = vector.shape_cast %117 : vector<8x128xf32> to vector<1x1x8x128xf32>
    tpu.vector_store %arg10[%c0_38, %c5, %c0_39, %c0_40], %120 {strides = array<i32>} : memref<1x16x8x128xf32, #tpu.memory_space<vmem>>, vector<1x1x8x128xf32>,
    %121 = vector.extract_strided_slice %59 {offsets = [0, 192], sizes = [16, 64], strides = [1, 1]} : vector<16x512xf32> to vector<16x64xf32>
    %122 = vector.extract_strided_slice %60 {offsets = [0, 192], sizes = [16, 64], strides = [1, 1]} : vector<16x512xf32> to vector<16x64xf32>
    %cst_41 = arith.constant dense<0.000000e+00> : vector<16x128xf32>
    %123 = tpu.matmul %121, %8, %cst_41 {dimension_numbers = #tpu.dot_dimension_numbers<[1], [0], [0], [1], [0, 0, 1, 1], [], []>} : vector<16x64xf32>, vector<64x128xf32>, vector<16x128xf32> -> vector<16x128xf32>
    %cst_42 = arith.constant dense<0.000000e+00> : vector<16x128xf32>
    %124 = tpu.matmul %122, %9, %cst_42 {dimension_numbers = #tpu.dot_dimension_numbers<[1], [0], [0], [1], [0, 0, 1, 1], [], []>} : vector<16x64xf32>, vector<64x128xf32>, vector<16x128xf32> -> vector<16x128xf32>
    %125 = arith.addf %123, %124 : vector<16x128xf32>
    %126 = vector.broadcast %7 : vector<16x1xf32> to vector<16x128xf32>
    %127 = arith.addf %125, %126 : vector<16x128xf32>
    %128 = arith.negf %127 : vector<16x128xf32>
    %129 = math.exp %128 : vector<16x128xf32>
    %cst_43 = arith.constant 1.000000e+00 : f32
    %130 = vector.broadcast %cst_43 : f32 to vector<16x128xf32>
    %131 = arith.addf %130, %129 : vector<16x128xf32>
    %132 = arith.divf %130, %131 : vector<16x128xf32>
    %133 = vector.extract_strided_slice %132 {offsets = [0, 0], sizes = [8, 128], strides = [1, 1]} : vector<16x128xf32> to vector<8x128xf32>
    %c0_44 = arith.constant 0 : index
    %c6 = arith.constant 6 : index
    %c0_45 = arith.constant 0 : index
    %c0_46 = arith.constant 0 : index
    %134 = vector.load %arg10[%c0_44, %c6, %c0_45, %c0_46] : memref<1x16x8x128xf32, #tpu.memory_space<vmem>>, vector<1x1x8x128xf32>
    %135 = vector.shape_cast %134 : vector<1x1x8x128xf32> to vector<8x128xf32>
    %136 = vector.shape_cast %133 : vector<8x128xf32> to vector<1x1x8x128xf32>
    tpu.vector_store %arg10[%c0_44, %c6, %c0_45, %c0_46], %136 {strides = array<i32>} : memref<1x16x8x128xf32, #tpu.memory_space<vmem>>, vector<1x1x8x128xf32>,
    %137 = vector.extract_strided_slice %132 {offsets = [8, 0], sizes = [8, 128], strides = [1, 1]} : vector<16x128xf32> to vector<8x128xf32>
    %c0_47 = arith.constant 0 : index
    %c7 = arith.constant 7 : index
    %c0_48 = arith.constant 0 : index
    %c0_49 = arith.constant 0 : index
    %138 = vector.load %arg10[%c0_47, %c7, %c0_48, %c0_49] : memref<1x16x8x128xf32, #tpu.memory_space<vmem>>, vector<1x1x8x128xf32>
    %139 = vector.shape_cast %138 : vector<1x1x8x128xf32> to vector<8x128xf32>
    %140 = vector.shape_cast %137 : vector<8x128xf32> to vector<1x1x8x128xf32>
    tpu.vector_store %arg10[%c0_47, %c7, %c0_48, %c0_49], %140 {strides = array<i32>} : memref<1x16x8x128xf32, #tpu.memory_space<vmem>>, vector<1x1x8x128xf32>,
    %141 = vector.extract_strided_slice %59 {offsets = [0, 256], sizes = [16, 64], strides = [1, 1]} : vector<16x512xf32> to vector<16x64xf32>
    %142 = vector.extract_strided_slice %60 {offsets = [0, 256], sizes = [16, 64], strides = [1, 1]} : vector<16x512xf32> to vector<16x64xf32>
    %cst_50 = arith.constant dense<0.000000e+00> : vector<16x128xf32>
    %143 = tpu.matmul %141, %8, %cst_50 {dimension_numbers = #tpu.dot_dimension_numbers<[1], [0], [0], [1], [0, 0, 1, 1], [], []>} : vector<16x64xf32>, vector<64x128xf32>, vector<16x128xf32> -> vector<16x128xf32>
    %cst_51 = arith.constant dense<0.000000e+00> : vector<16x128xf32>
    %144 = tpu.matmul %142, %9, %cst_51 {dimension_numbers = #tpu.dot_dimension_numbers<[1], [0], [0], [1], [0, 0, 1, 1], [], []>} : vector<16x64xf32>, vector<64x128xf32>, vector<16x128xf32> -> vector<16x128xf32>
    %145 = arith.addf %143, %144 : vector<16x128xf32>
    %146 = vector.broadcast %7 : vector<16x1xf32> to vector<16x128xf32>
    %147 = arith.addf %145, %146 : vector<16x128xf32>
    %148 = arith.negf %147 : vector<16x128xf32>
    %149 = math.exp %148 : vector<16x128xf32>
    %cst_52 = arith.constant 1.000000e+00 : f32
    %150 = vector.broadcast %cst_52 : f32 to vector<16x128xf32>
    %151 = arith.addf %150, %149 : vector<16x128xf32>
    %152 = arith.divf %150, %151 : vector<16x128xf32>
    %153 = vector.extract_strided_slice %152 {offsets = [0, 0], sizes = [8, 128], strides = [1, 1]} : vector<16x128xf32> to vector<8x128xf32>
    %c0_53 = arith.constant 0 : index
    %c8 = arith.constant 8 : index
    %c0_54 = arith.constant 0 : index
    %c0_55 = arith.constant 0 : index
    %154 = vector.load %arg10[%c0_53, %c8, %c0_54, %c0_55] : memref<1x16x8x128xf32, #tpu.memory_space<vmem>>, vector<1x1x8x128xf32>
    %155 = vector.shape_cast %154 : vector<1x1x8x128xf32> to vector<8x128xf32>
    %156 = vector.shape_cast %153 : vector<8x128xf32> to vector<1x1x8x128xf32>
    tpu.vector_store %arg10[%c0_53, %c8, %c0_54, %c0_55], %156 {strides = array<i32>} : memref<1x16x8x128xf32, #tpu.memory_space<vmem>>, vector<1x1x8x128xf32>,
    %157 = vector.extract_strided_slice %152 {offsets = [8, 0], sizes = [8, 128], strides = [1, 1]} : vector<16x128xf32> to vector<8x128xf32>
    %c0_56 = arith.constant 0 : index
    %c9 = arith.constant 9 : index
    %c0_57 = arith.constant 0 : index
    %c0_58 = arith.constant 0 : index
    %158 = vector.load %arg10[%c0_56, %c9, %c0_57, %c0_58] : memref<1x16x8x128xf32, #tpu.memory_space<vmem>>, vector<1x1x8x128xf32>
    %159 = vector.shape_cast %158 : vector<1x1x8x128xf32> to vector<8x128xf32>
    %160 = vector.shape_cast %157 : vector<8x128xf32> to vector<1x1x8x128xf32>
    tpu.vector_store %arg10[%c0_56, %c9, %c0_57, %c0_58], %160 {strides = array<i32>} : memref<1x16x8x128xf32, #tpu.memory_space<vmem>>, vector<1x1x8x128xf32>,
    %161 = vector.extract_strided_slice %59 {offsets = [0, 320], sizes = [16, 64], strides = [1, 1]} : vector<16x512xf32> to vector<16x64xf32>
    %162 = vector.extract_strided_slice %60 {offsets = [0, 320], sizes = [16, 64], strides = [1, 1]} : vector<16x512xf32> to vector<16x64xf32>
    %cst_59 = arith.constant dense<0.000000e+00> : vector<16x128xf32>
    %163 = tpu.matmul %161, %8, %cst_59 {dimension_numbers = #tpu.dot_dimension_numbers<[1], [0], [0], [1], [0, 0, 1, 1], [], []>} : vector<16x64xf32>, vector<64x128xf32>, vector<16x128xf32> -> vector<16x128xf32>
    %cst_60 = arith.constant dense<0.000000e+00> : vector<16x128xf32>
    %164 = tpu.matmul %162, %9, %cst_60 {dimension_numbers = #tpu.dot_dimension_numbers<[1], [0], [0], [1], [0, 0, 1, 1], [], []>} : vector<16x64xf32>, vector<64x128xf32>, vector<16x128xf32> -> vector<16x128xf32>
    %165 = arith.addf %163, %164 : vector<16x128xf32>
    %166 = vector.broadcast %7 : vector<16x1xf32> to vector<16x128xf32>
    %167 = arith.addf %165, %166 : vector<16x128xf32>
    %168 = arith.negf %167 : vector<16x128xf32>
    %169 = math.exp %168 : vector<16x128xf32>
    %cst_61 = arith.constant 1.000000e+00 : f32
    %170 = vector.broadcast %cst_61 : f32 to vector<16x128xf32>
    %171 = arith.addf %170, %169 : vector<16x128xf32>
    %172 = arith.divf %170, %171 : vector<16x128xf32>
    %173 = vector.extract_strided_slice %172 {offsets = [0, 0], sizes = [8, 128], strides = [1, 1]} : vector<16x128xf32> to vector<8x128xf32>
    %c0_62 = arith.constant 0 : index
    %c10 = arith.constant 10 : index
    %c0_63 = arith.constant 0 : index
    %c0_64 = arith.constant 0 : index
    %174 = vector.load %arg10[%c0_62, %c10, %c0_63, %c0_64] : memref<1x16x8x128xf32, #tpu.memory_space<vmem>>, vector<1x1x8x128xf32>
    %175 = vector.shape_cast %174 : vector<1x1x8x128xf32> to vector<8x128xf32>
    %176 = vector.shape_cast %173 : vector<8x128xf32> to vector<1x1x8x128xf32>
    tpu.vector_store %arg10[%c0_62, %c10, %c0_63, %c0_64], %176 {strides = array<i32>} : memref<1x16x8x128xf32, #tpu.memory_space<vmem>>, vector<1x1x8x128xf32>,
    %177 = vector.extract_strided_slice %172 {offsets = [8, 0], sizes = [8, 128], strides = [1, 1]} : vector<16x128xf32> to vector<8x128xf32>
    %c0_65 = arith.constant 0 : index
    %c11 = arith.constant 11 : index
    %c0_66 = arith.constant 0 : index
    %c0_67 = arith.constant 0 : index
    %178 = vector.load %arg10[%c0_65, %c11, %c0_66, %c0_67] : memref<1x16x8x128xf32, #tpu.memory_space<vmem>>, vector<1x1x8x128xf32>
    %179 = vector.shape_cast %178 : vector<1x1x8x128xf32> to vector<8x128xf32>
    %180 = vector.shape_cast %177 : vector<8x128xf32> to vector<1x1x8x128xf32>
    tpu.vector_store %arg10[%c0_65, %c11, %c0_66, %c0_67], %180 {strides = array<i32>} : memref<1x16x8x128xf32, #tpu.memory_space<vmem>>, vector<1x1x8x128xf32>,
    %181 = vector.extract_strided_slice %59 {offsets = [0, 384], sizes = [16, 64], strides = [1, 1]} : vector<16x512xf32> to vector<16x64xf32>
    %182 = vector.extract_strided_slice %60 {offsets = [0, 384], sizes = [16, 64], strides = [1, 1]} : vector<16x512xf32> to vector<16x64xf32>
    %cst_68 = arith.constant dense<0.000000e+00> : vector<16x128xf32>
    %183 = tpu.matmul %181, %8, %cst_68 {dimension_numbers = #tpu.dot_dimension_numbers<[1], [0], [0], [1], [0, 0, 1, 1], [], []>} : vector<16x64xf32>, vector<64x128xf32>, vector<16x128xf32> -> vector<16x128xf32>
    %cst_69 = arith.constant dense<0.000000e+00> : vector<16x128xf32>
    %184 = tpu.matmul %182, %9, %cst_69 {dimension_numbers = #tpu.dot_dimension_numbers<[1], [0], [0], [1], [0, 0, 1, 1], [], []>} : vector<16x64xf32>, vector<64x128xf32>, vector<16x128xf32> -> vector<16x128xf32>
    %185 = arith.addf %183, %184 : vector<16x128xf32>
    %186 = vector.broadcast %7 : vector<16x1xf32> to vector<16x128xf32>
    %187 = arith.addf %185, %186 : vector<16x128xf32>
    %188 = arith.negf %187 : vector<16x128xf32>
    %189 = math.exp %188 : vector<16x128xf32>
    %cst_70 = arith.constant 1.000000e+00 : f32
    %190 = vector.broadcast %cst_70 : f32 to vector<16x128xf32>
    %191 = arith.addf %190, %189 : vector<16x128xf32>
    %192 = arith.divf %190, %191 : vector<16x128xf32>
    %193 = vector.extract_strided_slice %192 {offsets = [0, 0], sizes = [8, 128], strides = [1, 1]} : vector<16x128xf32> to vector<8x128xf32>
    %c0_71 = arith.constant 0 : index
    %c12 = arith.constant 12 : index
    %c0_72 = arith.constant 0 : index
    %c0_73 = arith.constant 0 : index
    %194 = vector.load %arg10[%c0_71, %c12, %c0_72, %c0_73] : memref<1x16x8x128xf32, #tpu.memory_space<vmem>>, vector<1x1x8x128xf32>
    %195 = vector.shape_cast %194 : vector<1x1x8x128xf32> to vector<8x128xf32>
    %196 = vector.shape_cast %193 : vector<8x128xf32> to vector<1x1x8x128xf32>
    tpu.vector_store %arg10[%c0_71, %c12, %c0_72, %c0_73], %196 {strides = array<i32>} : memref<1x16x8x128xf32, #tpu.memory_space<vmem>>, vector<1x1x8x128xf32>,
    %197 = vector.extract_strided_slice %192 {offsets = [8, 0], sizes = [8, 128], strides = [1, 1]} : vector<16x128xf32> to vector<8x128xf32>
    %c0_74 = arith.constant 0 : index
    %c13 = arith.constant 13 : index
    %c0_75 = arith.constant 0 : index
    %c0_76 = arith.constant 0 : index
    %198 = vector.load %arg10[%c0_74, %c13, %c0_75, %c0_76] : memref<1x16x8x128xf32, #tpu.memory_space<vmem>>, vector<1x1x8x128xf32>
    %199 = vector.shape_cast %198 : vector<1x1x8x128xf32> to vector<8x128xf32>
    %200 = vector.shape_cast %197 : vector<8x128xf32> to vector<1x1x8x128xf32>
    tpu.vector_store %arg10[%c0_74, %c13, %c0_75, %c0_76], %200 {strides = array<i32>} : memref<1x16x8x128xf32, #tpu.memory_space<vmem>>, vector<1x1x8x128xf32>,
    %201 = vector.extract_strided_slice %59 {offsets = [0, 448], sizes = [16, 64], strides = [1, 1]} : vector<16x512xf32> to vector<16x64xf32>
    %202 = vector.extract_strided_slice %60 {offsets = [0, 448], sizes = [16, 64], strides = [1, 1]} : vector<16x512xf32> to vector<16x64xf32>
    %cst_77 = arith.constant dense<0.000000e+00> : vector<16x128xf32>
    %203 = tpu.matmul %201, %8, %cst_77 {dimension_numbers = #tpu.dot_dimension_numbers<[1], [0], [0], [1], [0, 0, 1, 1], [], []>} : vector<16x64xf32>, vector<64x128xf32>, vector<16x128xf32> -> vector<16x128xf32>
    %cst_78 = arith.constant dense<0.000000e+00> : vector<16x128xf32>
    %204 = tpu.matmul %202, %9, %cst_78 {dimension_numbers = #tpu.dot_dimension_numbers<[1], [0], [0], [1], [0, 0, 1, 1], [], []>} : vector<16x64xf32>, vector<64x128xf32>, vector<16x128xf32> -> vector<16x128xf32>
    %205 = arith.addf %203, %204 : vector<16x128xf32>
    %206 = vector.broadcast %7 : vector<16x1xf32> to vector<16x128xf32>
    %207 = arith.addf %205, %206 : vector<16x128xf32>
    %208 = arith.negf %207 : vector<16x128xf32>
    %209 = math.exp %208 : vector<16x128xf32>
    %cst_79 = arith.constant 1.000000e+00 : f32
    %210 = vector.broadcast %cst_79 : f32 to vector<16x128xf32>
    %211 = arith.addf %210, %209 : vector<16x128xf32>
    %212 = arith.divf %210, %211 : vector<16x128xf32>
    %213 = vector.extract_strided_slice %212 {offsets = [0, 0], sizes = [8, 128], strides = [1, 1]} : vector<16x128xf32> to vector<8x128xf32>
    %c0_80 = arith.constant 0 : index
    %c14 = arith.constant 14 : index
    %c0_81 = arith.constant 0 : index
    %c0_82 = arith.constant 0 : index
    %214 = vector.load %arg10[%c0_80, %c14, %c0_81, %c0_82] : memref<1x16x8x128xf32, #tpu.memory_space<vmem>>, vector<1x1x8x128xf32>
    %215 = vector.shape_cast %214 : vector<1x1x8x128xf32> to vector<8x128xf32>
    %216 = vector.shape_cast %213 : vector<8x128xf32> to vector<1x1x8x128xf32>
    tpu.vector_store %arg10[%c0_80, %c14, %c0_81, %c0_82], %216 {strides = array<i32>} : memref<1x16x8x128xf32, #tpu.memory_space<vmem>>, vector<1x1x8x128xf32>,
    %217 = vector.extract_strided_slice %212 {offsets = [8, 0], sizes = [8, 128], strides = [1, 1]} : vector<16x128xf32> to vector<8x128xf32>
    %c0_83 = arith.constant 0 : index
    %c15 = arith.constant 15 : index
    %c0_84 = arith.constant 0 : index
    %c0_85 = arith.constant 0 : index
    %218 = vector.load %arg10[%c0_83, %c15, %c0_84, %c0_85] : memref<1x16x8x128xf32, #tpu.memory_space<vmem>>, vector<1x1x8x128xf32>
    %219 = vector.shape_cast %218 : vector<1x1x8x128xf32> to vector<8x128xf32>
    %220 = vector.shape_cast %217 : vector<8x128xf32> to vector<1x1x8x128xf32>
    tpu.vector_store %arg10[%c0_83, %c15, %c0_84, %c0_85], %220 {strides = array<i32>} : memref<1x16x8x128xf32, #tpu.memory_space<vmem>>, vector<1x1x8x128xf32>,
    return
  }
  func.func @transform_0(%arg0: i32, %arg1: i32) -> (i32, i32, i32, i32) {
    %c0_i32 = arith.constant 0 : i32
    %c0_i32_0 = arith.constant 0 : i32
    %c0_i32_1 = arith.constant 0 : i32
    %c0_i32_2 = arith.constant 0 : i32
    return %arg0, %c0_i32, %c0_i32_0, %c0_i32_1 : i32, i32, i32, i32
  }
  func.func @transform_1(%arg0: i32, %arg1: i32) -> (i32, i32) {
    %c0_i32 = arith.constant 0 : i32
    %c0_i32_0 = arith.constant 0 : i32
    %c0_i32_1 = arith.constant 0 : i32
    return %c0_i32, %c0_i32_0 : i32, i32
  }
  func.func @transform_2(%arg0: i32, %arg1: i32) -> (i32, i32) {
    %c0_i32 = arith.constant 0 : i32
    %c0_i32_0 = arith.constant 0 : i32
    %c0_i32_1 = arith.constant 0 : i32
    return %c0_i32, %c0_i32_0 : i32, i32
  }
  func.func @transform_3(%arg0: i32, %arg1: i32) -> (i32, i32) {
    %c0_i32 = arith.constant 0 : i32
    %c0_i32_0 = arith.constant 0 : i32
    %c0_i32_1 = arith.constant 0 : i32
    return %c0_i32, %c0_i32_0 : i32, i32
  }
  func.func @transform_4(%arg0: i32, %arg1: i32) -> (i32, i32) {
    %c0_i32 = arith.constant 0 : i32
    %c0_i32_0 = arith.constant 0 : i32
    %c0_i32_1 = arith.constant 0 : i32
    return %c0_i32, %c0_i32_0 : i32, i32
  }
  func.func @transform_5(%arg0: i32, %arg1: i32) -> (i32, i32) {
    %c0_i32 = arith.constant 0 : i32
    %c0_i32_0 = arith.constant 0 : i32
    %c0_i32_1 = arith.constant 0 : i32
    return %c0_i32, %c0_i32_0 : i32, i32
  }
  func.func @transform_6(%arg0: i32, %arg1: i32) -> (i32, i32) {
    %c0_i32 = arith.constant 0 : i32
    %c0_i32_0 = arith.constant 0 : i32
    %c0_i32_1 = arith.constant 0 : i32
    return %c0_i32, %c0_i32_0 : i32, i32
  }
  func.func @transform_7(%arg0: i32, %arg1: i32) -> (i32, i32) {
    %c0_i32 = arith.constant 0 : i32
    %c0_i32_0 = arith.constant 0 : i32
    %c0_i32_1 = arith.constant 0 : i32
    return %c0_i32, %c0_i32_0 : i32, i32
  }
  func.func @transform_8(%arg0: i32, %arg1: i32) -> (i32, i32, i32, i32) {
    %c0_i32 = arith.constant 0 : i32
    %c0_i32_0 = arith.constant 0 : i32
    %c0_i32_1 = arith.constant 0 : i32
    return %arg0, %arg1, %c0_i32, %c0_i32_0 : i32, i32, i32, i32
  }
}

</mosaic_0001>

<bundles_post_ra>
// kernel: image_synthesis_forward.6
= control target key start
LH: loop header
LB: loop body
LE: loop exit
PB: predicated region body
PF: predicated region fallthrough
CT: control target
= control target key end

     0   :  { %s3647_s27 = smov 0   ;;  %s3649_s28 = smov 0   ;;  %s4472_s0 = inlined_call_operand.vmem [shape: f32[2,34,8,34], index: 0, kind: input, shape index: {}]   ;;  %s4473_s1 = inlined_call_operand.vmem [shape: f32[16,72], index: 1, kind: input, shape index: {}]   ;;  %s4474_s2 = inlined_call_operand.vmem [shape: f32[16,72], index: 2, kind: input, shape index: {}]   ;;  %s4475_s3 = inlined_call_operand.vmem [shape: f32[16,1], index: 3, kind: input, shape index: {}]   ;;  %s4476_s4 = inlined_call_operand.vmem [shape: f32[16,1], index: 4, kind: input, shape index: {}]   ;;  %s4477_s5 = inlined_call_operand.vmem [shape: f32[16,16], index: 5, kind: input, shape index: {}]   ;;  %s4478_s6 = inlined_call_operand.vmem [shape: f32[32,64], index: 6, kind: input, shape index: {}]   ;;  %s4479_s7 = inlined_call_operand.vmem [shape: f32[32,64], index: 7, kind: input, shape index: {}]   ;;  %s4480_s8 = inlined_call_operand.vmem [shape: f32[2,64,8,64], index: 8, kind: output, shape index: {}]  }
   0x1   :  { %s3651_s29 = smov 0   ;;  %s3653_s30 = smov 0  }
   0x2   :  { %s3655_s9 = smov 0  }
   0x3 LB: > { %s27_s10 = sadd.s32 1, %s3585_s29  ;;  %s30_s11 = sadd.s32 1, %s3589_s30  ;;  %s3593_s9 = sphi %s3655_s9, %s18_s9   ;;  %s3589_s30 = sphi %s3653_s30, %s4484_s30   ;;  %s3585_s29 = sphi %s3651_s29, %s4483_s29   ;;  %s3581_s28 = sphi %s3649_s28, %s4482_s28   ;;  %s3577_s27 = sphi %s3647_s27, %s4481_s27  }
   0x4   : > { %p28_p0 = scmp.ge.s32.totalorder %s27_s10, 4  ;;  %p3036_p1 = scmp.ge.s32.totalorder %s3593_s9, 1 }
   0x5   : > { %p276_p2 = scmp.lt.s32.totalorder %s3593_s9, 9 }
   0x6   : > { %s4486_s10 = smov (%p28_p0, %s27_s10), 0  ;;  %s4488_s11 = smov (!%p28_p0, %s30_s11), %s3589_s30 }
   0x7   : > { %p277_p3 = pnand %p3036_p1, %p276_p2  ;;  %p32_p4 = scmp.ge.s32.totalorder %s4488_s11, 2 }
   0x8   : > { %p314_p5 = scmp.lt.s32.totalorder (!%p277_p3), %s3581_s28, 1  ;;  %s3112_s13 = sshll.u32 (!%p277_p3), %s3577_s27, 6 }
   0x9   : > { %s4490_s11 = smov (%p32_p4, %s4488_s11), 0  ;;  %280 = sbr.rel (%p277_p3) target bundleno = 2444 (0x98c), region = 52 }
   0xa   : > { %s3595_s18 = smov (!%p277_p3), 126   ;;  %s3596_s19 = smov (!%p277_p3), 127  }
   0xb   : > { %s3597_s20 = smov (!%p277_p3), 32   ;;  %s3598_s21 = smov (!%p277_p3), 64  }
   0xc   : > { %s3599_s22 = smov (!%p277_p3), 96  }
   0xe   : > { %s4492_s28 = smov (!%p314_p5, %s3581_s28), 1  ;;  %vm584_vm0 = vcmask 261120   ;;  %vm594_vm1 = vcmask 523264   ;;  %vm604_vm2 = vcmask 785408   ;;  %v3600_v40 = vmov 0.0   ;;  %v347_v41 = vld [vmem:[%s4475_s3 + $0x8] sm:$0xff] }
   0xf   : > { %s3473_s12 = smul.u32 272, %s4492_s28  ;;  %712 = vmatprep.mubr.f32.mxu0 %v3600_v40  ;;  %795 = vmatprep.mubr.f32.mxu1 %v3600_v40  ;;  %v3601_v42 = vmov 0   ;;  %v346_v43 = vld [vmem:[%s4475_s3] sm:$0xff]  ;;  %vm641_vm3 = vcmask 588800   ;;  %vm994_vm4 = vcmask 130048  }
  0x10   : > { %3522 = vset.pattern.permute.xlu1 %v3601_v42  ;;  %3521 = vset.pattern.permute.xlu0 %v3601_v42 }
  0x11   : > { %s318_s16 = scalar_lea.vmem %s4472_s0, %s3473_s12 }
  0x12   : > { %s3686_s17 = scalar_lea.vmem %s318_s16, %s3112_s13 }
  0x13   : > { %v3689_v0 = vld [vmem:[%s3686_s17 + $0x38] sm:$0xff]  ;;  %v3692_v1 = vld [vmem:[%s3686_s17 + $0x40] sm:$0xff]  ;;  %v3705_v4 = vld [vmem:[%s3686_s17 + $0x30] sm:$0xff] }
  0x14   : > { %410 = vrot.lane.b32.xlu0 %v3689_v0, %s3595_s18  ;;  %415 = vrot.lane.b32.xlu1 %v3692_v1, %s3595_s18  ;;  %v3697_v2 = vld [vmem:[%s3686_s17 + $0x18] sm:$0xff]  ;;  %v3700_v3 = vld [vmem:[%s3686_s17 + $0x20] sm:$0xff] }
  0x15   : > { %v341_v5 = vld [vmem:[%s3686_s17 + $0x48] sm:$0xff]  ;;  %v3710_v6 = vld [vmem:[%s3686_s17 + $0x10] sm:$0xff]  ;;  %v3730_v9 = vld [vmem:[%s3686_s17] sm:$0xff] }
  0x16   : > { %v3713_v7 = vld [vmem:[%s3686_s17 + $0x28] sm:$0xff] }
  0x17   : > { %v3718_v8 = vld [vmem:[%s3686_s17 + $0x8] sm:$0xff]  ;;  %s3038_s17 = sshll.u32 %s3577_s27, 4 }
  0x18   : > { %384 = vrot.lane.b32.xlu0 %v3697_v2, %s3595_s18  ;;  %389 = vrot.lane.b32.xlu1 %v3700_v3, %s3595_s18  ;;  %p322_p6 = scmp.lt.s32.totalorder %s3038_s17, 63 }
  0x1a   : > { %s4494_s17 = smov (!%p322_p6, %s3038_s17), 63 }
  0x1c   : > { %402 = vrot.lane.b32.xlu0 %v3705_v4, %s3595_s18  ;;  %420 = vrot.lane.b32.xlu1 %v341_v5, %s3595_s18 }
  0x20   : > { %376 = vrot.lane.b32.xlu0 %v3710_v6, %s3595_s18  ;;  %394 = vrot.lane.b32.xlu1 %v3713_v7, %s3595_s18 }
  0x24   : > { %374 = vrot.lane.b32.xlu0 %v3718_v8, %s3595_s18  ;;  %408 = vrot.lane.b32.xlu1 %v3689_v0, %s3596_s19 }
  0x28   : > { %382 = vrot.lane.b32.xlu0 %v3697_v2, %s3596_s19  ;;  %413 = vrot.lane.b32.xlu1 %v3692_v1, %s3596_s19 }
  0x2c   : > { %387 = vrot.lane.b32.xlu0 %v3700_v3, %s3596_s19  ;;  %397 = vrot.lane.b32.xlu1 %v3705_v4, %s3596_s19 }
  0x30   : > { %418 = vrot.lane.b32.xlu0 %v341_v5, %s3596_s19  ;;  %367 = vrot.lane.b32.xlu1 %v3710_v6, %s3596_s19 }
  0x34   : > { %392 = vrot.lane.b32.xlu0 %v3713_v7, %s3596_s19  ;;  %365 = vrot.lane.b32.xlu1 %v3718_v8, %s3596_s19 }
  0x38   : > { %372 = vrot.lane.b32.xlu0 %v3730_v9, %s3595_s18  ;;  %363 = vrot.lane.b32.xlu1 %v3730_v9, %s3596_s19  ;;  %s3039_s18 = sshll.u32 %s4492_s28, 6 }
  0x39   : > { %s325_s27 = sadd.s32 %s3039_s18, %s4494_s17 }
  0x3a   : > { %s3040_s19 = sshll.u32 %s325_s27, 3 }
  0x3b   : > { %s4191_s24 = scalar_lea.vmem %s4480_s8, %s3040_s19 }
  0x3c   : > { %507 = vrot.lane.b32.xlu0 %v3689_v0, %s3597_s20  ;;  %453 = vrot.lane.b32.xlu1 %v3700_v3, %s3598_s21 }
  0x40   : > { %426 = vrot.lane.b32.xlu0 %v3697_v2, %s3597_s20  ;;  %561 = vrot.lane.b32.xlu1 %v341_v5, %s3599_s22 }
  0x44   : > { %534 = vrot.lane.b32.xlu0 %v3692_v1, %s3598_s21  ;;  %480 = vrot.lane.b32.xlu1 %v3713_v7, %s3599_s22 }
  0x48   : > { %505 = vrot.lane.b32.xlu0 %v3705_v4, %s3597_s20 }
  0x4c   : > { %424 = vrot.lane.b32.xlu0 %v3710_v6, %s3597_s20 }
  0x86   : > { %v411_v10 = vpop.permute.xlu0 %410  ;;  %v416_v11 = vpop.permute.xlu1 %415 }
  0x87   : > { %519 = vrot.lane.b32.xlu0 %v411_v10, %s3597_s20 }
  0x8a   : > { %v385_v12 = vpop.permute.xlu0 %384  ;;  %v3750_v13 = vpop.permute.xlu1 %389 }
  0x8b   : > { %438 = vrot.lane.b32.xlu1 %v385_v12, %s3597_s20  ;;  %546 = vrot.lane.b32.xlu0 %v416_v11, %s3598_s21 }
  0x8e   : > { %v3754_v14 = vpop.permute.xlu0 %402  ;;  %v421_v15 = vpop.permute.xlu1 %420 }
  0x8f   : > { %465 = vrot.lane.b32.xlu1 %v3750_v13, %s3598_s21  ;;  %517 = vrot.lane.b32.xlu0 %v3754_v14, %s3597_s20 }
  0x92   : > { %v3760_v16 = vpop.permute.xlu0 %376  ;;  %v3762_v17 = vpop.permute.xlu1 %394 }
  0x93   : > { %573 = vrot.lane.b32.xlu1 %v421_v15, %s3599_s22  ;;  %436 = vrot.lane.b32.xlu0 %v3760_v16, %s3597_s20 }
  0x96   : > { %v3767_v18 = vpop.permute.xlu0 %374  ;;  %v409_v19 = vpop.permute.xlu1 %408 }
  0x97   : > { %492 = vrot.lane.b32.xlu1 %v3762_v17, %s3599_s22  ;;  %544 = vrot.lane.b32.xlu0 %v411_v10, %s3598_s21 }
  0x9a   : > { %v383_v20 = vpop.permute.xlu0 %382  ;;  %v414_v21 = vpop.permute.xlu1 %413 }
  0x9b   : > { %463 = vrot.lane.b32.xlu1 %v385_v12, %s3598_s21  ;;  %515 = vrot.lane.b32.xlu0 %v3762_v17, %s3597_s20 }
  0x9e   : > { %v3775_v22 = vpop.permute.xlu0 %387  ;;  %v3777_v23 = vpop.permute.xlu1 %397 }
  0x9f   : > { %571 = vrot.lane.b32.xlu1 %v416_v11, %s3599_s22  ;;  %490 = vrot.lane.b32.xlu0 %v3750_v13, %s3599_s22 }
  0xa2   : > { %v419_v24 = vpop.permute.xlu0 %418  ;;  %v3786_v25 = vpop.permute.xlu1 %367 }
  0xa3   : > { %434 = vrot.lane.b32.xlu1 %v3767_v18, %s3597_s20  ;;  %461 = vrot.lane.b32.xlu0 %v3760_v16, %s3598_s21 }
  0xa6   : > { %v3788_v26 = vpop.permute.xlu0 %392  ;;  %v3793_v27 = vpop.permute.xlu1 %365 }
  0xa7   : > { %542 = vrot.lane.b32.xlu1 %v3754_v14, %s3598_s21  ;;  %569 = vrot.lane.b32.xlu0 %v411_v10, %s3599_s22 }
  0xaa   : > { %v3795_v28 = vpop.permute.xlu0 %372  ;;  %v3799_v29 = vpop.permute.xlu1 %363 }
  0xab   : > { %513 = vrot.lane.b32.xlu1 %v409_v19, %s3597_s20  ;;  %488 = vrot.lane.b32.xlu0 %v385_v12, %s3599_s22 }
  0xae   : > { %v508_v30 = vpop.permute.xlu0 %507  ;;  %v454_v31 = vpop.permute.xlu1 %453 }
  0xaf   : > { %432 = vrot.lane.b32.xlu1 %v383_v20, %s3597_s20  ;;  %459 = vrot.lane.b32.xlu0 %v3775_v22, %s3598_s21  ;;  %v616_v34 = vsel %vm584_vm0, %v3705_v4, %v508_v30 }
  0xb2   : > { %v427_v32 = vpop.permute.xlu0 %426  ;;  %v562_v38 = vpop.permute.xlu1 %561 }
  0xb3   : > { %540 = vrot.lane.b32.xlu1 %v414_v21, %s3598_s21  ;;  %567 = vrot.lane.b32.xlu0 %v419_v24, %s3599_s22  ;;  %v587_v33 = vsel %vm584_vm0, %v3710_v6, %v427_v32 }
  0xb4   : > { %v3811_v35 = vsel %vm594_vm1, %v587_v33, %v454_v31 }
  0xb6   : > { %v535_v36 = vpop.permute.xlu0 %534  ;;  %v3870_v46 = vpop.permute.xlu1 %480 }
  0xb7   : > { %511 = vrot.lane.b32.xlu1 %v3777_v23, %s3597_s20  ;;  %486 = vrot.lane.b32.xlu0 %v3788_v26, %s3599_s22  ;;  %v625_v37 = vsel %vm594_vm1, %v616_v34, %v535_v36 }
  0xb8   : > { %v3819_v39 = vsel %vm604_vm2, %v625_v37, %v562_v38 }
  0xba   : > { %v3866_v44 = vpop.permute.xlu0 %505 }
  0xbb   : > { %430 = vrot.lane.b32.xlu1 %v3786_v25, %s3597_s20  ;;  %457 = vrot.lane.b32.xlu0 %v383_v20, %s3598_s21 }
  0xbe   : > { %v3868_v45 = vpop.permute.xlu0 %424 }
  0xbf   : > { %538 = vrot.lane.b32.xlu1 %v409_v19, %s3598_s21  ;;  %565 = vrot.lane.b32.xlu0 %v414_v21, %s3599_s22 }
  0xc3   : > { %509 = vrot.lane.b32.xlu1 %v3788_v26, %s3597_s20  ;;  %428 = vrot.lane.b32.xlu0 %v3793_v27, %s3597_s20 }
  0xc7   : > { %484 = vrot.lane.b32.xlu1 %v3775_v22, %s3599_s22  ;;  %536 = vrot.lane.b32.xlu0 %v3777_v23, %s3598_s21 }
  0xcb   : > { %455 = vrot.lane.b32.xlu1 %v3786_v25, %s3598_s21  ;;  %532 = vrot.lane.b32.xlu0 %v3689_v0, %s3598_s21 }
  0xcf   : > { %563 = vrot.lane.b32.xlu1 %v409_v19, %s3599_s22  ;;  %503 = vrot.lane.b32.xlu0 %v3713_v7, %s3597_s20 }
  0xd3   : > { %482 = vrot.lane.b32.xlu1 %v383_v20, %s3599_s22  ;;  %422 = vrot.lane.b32.xlu0 %v3718_v8, %s3597_s20 }
  0xd7   : > { %451 = vrot.lane.b32.xlu1 %v3697_v2, %s3598_s21  ;;  %530 = vrot.lane.b32.xlu0 %v3705_v4, %s3598_s21 }
  0xdb   : > { %559 = vrot.lane.b32.xlu1 %v3692_v1, %s3599_s22  ;;  %557 = vrot.lane.b32.xlu0 %v3689_v0, %s3599_s22 }
  0xdf   : > { %478 = vrot.lane.b32.xlu1 %v3700_v3, %s3599_s22  ;;  %977 = vperm.xlu0 %3521, %v347_v41  }
  0xe3   : > { %449 = vrot.lane.b32.xlu1 %v3710_v6, %s3598_s21 }
  0xe7   : > { %476 = vrot.lane.b32.xlu1 %v3697_v2, %s3599_s22 }
  0xeb   : > { %972 = vperm.xlu1 %3522, %v346_v43  }
  0xf9   : > { %v520_v47 = vpop.permute.xlu0 %519 }
  0xfa   : > { %v622_v52 = vsel %vm584_vm0, %v3754_v14, %v520_v47 }
  0xfd   : > { %v439_v48 = vpop.permute.xlu1 %438  ;;  %v547_v49 = vpop.permute.xlu0 %546 }
  0xfe   : > { %v631_v53 = vsel %vm594_vm1, %v622_v52, %v547_v49  ;;  %v593_v57 = vsel %vm584_vm0, %v3760_v16, %v439_v48 }
 0x101   : > { %v466_v50 = vpop.permute.xlu1 %465  ;;  %v518_v51 = vpop.permute.xlu0 %517 }
 0x102   : > { %v603_v58 = vsel %vm594_vm1, %v593_v57, %v466_v50  ;;  %v621_v0 = vsel %vm584_vm0, %v3762_v17, %v518_v51 }
 0x105   : > { %v574_v54 = vpop.permute.xlu1 %573  ;;  %v437_v55 = vpop.permute.xlu0 %436 }
 0x106   : > { %v640_v56 = vsel %vm604_vm2, %v631_v53, %v574_v54  ;;  %v592_v1 = vsel %vm584_vm0, %v3767_v18, %v437_v55 }
 0x107   : > { %662 = vmatprep.subr.mxu0 %v640_v56  ;;  %745 = vmatprep.subr.mxu1 %v640_v56 }
 0x109   : > { %v493_v59 = vpop.permute.xlu1 %492  ;;  %v545_v60 = vpop.permute.xlu0 %544 }
 0x10a   : > { %v613_v61 = vsel %vm604_vm2, %v603_v58, %v493_v59  ;;  %v630_v2 = vsel %vm594_vm1, %v621_v0, %v545_v60 }
 0x10b   : > { %663 = vmatpush1.msra.mxu0 %v613_v61  ;;  %746 = vmatpush1.msra.mxu1 %v613_v61 }
 0x10d   : > { %v464_v62 = vpop.permute.xlu1 %463  ;;  %v516_v63 = vpop.permute.xlu0 %515 }
 0x10e   : > { %v602_v4 = vsel %vm594_vm1, %v592_v1, %v464_v62  ;;  %v620_v15 = vsel %vm584_vm0, %v3750_v13, %v516_v63 }
 0x111   : > { %v572_v5 = vpop.permute.xlu1 %571  ;;  %v491_v6 = vpop.permute.xlu0 %490 }
 0x112   : > { %v639_v10 = vsel %vm604_vm2, %v630_v2, %v572_v5  ;;  %v612_v11 = vsel %vm604_vm2, %v602_v4, %v491_v6 }
 0x113   : > { %664 = vmatprep.subr.mxu0 %v639_v10  ;;  %747 = vmatprep.subr.mxu1 %v639_v10 }
 0x114   : > { %665 = vmatpush1.msra.mxu0 %v612_v11  ;;  %748 = vmatpush1.msra.mxu1 %v612_v11  ;;  %v615_v11 = vsel %vm584_vm0, %v3713_v7, %v3866_v44 }
 0x115   : > { %v435_v12 = vpop.permute.xlu1 %434  ;;  %v462_v14 = vpop.permute.xlu0 %461 }
 0x116   : > { %v591_v18 = vsel %vm584_vm0, %v3795_v28, %v435_v12 }
 0x117   : > { %v601_v21 = vsel %vm594_vm1, %v591_v18, %v462_v14 }
 0x119   : > { %v543_v16 = vpop.permute.xlu1 %542  ;;  %v570_v17 = vpop.permute.xlu0 %569 }
 0x11a   : > { %v629_v19 = vsel %vm594_vm1, %v620_v15, %v543_v16 }
 0x11b   : > { %v638_v20 = vsel %vm604_vm2, %v629_v19, %v570_v17 }
 0x11c   : > { %666 = vmatprep.subr.mxu0 %v638_v20  ;;  %749 = vmatprep.subr.mxu1 %v638_v20  ;;  %v342_v20 = vld [vmem:[%s4473_s1] sm:$0xff] }
 0x11d   : > { %v514_v24 = vpop.permute.xlu1 %513  ;;  %v489_v30 = vpop.permute.xlu0 %488 }
 0x11e   : > { %v611_v31 = vsel %vm604_vm2, %v601_v21, %v489_v30  ;;  %v619_v33 = vsel %vm584_vm0, %v3777_v23, %v514_v24  ;;  %v344_v21 = vld [vmem:[%s4474_s2] sm:$0xff]  ;;  %v3957_v30 = vld [vmem:[%s4478_s6 + $0x18] sm:$0xff] }
 0x11f   : > { %667 = vmatpush1.msra.mxu0 %v611_v31  ;;  %750 = vmatpush1.msra.mxu1 %v611_v31  ;;  %v343_v31 = vld [vmem:[%s4473_s1 + $0x8] sm:$0xff] }
 0x121   : > { %v433_v13 = vpop.permute.xlu1 %432  ;;  %v460_v32 = vpop.permute.xlu0 %459 }
 0x122   : > { %v590_v36 = vsel %vm584_vm0, %v3786_v25, %v433_v13  ;;  %v345_v13 = vld [vmem:[%s4474_s2 + $0x8] sm:$0xff] }
 0x123   : > { %v600_v41 = vsel %vm594_vm1, %v590_v36, %v460_v32  ;;  %v3974_v32 = vld [vmem:[%s4479_s7 + $0x10] sm:$0xff]  ;;  %v4011_v36 = vld [vmem:[%s4478_s6] sm:$0xff] }
 0x125   : > { %v541_v28 = vpop.permute.xlu1 %540  ;;  %v568_v34 = vpop.permute.xlu0 %567 }
 0x126   : > { %v628_v37 = vsel %vm594_vm1, %v619_v33, %v541_v28  ;;  %v3992_v33 = vld [vmem:[%s4478_s6 + $0x8] sm:$0xff] }
 0x127   : > { %v637_v38 = vsel %vm604_vm2, %v628_v37, %v568_v34  ;;  %v3997_v28 = vld [vmem:[%s4479_s7 + $0x8] sm:$0xff]  ;;  %v4006_v34 = vld [vmem:[%s4479_s7] sm:$0xff] }
 0x128   : > { %668 = vmatprep.subr.mxu0 %v637_v38  ;;  %751 = vmatprep.subr.mxu1 %v637_v38 }
 0x129   : > { %v512_v42 = vpop.permute.xlu1 %511  ;;  %v487_v43 = vpop.permute.xlu0 %486 }
 0x12a   : > { %v610_v47 = vsel %vm604_vm2, %v600_v41, %v487_v43  ;;  %v618_v49 = vsel %vm584_vm0, %v3788_v26, %v512_v42 }
 0x12b   : > { %669 = vmatpush1.msra.mxu0 %v610_v47  ;;  %752 = vmatpush1.msra.mxu1 %v610_v47 }
 0x12d   : > { %v431_v23 = vpop.permute.xlu1 %430  ;;  %v458_v48 = vpop.permute.xlu0 %457 }
 0x12e   : > { %v589_v55 = vsel %vm584_vm0, %v3793_v27, %v431_v23 }
 0x12f   : > { %v599_v56 = vsel %vm594_vm1, %v589_v55, %v458_v48 }
 0x131   : > { %v539_v25 = vpop.permute.xlu1 %538  ;;  %v566_v50 = vpop.permute.xlu0 %565 }
 0x132   : > { %v627_v51 = vsel %vm594_vm1, %v618_v49, %v539_v25  ;;  %v358_v49 = vld [vmem:[%s4476_s4] sm:$0xff]  ;;  %v359_v25 = vld [vmem:[%s4476_s4 + $0x8] sm:$0xff] }
 0x133   : > { %v636_v52 = vsel %vm604_vm2, %v627_v51, %v566_v50  ;;  %v4082_v50 = vld [vmem:[%s4477_s5] sm:$0xff] }
 0x134   : > { %670 = vmatprep.subr.mxu0 %v636_v52  ;;  %753 = vmatprep.subr.mxu1 %v636_v52 }
 0x135   : > { %v510_v53 = vpop.permute.xlu1 %509  ;;  %v429_v54 = vpop.permute.xlu0 %428 }
 0x136   : > { %v617_v61 = vsel %vm584_vm0, %v3775_v22, %v510_v53  ;;  %v588_v27 = vsel %vm584_vm0, %v3799_v29, %v429_v54  ;;  %v607_v22 = vsel %vm604_vm2, %v3811_v35, %v3870_v46  ;;  %v586_v35 = vsel %vm584_vm0, %v3718_v8, %v3868_v45 }
 0x139   : > { %v485_v57 = vpop.permute.xlu1 %484  ;;  %v537_v58 = vpop.permute.xlu0 %536 }
 0x13a   : > { %v609_v59 = vsel %vm604_vm2, %v599_v56, %v485_v57  ;;  %v626_v62 = vsel %vm594_vm1, %v617_v61, %v537_v58 }
 0x13b   : > { %671 = vmatpush1.msra.mxu0 %v609_v59  ;;  %754 = vmatpush1.msra.mxu1 %v609_v59 }
 0x13d   : > { %v456_v26 = vpop.permute.xlu1 %455  ;;  %v533_v60 = vpop.permute.xlu0 %532 }
 0x13e   : > { %v598_v2 = vsel %vm594_vm1, %v588_v27, %v456_v26  ;;  %v624_v12 = vsel %vm594_vm1, %v615_v11, %v533_v60 }
 0x141   : > { %v564_v63 = vpop.permute.xlu1 %563  ;;  %v504_v0 = vpop.permute.xlu0 %503 }
 0x142   : > { %v635_v1 = vsel %vm604_vm2, %v626_v62, %v564_v63  ;;  %v614_v14 = vsel %vm584_vm0, %v3700_v3, %v504_v0  ;;  %v4107_v0 = vld [vmem:[%s4477_s5 + $0x8] sm:$0xff] }
 0x143   : > { %672 = vmatprep.subr.mxu0 %v635_v1  ;;  %755 = vmatprep.subr.mxu1 %v635_v1 }
 0x145   : > { %v483_v4 = vpop.permute.xlu1 %482  ;;  %v423_v5 = vpop.permute.xlu0 %422 }
 0x146   : > { %v608_v6 = vsel %vm604_vm2, %v598_v2, %v483_v4  ;;  %v585_v19 = vsel %vm584_vm0, %v3730_v9, %v423_v5  ;;  %v3952_v9 = vld [vmem:[%s4479_s7 + $0x18] sm:$0xff] }
 0x147   : > { %673 = vmatpush1.msra.mxu0 %v608_v6  ;;  %756 = vmatpush1.msra.mxu1 %v608_v6 }
 0x148   : > { %674 = vmatprep.subr.mxu0 %v3819_v39  ;;  %757 = vmatprep.subr.mxu1 %v3819_v39 }
 0x149   : > { %v452_v10 = vpop.permute.xlu1 %451  ;;  %675 = vmatpush1.msra.mxu0 %v607_v22  ;;  %758 = vmatpush1.msra.mxu1 %v607_v22  ;;  %v531_v29 = vpop.permute.xlu0 %530 }
 0x14a   : > { %v623_v46 = vsel %vm594_vm1, %v614_v14, %v531_v29  ;;  %v596_v17 = vsel %vm594_vm1, %v586_v35, %v452_v10 }
 0x14d   : > { %v560_v15 = vpop.permute.xlu1 %559  ;;  %v558_v16 = vpop.permute.xlu0 %557 }
 0x14e   : > { %v633_v39 = vsel %vm604_vm2, %v624_v12, %v560_v15  ;;  %v632_v3 = vsel %vm604_vm2, %v623_v46, %v558_v16 }
 0x14f   : > { %676 = vmatprep.subr.mxu0 %v633_v39  ;;  %759 = vmatprep.subr.mxu1 %v633_v39 }
 0x151   : > { %v479_v7 = vpop.permute.xlu1 %478 }
 0x152   : > { %v606_v44 = vsel %vm604_vm2, %v596_v17, %v479_v7 }
 0x153   : > { %677 = vmatpush1.msra.mxu0 %v606_v44  ;;  %760 = vmatpush1.msra.mxu1 %v606_v44 }
 0x154   : > { %678 = vmatprep.subr.mxu0 %v632_v3  ;;  %761 = vmatprep.subr.mxu1 %v632_v3 }
 0x155   : > { %v450_v18 = vpop.permute.xlu1 %449 }
 0x156   : > { %v595_v8 = vsel %vm594_vm1, %v585_v19, %v450_v18 }
 0x159   : > { %v477_v45 = vpop.permute.xlu1 %476 }
 0x15a   : > { %v605_v24 = vsel %vm604_vm2, %v595_v8, %v477_v45  ;;  %v4092_v58 = vpop.permute.xlu0 %977 }
 0x15b   : > { %679 = vmatpush1.msra.mxu0 %v605_v24  ;;  %762 = vmatpush1.msra.mxu1 %v605_v24 }
 0x15c   : > { %3043 = vmatmul.mubr.msk.f32.vlgmr.msra.gmra.mxu0 %vm641_vm3, %v342_v20  ;;  %3045 = vmatmul.mubr.msk.f32.vlgmr.msra.gmra.mxu1 %vm641_vm3, %v344_v21 }
 0x15d   : > { %718 = vmatprep.mubr.f32.mxu0 %v3600_v40  ;;  %801 = vmatprep.mubr.f32.mxu1 %v3600_v40  ;;  %v3979_v40 = vld [vmem:[%s4478_s6 + $0x10] sm:$0xff] }
 0x15e   : > { %3241 = vmatprep.subr.mxu0 %v3952_v9  ;;  %3252 = vmatprep.subr.mxu1 %v3957_v30 }
 0x15f   : > { %3242 = vmatpush3.msra.mxu0 %v3952_v9  ;;  %3253 = vmatpush3.msra.mxu1 %v3957_v30 }
 0x160   : > { %3044 = vmatmul.mubr.msk.f32.gmra.mxu0 %vm641_vm3, %v343_v31  ;;  %3046 = vmatmul.mubr.msk.f32.gmra.mxu1 %vm641_vm3, %v345_v13 }
 0x161   : > { %3243 = vmatprep.subr.mxu0 %v3974_v32  ;;  %3254 = vmatprep.subr.mxu1 %v3979_v40 }
 0x162   : > { %3244 = vmatpush3.msra.mxu0 %v3974_v32  ;;  %3255 = vmatpush3.msra.mxu1 %v3979_v40 }
 0x163   : > { %3256 = vmatprep.subr.mxu1 %v3992_v33  ;;  %3245 = vmatprep.subr.mxu0 %v3997_v28 }
 0x164   : > { %3246 = vmatpush3.msra.mxu0 %v3997_v28  ;;  %3257 = vmatpush3.msra.mxu1 %v3992_v33 }
 0x165   : > { %3247 = vmatprep.subr.mxu0 %v4006_v34  ;;  %3258 = vmatprep.subr.mxu1 %v4011_v36 }
 0x166   : > { %3248 = vmatpush3.msra.mxu0 %v4006_v34  ;;  %3259 = vmatpush3.msra.mxu1 %v4011_v36  ;;  %v4086_v51 = vpop.permute.xlu1 %972 }
 0x167   : > { %3270 = vmatprep.subr.mxu1 %v3952_v9 }
 0x21c   : > { %v714_v37 = vpop.f32.mrf.mxu0  ;;  %v797_v38 = vpop.f32.mrf.mxu1 }
 0x21d   : > { %1095 = vrot.lane.b32.xlu1 %v797_v38, %s3599_s22  ;;  %3249 = vmatprep.mubr.msk.f32.mxu0 %vm584_vm0, %v797_v38 }
 0x21e   : > { %1178 = vrot.lane.b32.xlu0 %v714_v37, %s3599_s22  ;;  %3260 = vmatprep.mubr.msk.f32.mxu1 %vm584_vm0, %v714_v37  ;;  %v4022_v41 = vpop.f32.mrf.mxu0  ;;  %v4024_v42 = vpop.f32.mrf.mxu1 }
 0x220   : > { %v720_v43 = vpop.f32.mrf.mxu0  ;;  %v803_v47 = vpop.f32.mrf.mxu1 }
 0x221   : > { %1097 = vrot.lane.b32.xlu1 %v803_v47, %s3599_s22  ;;  %3250 = vmatmul.mubr.msk.f32.vlgmr.msra.gmra.mxu0 %vm584_vm0, %v803_v47 }
 0x222   : > { %1180 = vrot.lane.b32.xlu0 %v720_v43, %s3599_s22  ;;  %3261 = vmatmul.mubr.msk.f32.vlgmr.msra.gmra.mxu1 %vm584_vm0, %v720_v43  ;;  %v4049_v23 = vpop.f32.mrf.mxu1  ;;  %v4051_v48 = vpop.f32.mrf.mxu0 }
 0x223   : > { %3271 = vmatpush3.msra.mxu1 %v3952_v9  ;;  %3267 = vmatprep.mubr.msk.f32.mxu0 %vm994_vm4, %v4082_v50 }
 0x224   : > { %3272 = vmatprep.subr.mxu1 %v3974_v32 }
 0x225   : > { %1360 = vrot.lane.b32.xlu1 %v797_v38, %s3598_s21  ;;  %3273 = vmatpush3.msra.mxu1 %v3974_v32 }
 0x226   : > { %1443 = vrot.lane.b32.xlu0 %v714_v37, %s3598_s21  ;;  %3274 = vmatprep.subr.mxu1 %v3997_v28 }
 0x227   : > { %3275 = vmatpush3.msra.mxu1 %v3997_v28 }
 0x228   : > { %3276 = vmatprep.subr.mxu1 %v4006_v34 }
 0x229   : > { %1362 = vrot.lane.b32.xlu1 %v803_v47, %s3598_s21  ;;  %3277 = vmatpush3.msra.mxu1 %v4006_v34 }
 0x22a   : > { %1445 = vrot.lane.b32.xlu0 %v720_v43, %s3598_s21 }
 0x22d   : > { %1625 = vrot.lane.b32.xlu1 %v797_v38, %s3597_s20 }
 0x22e   : > { %1708 = vrot.lane.b32.xlu0 %v714_v37, %s3597_s20 }
 0x231   : > { %1627 = vrot.lane.b32.xlu1 %v803_v47, %s3597_s20 }
 0x232   : > { %1710 = vrot.lane.b32.xlu0 %v720_v43, %s3597_s20 }
 0x235   : > { %2151 = vrot.lane.b32.xlu1 %v4024_v42, %s3599_s22 }
 0x236   : > { %2234 = vrot.lane.b32.xlu0 %v4022_v41, %s3599_s22 }
 0x239   : > { %2153 = vrot.lane.b32.xlu1 %v4049_v23, %s3599_s22 }
 0x23a   : > { %2236 = vrot.lane.b32.xlu0 %v4051_v48, %s3599_s22 }
 0x23d   : > { %2416 = vrot.lane.b32.xlu1 %v4024_v42, %s3598_s21 }
 0x23e   : > { %2499 = vrot.lane.b32.xlu0 %v4022_v41, %s3598_s21 }
 0x241   : > { %2418 = vrot.lane.b32.xlu1 %v4049_v23, %s3598_s21 }
 0x242   : > { %2501 = vrot.lane.b32.xlu0 %v4051_v48, %s3598_s21 }
 0x245   : > { %2681 = vrot.lane.b32.xlu1 %v4024_v42, %s3597_s20 }
 0x246   : > { %2764 = vrot.lane.b32.xlu0 %v4022_v41, %s3597_s20 }
 0x249   : > { %2683 = vrot.lane.b32.xlu1 %v4049_v23, %s3597_s20 }
 0x24a   : > { %2766 = vrot.lane.b32.xlu0 %v4051_v48, %s3597_s20 }
 0x24d   : > { %986 = vperm.xlu1 %3522, %v358_v49  }
 0x24e   : > { %991 = vperm.xlu0 %3521, %v359_v25  }
 0x28f   : > { %v1096_v52 = vpop.permute.xlu1 %1095 }
 0x290   : > { %3278 = vmatprep.mubr.msk.f32.mxu1 %vm584_vm0, %v1096_v52  ;;  %v1179_v1 = vpop.permute.xlu0 %1178 }
 0x293   : > { %v1098_v53 = vpop.permute.xlu1 %1097 }
 0x294   : > { %3279 = vmatmul.mubr.msk.f32.vlgmr.msra.gmra.mxu1 %vm584_vm0, %v1098_v53  ;;  %v1181_v27 = vpop.permute.xlu0 %1180 }
 0x295   : > { %3296 = vmatprep.mubr.msk.f32.mxu1 %vm994_vm4, %v4082_v50 }
 0x297   : > { %v1361_v2 = vpop.permute.xlu1 %1360 }
 0x298   : > { %v1444_v5 = vpop.permute.xlu0 %1443 }
 0x29b   : > { %v1363_v4 = vpop.permute.xlu1 %1362 }
 0x29c   : > { %v4133_v6 = vpop.permute.xlu0 %1445 }
 0x29f   : > { %v4137_v10 = vpop.permute.xlu1 %1625 }
 0x2a0   : > { %v4135_v22 = vpop.permute.xlu0 %1708 }
 0x2a3   : > { %v4141_v11 = vpop.permute.xlu1 %1627 }
 0x2a4   : > { %v4139_v29 = vpop.permute.xlu0 %1710 }
 0x2a7   : > { %v4145_v14 = vpop.permute.xlu1 %2151 }
 0x2a8   : > { %v4143_v12 = vpop.permute.xlu0 %2234 }
 0x2ab   : > { %v4149_v39 = vpop.permute.xlu1 %2153 }
 0x2ac   : > { %v4147_v15 = vpop.permute.xlu0 %2236 }
 0x2af   : > { %v4153_v46 = vpop.permute.xlu1 %2416 }
 0x2b0   : > { %v4151_v35 = vpop.permute.xlu0 %2499 }
 0x2b3   : > { %v4157_v17 = vpop.permute.xlu1 %2418 }
 0x2b4   : > { %v4155_v16 = vpop.permute.xlu0 %2501 }
 0x2b7   : > { %v4161_v44 = vpop.permute.xlu1 %2681 }
 0x2b8   : > { %v4159_v7 = vpop.permute.xlu0 %2764 }
 0x2bb   : > { %v4165_v18 = vpop.permute.xlu1 %2683 }
 0x2bc   : > { %v4163_v3 = vpop.permute.xlu0 %2766 }
 0x2c8   : > { %v4171_v21 = vpop.permute.xlu1 %986 }
 0x2c9   : > { %v4167_v19 = vpop.permute.xlu0 %991 }
 0x2e1   : > { %v3251_v54 = vpop.f32.mrf.mxu0 }
 0x2e2   : > { %v3262_v55 = vpop.f32.mrf.mxu1 }
 0x2e3   : > { %v967_v56 = vadd.f32 %v3262_v55, %v3251_v54  ;;  %v880_v57 = vpop.f32.mrf.mxu0 }
 0x2e4   : > { %v961_v59 = vpop.f32.mrf.mxu1 }
 0x2e5   : > { %v4095_v26 = vadd.f32 %v4092_v58, %v967_v56  ;;  %v962_v60 = vadd.f32 %v961_v59, %v880_v57 }
 0x2e7   : > { %v4098_v61 = vadd.f32 %v4086_v51, %v962_v60  ;;  %v983_v62 = vmul.f32 %v4095_v26, %v4095_v26 }
 0x2e9   : > { %3263 = vmatprep.subr.mxu0 %v983_v62  ;;  %v982_v63 = vmul.f32 %v4098_v61, %v4098_v61 }
 0x2ea   : > { %3264 = vmatpush3.msra.mxu0 %v983_v62 }
 0x2eb   : > { %3265 = vmatprep.subr.mxu0 %v982_v63 }
 0x2ec   : > { %3266 = vmatpush3.msra.mxu0 %v982_v63 }
 0x2ed   : > { %3268 = vmatmul.mubr.msk.f32.vlgmr.msra.gmra.mxu0 %vm994_vm4, %v4107_v0  ;;  %3281 = vmatprep.subr.mxu0 %v3957_v30 }
 0x2ee   : > { %3282 = vmatpush3.msra.mxu0 %v3957_v30  ;;  %3289 = vmatprep.mubr.msk.f32.mxu0 %vm584_vm0, %v1179_v1 }
 0x2ef   : > { %3283 = vmatprep.subr.mxu0 %v3979_v40 }
 0x2f0   : > { %3284 = vmatpush3.msra.mxu0 %v3979_v40 }
 0x2f1   : > { %3285 = vmatprep.subr.mxu0 %v3992_v33 }
 0x2f2   : > { %3286 = vmatpush3.msra.mxu0 %v3992_v33 }
 0x2f3   : > { %3287 = vmatprep.subr.mxu0 %v4011_v36 }
 0x2f4   : > { %3288 = vmatpush3.msra.mxu0 %v4011_v36 }
 0x2f5   : > { %3290 = vmatmul.mubr.msk.f32.vlgmr.msra.gmra.mxu0 %vm584_vm0, %v1181_v27  ;;  %3299 = vmatprep.subr.mxu0 %v3952_v9 }
 0x2f6   : > { %3300 = vmatpush3.msra.mxu0 %v3952_v9  ;;  %3307 = vmatprep.mubr.msk.f32.mxu0 %vm584_vm0, %v1361_v2 }
 0x2f7   : > { %3301 = vmatprep.subr.mxu0 %v3974_v32 }
 0x2f8   : > { %3302 = vmatpush3.msra.mxu0 %v3974_v32 }
 0x2f9   : > { %3303 = vmatprep.subr.mxu0 %v3997_v28 }
 0x2fa   : > { %3304 = vmatpush3.msra.mxu0 %v3997_v28 }
 0x2fb   : > { %3305 = vmatprep.subr.mxu0 %v4006_v34 }
 0x2fc   : > { %3306 = vmatpush3.msra.mxu0 %v4006_v34 }
 0x2fd   : > { %3308 = vmatmul.mubr.msk.f32.vlgmr.msra.gmra.mxu0 %vm584_vm0, %v1363_v4 }
 0x2fe   : > { %3325 = vmatprep.mubr.msk.f32.mxu0 %vm994_vm4, %v4082_v50 }
 0x354   : > { %v3280_v31 = vpop.f32.mrf.mxu1 }
 0x356   : > { %v1169_v38 = vpop.f32.mrf.mxu1 }
 0x3ad   : > { %v3269_v8 = vpop.f32.mrf.mxu0 }
 0x3ae   : > { %v1073_v45 = vadd.f32 %v3269_v8, %v4167_v19 }
 0x3af   : > { %v1067_v20 = vpop.f32.mrf.mxu0 }
 0x3b0   : > { %3523 = vrsqrt.f32 %v1073_v45  ;;  %v1068_v24 = vadd.f32 %v1067_v20, %v4171_v21  ;;  %vm1085_vm5 = vcmp.eq.f32.partialorder %v1073_v45, inf  ;;  %v1088_v56 = vand.u32 2147483648, %v1073_v45 }
 0x3b1   : > { %vm1087_vm6 = vcmp.eq.f32.partialorder %v1073_v45, 0.0 }
 0x3b2   : > { %3525 = vrsqrt.f32 %v1068_v24  ;;  %vm1078_vm7 = vcmp.eq.f32.partialorder %v1068_v24, inf  ;;  %v1081_v1 = vand.u32 2147483648, %v1068_v24  ;;  %vm1080_vm8 = vcmp.eq.f32.partialorder %v1068_v24, 0.0 }
 0x3b5   : > { %v3291_v13 = vpop.f32.mrf.mxu0 }
 0x3b6   : > { %v1258_v37 = vadd.f32 %v3291_v13, %v3280_v31 }
 0x3b7   : > { %v1252_v43 = vpop.f32.mrf.mxu0 }
 0x3b8   : > { %v4176_v47 = vadd.f32 %v1258_v37, %v4092_v58  ;;  %v1253_v49 = vadd.f32 %v1252_v43, %v1169_v38 }
 0x3ba   : > { %v4179_v25 = vadd.f32 %v1253_v49, %v4086_v51  ;;  %v1264_v52 = vmul.f32 %v4176_v47, %v4176_v47 }
 0x3bc   : > { %3292 = vmatprep.subr.mxu1 %v1264_v52  ;;  %v1263_v53 = vmul.f32 %v4179_v25, %v4179_v25 }
 0x3bd   : > { %v3524_v54 = vpop.eup %3523  ;;  %3293 = vmatpush3.msra.mxu1 %v1264_v52 }
 0x3be   : > { %v1084_v55 = vmul.f32 %v3524_v54, %v1073_v45  ;;  %3294 = vmatprep.subr.mxu1 %v1263_v53 }
 0x3bf   : > { %3295 = vmatpush3.msra.mxu1 %v1263_v53  ;;  %v3526_v57 = vpop.eup %3525 }
 0x3c0   : > { %v1086_v59 = vsel %vm1085_vm5, %v1073_v45, %v1084_v55  ;;  %3297 = vmatmul.mubr.msk.f32.vlgmr.msra.gmra.mxu1 %vm994_vm4, %v4107_v0  ;;  %3310 = vmatprep.subr.mxu1 %v3957_v30  ;;  %v1077_v62 = vmul.f32 %v3526_v57, %v1068_v24 }
 0x3c1   : > { %v1089_v60 = vsel %vm1087_vm6, %v1088_v56, %v1086_v59  ;;  %3311 = vmatpush3.msra.mxu1 %v3957_v30  ;;  %3318 = vmatprep.mubr.msk.f32.mxu1 %vm584_vm0, %v1444_v5 }
 0x3c2   : > { %v1091_v63 = vmul.f32 %v1089_v60, %v4095_v26  ;;  %3312 = vmatprep.subr.mxu1 %v3979_v40  ;;  %v1079_v27 = vsel %vm1078_vm7, %v1068_v24, %v1077_v62 }
 0x3c3   : > { %3313 = vmatpush3.msra.mxu1 %v3979_v40  ;;  %v1082_v2 = vsel %vm1080_vm8, %v1081_v1, %v1079_v27 }
 0x3c4   : > { %3053 = vst.msk [vmem:[%s4191_s24 + $0x8] sm:$0xff] %vm594_vm1, %v1091_v63  ;;  %3314 = vmatprep.subr.mxu1 %v3992_v33  ;;  %v1090_v4 = vmul.f32 %v1082_v2, %v4098_v61 }
 0x3c5   : > { %3315 = vmatpush3.msra.mxu1 %v3992_v33 }
 0x3c6   : > { %3316 = vmatprep.subr.mxu1 %v4011_v36  ;;  %1092 = vst.msk [vmem:[%s4191_s24] sm:$0xff] %vm594_vm1, %v1090_v4 }
 0x3c7   : > { %3317 = vmatpush3.msra.mxu1 %v4011_v36 }
 0x3c8   : > { %3319 = vmatmul.mubr.msk.f32.vlgmr.msra.gmra.mxu1 %vm584_vm0, %v4133_v6  ;;  %3328 = vmatprep.subr.mxu1 %v3952_v9 }
 0x3c9   : > { %3329 = vmatpush3.msra.mxu1 %v3952_v9  ;;  %3336 = vmatprep.mubr.msk.f32.mxu1 %vm584_vm0, %v4137_v10  ;;  %v3309_v10 = vpop.f32.mrf.mxu0 }
 0x3ca   : > { %3330 = vmatprep.subr.mxu1 %v3974_v32 }
 0x3cb   : > { %3331 = vmatpush3.msra.mxu1 %v3974_v32  ;;  %v1434_v20 = vpop.f32.mrf.mxu0 }
 0x3cc   : > { %3332 = vmatprep.subr.mxu1 %v3997_v28 }
 0x3cd   : > { %3333 = vmatpush3.msra.mxu1 %v3997_v28 }
 0x3ce   : > { %3334 = vmatprep.subr.mxu1 %v4006_v34 }
 0x3cf   : > { %3335 = vmatpush3.msra.mxu1 %v4006_v34 }
 0x3d0   : > { %3337 = vmatmul.mubr.msk.f32.vlgmr.msra.gmra.mxu1 %vm584_vm0, %v4141_v11 }
 0x3d1   : > { %3354 = vmatprep.mubr.msk.f32.mxu1 %vm994_vm4, %v4082_v50 }
 0x480   : > { %v3298_v26 = vpop.f32.mrf.mxu1 }
 0x481   : > { %v1337_v61 = vadd.f32 %v3298_v26, %v4167_v19 }
 0x482   : > { %v1331_v5 = vpop.f32.mrf.mxu1 }
 0x483   : > { %3527 = vrsqrt.f32 %v1337_v61  ;;  %v1332_v6 = vadd.f32 %v1331_v5, %v4171_v21  ;;  %vm1349_vm9 = vcmp.eq.f32.partialorder %v1337_v61, inf  ;;  %v1352_v52 = vand.u32 2147483648, %v1337_v61 }
 0x484   : > { %vm1351_vm10 = vcmp.eq.f32.partialorder %v1337_v61, 0.0 }
 0x485   : > { %3529 = vrsqrt.f32 %v1332_v6  ;;  %vm1342_vm11 = vcmp.eq.f32.partialorder %v1332_v6, inf  ;;  %v1345_v59 = vand.u32 2147483648, %v1332_v6  ;;  %vm1344_vm12 = vcmp.eq.f32.partialorder %v1332_v6, 0.0 }
 0x488   : > { %v3320_v8 = vpop.f32.mrf.mxu1 }
 0x489   : > { %v1523_v45 = vadd.f32 %v3320_v8, %v3309_v10 }
 0x48a   : > { %v1517_v24 = vpop.f32.mrf.mxu1 }
 0x48b   : > { %v4226_v31 = vadd.f32 %v1523_v45, %v4092_v58  ;;  %v1518_v11 = vadd.f32 %v1517_v24, %v1434_v20 }
 0x48d   : > { %v4229_v13 = vadd.f32 %v1518_v11, %v4086_v51  ;;  %v1529_v37 = vmul.f32 %v4226_v31, %v4226_v31 }
 0x48f   : > { %3321 = vmatprep.subr.mxu0 %v1529_v37  ;;  %v1528_v38 = vmul.f32 %v4229_v13, %v4229_v13 }
 0x490   : > { %v3528_v43 = vpop.eup %3527  ;;  %3322 = vmatpush3.msra.mxu0 %v1529_v37 }
 0x491   : > { %v1348_v49 = vmul.f32 %v3528_v43, %v1337_v61  ;;  %3323 = vmatprep.subr.mxu0 %v1528_v38 }
 0x492   : > { %3324 = vmatpush3.msra.mxu0 %v1528_v38  ;;  %v3530_v53 = vpop.eup %3529 }
 0x493   : > { %v1350_v54 = vsel %vm1349_vm9, %v1337_v61, %v1348_v49  ;;  %3326 = vmatmul.mubr.msk.f32.vlgmr.msra.gmra.mxu0 %vm994_vm4, %v4107_v0  ;;  %3339 = vmatprep.subr.mxu0 %v3957_v30  ;;  %v1341_v56 = vmul.f32 %v3530_v53, %v1332_v6 }
 0x494   : > { %v1353_v55 = vsel %vm1351_vm10, %v1352_v52, %v1350_v54  ;;  %3340 = vmatpush3.msra.mxu0 %v3957_v30  ;;  %3347 = vmatprep.mubr.msk.f32.mxu0 %vm584_vm0, %v4135_v22 }
 0x495   : > { %v1355_v57 = vmul.f32 %v1353_v55, %v4176_v47  ;;  %3341 = vmatprep.subr.mxu0 %v3979_v40  ;;  %v1343_v60 = vsel %vm1342_vm11, %v1332_v6, %v1341_v56 }
 0x496   : > { %3342 = vmatpush3.msra.mxu0 %v3979_v40  ;;  %v1346_v62 = vsel %vm1344_vm12, %v1345_v59, %v1343_v60 }
 0x497   : > { %3061 = vst.msk [vmem:[%s4191_s24 + $0x18] sm:$0xff] %vm594_vm1, %v1355_v57  ;;  %3343 = vmatprep.subr.mxu0 %v3992_v33  ;;  %v1354_v63 = vmul.f32 %v1346_v62, %v4179_v25  ;;  %v3338_v25 = vpop.f32.mrf.mxu1 }
 0x498   : > { %3344 = vmatpush3.msra.mxu0 %v3992_v33 }
 0x499   : > { %3345 = vmatprep.subr.mxu0 %v4011_v36  ;;  %3060 = vst.msk [vmem:[%s4191_s24 + $0x10] sm:$0xff] %vm594_vm1, %v1354_v63  ;;  %v1699_v2 = vpop.f32.mrf.mxu1 }
 0x49a   : > { %3346 = vmatpush3.msra.mxu0 %v4011_v36 }
 0x49b   : > { %3348 = vmatmul.mubr.msk.f32.vlgmr.msra.gmra.mxu0 %vm584_vm0, %v4139_v29  ;;  %3357 = vmatprep.subr.mxu0 %v3952_v9 }
 0x49c   : > { %3358 = vmatpush3.msra.mxu0 %v3952_v9  ;;  %3365 = vmatprep.mubr.msk.f32.mxu0 %vm584_vm0, %v4024_v42 }
 0x49d   : > { %3359 = vmatprep.subr.mxu0 %v3974_v32 }
 0x49e   : > { %3360 = vmatpush3.msra.mxu0 %v3974_v32 }
 0x49f   : > { %3361 = vmatprep.subr.mxu0 %v3997_v28 }
 0x4a0   : > { %3362 = vmatpush3.msra.mxu0 %v3997_v28 }
 0x4a1   : > { %3363 = vmatprep.subr.mxu0 %v4006_v34 }
 0x4a2   : > { %3364 = vmatpush3.msra.mxu0 %v4006_v34 }
 0x4a3   : > { %3366 = vmatmul.mubr.msk.f32.vlgmr.msra.gmra.mxu0 %vm584_vm0, %v4049_v23 }
 0x4a4   : > { %3383 = vmatprep.mubr.msk.f32.mxu0 %vm994_vm4, %v4082_v50 }
 0x553   : > { %v3327_v22 = vpop.f32.mrf.mxu0 }
 0x554   : > { %v1602_v42 = vadd.f32 %v3327_v22, %v4167_v19 }
 0x555   : > { %v1596_v29 = vpop.f32.mrf.mxu0 }
 0x556   : > { %3531 = vrsqrt.f32 %v1602_v42  ;;  %v1597_v47 = vadd.f32 %v1596_v29, %v4171_v21  ;;  %vm1614_vm13 = vcmp.eq.f32.partialorder %v1602_v42, inf  ;;  %v1617_v45 = vand.u32 2147483648, %v1602_v42 }
 0x557   : > { %vm1616_vm14 = vcmp.eq.f32.partialorder %v1602_v42, 0.0 }
 0x558   : > { %3533 = vrsqrt.f32 %v1597_v47  ;;  %vm1607_vm15 = vcmp.eq.f32.partialorder %v1597_v47, inf  ;;  %v1610_v43 = vand.u32 2147483648, %v1597_v47  ;;  %vm1609_vm2 = vcmp.eq.f32.partialorder %v1597_v47, 0.0 }
 0x55b   : > { %v3349_v1 = vpop.f32.mrf.mxu0 }
 0x55c   : > { %v1788_v27 = vadd.f32 %v3349_v1, %v3338_v25 }
 0x55d   : > { %v1782_v4 = vpop.f32.mrf.mxu0 }
 0x55e   : > { %v4272_v26 = vadd.f32 %v1788_v27, %v4092_v58  ;;  %v1783_v23 = vadd.f32 %v1782_v4, %v1699_v2 }
 0x560   : > { %v4275_v61 = vadd.f32 %v1783_v23, %v4086_v51  ;;  %v1794_v5 = vmul.f32 %v4272_v26, %v4272_v26 }
 0x562   : > { %3350 = vmatprep.subr.mxu1 %v1794_v5  ;;  %v1793_v6 = vmul.f32 %v4275_v61, %v4275_v61 }
 0x563   : > { %v3532_v10 = vpop.eup %3531  ;;  %3351 = vmatpush3.msra.mxu1 %v1794_v5 }
 0x564   : > { %v1613_v8 = vmul.f32 %v3532_v10, %v1602_v42  ;;  %3352 = vmatprep.subr.mxu1 %v1793_v6 }
 0x565   : > { %3353 = vmatpush3.msra.mxu1 %v1793_v6  ;;  %v3534_v20 = vpop.eup %3533 }
 0x566   : > { %v1615_v24 = vsel %vm1614_vm13, %v1602_v42, %v1613_v8  ;;  %3355 = vmatmul.mubr.msk.f32.vlgmr.msra.gmra.mxu1 %vm994_vm4, %v4107_v0  ;;  %3368 = vmatprep.subr.mxu1 %v3957_v30  ;;  %v1606_v37 = vmul.f32 %v3534_v20, %v1597_v47 }
 0x567   : > { %v1618_v11 = vsel %vm1616_vm14, %v1617_v45, %v1615_v24  ;;  %3369 = vmatpush3.msra.mxu1 %v3957_v30  ;;  %3376 = vmatprep.mubr.msk.f32.mxu1 %vm584_vm0, %v4022_v41 }
 0x568   : > { %v1620_v38 = vmul.f32 %v1618_v11, %v4226_v31  ;;  %3370 = vmatprep.subr.mxu1 %v3979_v40  ;;  %v1608_v49 = vsel %vm1607_vm15, %v1597_v47, %v1606_v37 }
 0x569   : > { %3371 = vmatpush3.msra.mxu1 %v3979_v40  ;;  %v1611_v52 = vsel %vm1609_vm2, %v1610_v43, %v1608_v49 }
 0x56a   : > { %3069 = vst.msk [vmem:[%s4191_s24 + $0x28] sm:$0xff] %vm594_vm1, %v1620_v38  ;;  %3372 = vmatprep.subr.mxu1 %v3992_v33  ;;  %v1619_v53 = vmul.f32 %v1611_v52, %v4229_v13  ;;  %v3367_v13 = vpop.f32.mrf.mxu0 }
 0x56b   : > { %3373 = vmatpush3.msra.mxu1 %v3992_v33 }
 0x56c   : > { %3374 = vmatprep.subr.mxu1 %v4011_v36  ;;  %3068 = vst.msk [vmem:[%s4191_s24 + $0x20] sm:$0xff] %vm594_vm1, %v1619_v53  ;;  %v1962_v56 = vpop.f32.mrf.mxu0 }
 0x56d   : > { %3375 = vmatpush3.msra.mxu1 %v4011_v36 }
 0x56e   : > { %3377 = vmatmul.mubr.msk.f32.vlgmr.msra.gmra.mxu1 %vm584_vm0, %v4051_v48  ;;  %3386 = vmatprep.subr.mxu1 %v3952_v9 }
 0x56f   : > { %3387 = vmatpush3.msra.mxu1 %v3952_v9  ;;  %3394 = vmatprep.mubr.msk.f32.mxu1 %vm584_vm0, %v4145_v14 }
 0x570   : > { %3388 = vmatprep.subr.mxu1 %v3974_v32 }
 0x571   : > { %3389 = vmatpush3.msra.mxu1 %v3974_v32 }
 0x572   : > { %3390 = vmatprep.subr.mxu1 %v3997_v28 }
 0x573   : > { %3391 = vmatpush3.msra.mxu1 %v3997_v28 }
 0x574   : > { %3392 = vmatprep.subr.mxu1 %v4006_v34 }
 0x575   : > { %3393 = vmatpush3.msra.mxu1 %v4006_v34 }
 0x576   : > { %3395 = vmatmul.mubr.msk.f32.vlgmr.msra.gmra.mxu1 %vm584_vm0, %v4149_v39 }
 0x577   : > { %3412 = vmatprep.mubr.msk.f32.mxu1 %vm994_vm4, %v4082_v50 }
 0x626   : > { %v3356_v41 = vpop.f32.mrf.mxu1 }
 0x627   : > { %v1867_v48 = vadd.f32 %v3356_v41, %v4167_v19 }
 0x628   : > { %v1861_v14 = vpop.f32.mrf.mxu1 }
 0x629   : > { %3535 = vrsqrt.f32 %v1867_v48  ;;  %v1862_v31 = vadd.f32 %v1861_v14, %v4171_v21  ;;  %vm1879_vm3 = vcmp.eq.f32.partialorder %v1867_v48, inf  ;;  %v1882_v29 = vand.u32 2147483648, %v1867_v48 }
 0x62a   : > { %vm1881_vm5 = vcmp.eq.f32.partialorder %v1867_v48, 0.0 }
 0x62b   : > { %3537 = vrsqrt.f32 %v1862_v31  ;;  %vm1872_vm6 = vcmp.eq.f32.partialorder %v1862_v31, inf  ;;  %v1875_v4 = vand.u32 2147483648, %v1862_v31  ;;  %vm1874_vm7 = vcmp.eq.f32.partialorder %v1862_v31, 0.0 }
 0x62e   : > { %v3378_v54 = vpop.f32.mrf.mxu1 }
 0x62f   : > { %v2049_v55 = vadd.f32 %v3378_v54, %v3367_v13 }
 0x630   : > { %v2043_v57 = vpop.f32.mrf.mxu1 }
 0x631   : > { %v4318_v59 = vadd.f32 %v2049_v55, %v4092_v58  ;;  %v2044_v39 = vadd.f32 %v2043_v57, %v1962_v56 }
 0x633   : > { %v4321_v60 = vadd.f32 %v2044_v39, %v4086_v51  ;;  %v2055_v62 = vmul.f32 %v4318_v59, %v4318_v59 }
 0x635   : > { %3379 = vmatprep.subr.mxu0 %v2055_v62  ;;  %v2054_v63 = vmul.f32 %v4321_v60, %v4321_v60 }
 0x636   : > { %v3536_v22 = vpop.eup %3535  ;;  %3380 = vmatpush3.msra.mxu0 %v2055_v62 }
 0x637   : > { %v1878_v42 = vmul.f32 %v3536_v22, %v1867_v48  ;;  %3381 = vmatprep.subr.mxu0 %v2054_v63 }
 0x638   : > { %3382 = vmatpush3.msra.mxu0 %v2054_v63  ;;  %v3538_v47 = vpop.eup %3537 }
 0x639   : > { %v1880_v25 = vsel %vm1879_vm3, %v1867_v48, %v1878_v42  ;;  %3384 = vmatmul.mubr.msk.f32.vlgmr.msra.gmra.mxu0 %vm994_vm4, %v4107_v0  ;;  %3397 = vmatprep.subr.mxu0 %v3957_v30  ;;  %v1871_v27 = vmul.f32 %v3538_v47, %v1862_v31 }
 0x63a   : > { %v1883_v1 = vsel %vm1881_vm5, %v1882_v29, %v1880_v25  ;;  %3398 = vmatpush3.msra.mxu0 %v3957_v30  ;;  %3405 = vmatprep.mubr.msk.f32.mxu0 %vm584_vm0, %v4143_v12 }
 0x63b   : > { %v1885_v2 = vmul.f32 %v1883_v1, %v4272_v26  ;;  %3399 = vmatprep.subr.mxu0 %v3979_v40  ;;  %v1873_v23 = vsel %vm1872_vm6, %v1862_v31, %v1871_v27 }
 0x63c   : > { %3400 = vmatpush3.msra.mxu0 %v3979_v40  ;;  %v1876_v5 = vsel %vm1874_vm7, %v1875_v4, %v1873_v23 }
 0x63d   : > { %3077 = vst.msk [vmem:[%s4191_s24 + $0x38] sm:$0xff] %vm594_vm1, %v1885_v2  ;;  %3401 = vmatprep.subr.mxu0 %v3992_v33  ;;  %v1884_v6 = vmul.f32 %v1876_v5, %v4275_v61  ;;  %v3396_v61 = vpop.f32.mrf.mxu1 }
 0x63e   : > { %3402 = vmatpush3.msra.mxu0 %v3992_v33 }
 0x63f   : > { %3403 = vmatprep.subr.mxu0 %v4011_v36  ;;  %3076 = vst.msk [vmem:[%s4191_s24 + $0x30] sm:$0xff] %vm594_vm1, %v1884_v6  ;;  %v2225_v45 = vpop.f32.mrf.mxu1 }
 0x640   : > { %3404 = vmatpush3.msra.mxu0 %v4011_v36 }
 0x641   : > { %3406 = vmatmul.mubr.msk.f32.vlgmr.msra.gmra.mxu0 %vm584_vm0, %v4147_v15  ;;  %3415 = vmatprep.subr.mxu0 %v3952_v9 }
 0x642   : > { %3416 = vmatpush3.msra.mxu0 %v3952_v9  ;;  %3423 = vmatprep.mubr.msk.f32.mxu0 %vm584_vm0, %v4153_v46 }
 0x643   : > { %3417 = vmatprep.subr.mxu0 %v3974_v32 }
 0x644   : > { %3418 = vmatpush3.msra.mxu0 %v3974_v32 }
 0x645   : > { %3419 = vmatprep.subr.mxu0 %v3997_v28 }
 0x646   : > { %3420 = vmatpush3.msra.mxu0 %v3997_v28 }
 0x647   : > { %3421 = vmatprep.subr.mxu0 %v4006_v34 }
 0x648   : > { %3422 = vmatpush3.msra.mxu0 %v4006_v34 }
 0x649   : > { %3424 = vmatmul.mubr.msk.f32.vlgmr.msra.gmra.mxu0 %vm584_vm0, %v4157_v17 }
 0x64a   : > { %3441 = vmatprep.mubr.msk.f32.mxu0 %vm994_vm4, %v4082_v50 }
 0x6f9   : > { %v3385_v12 = vpop.f32.mrf.mxu0 }
 0x6fa   : > { %v2128_v15 = vadd.f32 %v3385_v12, %v4167_v19 }
 0x6fb   : > { %v2122_v46 = vpop.f32.mrf.mxu0 }
 0x6fc   : > { %3539 = vrsqrt.f32 %v2128_v15  ;;  %v2123_v26 = vadd.f32 %v2122_v46, %v4171_v21  ;;  %vm2140_vm8 = vcmp.eq.f32.partialorder %v2128_v15, inf  ;;  %v2143_v52 = vand.u32 2147483648, %v2128_v15 }
 0x6fd   : > { %vm2142_vm9 = vcmp.eq.f32.partialorder %v2128_v15, 0.0 }
 0x6fe   : > { %3541 = vrsqrt.f32 %v2123_v26  ;;  %vm2133_vm10 = vcmp.eq.f32.partialorder %v2123_v26, inf  ;;  %v2136_v13 = vand.u32 2147483648, %v2123_v26  ;;  %vm2135_vm11 = vcmp.eq.f32.partialorder %v2123_v26, 0.0 }
 0x701   : > { %v3407_v10 = vpop.f32.mrf.mxu0 }
 0x702   : > { %v2314_v8 = vadd.f32 %v3407_v10, %v3396_v61 }
 0x703   : > { %v2308_v20 = vpop.f32.mrf.mxu0 }
 0x704   : > { %v4364_v24 = vadd.f32 %v2314_v8, %v4092_v58  ;;  %v2309_v17 = vadd.f32 %v2308_v20, %v2225_v45 }
 0x706   : > { %v4367_v11 = vadd.f32 %v2309_v17, %v4086_v51  ;;  %v2320_v37 = vmul.f32 %v4364_v24, %v4364_v24 }
 0x708   : > { %3408 = vmatprep.subr.mxu1 %v2320_v37  ;;  %v2319_v38 = vmul.f32 %v4367_v11, %v4367_v11 }
 0x709   : > { %v3540_v43 = vpop.eup %3539  ;;  %3409 = vmatpush3.msra.mxu1 %v2320_v37 }
 0x70a   : > { %v2139_v49 = vmul.f32 %v3540_v43, %v2128_v15  ;;  %3410 = vmatprep.subr.mxu1 %v2319_v38 }
 0x70b   : > { %3411 = vmatpush3.msra.mxu1 %v2319_v38  ;;  %v3542_v53 = vpop.eup %3541 }
 0x70c   : > { %v2141_v41 = vsel %vm2140_vm8, %v2128_v15, %v2139_v49  ;;  %3413 = vmatmul.mubr.msk.f32.vlgmr.msra.gmra.mxu1 %vm994_vm4, %v4107_v0  ;;  %3426 = vmatprep.subr.mxu1 %v3957_v30  ;;  %v2132_v14 = vmul.f32 %v3542_v53, %v2123_v26 }
 0x70d   : > { %v2144_v48 = vsel %vm2142_vm9, %v2143_v52, %v2141_v41  ;;  %3427 = vmatpush3.msra.mxu1 %v3957_v30  ;;  %3434 = vmatprep.mubr.msk.f32.mxu1 %vm584_vm0, %v4151_v35 }
 0x70e   : > { %v2146_v31 = vmul.f32 %v2144_v48, %v4318_v59  ;;  %3428 = vmatprep.subr.mxu1 %v3979_v40  ;;  %v2134_v54 = vsel %vm2133_vm10, %v2123_v26, %v2132_v14 }
 0x70f   : > { %3429 = vmatpush3.msra.mxu1 %v3979_v40  ;;  %v2137_v55 = vsel %vm2135_vm11, %v2136_v13, %v2134_v54 }
 0x710   : > { %3085 = vst.msk [vmem:[%s4191_s24 + $0x48] sm:$0xff] %vm594_vm1, %v2146_v31  ;;  %3430 = vmatprep.subr.mxu1 %v3992_v33  ;;  %v2145_v56 = vmul.f32 %v2137_v55, %v4321_v60 }
 0x711   : > { %3431 = vmatpush3.msra.mxu1 %v3992_v33 }
 0x712   : > { %3432 = vmatprep.subr.mxu1 %v4011_v36  ;;  %3084 = vst.msk [vmem:[%s4191_s24 + $0x40] sm:$0xff] %vm594_vm1, %v2145_v56 }
 0x713   : > { %3433 = vmatpush3.msra.mxu1 %v4011_v36 }
 0x714   : > { %3435 = vmatmul.mubr.msk.f32.vlgmr.msra.gmra.mxu1 %vm584_vm0, %v4155_v16  ;;  %3444 = vmatprep.subr.mxu1 %v3952_v9 }
 0x715   : > { %3445 = vmatpush3.msra.mxu1 %v3952_v9  ;;  %3452 = vmatprep.mubr.msk.f32.mxu1 %vm584_vm0, %v4161_v44  ;;  %v3425_v44 = vpop.f32.mrf.mxu0 }
 0x716   : > { %3446 = vmatprep.subr.mxu1 %v3974_v32 }
 0x717   : > { %3447 = vmatpush3.msra.mxu1 %v3974_v32  ;;  %v2490_v59 = vpop.f32.mrf.mxu0 }
 0x718   : > { %3448 = vmatprep.subr.mxu1 %v3997_v28 }
 0x719   : > { %3449 = vmatpush3.msra.mxu1 %v3997_v28 }
 0x71a   : > { %3450 = vmatprep.subr.mxu1 %v4006_v34 }
 0x71b   : > { %3451 = vmatpush3.msra.mxu1 %v4006_v34 }
 0x71c   : > { %3453 = vmatmul.mubr.msk.f32.vlgmr.msra.gmra.mxu1 %vm584_vm0, %v4165_v18 }
 0x71d   : > { %3470 = vmatprep.mubr.msk.f32.mxu1 %vm994_vm4, %v4082_v50 }
 0x7cc   : > { %v3414_v9 = vpop.f32.mrf.mxu1 }
 0x7cd   : > { %v2393_v35 = vadd.f32 %v3414_v9, %v4167_v19 }
 0x7ce   : > { %v2387_v16 = vpop.f32.mrf.mxu1 }
 0x7cf   : > { %3543 = vrsqrt.f32 %v2393_v35  ;;  %v2388_v32 = vadd.f32 %v2387_v16, %v4171_v21  ;;  %vm2405_vm12 = vcmp.eq.f32.partialorder %v2393_v35, inf  ;;  %v2408_v42 = vand.u32 2147483648, %v2393_v35 }
 0x7d0   : > { %vm2407_vm13 = vcmp.eq.f32.partialorder %v2393_v35, 0.0 }
 0x7d1   : > { %3545 = vrsqrt.f32 %v2388_v32  ;;  %vm2398_vm14 = vcmp.eq.f32.partialorder %v2388_v32, inf  ;;  %v2401_v2 = vand.u32 2147483648, %v2388_v32  ;;  %vm2400_vm15 = vcmp.eq.f32.partialorder %v2388_v32, 0.0 }
 0x7d4   : > { %v3436_v28 = vpop.f32.mrf.mxu1 }
 0x7d5   : > { %v2579_v57 = vadd.f32 %v3436_v28, %v3425_v44 }
 0x7d6   : > { %v2573_v39 = vpop.f32.mrf.mxu1 }
 0x7d7   : > { %v4410_v34 = vadd.f32 %v2579_v57, %v4092_v58  ;;  %v2574_v18 = vadd.f32 %v2573_v39, %v2490_v59 }
 0x7d9   : > { %v4413_v60 = vadd.f32 %v2574_v18, %v4086_v51  ;;  %v2585_v50 = vmul.f32 %v4410_v34, %v4410_v34 }
 0x7db   : > { %3437 = vmatprep.subr.mxu0 %v2585_v50  ;;  %v2584_v62 = vmul.f32 %v4413_v60, %v4413_v60 }
 0x7dc   : > { %v3544_v63 = vpop.eup %3543  ;;  %3438 = vmatpush3.msra.mxu0 %v2585_v50  ;;  %v3454_v12 = vpop.f32.mrf.mxu1 }
 0x7dd   : > { %v2404_v22 = vmul.f32 %v3544_v63, %v2393_v35  ;;  %3439 = vmatprep.subr.mxu0 %v2584_v62 }
 0x7de   : > { %3440 = vmatpush3.msra.mxu0 %v2584_v62  ;;  %v3546_v29 = vpop.eup %3545  ;;  %v2755_v46 = vpop.f32.mrf.mxu1 }
 0x7df   : > { %v2406_v47 = vsel %vm2405_vm12, %v2393_v35, %v2404_v22  ;;  %3442 = vmatmul.mubr.msk.f32.vlgmr.msra.gmra.mxu0 %vm994_vm4, %v4107_v0  ;;  %3455 = vmatprep.subr.mxu0 %v3957_v30  ;;  %v2397_v1 = vmul.f32 %v3546_v29, %v2388_v32 }
 0x7e0   : > { %v2409_v25 = vsel %vm2407_vm13, %v2408_v42, %v2406_v47  ;;  %3456 = vmatpush3.msra.mxu0 %v3957_v30  ;;  %3463 = vmatprep.mubr.msk.f32.mxu0 %vm584_vm0, %v4159_v7 }
 0x7e1   : > { %v2411_v27 = vmul.f32 %v2409_v25, %v4364_v24  ;;  %3457 = vmatprep.subr.mxu0 %v3979_v40  ;;  %v2399_v4 = vsel %vm2398_vm14, %v2388_v32, %v2397_v1 }
 0x7e2   : > { %3458 = vmatpush3.msra.mxu0 %v3979_v40  ;;  %v2402_v23 = vsel %vm2400_vm15, %v2401_v2, %v2399_v4 }
 0x7e3   : > { %3093 = vst.msk [vmem:[%s4191_s24 + $0x58] sm:$0xff] %vm594_vm1, %v2411_v27  ;;  %3459 = vmatprep.subr.mxu0 %v3992_v33  ;;  %v2410_v30 = vmul.f32 %v2402_v23, %v4367_v11 }
 0x7e4   : > { %3460 = vmatpush3.msra.mxu0 %v3992_v33 }
 0x7e5   : > { %3461 = vmatprep.subr.mxu0 %v4011_v36  ;;  %3092 = vst.msk [vmem:[%s4191_s24 + $0x50] sm:$0xff] %vm594_vm1, %v2410_v30 }
 0x7e6   : > { %3462 = vmatpush3.msra.mxu0 %v4011_v36 }
 0x7e7   : > { %3464 = vmatmul.mubr.msk.f32.vlgmr.msra.gmra.mxu0 %vm584_vm0, %v4163_v3 }
 0x89f   : > { %v3443_v7 = vpop.f32.mrf.mxu0 }
 0x8a0   : > { %v2658_v40 = vadd.f32 %v3443_v7, %v4167_v19 }
 0x8a1   : > { %v2652_v5 = vpop.f32.mrf.mxu0 }
 0x8a2   : > { %3547 = vrsqrt.f32 %v2658_v40  ;;  %v2653_v6 = vadd.f32 %v2652_v5, %v4171_v21  ;;  %vm2670_vm0 = vcmp.eq.f32.partialorder %v2658_v40, inf  ;;  %v2673_v24 = vand.u32 2147483648, %v2658_v40 }
 0x8a3   : > { %vm2672_vm2 = vcmp.eq.f32.partialorder %v2658_v40, 0.0 }
 0x8a4   : > { %3549 = vrsqrt.f32 %v2653_v6  ;;  %vm2663_vm3 = vcmp.eq.f32.partialorder %v2653_v6, inf  ;;  %v2666_v38 = vand.u32 2147483648, %v2653_v6  ;;  %vm2665_vm5 = vcmp.eq.f32.partialorder %v2653_v6, 0.0 }
 0x8a7   : > { %v3465_v15 = vpop.f32.mrf.mxu0 }
 0x8a8   : > { %v2844_v33 = vadd.f32 %v3465_v15, %v3454_v12 }
 0x8a9   : > { %v2838_v26 = vpop.f32.mrf.mxu0 }
 0x8aa   : > { %v2848_v61 = vadd.f32 %v2844_v33, %v4092_v58  ;;  %v2839_v10 = vadd.f32 %v2838_v26, %v2755_v46 }
 0x8ac   : > { %v2847_v36 = vadd.f32 %v2839_v10, %v4086_v51  ;;  %v2850_v8 = vmul.f32 %v2848_v61, %v2848_v61 }
 0x8ae   : > { %3466 = vmatprep.subr.mxu1 %v2850_v8  ;;  %v2849_v3 = vmul.f32 %v2847_v36, %v2847_v36 }
 0x8af   : > { %v3548_v45 = vpop.eup %3547  ;;  %3467 = vmatpush3.msra.mxu1 %v2850_v8 }
 0x8b0   : > { %v2669_v20 = vmul.f32 %v3548_v45, %v2658_v40  ;;  %3468 = vmatprep.subr.mxu1 %v2849_v3 }
 0x8b1   : > { %3469 = vmatpush3.msra.mxu1 %v2849_v3  ;;  %v3550_v17 = vpop.eup %3549 }
 0x8b2   : > { %v2671_v11 = vsel %vm2670_vm0, %v2658_v40, %v2669_v20  ;;  %3471 = vmatmul.mubr.msk.f32.vlgmr.msra.gmra.mxu1 %vm994_vm4, %v4107_v0  ;;  %v2662_v51 = vmul.f32 %v3550_v17, %v2653_v6 }
 0x8b3   : > { %v2674_v58 = vsel %vm2672_vm2, %v2673_v24, %v2671_v11 }
 0x8b4   : > { %v2676_v37 = vmul.f32 %v2674_v58, %v4410_v34  ;;  %v2664_v43 = vsel %vm2663_vm3, %v2653_v6, %v2662_v51 }
 0x8b5   : > { %v2667_v49 = vsel %vm2665_vm5, %v2666_v38, %v2664_v43 }
 0x8b6   : > { %3101 = vst.msk [vmem:[%s4191_s24 + $0x68] sm:$0xff] %vm594_vm1, %v2676_v37  ;;  %v2675_v52 = vmul.f32 %v2667_v49, %v4413_v60 }
 0x8b8   : > { %3100 = vst.msk [vmem:[%s4191_s24 + $0x60] sm:$0xff] %vm594_vm1, %v2675_v52 }
 0x972   : > { %v3472_v53 = vpop.f32.mrf.mxu1 }
 0x973   : > { %v2923_v41 = vadd.f32 %v3472_v53, %v4167_v19 }
 0x974   : > { %v2917_v48 = vpop.f32.mrf.mxu1 }
 0x975   : > { %3551 = vrsqrt.f32 %v2923_v41  ;;  %v2918_v0 = vadd.f32 %v2917_v48, %v4171_v21  ;;  %vm2935_vm4 = vcmp.eq.f32.partialorder %v2923_v41, inf  ;;  %v2938_v13 = vand.u32 2147483648, %v2923_v41 }
 0x976   : > { %vm2937_vm6 = vcmp.eq.f32.partialorder %v2923_v41, 0.0 }
 0x977   : > { %3553 = vrsqrt.f32 %v2918_v0  ;;  %vm2928_vm7 = vcmp.eq.f32.partialorder %v2918_v0, inf  ;;  %v2931_v16 = vand.u32 2147483648, %v2918_v0  ;;  %vm2930_vm8 = vcmp.eq.f32.partialorder %v2918_v0, 0.0 }
 0x982   : > { %v3552_v14 = vpop.eup %3551 }
 0x983   : > { %v2934_v31 = vmul.f32 %v3552_v14, %v2923_v41 }
 0x984   : > { %v3554_v54 = vpop.eup %3553 }
 0x985   : > { %v2936_v55 = vsel %vm2935_vm4, %v2923_v41, %v2934_v31  ;;  %v2927_v9 = vmul.f32 %v3554_v54, %v2918_v0 }
 0x986   : > { %v2939_v56 = vsel %vm2937_vm6, %v2938_v13, %v2936_v55 }
 0x987   : > { %v2941_v35 = vmul.f32 %v2939_v56, %v2848_v61  ;;  %v2929_v19 = vsel %vm2928_vm7, %v2918_v0, %v2927_v9 }
 0x988   : > { %v2932_v21 = vsel %vm2930_vm8, %v2931_v16, %v2929_v19 }
 0x989   : > { %3109 = vst.msk [vmem:[%s4191_s24 + $0x78] sm:$0xff] %vm594_vm1, %v2941_v35  ;;  %v2940_v32 = vmul.f32 %v2932_v21, %v2847_v36 }
 0x98b   : > { %3108 = vst.msk [vmem:[%s4191_s24 + $0x70] sm:$0xff] %vm594_vm1, %v2940_v32 }
 0x98c PF: > { %s18_s9 = sadd.s32 1, %s3593_s9   ;;  %s4481_s27 = smov %s3585_s29 }
 0x98d   : > { %p15_p7 = scmp.ge.s32.totalorder %s18_s9, 10   ;;  %s4482_s28 = smov %s3589_s30 }
 0x98e   : > { %s4483_s29 = smov %s4486_s10  ;;  %s4484_s30 = smov %s4490_s11 }
 0x98f   :  { %17 = sbr.rel (!%p15_p7) target bundleno = 3 (0x3), region = 98 }

// kernel: image_synthesis_forward.5
= control target key start
LH: loop header
LB: loop body
LE: loop exit
PB: predicated region body
PF: predicated region fallthrough
CT: control target
= control target key end

     0   :  { %s3650_s27 = smov 0   ;;  %s3652_s28 = smov 0   ;;  %s4362_s0 = inlined_call_operand.vmem [shape: f32[2,18,8,18], index: 0, kind: input, shape index: {}]   ;;  %s4363_s1 = inlined_call_operand.vmem [shape: f32[16,72], index: 1, kind: input, shape index: {}]   ;;  %s4364_s2 = inlined_call_operand.vmem [shape: f32[16,72], index: 2, kind: input, shape index: {}]   ;;  %s4365_s3 = inlined_call_operand.vmem [shape: f32[16,1], index: 3, kind: input, shape index: {}]   ;;  %s4366_s4 = inlined_call_operand.vmem [shape: f32[16,1], index: 4, kind: input, shape index: {}]   ;;  %s4367_s5 = inlined_call_operand.vmem [shape: f32[16,16], index: 5, kind: input, shape index: {}]   ;;  %s4368_s6 = inlined_call_operand.vmem [shape: f32[16,32], index: 6, kind: input, shape index: {}]   ;;  %s4369_s7 = inlined_call_operand.vmem [shape: f32[16,32], index: 7, kind: input, shape index: {}]   ;;  %s4370_s8 = inlined_call_operand.vmem [shape: f32[2,32,8,32], index: 8, kind: output, shape index: {}]  }
   0x1   :  { %s3654_s29 = smov 0   ;;  %s3656_s30 = smov 0  }
   0x2   :  { %s3658_s9 = smov 0  }
   0x3 LB: > { %s27_s10 = sadd.s32 1, %s3585_s29  ;;  %s30_s11 = sadd.s32 1, %s3589_s30  ;;  %s3593_s9 = sphi %s3658_s9, %s18_s9   ;;  %s3589_s30 = sphi %s3656_s30, %s4374_s30   ;;  %s3585_s29 = sphi %s3654_s29, %s4373_s29   ;;  %s3581_s28 = sphi %s3652_s28, %s4372_s28   ;;  %s3577_s27 = sphi %s3650_s27, %s4371_s27  }
   0x4   : > { %p28_p0 = scmp.ge.s32.totalorder %s27_s10, 2  ;;  %p3065_p1 = scmp.ge.s32.totalorder %s3593_s9, 1 }
   0x5   : > { %p276_p2 = scmp.lt.s32.totalorder %s3593_s9, 5 }
   0x6   : > { %s4376_s10 = smov (%p28_p0, %s27_s10), 0  ;;  %s4378_s11 = smov (!%p28_p0, %s30_s11), %s3589_s30 }
   0x7   : > { %p277_p3 = pnand %p3065_p1, %p276_p2  ;;  %p32_p4 = scmp.ge.s32.totalorder %s4378_s11, 2 }
   0x8   : > { %p314_p5 = scmp.lt.s32.totalorder (!%p277_p3), %s3581_s28, 1  ;;  %s3141_s13 = sshll.u32 (!%p277_p3), %s3577_s27, 6 }
   0x9   : > { %s4380_s11 = smov (%p32_p4, %s4378_s11), 0  ;;  %280 = sbr.rel (%p277_p3) target bundleno = 2440 (0x988), region = 52 }
   0xa   : > { %s3595_s18 = smov (!%p277_p3), 126   ;;  %s3596_s19 = smov (!%p277_p3), 127  }
   0xb   : > { %s3597_s20 = smov (!%p277_p3), 16   ;;  %s3598_s21 = smov (!%p277_p3), 32  }
   0xc   : > { %s3599_s22 = smov (!%p277_p3), 48   ;;  %s3600_s23 = smov (!%p277_p3), 64  }
   0xd   : > { %s3601_s24 = smov (!%p277_p3), 80   ;;  %s3602_s25 = smov (!%p277_p3), 96  }
   0xe   : > { %s4382_s28 = smov (!%p314_p5, %s3581_s28), 1  ;;  %s3603_s26 = smov 112   ;;  %vm601_vm0 = vcmask 130048   ;;  %vm611_vm1 = vcmask 261120   ;;  %v342_v35 = vld [vmem:[%s4363_s1] sm:$0xff]  ;;  %vm671_vm2 = vcmask 588800  }
   0xf   : > { %s3470_s12 = smul.u32 144, %s4382_s28  ;;  %v344_v36 = vld [vmem:[%s4364_s2] sm:$0xff]  ;;  %3278 = vmatprep.mubr.msk.f32.mxu0 %vm671_vm2, %v342_v35  ;;  %v3604_v37 = vmov 0   ;;  %v347_v39 = vld [vmem:[%s4365_s3 + $0x8] sm:$0xff]  ;;  %vm631_vm3 = vcmask 523264   ;;  %vm621_vm4 = vcmask 392192  }
  0x10   : > { %3299 = vmatprep.mubr.msk.f32.mxu1 %vm671_vm2, %v344_v36  ;;  %3522 = vset.pattern.permute.xlu0 %v3604_v37  ;;  %v346_v43 = vld [vmem:[%s4365_s3] sm:$0xff]  ;;  %vm641_vm5 = vcmask 654336   ;;  %vm651_vm6 = vcmask 785408   ;;  %vm661_vm7 = vcmask 916480  }
  0x11   : > { %s318_s16 = scalar_lea.vmem %s4362_s0, %s3470_s12  ;;  %3521 = vset.pattern.permute.xlu1 %v3604_v37 }
  0x12   : > { %s3689_s17 = scalar_lea.vmem %s318_s16, %s3141_s13 }
  0x13   : > { %v3692_v0 = vld [vmem:[%s3689_s17 + $0x18] sm:$0xff]  ;;  %v3695_v1 = vld [vmem:[%s3689_s17 + $0x10] sm:$0xff]  ;;  %v3700_v2 = vld [vmem:[%s3689_s17 + $0x20] sm:$0xff] }
  0x14   : > { %380 = vrot.lane.b32.xlu0 %v3692_v0, %s3595_s18  ;;  %372 = vrot.lane.b32.xlu1 %v3695_v1, %s3595_s18  ;;  %v3703_v3 = vld [vmem:[%s3689_s17 + $0x28] sm:$0xff]  ;;  %v3708_v4 = vld [vmem:[%s3689_s17 + $0x30] sm:$0xff] }
  0x15   : > { %v3711_v5 = vld [vmem:[%s3689_s17 + $0x8] sm:$0xff]  ;;  %v3716_v6 = vld [vmem:[%s3689_s17 + $0x38] sm:$0xff]  ;;  %v3719_v7 = vld [vmem:[%s3689_s17 + $0x40] sm:$0xff] }
  0x16   : > { %v3724_v8 = vld [vmem:[%s3689_s17 + $0x48] sm:$0xff]  ;;  %v3737_v9 = vld [vmem:[%s3689_s17] sm:$0xff]  ;;  %s3067_s17 = sshll.u32 %s3577_s27, 4  ;;  %s3068_s27 = sshll.u32 %s4382_s28, 5 }
  0x17   : > { %p322_p6 = scmp.lt.s32.totalorder %s3067_s17, 31 }
  0x18   : > { %385 = vrot.lane.b32.xlu0 %v3700_v2, %s3595_s18  ;;  %390 = vrot.lane.b32.xlu1 %v3703_v3, %s3595_s18 }
  0x19   : > { %s4384_s17 = smov (!%p322_p6, %s3067_s17), 31 }
  0x1c   : > { %395 = vrot.lane.b32.xlu0 %v3708_v4, %s3595_s18  ;;  %370 = vrot.lane.b32.xlu1 %v3711_v5, %s3595_s18 }
  0x20   : > { %400 = vrot.lane.b32.xlu0 %v3716_v6, %s3595_s18  ;;  %405 = vrot.lane.b32.xlu1 %v3719_v7, %s3595_s18 }
  0x24   : > { %378 = vrot.lane.b32.xlu0 %v3692_v0, %s3596_s19  ;;  %410 = vrot.lane.b32.xlu1 %v3724_v8, %s3595_s18 }
  0x28   : > { %383 = vrot.lane.b32.xlu0 %v3700_v2, %s3596_s19  ;;  %363 = vrot.lane.b32.xlu1 %v3695_v1, %s3596_s19 }
  0x2c   : > { %388 = vrot.lane.b32.xlu0 %v3703_v3, %s3596_s19  ;;  %393 = vrot.lane.b32.xlu1 %v3708_v4, %s3596_s19 }
  0x30   : > { %361 = vrot.lane.b32.xlu0 %v3711_v5, %s3596_s19  ;;  %398 = vrot.lane.b32.xlu1 %v3716_v6, %s3596_s19 }
  0x34   : > { %403 = vrot.lane.b32.xlu0 %v3719_v7, %s3596_s19  ;;  %408 = vrot.lane.b32.xlu1 %v3724_v8, %s3596_s19 }
  0x38   : > { %359 = vrot.lane.b32.xlu1 %v3737_v9, %s3596_s19  ;;  %368 = vrot.lane.b32.xlu0 %v3737_v9, %s3595_s18  ;;  %s325_s18 = sadd.s32 %s3068_s27, %s4384_s17 }
  0x39   : > { %s3069_s19 = sshll.u32 %s325_s18, 3 }
  0x3a   : > { %s4132_s13 = scalar_lea.vmem %s4370_s8, %s3069_s19 }
  0x3c   : > { %416 = vrot.lane.b32.xlu1 %v3692_v0, %s3597_s20  ;;  %414 = vrot.lane.b32.xlu0 %v3695_v1, %s3597_s20 }
  0x40   : > { %443 = vrot.lane.b32.xlu1 %v3700_v2, %s3598_s21 }
  0x44   : > { %470 = vrot.lane.b32.xlu1 %v3703_v3, %s3599_s22 }
  0x86   : > { %v381_v10 = vpop.permute.xlu0 %380  ;;  %v3749_v11 = vpop.permute.xlu1 %372 }
  0x87   : > { %428 = vrot.lane.b32.xlu0 %v381_v10, %s3597_s20 }
  0x8a   : > { %v386_v12 = vpop.permute.xlu0 %385  ;;  %v391_v13 = vpop.permute.xlu1 %390 }
  0x8b   : > { %455 = vrot.lane.b32.xlu1 %v386_v12, %s3598_s21  ;;  %426 = vrot.lane.b32.xlu0 %v3749_v11, %s3597_s20 }
  0x8e   : > { %v3755_v14 = vpop.permute.xlu1 %370  ;;  %v396_v15 = vpop.permute.xlu0 %395 }
  0x8f   : > { %482 = vrot.lane.b32.xlu1 %v391_v13, %s3599_s22  ;;  %453 = vrot.lane.b32.xlu0 %v381_v10, %s3598_s21 }
  0x92   : > { %v406_v16 = vpop.permute.xlu1 %405  ;;  %v401_v18 = vpop.permute.xlu0 %400 }
  0x93   : > { %509 = vrot.lane.b32.xlu1 %v396_v15, %s3600_s23  ;;  %480 = vrot.lane.b32.xlu0 %v386_v12, %s3599_s22 }
  0x96   : > { %v411_v17 = vpop.permute.xlu1 %410  ;;  %v379_v21 = vpop.permute.xlu0 %378 }
  0x97   : > { %424 = vrot.lane.b32.xlu1 %v3755_v14, %s3597_s20  ;;  %451 = vrot.lane.b32.xlu0 %v3749_v11, %s3598_s21 }
  0x9a   : > { %v3765_v19 = vpop.permute.xlu1 %363  ;;  %v384_v24 = vpop.permute.xlu0 %383 }
  0x9b   : > { %536 = vrot.lane.b32.xlu1 %v401_v18, %s3601_s24  ;;  %563 = vrot.lane.b32.xlu0 %v406_v16, %s3602_s25 }
  0x9e   : > { %v394_v20 = vpop.permute.xlu1 %393  ;;  %v389_v27 = vpop.permute.xlu0 %388 }
  0x9f   : > { %507 = vrot.lane.b32.xlu1 %v391_v13, %s3600_s23  ;;  %478 = vrot.lane.b32.xlu0 %v381_v10, %s3599_s22 }
  0xa2   : > { %v399_v22 = vpop.permute.xlu1 %398  ;;  %v3791_v31 = vpop.permute.xlu0 %361 }
  0xa3   : > { %422 = vrot.lane.b32.xlu1 %v379_v21, %s3597_s20  ;;  %590 = vrot.lane.b32.xlu0 %v411_v17, %s3603_s26 }
  0xa6   : > { %v409_v23 = vpop.permute.xlu1 %408  ;;  %v404_v32 = vpop.permute.xlu0 %403 }
  0xa7   : > { %534 = vrot.lane.b32.xlu1 %v396_v15, %s3601_s24  ;;  %505 = vrot.lane.b32.xlu0 %v386_v12, %s3600_s23 }
  0xaa   : > { %v3775_v25 = vpop.permute.xlu1 %359  ;;  %v3830_v33 = vpop.permute.xlu0 %368 }
  0xab   : > { %449 = vrot.lane.b32.xlu1 %v384_v24, %s3598_s21  ;;  %420 = vrot.lane.b32.xlu0 %v3765_v19, %s3597_s20 }
  0xae   : > { %v417_v26 = vpop.permute.xlu1 %416  ;;  %v3840_v34 = vpop.permute.xlu0 %414 }
  0xaf   : > { %561 = vrot.lane.b32.xlu1 %v401_v18, %s3602_s25  ;;  %532 = vrot.lane.b32.xlu0 %v391_v13, %s3601_s24  ;;  %v604_v28 = vsel %vm601_vm0, %v3695_v1, %v417_v26 }
  0xb2   : > { %v444_v29 = vpop.permute.xlu1 %443 }
  0xb3   : > { %476 = vrot.lane.b32.xlu1 %v389_v27, %s3599_s22  ;;  %447 = vrot.lane.b32.xlu0 %v379_v21, %s3598_s21  ;;  %v3787_v30 = vsel %vm611_vm1, %v604_v28, %v444_v29 }
  0xb6   : > { %v3854_v38 = vpop.permute.xlu1 %470 }
  0xb7   : > { %588 = vrot.lane.b32.xlu1 %v406_v16, %s3603_s26  ;;  %559 = vrot.lane.b32.xlu0 %v396_v15, %s3602_s25 }
  0xbb   : > { %503 = vrot.lane.b32.xlu1 %v394_v20, %s3600_s23  ;;  %418 = vrot.lane.b32.xlu0 %v3791_v31, %s3597_s20 }
  0xbf   : > { %474 = vrot.lane.b32.xlu1 %v384_v24, %s3599_s22  ;;  %530 = vrot.lane.b32.xlu0 %v399_v22, %s3601_s24 }
  0xc3   : > { %586 = vrot.lane.b32.xlu1 %v401_v18, %s3603_s26  ;;  %445 = vrot.lane.b32.xlu0 %v3765_v19, %s3598_s21 }
  0xc7   : > { %501 = vrot.lane.b32.xlu1 %v389_v27, %s3600_s23  ;;  %557 = vrot.lane.b32.xlu0 %v404_v32, %s3602_s25 }
  0xcb   : > { %528 = vrot.lane.b32.xlu1 %v394_v20, %s3601_s24  ;;  %472 = vrot.lane.b32.xlu0 %v379_v21, %s3599_s22 }
  0xcf   : > { %555 = vrot.lane.b32.xlu1 %v399_v22, %s3602_s25  ;;  %584 = vrot.lane.b32.xlu0 %v409_v23, %s3603_s26 }
  0xd3   : > { %582 = vrot.lane.b32.xlu1 %v404_v32, %s3603_s26  ;;  %499 = vrot.lane.b32.xlu0 %v384_v24, %s3600_s23 }
  0xd7   : > { %497 = vrot.lane.b32.xlu1 %v3708_v4, %s3600_s23  ;;  %526 = vrot.lane.b32.xlu0 %v389_v27, %s3601_s24 }
  0xdb   : > { %412 = vrot.lane.b32.xlu1 %v3711_v5, %s3597_s20  ;;  %441 = vrot.lane.b32.xlu0 %v3692_v0, %s3598_s21 }
  0xdf   : > { %524 = vrot.lane.b32.xlu1 %v3716_v6, %s3601_s24  ;;  %553 = vrot.lane.b32.xlu0 %v394_v20, %s3602_s25 }
  0xe3   : > { %439 = vrot.lane.b32.xlu1 %v3695_v1, %s3598_s21  ;;  %468 = vrot.lane.b32.xlu0 %v3700_v2, %s3599_s22 }
  0xe7   : > { %551 = vrot.lane.b32.xlu1 %v3719_v7, %s3602_s25  ;;  %580 = vrot.lane.b32.xlu0 %v399_v22, %s3603_s26 }
  0xeb   : > { %522 = vrot.lane.b32.xlu1 %v3708_v4, %s3601_s24  ;;  %495 = vrot.lane.b32.xlu0 %v3703_v3, %s3600_s23 }
  0xef   : > { %493 = vrot.lane.b32.xlu1 %v3700_v2, %s3600_s23  ;;  %466 = vrot.lane.b32.xlu0 %v3692_v0, %s3599_s22 }
  0xf3   : > { %520 = vrot.lane.b32.xlu1 %v3703_v3, %s3601_s24  ;;  %578 = vrot.lane.b32.xlu0 %v3724_v8, %s3603_s26 }
  0xf7   : > { %547 = vrot.lane.b32.xlu1 %v3708_v4, %s3602_s25  ;;  %549 = vrot.lane.b32.xlu0 %v3716_v6, %s3602_s25 }
  0xf9   : > { %v429_v40 = vpop.permute.xlu0 %428 }
  0xfa   : > { %v610_v52 = vsel %vm601_vm0, %v3749_v11, %v429_v40 }
  0xfb   : > { %576 = vrot.lane.b32.xlu0 %v3719_v7, %s3603_s26  ;;  %1003 = vperm.xlu1 %3521, %v347_v39  }
  0xfd   : > { %v456_v41 = vpop.permute.xlu1 %455  ;;  %v427_v42 = vpop.permute.xlu0 %426 }
  0xfe   : > { %v620_v53 = vsel %vm611_vm1, %v610_v52, %v456_v41 }
  0xff   : > { %574 = vrot.lane.b32.xlu0 %v3716_v6, %s3603_s26  ;;  %v609_v6 = vsel %vm601_vm0, %v3755_v14, %v427_v42 }
 0x101   : > { %v483_v44 = vpop.permute.xlu1 %482  ;;  %v454_v45 = vpop.permute.xlu0 %453 }
 0x102   : > { %v630_v54 = vsel %vm621_vm4, %v620_v53, %v483_v44  ;;  %v619_v7 = vsel %vm611_vm1, %v609_v6, %v454_v45 }
 0x103   : > { %998 = vperm.xlu0 %3522, %v346_v43  }
 0x105   : > { %v510_v46 = vpop.permute.xlu1 %509  ;;  %v481_v47 = vpop.permute.xlu0 %480 }
 0x106   : > { %v640_v55 = vsel %vm631_vm3, %v630_v54, %v510_v46  ;;  %v629_v11 = vsel %vm621_vm4, %v619_v7, %v481_v47 }
 0x109   : > { %v425_v48 = vpop.permute.xlu1 %424  ;;  %v452_v49 = vpop.permute.xlu0 %451 }
 0x10a   : > { %v608_v21 = vsel %vm601_vm0, %v3830_v33, %v425_v48 }
 0x10b   : > { %v618_v22 = vsel %vm611_vm1, %v608_v21, %v452_v49  ;;  %v603_v21 = vsel %vm601_vm0, %v3711_v5, %v3840_v34 }
 0x10d   : > { %v537_v50 = vpop.permute.xlu1 %536  ;;  %v564_v51 = vpop.permute.xlu0 %563 }
 0x10e   : > { %v650_v58 = vsel %vm641_vm5, %v640_v55, %v537_v50 }
 0x10f   : > { %v660_v59 = vsel %vm651_vm6, %v650_v58, %v564_v51 }
 0x111   : > { %v508_v56 = vpop.permute.xlu1 %507  ;;  %v479_v57 = vpop.permute.xlu0 %478 }
 0x112   : > { %v639_v12 = vsel %vm631_vm3, %v629_v11, %v508_v56  ;;  %v628_v26 = vsel %vm621_vm4, %v618_v22, %v479_v57 }
 0x115   : > { %v423_v60 = vpop.permute.xlu1 %422  ;;  %v591_v61 = vpop.permute.xlu0 %590 }
 0x116   : > { %v670_v62 = vsel %vm661_vm7, %v660_v59, %v591_v61  ;;  %v607_v39 = vsel %vm601_vm0, %v3765_v19, %v423_v60 }
 0x117   : > { %3260 = vmatprep.subr.mxu0 %v670_v62  ;;  %3281 = vmatprep.subr.mxu1 %v670_v62 }
 0x118   : > { %3261 = vmatpush3.msra.mxu0 %v670_v62  ;;  %3282 = vmatpush3.msra.mxu1 %v670_v62 }
 0x119   : > { %v535_v63 = vpop.permute.xlu1 %534  ;;  %v506_v0 = vpop.permute.xlu0 %505 }
 0x11a   : > { %v649_v13 = vsel %vm641_vm5, %v639_v12, %v535_v63  ;;  %v638_v27 = vsel %vm631_vm3, %v628_v26, %v506_v0 }
 0x11d   : > { %v450_v1 = vpop.permute.xlu1 %449  ;;  %v421_v2 = vpop.permute.xlu0 %420 }
 0x11e   : > { %v617_v40 = vsel %vm611_vm1, %v607_v39, %v450_v1  ;;  %v606_v45 = vsel %vm601_vm0, %v3791_v31, %v421_v2 }
 0x121   : > { %v562_v3 = vpop.permute.xlu1 %561  ;;  %v533_v4 = vpop.permute.xlu0 %532 }
 0x122   : > { %v659_v15 = vsel %vm651_vm6, %v649_v13, %v562_v3  ;;  %v648_v28 = vsel %vm641_vm5, %v638_v27, %v533_v4 }
 0x125   : > { %v477_v8 = vpop.permute.xlu1 %476  ;;  %v448_v10 = vpop.permute.xlu0 %447 }
 0x126   : > { %v627_v43 = vsel %vm621_vm4, %v617_v40, %v477_v8  ;;  %v616_v47 = vsel %vm611_vm1, %v606_v45, %v448_v10  ;;  %v3963_v45 = vld [vmem:[%s4369_s7] sm:$0xff] }
 0x129   : > { %v589_v16 = vpop.permute.xlu1 %588  ;;  %v560_v17 = vpop.permute.xlu0 %559 }
 0x12a   : > { %v669_v18 = vsel %vm661_vm7, %v659_v15, %v589_v16  ;;  %v658_v29 = vsel %vm651_vm6, %v648_v28, %v560_v17  ;;  %v624_v15 = vsel %vm621_vm4, %v3787_v30, %v3854_v38 }
 0x12b   : > { %3262 = vmatprep.subr.mxu0 %v669_v18  ;;  %3283 = vmatprep.subr.mxu1 %v669_v18 }
 0x12c   : > { %3263 = vmatpush3.msra.mxu0 %v669_v18  ;;  %3284 = vmatpush3.msra.mxu1 %v669_v18 }
 0x12d   : > { %v504_v14 = vpop.permute.xlu1 %503  ;;  %v419_v20 = vpop.permute.xlu0 %418 }
 0x12e   : > { %v637_v44 = vsel %vm631_vm3, %v627_v43, %v504_v14  ;;  %v605_v63 = vsel %vm601_vm0, %v3775_v25, %v419_v20  ;;  %v3949_v43 = vld [vmem:[%s4369_s7 + $0x8] sm:$0xff] }
 0x131   : > { %v475_v23 = vpop.permute.xlu1 %474  ;;  %v531_v24 = vpop.permute.xlu0 %530 }
 0x132   : > { %v647_v46 = vsel %vm641_vm5, %v637_v44, %v531_v24  ;;  %v626_v19 = vsel %vm621_vm4, %v616_v47, %v475_v23  ;;  %v3954_v44 = vld [vmem:[%s4368_s6 + $0x8] sm:$0xff] }
 0x135   : > { %v587_v32 = vpop.permute.xlu1 %586  ;;  %v446_v35 = vpop.permute.xlu0 %445 }
 0x136   : > { %v668_v36 = vsel %vm661_vm7, %v658_v29, %v587_v32  ;;  %v615_v0 = vsel %vm611_vm1, %v605_v63, %v446_v35 }
 0x137   : > { %3264 = vmatprep.subr.mxu0 %v668_v36  ;;  %3285 = vmatprep.subr.mxu1 %v668_v36 }
 0x138   : > { %3265 = vmatpush3.msra.mxu0 %v668_v36  ;;  %3286 = vmatpush3.msra.mxu1 %v668_v36 }
 0x139   : > { %v502_v33 = vpop.permute.xlu1 %501  ;;  %v558_v37 = vpop.permute.xlu0 %557 }
 0x13a   : > { %v657_v48 = vsel %vm651_vm6, %v647_v46, %v558_v37  ;;  %v636_v52 = vsel %vm631_vm3, %v626_v19, %v502_v33  ;;  %v3968_v46 = vld [vmem:[%s4368_s6] sm:$0xff] }
 0x13b   : > { %v354_v19 = vld [vmem:[%s4366_s4] sm:$0xff] }
 0x13d   : > { %v529_v41 = vpop.permute.xlu1 %528  ;;  %v473_v42 = vpop.permute.xlu0 %472 }
 0x13e   : > { %v646_v53 = vsel %vm641_vm5, %v636_v52, %v529_v41  ;;  %v625_v3 = vsel %vm621_vm4, %v615_v0, %v473_v42  ;;  %v343_v41 = vld [vmem:[%s4363_s1 + $0x8] sm:$0xff]  ;;  %v4019_v52 = vld [vmem:[%s4367_s5] sm:$0xff] }
 0x13f   : > { %v345_v42 = vld [vmem:[%s4364_s2 + $0x8] sm:$0xff] }
 0x141   : > { %v556_v49 = vpop.permute.xlu1 %555  ;;  %v585_v50 = vpop.permute.xlu0 %584 }
 0x142   : > { %v667_v51 = vsel %vm661_vm7, %v657_v48, %v585_v50  ;;  %v656_v31 = vsel %vm651_vm6, %v646_v53, %v556_v49 }
 0x143   : > { %3266 = vmatprep.subr.mxu0 %v667_v51  ;;  %3287 = vmatprep.subr.mxu1 %v667_v51 }
 0x144   : > { %3267 = vmatpush3.msra.mxu0 %v667_v51  ;;  %3288 = vmatpush3.msra.mxu1 %v667_v51  ;;  %v355_v51 = vld [vmem:[%s4366_s4 + $0x8] sm:$0xff] }
 0x145   : > { %v583_v54 = vpop.permute.xlu1 %582  ;;  %v500_v55 = vpop.permute.xlu0 %499 }
 0x146   : > { %v666_v56 = vsel %vm661_vm7, %v656_v31, %v583_v54  ;;  %v635_v4 = vsel %vm631_vm3, %v625_v3, %v500_v55  ;;  %v4044_v3 = vld [vmem:[%s4367_s5 + $0x8] sm:$0xff] }
 0x147   : > { %3268 = vmatprep.subr.mxu0 %v666_v56  ;;  %3289 = vmatprep.subr.mxu1 %v666_v56 }
 0x148   : > { %3269 = vmatpush3.msra.mxu0 %v666_v56  ;;  %3290 = vmatpush3.msra.mxu1 %v666_v56 }
 0x149   : > { %v498_v57 = vpop.permute.xlu1 %497  ;;  %v527_v58 = vpop.permute.xlu0 %526 }
 0x14a   : > { %v645_v6 = vsel %vm641_vm5, %v635_v4, %v527_v58  ;;  %v634_v17 = vsel %vm631_vm3, %v624_v15, %v498_v57 }
 0x14d   : > { %v413_v59 = vpop.permute.xlu1 %412  ;;  %v442_v60 = vpop.permute.xlu0 %441 }
 0x14e   : > { %v613_v23 = vsel %vm611_vm1, %v603_v21, %v442_v60  ;;  %v602_v30 = vsel %vm601_vm0, %v3737_v9, %v413_v59 }
 0x151   : > { %v525_v61 = vpop.permute.xlu1 %524  ;;  %v554_v62 = vpop.permute.xlu0 %553 }
 0x152   : > { %v655_v7 = vsel %vm651_vm6, %v645_v6, %v554_v62  ;;  %v644_v18 = vsel %vm641_vm5, %v634_v17, %v525_v61 }
 0x155   : > { %v440_v1 = vpop.permute.xlu1 %439  ;;  %v469_v2 = vpop.permute.xlu0 %468 }
 0x156   : > { %v623_v38 = vsel %vm621_vm4, %v613_v23, %v469_v2  ;;  %v612_v28 = vsel %vm611_vm1, %v602_v30, %v440_v1 }
 0x159   : > { %v552_v8 = vpop.permute.xlu1 %551  ;;  %v581_v10 = vpop.permute.xlu0 %580 }
 0x15a   : > { %v665_v11 = vsel %vm661_vm7, %v655_v7, %v581_v10  ;;  %v654_v14 = vsel %vm651_vm6, %v644_v18, %v552_v8 }
 0x15b   : > { %3270 = vmatprep.subr.mxu0 %v665_v11  ;;  %3291 = vmatprep.subr.mxu1 %v665_v11 }
 0x15c   : > { %3271 = vmatpush3.msra.mxu0 %v665_v11  ;;  %3292 = vmatpush3.msra.mxu1 %v665_v11 }
 0x15d   : > { %v523_v25 = vpop.permute.xlu1 %522  ;;  %v496_v12 = vpop.permute.xlu0 %495 }
 0x15e   : > { %v633_v26 = vsel %vm631_vm3, %v623_v38, %v496_v12 }
 0x15f   : > { %v643_v34 = vsel %vm641_vm5, %v633_v26, %v523_v25 }
 0x161   : > { %v467_v13 = vpop.permute.xlu0 %466  ;;  %v494_v16 = vpop.permute.xlu1 %493 }
 0x162   : > { %v622_v5 = vsel %vm621_vm4, %v612_v28, %v467_v13 }
 0x163   : > { %v632_v36 = vsel %vm631_vm3, %v622_v5, %v494_v16 }
 0x165   : > { %v579_v20 = vpop.permute.xlu0 %578  ;;  %v521_v24 = vpop.permute.xlu1 %520 }
 0x166   : > { %v664_v22 = vsel %vm661_vm7, %v654_v14, %v579_v20  ;;  %v642_v33 = vsel %vm641_vm5, %v632_v36, %v521_v24 }
 0x167   : > { %3272 = vmatprep.subr.mxu0 %v664_v22  ;;  %3293 = vmatprep.subr.mxu1 %v664_v22 }
 0x168   : > { %3273 = vmatpush3.msra.mxu0 %v664_v22  ;;  %3294 = vmatpush3.msra.mxu1 %v664_v22 }
 0x169   : > { %v550_v27 = vpop.permute.xlu0 %549  ;;  %v548_v35 = vpop.permute.xlu1 %547 }
 0x16a   : > { %v653_v29 = vsel %vm651_vm6, %v643_v34, %v550_v27  ;;  %v652_v37 = vsel %vm651_vm6, %v642_v33, %v548_v35 }
 0x16d   : > { %v577_v32 = vpop.permute.xlu0 %576 }
 0x16e   : > { %v663_v9 = vsel %vm661_vm7, %v653_v29, %v577_v32 }
 0x16f   : > { %3274 = vmatprep.subr.mxu0 %v663_v9  ;;  %3295 = vmatprep.subr.mxu1 %v663_v9 }
 0x170   : > { %3275 = vmatpush3.msra.mxu0 %v663_v9  ;;  %3296 = vmatpush3.msra.mxu1 %v663_v9 }
 0x171   : > { %v575_v39 = vpop.permute.xlu0 %574 }
 0x172   : > { %v662_v40 = vsel %vm661_vm7, %v652_v37, %v575_v39 }
 0x173   : > { %3276 = vmatprep.subr.mxu0 %v662_v40  ;;  %3297 = vmatprep.subr.mxu1 %v662_v40 }
 0x174   : > { %3277 = vmatpush3.msra.mxu0 %v662_v40  ;;  %3298 = vmatpush3.msra.mxu1 %v662_v40 }
 0x175   : > { %3279 = vmatmul.mubr.msk.f32.vlgmr.msra.gmra.mxu0 %vm671_vm2, %v343_v41  ;;  %3300 = vmatmul.mubr.msk.f32.vlgmr.msra.gmra.mxu1 %vm671_vm2, %v345_v42 }
 0x176   : > { %3302 = vmatprep.subr.mxu0 %v3949_v43  ;;  %3309 = vmatprep.subr.mxu1 %v3954_v44  ;;  %v4023_v53 = vpop.permute.xlu1 %1003 }
 0x177   : > { %3310 = vmatpush3.msra.mxu1 %v3954_v44  ;;  %3303 = vmatpush3.msra.mxu0 %v3949_v43 }
 0x178   : > { %3304 = vmatprep.subr.mxu0 %v3963_v45  ;;  %3311 = vmatprep.subr.mxu1 %v3968_v46 }
 0x179   : > { %3312 = vmatpush3.msra.mxu1 %v3968_v46  ;;  %3305 = vmatpush3.msra.mxu0 %v3963_v45 }
 0x17a   : > { %3323 = vmatprep.subr.mxu1 %v3949_v43 }
 0x17e   : > { %v4025_v31 = vpop.permute.xlu0 %998 }
 0x235   : > { %v3280_v47 = vpop.f32.mrf.mxu0  ;;  %v3301_v48 = vpop.f32.mrf.mxu1 }
 0x236   : > { %1122 = vrot.lane.b32.xlu0 %v3301_v48, %s3603_s26 }
 0x237   : > { %v744_v49 = vpop.f32.mrf.mxu0  ;;  %v825_v50 = vpop.f32.mrf.mxu1 }
 0x238   : > { %1120 = vrot.lane.b32.xlu1 %v825_v50, %s3603_s26  ;;  %3306 = vmatprep.mubr.msk.f32.mxu0 %vm601_vm0, %v825_v50 }
 0x239   : > { %3313 = vmatprep.mubr.msk.f32.mxu1 %vm601_vm0, %v744_v49  ;;  %3307 = vmatmul.mubr.msk.f32.vlgmr.msra.gmra.mxu0 %vm601_vm0, %v3301_v48 }
 0x23a   : > { %3314 = vmatmul.mubr.msk.f32.vlgmr.msra.gmra.mxu1 %vm601_vm0, %v3280_v47  ;;  %1385 = vrot.lane.b32.xlu0 %v825_v50, %s3602_s25 }
 0x23b   : > { %3324 = vmatpush3.msra.mxu1 %v3949_v43  ;;  %3320 = vmatprep.mubr.msk.f32.mxu0 %vm601_vm0, %v4019_v52 }
 0x23c   : > { %1203 = vrot.lane.b32.xlu1 %v744_v49, %s3603_s26  ;;  %3325 = vmatprep.subr.mxu1 %v3963_v45 }
 0x23d   : > { %3326 = vmatpush3.msra.mxu1 %v3963_v45 }
 0x23e   : > { %1387 = vrot.lane.b32.xlu0 %v3301_v48, %s3602_s25 }
 0x240   : > { %1205 = vrot.lane.b32.xlu1 %v3280_v47, %s3603_s26 }
 0x242   : > { %1650 = vrot.lane.b32.xlu0 %v825_v50, %s3601_s24 }
 0x244   : > { %1468 = vrot.lane.b32.xlu1 %v744_v49, %s3602_s25 }
 0x246   : > { %1652 = vrot.lane.b32.xlu0 %v3301_v48, %s3601_s24 }
 0x248   : > { %1470 = vrot.lane.b32.xlu1 %v3280_v47, %s3602_s25 }
 0x24a   : > { %1915 = vrot.lane.b32.xlu0 %v825_v50, %s3600_s23 }
 0x24c   : > { %1733 = vrot.lane.b32.xlu1 %v744_v49, %s3601_s24 }
 0x24e   : > { %1917 = vrot.lane.b32.xlu0 %v3301_v48, %s3600_s23 }
 0x250   : > { %1735 = vrot.lane.b32.xlu1 %v3280_v47, %s3601_s24 }
 0x252   : > { %2180 = vrot.lane.b32.xlu0 %v825_v50, %s3599_s22 }
 0x254   : > { %1998 = vrot.lane.b32.xlu1 %v744_v49, %s3600_s23 }
 0x256   : > { %2182 = vrot.lane.b32.xlu0 %v3301_v48, %s3599_s22 }
 0x258   : > { %2000 = vrot.lane.b32.xlu1 %v3280_v47, %s3600_s23 }
 0x25a   : > { %2445 = vrot.lane.b32.xlu0 %v825_v50, %s3598_s21 }
 0x25c   : > { %2263 = vrot.lane.b32.xlu1 %v744_v49, %s3599_s22 }
 0x25e   : > { %2447 = vrot.lane.b32.xlu0 %v3301_v48, %s3598_s21 }
 0x260   : > { %2265 = vrot.lane.b32.xlu1 %v3280_v47, %s3599_s22 }
 0x262   : > { %2710 = vrot.lane.b32.xlu0 %v825_v50, %s3597_s20 }
 0x264   : > { %2528 = vrot.lane.b32.xlu1 %v744_v49, %s3598_s21 }
 0x266   : > { %2712 = vrot.lane.b32.xlu0 %v3301_v48, %s3597_s20 }
 0x268   : > { %2530 = vrot.lane.b32.xlu1 %v3280_v47, %s3598_s21 }
 0x26a   : > { %1012 = vperm.xlu0 %3522, %v354_v19  }
 0x26c   : > { %2793 = vrot.lane.b32.xlu1 %v744_v49, %s3597_s20 }
 0x270   : > { %2795 = vrot.lane.b32.xlu1 %v3280_v47, %s3597_s20 }
 0x274   : > { %1017 = vperm.xlu1 %3521, %v355_v51  }
 0x2a8   : > { %v1123_v55 = vpop.permute.xlu0 %1122 }
 0x2aa   : > { %v1121_v54 = vpop.permute.xlu1 %1120 }
 0x2ab   : > { %3327 = vmatprep.mubr.msk.f32.mxu1 %vm601_vm0, %v1121_v54 }
 0x2ac   : > { %3328 = vmatmul.mubr.msk.f32.vlgmr.msra.gmra.mxu1 %vm601_vm0, %v1123_v55  ;;  %v1386_v4 = vpop.permute.xlu0 %1385 }
 0x2ad   : > { %3341 = vmatprep.mubr.msk.f32.mxu1 %vm601_vm0, %v4019_v52 }
 0x2ae   : > { %v1204_v2 = vpop.permute.xlu1 %1203 }
 0x2b0   : > { %v1388_v7 = vpop.permute.xlu0 %1387 }
 0x2b2   : > { %v1206_v6 = vpop.permute.xlu1 %1205 }
 0x2b4   : > { %v4064_v25 = vpop.permute.xlu0 %1650 }
 0x2b6   : > { %v1469_v8 = vpop.permute.xlu1 %1468 }
 0x2b8   : > { %v4068_v13 = vpop.permute.xlu0 %1652 }
 0x2ba   : > { %v1471_v10 = vpop.permute.xlu1 %1470 }
 0x2bc   : > { %v4072_v16 = vpop.permute.xlu0 %1915 }
 0x2be   : > { %v4062_v11 = vpop.permute.xlu1 %1733 }
 0x2c0   : > { %v4076_v18 = vpop.permute.xlu0 %1917 }
 0x2c2   : > { %v4066_v12 = vpop.permute.xlu1 %1735 }
 0x2c4   : > { %v4080_v20 = vpop.permute.xlu0 %2180 }
 0x2c6   : > { %v4070_v15 = vpop.permute.xlu1 %1998 }
 0x2c8   : > { %v4084_v22 = vpop.permute.xlu0 %2182 }
 0x2ca   : > { %v4074_v17 = vpop.permute.xlu1 %2000 }
 0x2cc   : > { %v4088_v30 = vpop.permute.xlu0 %2445 }
 0x2ce   : > { %v4078_v14 = vpop.permute.xlu1 %2263 }
 0x2d0   : > { %v4092_v24 = vpop.permute.xlu0 %2447 }
 0x2d2   : > { %v4082_v21 = vpop.permute.xlu1 %2265 }
 0x2d4   : > { %v4096_v27 = vpop.permute.xlu0 %2710 }
 0x2d6   : > { %v4086_v23 = vpop.permute.xlu1 %2528 }
 0x2d8   : > { %v4100_v5 = vpop.permute.xlu0 %2712 }
 0x2da   : > { %v4090_v38 = vpop.permute.xlu1 %2530 }
 0x2de   : > { %v4094_v26 = vpop.permute.xlu1 %2793 }
 0x2e2   : > { %v4098_v28 = vpop.permute.xlu1 %2795 }
 0x2e5   : > { %v4106_v36 = vpop.permute.xlu0 %1012 }
 0x2ef   : > { %v4102_v34 = vpop.permute.xlu1 %1017 }
 0x2f9   : > { %v3308_v56 = vpop.f32.mrf.mxu0 }
 0x2fa   : > { %v3315_v57 = vpop.f32.mrf.mxu1 }
 0x2fb   : > { %v993_v58 = vadd.f32 %v3315_v57, %v3308_v56  ;;  %v906_v59 = vpop.f32.mrf.mxu0 }
 0x2fc   : > { %v987_v60 = vpop.f32.mrf.mxu1 }
 0x2fd   : > { %v4032_v61 = vadd.f32 %v4023_v53, %v993_v58  ;;  %v988_v62 = vadd.f32 %v987_v60, %v906_v59 }
 0x2ff   : > { %v4035_v63 = vadd.f32 %v4025_v31, %v988_v62  ;;  %v1009_v0 = vmul.f32 %v4032_v61, %v4032_v61 }
 0x301   : > { %3316 = vmatprep.subr.mxu0 %v1009_v0  ;;  %v1008_v1 = vmul.f32 %v4035_v63, %v4035_v63 }
 0x302   : > { %3317 = vmatpush3.msra.mxu0 %v1009_v0 }
 0x303   : > { %3318 = vmatprep.subr.mxu0 %v1008_v1 }
 0x304   : > { %3319 = vmatpush3.msra.mxu0 %v1008_v1 }
 0x305   : > { %3321 = vmatmul.mubr.msk.f32.vlgmr.msra.gmra.mxu0 %vm601_vm0, %v4044_v3  ;;  %3330 = vmatprep.subr.mxu0 %v3954_v44 }
 0x306   : > { %3331 = vmatpush3.msra.mxu0 %v3954_v44  ;;  %3334 = vmatprep.mubr.msk.f32.mxu0 %vm601_vm0, %v1204_v2 }
 0x307   : > { %3332 = vmatprep.subr.mxu0 %v3968_v46 }
 0x308   : > { %3333 = vmatpush3.msra.mxu0 %v3968_v46 }
 0x309   : > { %3335 = vmatmul.mubr.msk.f32.vlgmr.msra.gmra.mxu0 %vm601_vm0, %v1206_v6  ;;  %3344 = vmatprep.subr.mxu0 %v3949_v43 }
 0x30a   : > { %3345 = vmatpush3.msra.mxu0 %v3949_v43  ;;  %3348 = vmatprep.mubr.msk.f32.mxu0 %vm601_vm0, %v1386_v4 }
 0x30b   : > { %3346 = vmatprep.subr.mxu0 %v3963_v45 }
 0x30c   : > { %3347 = vmatpush3.msra.mxu0 %v3963_v45 }
 0x30d   : > { %3349 = vmatmul.mubr.msk.f32.vlgmr.msra.gmra.mxu0 %vm601_vm0, %v1388_v7 }
 0x30e   : > { %3362 = vmatprep.mubr.msk.f32.mxu0 %vm601_vm0, %v4019_v52 }
 0x36c   : > { %v3329_v35 = vpop.f32.mrf.mxu1 }
 0x36e   : > { %v1194_v40 = vpop.f32.mrf.mxu1 }
 0x3c5   : > { %v3322_v29 = vpop.f32.mrf.mxu0 }
 0x3c6   : > { %v1098_v32 = vadd.f32 %v3322_v29, %v4102_v34 }
 0x3c7   : > { %v1092_v9 = vpop.f32.mrf.mxu0 }
 0x3c8   : > { %3523 = vrsqrt.f32 %v1098_v32  ;;  %v1093_v33 = vadd.f32 %v1092_v9, %v4106_v36  ;;  %vm1110_vm8 = vcmp.eq.f32.partialorder %v1098_v32, inf  ;;  %v1113_v54 = vand.u32 2147483648, %v1098_v32 }
 0x3c9   : > { %v3336_v37 = vpop.f32.mrf.mxu0  ;;  %vm1112_vm9 = vcmp.eq.f32.partialorder %v1098_v32, 0.0 }
 0x3ca   : > { %v1283_v39 = vadd.f32 %v3336_v37, %v3329_v35  ;;  %3525 = vrsqrt.f32 %v1093_v33  ;;  %vm1103_vm10 = vcmp.eq.f32.partialorder %v1093_v33, inf  ;;  %v1106_v60 = vand.u32 2147483648, %v1093_v33 }
 0x3cb   : > { %v1277_v41 = vpop.f32.mrf.mxu0  ;;  %vm1105_vm11 = vcmp.eq.f32.partialorder %v1093_v33, 0.0 }
 0x3cc   : > { %v4110_v42 = vadd.f32 %v1283_v39, %v4023_v53  ;;  %v1278_v47 = vadd.f32 %v1277_v41, %v1194_v40 }
 0x3cd   : > { %v3350_v4 = vpop.f32.mrf.mxu0 }
 0x3ce   : > { %v4113_v48 = vadd.f32 %v1278_v47, %v4025_v31  ;;  %v1289_v49 = vmul.f32 %v4110_v42, %v4110_v42 }
 0x3d0   : > { %3337 = vmatprep.subr.mxu1 %v1289_v49  ;;  %v1288_v50 = vmul.f32 %v4113_v48, %v4113_v48 }
 0x3d1   : > { %3338 = vmatpush3.msra.mxu1 %v1289_v49 }
 0x3d2   : > { %3339 = vmatprep.subr.mxu1 %v1288_v50 }
 0x3d3   : > { %3340 = vmatpush3.msra.mxu1 %v1288_v50 }
 0x3d4   : > { %3342 = vmatmul.mubr.msk.f32.vlgmr.msra.gmra.mxu1 %vm601_vm0, %v4044_v3  ;;  %3351 = vmatprep.subr.mxu1 %v3954_v44 }
 0x3d5   : > { %v3524_v19 = vpop.eup %3523  ;;  %3352 = vmatpush3.msra.mxu1 %v3954_v44  ;;  %3355 = vmatprep.mubr.msk.f32.mxu1 %vm601_vm0, %v1469_v8 }
 0x3d6   : > { %v1109_v51 = vmul.f32 %v3524_v19, %v1098_v32  ;;  %3353 = vmatprep.subr.mxu1 %v3968_v46 }
 0x3d7   : > { %3354 = vmatpush3.msra.mxu1 %v3968_v46  ;;  %v3526_v55 = vpop.eup %3525 }
 0x3d8   : > { %v1111_v56 = vsel %vm1110_vm8, %v1098_v32, %v1109_v51  ;;  %3356 = vmatmul.mubr.msk.f32.vlgmr.msra.gmra.mxu1 %vm601_vm0, %v1471_v10  ;;  %3365 = vmatprep.subr.mxu1 %v3949_v43  ;;  %v1102_v58 = vmul.f32 %v3526_v55, %v1093_v33 }
 0x3d9   : > { %v1114_v57 = vsel %vm1112_vm9, %v1113_v54, %v1111_v56  ;;  %3366 = vmatpush3.msra.mxu1 %v3949_v43  ;;  %3369 = vmatprep.mubr.msk.f32.mxu1 %vm601_vm0, %v4064_v25  ;;  %v1459_v25 = vpop.f32.mrf.mxu0 }
 0x3da   : > { %v1116_v59 = vmul.f32 %v1114_v57, %v4032_v61  ;;  %3367 = vmatprep.subr.mxu1 %v3963_v45  ;;  %v1104_v62 = vsel %vm1103_vm10, %v1093_v33, %v1102_v58 }
 0x3db   : > { %3368 = vmatpush3.msra.mxu1 %v3963_v45  ;;  %v1107_v0 = vsel %vm1105_vm11, %v1106_v60, %v1104_v62 }
 0x3dc   : > { %3082 = vst.msk [vmem:[%s4132_s13 + $0x8] sm:$0xff] %vm611_vm1, %v1116_v59  ;;  %3370 = vmatmul.mubr.msk.f32.vlgmr.msra.gmra.mxu1 %vm601_vm0, %v4068_v13  ;;  %v1115_v1 = vmul.f32 %v1107_v0, %v4035_v63 }
 0x3dd   : > { %3383 = vmatprep.mubr.msk.f32.mxu1 %vm601_vm0, %v4019_v52 }
 0x3de   : > { %1117 = vst.msk [vmem:[%s4132_s13] sm:$0xff] %vm611_vm1, %v1115_v1 }
 0x494   : > { %v3343_v61 = vpop.f32.mrf.mxu1 }
 0x495   : > { %v1362_v2 = vadd.f32 %v3343_v61, %v4102_v34 }
 0x496   : > { %v1356_v6 = vpop.f32.mrf.mxu1 }
 0x497   : > { %3527 = vrsqrt.f32 %v1362_v2  ;;  %v1357_v7 = vadd.f32 %v1356_v6, %v4106_v36  ;;  %vm1374_vm12 = vcmp.eq.f32.partialorder %v1362_v2, inf  ;;  %v1377_v39 = vand.u32 2147483648, %v1362_v2 }
 0x498   : > { %v3357_v8 = vpop.f32.mrf.mxu1  ;;  %vm1376_vm13 = vcmp.eq.f32.partialorder %v1362_v2, 0.0 }
 0x499   : > { %v1548_v10 = vadd.f32 %v3357_v8, %v3350_v4  ;;  %3529 = vrsqrt.f32 %v1357_v7  ;;  %vm1367_vm14 = vcmp.eq.f32.partialorder %v1357_v7, inf  ;;  %v1370_v50 = vand.u32 2147483648, %v1357_v7 }
 0x49a   : > { %v1542_v13 = vpop.f32.mrf.mxu1  ;;  %vm1369_vm15 = vcmp.eq.f32.partialorder %v1357_v7, 0.0 }
 0x49b   : > { %v4152_v63 = vadd.f32 %v1548_v10, %v4023_v53  ;;  %v1543_v29 = vadd.f32 %v1542_v13, %v1459_v25 }
 0x49c   : > { %v3371_v54 = vpop.f32.mrf.mxu1 }
 0x49d   : > { %v4155_v32 = vadd.f32 %v1543_v29, %v4025_v31  ;;  %v1554_v35 = vmul.f32 %v4152_v63, %v4152_v63 }
 0x49e   : > { %v1724_v59 = vpop.f32.mrf.mxu1 }
 0x49f   : > { %3358 = vmatprep.subr.mxu0 %v1554_v35  ;;  %v1553_v9 = vmul.f32 %v4155_v32, %v4155_v32 }
 0x4a0   : > { %3359 = vmatpush3.msra.mxu0 %v1554_v35 }
 0x4a1   : > { %3360 = vmatprep.subr.mxu0 %v1553_v9 }
 0x4a2   : > { %3361 = vmatpush3.msra.mxu0 %v1553_v9 }
 0x4a3   : > { %3363 = vmatmul.mubr.msk.f32.vlgmr.msra.gmra.mxu0 %vm601_vm0, %v4044_v3  ;;  %3372 = vmatprep.subr.mxu0 %v3954_v44 }
 0x4a4   : > { %v3528_v33 = vpop.eup %3527  ;;  %3373 = vmatpush3.msra.mxu0 %v3954_v44  ;;  %3376 = vmatprep.mubr.msk.f32.mxu0 %vm601_vm0, %v4062_v11 }
 0x4a5   : > { %v1373_v37 = vmul.f32 %v3528_v33, %v1362_v2  ;;  %3374 = vmatprep.subr.mxu0 %v3968_v46 }
 0x4a6   : > { %3375 = vmatpush3.msra.mxu0 %v3968_v46  ;;  %v3530_v40 = vpop.eup %3529 }
 0x4a7   : > { %v1375_v41 = vsel %vm1374_vm12, %v1362_v2, %v1373_v37  ;;  %3377 = vmatmul.mubr.msk.f32.vlgmr.msra.gmra.mxu0 %vm601_vm0, %v4066_v12  ;;  %3386 = vmatprep.subr.mxu0 %v3949_v43  ;;  %v1366_v49 = vmul.f32 %v3530_v40, %v1357_v7 }
 0x4a8   : > { %v1378_v47 = vsel %vm1376_vm13, %v1377_v39, %v1375_v41  ;;  %3387 = vmatpush3.msra.mxu0 %v3949_v43  ;;  %3390 = vmatprep.mubr.msk.f32.mxu0 %vm601_vm0, %v4072_v16 }
 0x4a9   : > { %v1380_v11 = vmul.f32 %v1378_v47, %v4110_v42  ;;  %3388 = vmatprep.subr.mxu0 %v3963_v45  ;;  %v1368_v19 = vsel %vm1367_vm14, %v1357_v7, %v1366_v49 }
 0x4aa   : > { %3389 = vmatpush3.msra.mxu0 %v3963_v45  ;;  %v1371_v12 = vsel %vm1369_vm15, %v1370_v50, %v1368_v19 }
 0x4ab   : > { %3090 = vst.msk [vmem:[%s4132_s13 + $0x18] sm:$0xff] %vm611_vm1, %v1380_v11  ;;  %3391 = vmatmul.mubr.msk.f32.vlgmr.msra.gmra.mxu0 %vm601_vm0, %v4076_v18  ;;  %v1379_v51 = vmul.f32 %v1371_v12, %v4113_v48 }
 0x4ac   : > { %3404 = vmatprep.mubr.msk.f32.mxu0 %vm601_vm0, %v4019_v52 }
 0x4ad   : > { %3089 = vst.msk [vmem:[%s4132_s13 + $0x10] sm:$0xff] %vm611_vm1, %v1379_v51 }
 0x563   : > { %v3364_v16 = vpop.f32.mrf.mxu0 }
 0x564   : > { %v1627_v42 = vadd.f32 %v3364_v16, %v4102_v34 }
 0x565   : > { %v1621_v55 = vpop.f32.mrf.mxu0 }
 0x566   : > { %3531 = vrsqrt.f32 %v1627_v42  ;;  %v1622_v56 = vadd.f32 %v1621_v55, %v4106_v36  ;;  %vm1639_vm2 = vcmp.eq.f32.partialorder %v1627_v42, inf  ;;  %v1642_v4 = vand.u32 2147483648, %v1627_v42 }
 0x567   : > { %v3378_v57 = vpop.f32.mrf.mxu0  ;;  %vm1641_vm3 = vcmp.eq.f32.partialorder %v1627_v42, 0.0 }
 0x568   : > { %v1813_v58 = vadd.f32 %v3378_v57, %v3371_v54  ;;  %3533 = vrsqrt.f32 %v1622_v56  ;;  %vm1632_vm4 = vcmp.eq.f32.partialorder %v1622_v56, inf  ;;  %v1635_v25 = vand.u32 2147483648, %v1622_v56 }
 0x569   : > { %v1807_v18 = vpop.f32.mrf.mxu0  ;;  %vm1634_vm5 = vcmp.eq.f32.partialorder %v1622_v56, 0.0 }
 0x56a   : > { %v4190_v48 = vadd.f32 %v1813_v58, %v4023_v53  ;;  %v1808_v60 = vadd.f32 %v1807_v18, %v1724_v59 }
 0x56b   : > { %v3392_v35 = vpop.f32.mrf.mxu0 }
 0x56c   : > { %v4193_v62 = vadd.f32 %v1808_v60, %v4025_v31  ;;  %v1819_v0 = vmul.f32 %v4190_v48, %v4190_v48 }
 0x56d   : > { %v1989_v40 = vpop.f32.mrf.mxu0 }
 0x56e   : > { %3379 = vmatprep.subr.mxu1 %v1819_v0  ;;  %v1818_v1 = vmul.f32 %v4193_v62, %v4193_v62 }
 0x56f   : > { %3380 = vmatpush3.msra.mxu1 %v1819_v0 }
 0x570   : > { %3381 = vmatprep.subr.mxu1 %v1818_v1 }
 0x571   : > { %3382 = vmatpush3.msra.mxu1 %v1818_v1 }
 0x572   : > { %3384 = vmatmul.mubr.msk.f32.vlgmr.msra.gmra.mxu1 %vm601_vm0, %v4044_v3  ;;  %3393 = vmatprep.subr.mxu1 %v3954_v44 }
 0x573   : > { %v3532_v61 = vpop.eup %3531  ;;  %3394 = vmatpush3.msra.mxu1 %v3954_v44  ;;  %3397 = vmatprep.mubr.msk.f32.mxu1 %vm601_vm0, %v4070_v15 }
 0x574   : > { %v1638_v2 = vmul.f32 %v3532_v61, %v1627_v42  ;;  %3395 = vmatprep.subr.mxu1 %v3968_v46 }
 0x575   : > { %3396 = vmatpush3.msra.mxu1 %v3968_v46  ;;  %v3534_v6 = vpop.eup %3533 }
 0x576   : > { %v1640_v7 = vsel %vm1639_vm2, %v1627_v42, %v1638_v2  ;;  %3398 = vmatmul.mubr.msk.f32.vlgmr.msra.gmra.mxu1 %vm601_vm0, %v4074_v17  ;;  %3407 = vmatprep.subr.mxu1 %v3949_v43  ;;  %v1631_v10 = vmul.f32 %v3534_v6, %v1622_v56 }
 0x577   : > { %v1643_v8 = vsel %vm1641_vm3, %v1642_v4, %v1640_v7  ;;  %3408 = vmatpush3.msra.mxu1 %v3949_v43  ;;  %3411 = vmatprep.mubr.msk.f32.mxu1 %vm601_vm0, %v4080_v20 }
 0x578   : > { %v1645_v15 = vmul.f32 %v1643_v8, %v4152_v63  ;;  %3409 = vmatprep.subr.mxu1 %v3963_v45  ;;  %v1633_v13 = vsel %vm1632_vm4, %v1622_v56, %v1631_v10 }
 0x579   : > { %3410 = vmatpush3.msra.mxu1 %v3963_v45  ;;  %v1636_v17 = vsel %vm1634_vm5, %v1635_v25, %v1633_v13 }
 0x57a   : > { %3098 = vst.msk [vmem:[%s4132_s13 + $0x28] sm:$0xff] %vm611_vm1, %v1645_v15  ;;  %3412 = vmatmul.mubr.msk.f32.vlgmr.msra.gmra.mxu1 %vm601_vm0, %v4084_v22  ;;  %v1644_v29 = vmul.f32 %v1636_v17, %v4155_v32 }
 0x57b   : > { %3425 = vmatprep.mubr.msk.f32.mxu1 %vm601_vm0, %v4019_v52 }
 0x57c   : > { %3097 = vst.msk [vmem:[%s4132_s13 + $0x20] sm:$0xff] %vm611_vm1, %v1644_v29 }
 0x632   : > { %v3385_v20 = vpop.f32.mrf.mxu1 }
 0x633   : > { %v1892_v63 = vadd.f32 %v3385_v20, %v4102_v34 }
 0x634   : > { %v1886_v9 = vpop.f32.mrf.mxu1 }
 0x635   : > { %3535 = vrsqrt.f32 %v1892_v63  ;;  %v1887_v33 = vadd.f32 %v1886_v9, %v4106_v36  ;;  %vm1904_vm6 = vcmp.eq.f32.partialorder %v1892_v63, inf  ;;  %v1907_v12 = vand.u32 2147483648, %v1892_v63 }
 0x636   : > { %v3399_v37 = vpop.f32.mrf.mxu1  ;;  %vm1906_vm7 = vcmp.eq.f32.partialorder %v1892_v63, 0.0 }
 0x637   : > { %v2078_v39 = vadd.f32 %v3399_v37, %v3392_v35  ;;  %3537 = vrsqrt.f32 %v1887_v33  ;;  %vm1897_vm8 = vcmp.eq.f32.partialorder %v1887_v33, inf  ;;  %v1900_v55 = vand.u32 2147483648, %v1887_v33 }
 0x638   : > { %v2072_v22 = vpop.f32.mrf.mxu1  ;;  %vm1899_vm9 = vcmp.eq.f32.partialorder %v1887_v33, 0.0 }
 0x639   : > { %v4228_v32 = vadd.f32 %v2078_v39, %v4023_v53  ;;  %v2073_v41 = vadd.f32 %v2072_v22, %v1989_v40 }
 0x63a   : > { %v3413_v59 = vpop.f32.mrf.mxu1 }
 0x63b   : > { %v4231_v47 = vadd.f32 %v2073_v41, %v4025_v31  ;;  %v2084_v49 = vmul.f32 %v4228_v32, %v4228_v32 }
 0x63c   : > { %v2254_v1 = vpop.f32.mrf.mxu1 }
 0x63d   : > { %3400 = vmatprep.subr.mxu0 %v2084_v49  ;;  %v2083_v11 = vmul.f32 %v4231_v47, %v4231_v47 }
 0x63e   : > { %3401 = vmatpush3.msra.mxu0 %v2084_v49 }
 0x63f   : > { %3402 = vmatprep.subr.mxu0 %v2083_v11 }
 0x640   : > { %3403 = vmatpush3.msra.mxu0 %v2083_v11 }
 0x641   : > { %3405 = vmatmul.mubr.msk.f32.vlgmr.msra.gmra.mxu0 %vm601_vm0, %v4044_v3  ;;  %3414 = vmatprep.subr.mxu0 %v3954_v44 }
 0x642   : > { %v3536_v50 = vpop.eup %3535  ;;  %3415 = vmatpush3.msra.mxu0 %v3954_v44  ;;  %3418 = vmatprep.mubr.msk.f32.mxu0 %vm601_vm0, %v4078_v14 }
 0x643   : > { %v1903_v19 = vmul.f32 %v3536_v50, %v1892_v63  ;;  %3416 = vmatprep.subr.mxu0 %v3968_v46 }
 0x644   : > { %3417 = vmatpush3.msra.mxu0 %v3968_v46  ;;  %v3538_v51 = vpop.eup %3537 }
 0x645   : > { %v1905_v16 = vsel %vm1904_vm6, %v1892_v63, %v1903_v19  ;;  %3419 = vmatmul.mubr.msk.f32.vlgmr.msra.gmra.mxu0 %vm601_vm0, %v4082_v21  ;;  %3428 = vmatprep.subr.mxu0 %v3949_v43  ;;  %v1896_v54 = vmul.f32 %v3538_v51, %v1887_v33 }
 0x646   : > { %v1908_v42 = vsel %vm1906_vm7, %v1907_v12, %v1905_v16  ;;  %3429 = vmatpush3.msra.mxu0 %v3949_v43  ;;  %3432 = vmatprep.mubr.msk.f32.mxu0 %vm601_vm0, %v4088_v30 }
 0x647   : > { %v1910_v14 = vmul.f32 %v1908_v42, %v4190_v48  ;;  %3430 = vmatprep.subr.mxu0 %v3963_v45  ;;  %v1898_v56 = vsel %vm1897_vm8, %v1887_v33, %v1896_v54 }
 0x648   : > { %3431 = vmatpush3.msra.mxu0 %v3963_v45  ;;  %v1901_v21 = vsel %vm1899_vm9, %v1900_v55, %v1898_v56 }
 0x649   : > { %3106 = vst.msk [vmem:[%s4132_s13 + $0x38] sm:$0xff] %vm611_vm1, %v1910_v14  ;;  %3433 = vmatmul.mubr.msk.f32.vlgmr.msra.gmra.mxu0 %vm601_vm0, %v4092_v24  ;;  %v1909_v57 = vmul.f32 %v1901_v21, %v4193_v62 }
 0x64a   : > { %3446 = vmatprep.mubr.msk.f32.mxu0 %vm601_vm0, %v4019_v52 }
 0x64b   : > { %3105 = vst.msk [vmem:[%s4132_s13 + $0x30] sm:$0xff] %vm611_vm1, %v1909_v57 }
 0x701   : > { %v3406_v30 = vpop.f32.mrf.mxu0 }
 0x702   : > { %v2157_v58 = vadd.f32 %v3406_v30, %v4102_v34 }
 0x703   : > { %v2151_v18 = vpop.f32.mrf.mxu0 }
 0x704   : > { %3539 = vrsqrt.f32 %v2157_v58  ;;  %v2152_v48 = vadd.f32 %v2151_v18, %v4106_v36  ;;  %vm2169_vm10 = vcmp.eq.f32.partialorder %v2157_v58, inf  ;;  %v2172_v10 = vand.u32 2147483648, %v2157_v58 }
 0x705   : > { %v3420_v60 = vpop.f32.mrf.mxu0  ;;  %vm2171_vm11 = vcmp.eq.f32.partialorder %v2157_v58, 0.0 }
 0x706   : > { %v2343_v0 = vadd.f32 %v3420_v60, %v3413_v59  ;;  %3541 = vrsqrt.f32 %v2152_v48  ;;  %vm2162_vm12 = vcmp.eq.f32.partialorder %v2152_v48, inf  ;;  %v2165_v29 = vand.u32 2147483648, %v2152_v48 }
 0x707   : > { %v2337_v24 = vpop.f32.mrf.mxu0  ;;  %vm2164_vm13 = vcmp.eq.f32.partialorder %v2152_v48, 0.0 }
 0x708   : > { %v4266_v62 = vadd.f32 %v2343_v0, %v4023_v53  ;;  %v2338_v61 = vadd.f32 %v2337_v24, %v2254_v1 }
 0x709   : > { %v3434_v35 = vpop.f32.mrf.mxu0 }
 0x70a   : > { %v4269_v2 = vadd.f32 %v2338_v61, %v4025_v31  ;;  %v2349_v4 = vmul.f32 %v4266_v62, %v4266_v62 }
 0x70b   : > { %v2519_v39 = vpop.f32.mrf.mxu0 }
 0x70c   : > { %3421 = vmatprep.subr.mxu1 %v2349_v4  ;;  %v2348_v6 = vmul.f32 %v4269_v2, %v4269_v2 }
 0x70d   : > { %3422 = vmatpush3.msra.mxu1 %v2349_v4 }
 0x70e   : > { %3423 = vmatprep.subr.mxu1 %v2348_v6 }
 0x70f   : > { %3424 = vmatpush3.msra.mxu1 %v2348_v6 }
 0x710   : > { %3426 = vmatmul.mubr.msk.f32.vlgmr.msra.gmra.mxu1 %vm601_vm0, %v4044_v3  ;;  %3435 = vmatprep.subr.mxu1 %v3954_v44 }
 0x711   : > { %v3540_v7 = vpop.eup %3539  ;;  %3436 = vmatpush3.msra.mxu1 %v3954_v44  ;;  %3439 = vmatprep.mubr.msk.f32.mxu1 %vm601_vm0, %v4086_v23 }
 0x712   : > { %v2168_v8 = vmul.f32 %v3540_v7, %v2157_v58  ;;  %3437 = vmatprep.subr.mxu1 %v3968_v46 }
 0x713   : > { %3438 = vmatpush3.msra.mxu1 %v3968_v46  ;;  %v3542_v15 = vpop.eup %3541 }
 0x714   : > { %v2170_v25 = vsel %vm2169_vm10, %v2157_v58, %v2168_v8  ;;  %3440 = vmatmul.mubr.msk.f32.vlgmr.msra.gmra.mxu1 %vm601_vm0, %v4090_v38  ;;  %3449 = vmatprep.subr.mxu1 %v3949_v43  ;;  %v2161_v17 = vmul.f32 %v3542_v15, %v2152_v48 }
 0x715   : > { %v2173_v13 = vsel %vm2171_vm11, %v2172_v10, %v2170_v25  ;;  %3450 = vmatpush3.msra.mxu1 %v3949_v43  ;;  %3453 = vmatprep.mubr.msk.f32.mxu1 %vm601_vm0, %v4096_v27 }
 0x716   : > { %v2175_v23 = vmul.f32 %v2173_v13, %v4228_v32  ;;  %3451 = vmatprep.subr.mxu1 %v3963_v45  ;;  %v2163_v20 = vsel %vm2162_vm12, %v2152_v48, %v2161_v17 }
 0x717   : > { %3452 = vmatpush3.msra.mxu1 %v3963_v45  ;;  %v2166_v38 = vsel %vm2164_vm13, %v2165_v29, %v2163_v20 }
 0x718   : > { %3114 = vst.msk [vmem:[%s4132_s13 + $0x48] sm:$0xff] %vm611_vm1, %v2175_v23  ;;  %3454 = vmatmul.mubr.msk.f32.vlgmr.msra.gmra.mxu1 %vm601_vm0, %v4100_v5  ;;  %v2174_v43 = vmul.f32 %v2166_v38, %v4231_v47 }
 0x719   : > { %3467 = vmatprep.mubr.msk.f32.mxu1 %vm601_vm0, %v4019_v52 }
 0x71a   : > { %3113 = vst.msk [vmem:[%s4132_s13 + $0x40] sm:$0xff] %vm611_vm1, %v2174_v43 }
 0x7d0   : > { %v3427_v27 = vpop.f32.mrf.mxu1 }
 0x7d1   : > { %v2422_v63 = vadd.f32 %v3427_v27, %v4102_v34 }
 0x7d2   : > { %v2416_v9 = vpop.f32.mrf.mxu1 }
 0x7d3   : > { %3543 = vrsqrt.f32 %v2422_v63  ;;  %v2417_v45 = vadd.f32 %v2416_v9, %v4106_v36  ;;  %vm2434_vm14 = vcmp.eq.f32.partialorder %v2422_v63, inf  ;;  %v2437_v11 = vand.u32 2147483648, %v2422_v63 }
 0x7d4   : > { %v3441_v33 = vpop.f32.mrf.mxu1  ;;  %vm2436_vm15 = vcmp.eq.f32.partialorder %v2422_v63, 0.0 }
 0x7d5   : > { %v2608_v37 = vadd.f32 %v3441_v33, %v3434_v35  ;;  %3545 = vrsqrt.f32 %v2417_v45  ;;  %vm2427_vm2 = vcmp.eq.f32.partialorder %v2417_v45, inf  ;;  %vm2429_vm3 = vcmp.eq.f32.partialorder %v2417_v45, 0.0 }
 0x7d6   : > { %v2602_v5 = vpop.f32.mrf.mxu1 }
 0x7d7   : > { %v4304_v40 = vadd.f32 %v2608_v37, %v4023_v53  ;;  %v2603_v22 = vadd.f32 %v2602_v5, %v2519_v39 }
 0x7d8   : > { %v3455_v55 = vpop.f32.mrf.mxu1 }
 0x7d9   : > { %v4307_v52 = vadd.f32 %v2603_v22, %v4025_v31  ;;  %v2614_v32 = vmul.f32 %v4304_v40, %v4304_v40 }
 0x7da   : > { %v2784_v30 = vpop.f32.mrf.mxu1 }
 0x7db   : > { %3442 = vmatprep.subr.mxu0 %v2614_v32  ;;  %v2613_v41 = vmul.f32 %v4307_v52, %v4307_v52 }
 0x7dc   : > { %3443 = vmatpush3.msra.mxu0 %v2614_v32 }
 0x7dd   : > { %3444 = vmatprep.subr.mxu0 %v2613_v41 }
 0x7de   : > { %3445 = vmatpush3.msra.mxu0 %v2613_v41 }
 0x7df   : > { %3447 = vmatmul.mubr.msk.f32.vlgmr.msra.gmra.mxu0 %vm601_vm0, %v4044_v3  ;;  %3456 = vmatprep.subr.mxu0 %v3954_v44 }
 0x7e0   : > { %v3544_v47 = vpop.eup %3543  ;;  %3457 = vmatpush3.msra.mxu0 %v3954_v44  ;;  %3460 = vmatprep.mubr.msk.f32.mxu0 %vm601_vm0, %v4094_v26  ;;  %v2430_v26 = vand.u32 2147483648, %v2417_v45 }
 0x7e1   : > { %v2433_v49 = vmul.f32 %v3544_v47, %v2422_v63  ;;  %3458 = vmatprep.subr.mxu0 %v3968_v46 }
 0x7e2   : > { %3459 = vmatpush3.msra.mxu0 %v3968_v46  ;;  %v3546_v50 = vpop.eup %3545 }
 0x7e3   : > { %v2435_v19 = vsel %vm2434_vm14, %v2422_v63, %v2433_v49  ;;  %3461 = vmatmul.mubr.msk.f32.vlgmr.msra.gmra.mxu0 %vm601_vm0, %v4098_v28  ;;  %v2426_v44 = vmul.f32 %v3546_v50, %v2417_v45 }
 0x7e4   : > { %v2438_v12 = vsel %vm2436_vm15, %v2437_v11, %v2435_v19 }
 0x7e5   : > { %v2440_v51 = vmul.f32 %v2438_v12, %v4266_v62  ;;  %v2428_v16 = vsel %vm2427_vm2, %v2417_v45, %v2426_v44 }
 0x7e6   : > { %v2431_v42 = vsel %vm2429_vm3, %v2430_v26, %v2428_v16 }
 0x7e7   : > { %3122 = vst.msk [vmem:[%s4132_s13 + $0x58] sm:$0xff] %vm611_vm1, %v2440_v51  ;;  %v2439_v54 = vmul.f32 %v2431_v42, %v4269_v2 }
 0x7e9   : > { %3121 = vst.msk [vmem:[%s4132_s13 + $0x50] sm:$0xff] %vm611_vm1, %v2439_v54 }
 0x89f   : > { %v3448_v46 = vpop.f32.mrf.mxu0 }
 0x8a0   : > { %v2687_v14 = vadd.f32 %v3448_v46, %v4102_v34 }
 0x8a1   : > { %v2681_v28 = vpop.f32.mrf.mxu0 }
 0x8a2   : > { %3547 = vrsqrt.f32 %v2687_v14  ;;  %v2682_v56 = vadd.f32 %v2681_v28, %v4106_v36  ;;  %vm2699_vm4 = vcmp.eq.f32.partialorder %v2687_v14, inf  ;;  %v2702_v62 = vand.u32 2147483648, %v2687_v14 }
 0x8a3   : > { %v3462_v21 = vpop.f32.mrf.mxu0  ;;  %vm2701_vm5 = vcmp.eq.f32.partialorder %v2687_v14, 0.0 }
 0x8a4   : > { %v2873_v57 = vadd.f32 %v3462_v21, %v3455_v55  ;;  %3549 = vrsqrt.f32 %v2682_v56  ;;  %vm2692_vm6 = vcmp.eq.f32.partialorder %v2682_v56, inf  ;;  %v2695_v6 = vand.u32 2147483648, %v2682_v56 }
 0x8a5   : > { %v2867_v58 = vpop.f32.mrf.mxu0  ;;  %vm2694_vm7 = vcmp.eq.f32.partialorder %v2682_v56, 0.0 }
 0x8a6   : > { %v2877_v59 = vadd.f32 %v2873_v57, %v4023_v53  ;;  %v2868_v18 = vadd.f32 %v2867_v58, %v2784_v30 }
 0x8a8   : > { %v2876_v48 = vadd.f32 %v2868_v18, %v4025_v31  ;;  %v2879_v60 = vmul.f32 %v2877_v59, %v2877_v59 }
 0x8aa   : > { %3463 = vmatprep.subr.mxu1 %v2879_v60  ;;  %v2878_v0 = vmul.f32 %v2876_v48, %v2876_v48 }
 0x8ab   : > { %3464 = vmatpush3.msra.mxu1 %v2879_v60 }
 0x8ac   : > { %3465 = vmatprep.subr.mxu1 %v2878_v0 }
 0x8ad   : > { %3466 = vmatpush3.msra.mxu1 %v2878_v0 }
 0x8ae   : > { %3468 = vmatmul.mubr.msk.f32.vlgmr.msra.gmra.mxu1 %vm601_vm0, %v4044_v3 }
 0x8af   : > { %v3548_v1 = vpop.eup %3547 }
 0x8b0   : > { %v2698_v24 = vmul.f32 %v3548_v1, %v2687_v14 }
 0x8b1   : > { %v3550_v61 = vpop.eup %3549 }
 0x8b2   : > { %v2700_v53 = vsel %vm2699_vm4, %v2687_v14, %v2698_v24  ;;  %v2691_v31 = vmul.f32 %v3550_v61, %v2682_v56 }
 0x8b3   : > { %v2703_v2 = vsel %vm2701_vm5, %v2702_v62, %v2700_v53 }
 0x8b4   : > { %v2705_v4 = vmul.f32 %v2703_v2, %v4304_v40  ;;  %v2693_v7 = vsel %vm2692_vm6, %v2682_v56, %v2691_v31 }
 0x8b5   : > { %v2696_v8 = vsel %vm2694_vm7, %v2695_v6, %v2693_v7 }
 0x8b6   : > { %3130 = vst.msk [vmem:[%s4132_s13 + $0x68] sm:$0xff] %vm611_vm1, %v2705_v4  ;;  %v2704_v3 = vmul.f32 %v2696_v8, %v4307_v52 }
 0x8b8   : > { %3129 = vst.msk [vmem:[%s4132_s13 + $0x60] sm:$0xff] %vm611_vm1, %v2704_v3 }
 0x96e   : > { %v3469_v10 = vpop.f32.mrf.mxu1 }
 0x96f   : > { %v2952_v15 = vadd.f32 %v3469_v10, %v4102_v34 }
 0x970   : > { %v2946_v25 = vpop.f32.mrf.mxu1 }
 0x971   : > { %3551 = vrsqrt.f32 %v2952_v15  ;;  %v2947_v13 = vadd.f32 %v2946_v25, %v4106_v36  ;;  %vm2964_vm0 = vcmp.eq.f32.partialorder %v2952_v15, inf  ;;  %v2967_v29 = vand.u32 2147483648, %v2952_v15 }
 0x972   : > { %vm2966_vm8 = vcmp.eq.f32.partialorder %v2952_v15, 0.0 }
 0x973   : > { %3553 = vrsqrt.f32 %v2947_v13  ;;  %vm2957_vm9 = vcmp.eq.f32.partialorder %v2947_v13, inf  ;;  %v2960_v35 = vand.u32 2147483648, %v2947_v13  ;;  %vm2959_vm10 = vcmp.eq.f32.partialorder %v2947_v13, 0.0 }
 0x97e   : > { %v3552_v17 = vpop.eup %3551 }
 0x97f   : > { %v2963_v23 = vmul.f32 %v3552_v17, %v2952_v15 }
 0x980   : > { %v3554_v20 = vpop.eup %3553 }
 0x981   : > { %v2965_v38 = vsel %vm2964_vm0, %v2952_v15, %v2963_v23  ;;  %v2956_v27 = vmul.f32 %v3554_v20, %v2947_v13 }
 0x982   : > { %v2968_v43 = vsel %vm2966_vm8, %v2967_v29, %v2965_v38 }
 0x983   : > { %v2970_v63 = vmul.f32 %v2968_v43, %v2877_v59  ;;  %v2958_v34 = vsel %vm2957_vm9, %v2947_v13, %v2956_v27 }
 0x984   : > { %v2961_v36 = vsel %vm2959_vm10, %v2960_v35, %v2958_v34 }
 0x985   : > { %3138 = vst.msk [vmem:[%s4132_s13 + $0x78] sm:$0xff] %vm611_vm1, %v2970_v63  ;;  %v2969_v9 = vmul.f32 %v2961_v36, %v2876_v48 }
 0x987   : > { %3137 = vst.msk [vmem:[%s4132_s13 + $0x70] sm:$0xff] %vm611_vm1, %v2969_v9 }
 0x988 PF: > { %s18_s9 = sadd.s32 1, %s3593_s9   ;;  %s4371_s27 = smov %s3585_s29 }
 0x989   : > { %p15_p7 = scmp.ge.s32.totalorder %s18_s9, 6   ;;  %s4372_s28 = smov %s3589_s30 }
 0x98a   : > { %s4373_s29 = smov %s4376_s10  ;;  %s4374_s30 = smov %s4380_s11 }
 0x98b   :  { %17 = sbr.rel (!%p15_p7) target bundleno = 3 (0x3), region = 98 }

// kernel: image_synthesis_forward.4
= control target key start
LH: loop header
LB: loop body
LE: loop exit
PB: predicated region body
PF: predicated region fallthrough
CT: control target
= control target key end

     0   :  { %s3576_s27 = smov 0   ;;  %s3578_s28 = smov 0   ;;  %s4188_s0 = inlined_call_operand.vmem [shape: f32[2,10,8,10], index: 0, kind: input, shape index: {}]   ;;  %s4189_s1 = inlined_call_operand.vmem [shape: f32[16,72], index: 1, kind: input, shape index: {}]   ;;  %s4190_s2 = inlined_call_operand.vmem [shape: f32[16,72], index: 2, kind: input, shape index: {}]   ;;  %s4191_s3 = inlined_call_operand.vmem [shape: f32[16,1], index: 3, kind: input, shape index: {}]   ;;  %s4192_s4 = inlined_call_operand.vmem [shape: f32[16,1], index: 4, kind: input, shape index: {}]   ;;  %s4193_s5 = inlined_call_operand.vmem [shape: f32[16,16], index: 5, kind: input, shape index: {}]   ;;  %s4194_s6 = inlined_call_operand.vmem [shape: f32[8,16], index: 6, kind: input, shape index: {}]   ;;  %s4195_s7 = inlined_call_operand.vmem [shape: f32[8,16], index: 7, kind: input, shape index: {}]   ;;  %s4196_s8 = inlined_call_operand.vmem [shape: f32[2,16,8,16], index: 8, kind: output, shape index: {}]  }
   0x1   :  { %s3580_s29 = smov 0  }
   0x2 LB: > { %s30_s30 = sadd.s32 1, %s3508_s28  ;;  %p3060_p0 = scmp.ge.s32.totalorder %s3512_s29, 1  ;;  %s3512_s29 = sphi %s3580_s29, %s18_s29   ;;  %s3508_s28 = sphi %s3578_s28, %s4198_s28   ;;  %s3504_s27 = sphi %s3576_s27, %s4197_s27  }
   0x3   : > { %p32_p1 = scmp.ge.s32.totalorder %s30_s30, 2  ;;  %p276_p2 = scmp.lt.s32.totalorder %s3512_s29, 3 }
   0x5   : > { %s4200_s30 = smov (%p32_p1, %s30_s30), 0  ;;  %p277_p3 = pnand %p3060_p0, %p276_p2 }
   0x6   : > { %p314_p4 = scmp.lt.s32.totalorder (!%p277_p3), %s3504_s27, 1  ;;  %s3514_s13 = smov (!%p277_p3), 126  }
   0x7   : > { %280 = sbr.rel (%p277_p3) target bundleno = 2437 (0x985), region = 52  ;;  %s3515_s14 = smov (!%p277_p3), 127  }
   0x8   : > { %s3516_s15 = smov (!%p277_p3), 8   ;;  %s3517_s16 = smov (!%p277_p3), 16  }
   0x9   : > { %s3518_s17 = smov (!%p277_p3), 24   ;;  %s3519_s18 = smov (!%p277_p3), 32  }
   0xa   : > { %s3520_s19 = smov (!%p277_p3), 40   ;;  %s3521_s20 = smov (!%p277_p3), 48  }
   0xb   : > { %s3522_s21 = smov (!%p277_p3), 56   ;;  %s3526_s22 = smov (!%p277_p3), 104  }
   0xc   : > { %s4202_s27 = smov (!%p314_p4, %s3504_s27), 1  ;;  %vm599_vm0 = vcmask 64512   ;;  %vm609_vm1 = vcmask 130048   ;;  %v342_v35 = vld [vmem:[%s4189_s1] sm:$0xff]  ;;  %vm669_vm2 = vcmask 588800   ;;  %v3523_v37 = vmov 0  }
   0xd   : > { %s3414_s9 = smul.u32 80, %s4202_s27  ;;  %v344_v36 = vld [vmem:[%s4190_s2] sm:$0xff]  ;;  %3254 = vmatprep.mubr.msk.f32.mxu0 %vm669_vm2, %v342_v35  ;;  %3457 = vset.pattern.permute.xlu0 %v3523_v37  ;;  %v347_v39 = vld [vmem:[%s4191_s3 + $0x8] sm:$0xff]  ;;  %vm629_vm3 = vcmask 261120   ;;  %vm619_vm4 = vcmask 195584   ;;  %vm639_vm5 = vcmask 326656  }
   0xe   : > { %3275 = vmatprep.mubr.msk.f32.mxu1 %vm669_vm2, %v344_v36  ;;  %3456 = vset.pattern.permute.xlu1 %v3523_v37  ;;  %v346_v43 = vld [vmem:[%s4191_s3] sm:$0xff]  ;;  %vm649_vm6 = vcmask 392192   ;;  %vm659_vm7 = vcmask 457728   ;;  %s3527_s23 = smov 96   ;;  %s3528_s24 = smov 88  }
   0xf   : > { %s3600_s12 = scalar_lea.vmem %s4188_s0, %s3414_s9  ;;  %s3529_s25 = smov 80  }
  0x10   : > { %v3603_v0 = vld [vmem:[%s3600_s12 + $0x18] sm:$0xff]  ;;  %v3606_v1 = vld [vmem:[%s3600_s12 + $0x10] sm:$0xff]  ;;  %v3611_v2 = vld [vmem:[%s3600_s12 + $0x20] sm:$0xff]  ;;  %s3530_s26 = smov 72  }
  0x11   : > { %378 = vrot.lane.b32.xlu0 %v3603_v0, %s3514_s13  ;;  %370 = vrot.lane.b32.xlu1 %v3606_v1, %s3514_s13  ;;  %v3614_v3 = vld [vmem:[%s3600_s12 + $0x28] sm:$0xff]  ;;  %v3619_v4 = vld [vmem:[%s3600_s12 + $0x30] sm:$0xff] }
  0x12   : > { %v3622_v5 = vld [vmem:[%s3600_s12 + $0x8] sm:$0xff]  ;;  %v3627_v6 = vld [vmem:[%s3600_s12 + $0x38] sm:$0xff]  ;;  %v3630_v7 = vld [vmem:[%s3600_s12 + $0x40] sm:$0xff] }
  0x13   : > { %v3635_v8 = vld [vmem:[%s3600_s12 + $0x48] sm:$0xff]  ;;  %v3648_v9 = vld [vmem:[%s3600_s12] sm:$0xff] }
  0x15   : > { %383 = vrot.lane.b32.xlu0 %v3611_v2, %s3514_s13  ;;  %388 = vrot.lane.b32.xlu1 %v3614_v3, %s3514_s13 }
  0x19   : > { %393 = vrot.lane.b32.xlu0 %v3619_v4, %s3514_s13  ;;  %368 = vrot.lane.b32.xlu1 %v3622_v5, %s3514_s13 }
  0x1d   : > { %398 = vrot.lane.b32.xlu0 %v3627_v6, %s3514_s13  ;;  %403 = vrot.lane.b32.xlu1 %v3630_v7, %s3514_s13 }
  0x21   : > { %376 = vrot.lane.b32.xlu0 %v3603_v0, %s3515_s14  ;;  %408 = vrot.lane.b32.xlu1 %v3635_v8, %s3514_s13 }
  0x25   : > { %381 = vrot.lane.b32.xlu0 %v3611_v2, %s3515_s14  ;;  %361 = vrot.lane.b32.xlu1 %v3606_v1, %s3515_s14 }
  0x29   : > { %386 = vrot.lane.b32.xlu0 %v3614_v3, %s3515_s14  ;;  %391 = vrot.lane.b32.xlu1 %v3619_v4, %s3515_s14 }
  0x2d   : > { %359 = vrot.lane.b32.xlu0 %v3622_v5, %s3515_s14  ;;  %396 = vrot.lane.b32.xlu1 %v3627_v6, %s3515_s14 }
  0x31   : > { %401 = vrot.lane.b32.xlu0 %v3630_v7, %s3515_s14  ;;  %406 = vrot.lane.b32.xlu1 %v3635_v8, %s3515_s14 }
  0x35   : > { %357 = vrot.lane.b32.xlu1 %v3648_v9, %s3515_s14  ;;  %366 = vrot.lane.b32.xlu0 %v3648_v9, %s3514_s13 }
  0x39   : > { %414 = vrot.lane.b32.xlu1 %v3603_v0, %s3516_s15  ;;  %412 = vrot.lane.b32.xlu0 %v3606_v1, %s3516_s15 }
  0x3d   : > { %441 = vrot.lane.b32.xlu1 %v3611_v2, %s3517_s16 }
  0x41   : > { %468 = vrot.lane.b32.xlu1 %v3614_v3, %s3518_s17 }
  0x83   : > { %v379_v10 = vpop.permute.xlu0 %378  ;;  %v3660_v11 = vpop.permute.xlu1 %370 }
  0x84   : > { %426 = vrot.lane.b32.xlu0 %v379_v10, %s3516_s15 }
  0x87   : > { %v384_v12 = vpop.permute.xlu0 %383  ;;  %v389_v13 = vpop.permute.xlu1 %388 }
  0x88   : > { %453 = vrot.lane.b32.xlu1 %v384_v12, %s3517_s16  ;;  %424 = vrot.lane.b32.xlu0 %v3660_v11, %s3516_s15 }
  0x8b   : > { %v3666_v14 = vpop.permute.xlu1 %368  ;;  %v394_v15 = vpop.permute.xlu0 %393 }
  0x8c   : > { %480 = vrot.lane.b32.xlu1 %v389_v13, %s3518_s17  ;;  %451 = vrot.lane.b32.xlu0 %v379_v10, %s3517_s16 }
  0x8f   : > { %v404_v16 = vpop.permute.xlu1 %403  ;;  %v399_v18 = vpop.permute.xlu0 %398 }
  0x90   : > { %507 = vrot.lane.b32.xlu1 %v394_v15, %s3519_s18  ;;  %478 = vrot.lane.b32.xlu0 %v384_v12, %s3518_s17 }
  0x93   : > { %v409_v17 = vpop.permute.xlu1 %408  ;;  %v377_v21 = vpop.permute.xlu0 %376 }
  0x94   : > { %422 = vrot.lane.b32.xlu1 %v3666_v14, %s3516_s15  ;;  %449 = vrot.lane.b32.xlu0 %v3660_v11, %s3517_s16 }
  0x97   : > { %v3676_v19 = vpop.permute.xlu1 %361  ;;  %v382_v24 = vpop.permute.xlu0 %381 }
  0x98   : > { %534 = vrot.lane.b32.xlu1 %v399_v18, %s3520_s19  ;;  %561 = vrot.lane.b32.xlu0 %v404_v16, %s3521_s20 }
  0x9b   : > { %v392_v20 = vpop.permute.xlu1 %391  ;;  %v387_v27 = vpop.permute.xlu0 %386 }
  0x9c   : > { %505 = vrot.lane.b32.xlu1 %v389_v13, %s3519_s18  ;;  %476 = vrot.lane.b32.xlu0 %v379_v10, %s3518_s17 }
  0x9f   : > { %v397_v22 = vpop.permute.xlu1 %396  ;;  %v3702_v31 = vpop.permute.xlu0 %359 }
  0xa0   : > { %420 = vrot.lane.b32.xlu1 %v377_v21, %s3516_s15  ;;  %588 = vrot.lane.b32.xlu0 %v409_v17, %s3522_s21 }
  0xa3   : > { %v407_v23 = vpop.permute.xlu1 %406  ;;  %v402_v32 = vpop.permute.xlu0 %401 }
  0xa4   : > { %532 = vrot.lane.b32.xlu1 %v394_v15, %s3520_s19  ;;  %503 = vrot.lane.b32.xlu0 %v384_v12, %s3519_s18 }
  0xa7   : > { %v3686_v25 = vpop.permute.xlu1 %357  ;;  %v3741_v33 = vpop.permute.xlu0 %366 }
  0xa8   : > { %447 = vrot.lane.b32.xlu1 %v382_v24, %s3517_s16  ;;  %418 = vrot.lane.b32.xlu0 %v3676_v19, %s3516_s15 }
  0xab   : > { %v415_v26 = vpop.permute.xlu1 %414  ;;  %v3751_v34 = vpop.permute.xlu0 %412 }
  0xac   : > { %559 = vrot.lane.b32.xlu1 %v399_v18, %s3521_s20  ;;  %530 = vrot.lane.b32.xlu0 %v389_v13, %s3520_s19  ;;  %v602_v28 = vsel %vm599_vm0, %v3606_v1, %v415_v26 }
  0xaf   : > { %v442_v29 = vpop.permute.xlu1 %441 }
  0xb0   : > { %474 = vrot.lane.b32.xlu1 %v387_v27, %s3518_s17  ;;  %445 = vrot.lane.b32.xlu0 %v377_v21, %s3517_s16  ;;  %v3698_v30 = vsel %vm609_vm1, %v602_v28, %v442_v29 }
  0xb3   : > { %v3765_v38 = vpop.permute.xlu1 %468 }
  0xb4   : > { %586 = vrot.lane.b32.xlu1 %v404_v16, %s3522_s21  ;;  %557 = vrot.lane.b32.xlu0 %v394_v15, %s3521_s20 }
  0xb8   : > { %501 = vrot.lane.b32.xlu1 %v392_v20, %s3519_s18  ;;  %416 = vrot.lane.b32.xlu0 %v3702_v31, %s3516_s15 }
  0xbc   : > { %472 = vrot.lane.b32.xlu1 %v382_v24, %s3518_s17  ;;  %528 = vrot.lane.b32.xlu0 %v397_v22, %s3520_s19 }
  0xc0   : > { %584 = vrot.lane.b32.xlu1 %v399_v18, %s3522_s21  ;;  %443 = vrot.lane.b32.xlu0 %v3676_v19, %s3517_s16 }
  0xc4   : > { %499 = vrot.lane.b32.xlu1 %v387_v27, %s3519_s18  ;;  %555 = vrot.lane.b32.xlu0 %v402_v32, %s3521_s20 }
  0xc8   : > { %526 = vrot.lane.b32.xlu1 %v392_v20, %s3520_s19  ;;  %470 = vrot.lane.b32.xlu0 %v377_v21, %s3518_s17 }
  0xcc   : > { %553 = vrot.lane.b32.xlu1 %v397_v22, %s3521_s20  ;;  %582 = vrot.lane.b32.xlu0 %v407_v23, %s3522_s21 }
  0xd0   : > { %580 = vrot.lane.b32.xlu1 %v402_v32, %s3522_s21  ;;  %497 = vrot.lane.b32.xlu0 %v382_v24, %s3519_s18 }
  0xd4   : > { %495 = vrot.lane.b32.xlu1 %v3619_v4, %s3519_s18  ;;  %524 = vrot.lane.b32.xlu0 %v387_v27, %s3520_s19 }
  0xd8   : > { %410 = vrot.lane.b32.xlu1 %v3622_v5, %s3516_s15  ;;  %439 = vrot.lane.b32.xlu0 %v3603_v0, %s3517_s16 }
  0xdc   : > { %522 = vrot.lane.b32.xlu1 %v3627_v6, %s3520_s19  ;;  %551 = vrot.lane.b32.xlu0 %v392_v20, %s3521_s20 }
  0xe0   : > { %437 = vrot.lane.b32.xlu1 %v3606_v1, %s3517_s16  ;;  %466 = vrot.lane.b32.xlu0 %v3611_v2, %s3518_s17 }
  0xe4   : > { %549 = vrot.lane.b32.xlu1 %v3630_v7, %s3521_s20  ;;  %578 = vrot.lane.b32.xlu0 %v397_v22, %s3522_s21 }
  0xe8   : > { %520 = vrot.lane.b32.xlu1 %v3619_v4, %s3520_s19  ;;  %493 = vrot.lane.b32.xlu0 %v3614_v3, %s3519_s18 }
  0xec   : > { %491 = vrot.lane.b32.xlu1 %v3611_v2, %s3519_s18  ;;  %464 = vrot.lane.b32.xlu0 %v3603_v0, %s3518_s17  ;;  %s3133_s17 = sshll.u32 %s4202_s27, 7 }
  0xf0   : > { %518 = vrot.lane.b32.xlu1 %v3614_v3, %s3520_s19  ;;  %576 = vrot.lane.b32.xlu0 %v3635_v8, %s3522_s21 }
  0xf4   : > { %545 = vrot.lane.b32.xlu1 %v3619_v4, %s3521_s20  ;;  %547 = vrot.lane.b32.xlu0 %v3627_v6, %s3521_s20  ;;  %s3524_s20 = smov 120  }
  0xf6   : > { %v427_v40 = vpop.permute.xlu0 %426 }
  0xf7   : > { %v608_v52 = vsel %vm599_vm0, %v3660_v11, %v427_v40 }
  0xf8   : > { %574 = vrot.lane.b32.xlu0 %v3630_v7, %s3522_s21  ;;  %1001 = vperm.xlu1 %3456, %v347_v39  }
  0xfa   : > { %v454_v41 = vpop.permute.xlu1 %453  ;;  %v425_v42 = vpop.permute.xlu0 %424 }
  0xfb   : > { %v618_v53 = vsel %vm609_vm1, %v608_v52, %v454_v41 }
  0xfc   : > { %572 = vrot.lane.b32.xlu0 %v3627_v6, %s3522_s21  ;;  %v607_v6 = vsel %vm599_vm0, %v3666_v14, %v425_v42  ;;  %s3525_s21 = smov 112  }
  0xfe   : > { %v481_v44 = vpop.permute.xlu1 %480  ;;  %v452_v45 = vpop.permute.xlu0 %451 }
  0xff   : > { %v628_v54 = vsel %vm619_vm4, %v618_v53, %v481_v44  ;;  %v617_v7 = vsel %vm609_vm1, %v607_v6, %v452_v45 }
 0x100   : > { %996 = vperm.xlu0 %3457, %v346_v43  }
 0x102   : > { %v508_v46 = vpop.permute.xlu1 %507  ;;  %v479_v47 = vpop.permute.xlu0 %478 }
 0x103   : > { %v638_v55 = vsel %vm629_vm3, %v628_v54, %v508_v46  ;;  %v627_v11 = vsel %vm619_vm4, %v617_v7, %v479_v47 }
 0x106   : > { %v423_v48 = vpop.permute.xlu1 %422  ;;  %v450_v49 = vpop.permute.xlu0 %449 }
 0x107   : > { %v606_v21 = vsel %vm599_vm0, %v3741_v33, %v423_v48 }
 0x108   : > { %v616_v22 = vsel %vm609_vm1, %v606_v21, %v450_v49  ;;  %v601_v21 = vsel %vm599_vm0, %v3622_v5, %v3751_v34 }
 0x10a   : > { %v535_v50 = vpop.permute.xlu1 %534  ;;  %v562_v51 = vpop.permute.xlu0 %561 }
 0x10b   : > { %v648_v58 = vsel %vm639_vm5, %v638_v55, %v535_v50 }
 0x10c   : > { %v658_v59 = vsel %vm649_vm6, %v648_v58, %v562_v51 }
 0x10e   : > { %v506_v56 = vpop.permute.xlu1 %505  ;;  %v477_v57 = vpop.permute.xlu0 %476 }
 0x10f   : > { %v637_v12 = vsel %vm629_vm3, %v627_v11, %v506_v56  ;;  %v626_v26 = vsel %vm619_vm4, %v616_v22, %v477_v57 }
 0x112   : > { %v421_v60 = vpop.permute.xlu1 %420  ;;  %v589_v61 = vpop.permute.xlu0 %588 }
 0x113   : > { %v668_v62 = vsel %vm659_vm7, %v658_v59, %v589_v61  ;;  %v605_v39 = vsel %vm599_vm0, %v3676_v19, %v421_v60 }
 0x114   : > { %3236 = vmatprep.subr.mxu0 %v668_v62  ;;  %3257 = vmatprep.subr.mxu1 %v668_v62 }
 0x115   : > { %3237 = vmatpush3.msra.mxu0 %v668_v62  ;;  %3258 = vmatpush3.msra.mxu1 %v668_v62 }
 0x116   : > { %v533_v63 = vpop.permute.xlu1 %532  ;;  %v504_v0 = vpop.permute.xlu0 %503 }
 0x117   : > { %v647_v13 = vsel %vm639_vm5, %v637_v12, %v533_v63  ;;  %v636_v27 = vsel %vm629_vm3, %v626_v26, %v504_v0 }
 0x11a   : > { %v448_v1 = vpop.permute.xlu1 %447  ;;  %v419_v2 = vpop.permute.xlu0 %418 }
 0x11b   : > { %v615_v40 = vsel %vm609_vm1, %v605_v39, %v448_v1  ;;  %v604_v45 = vsel %vm599_vm0, %v3702_v31, %v419_v2 }
 0x11e   : > { %v560_v3 = vpop.permute.xlu1 %559  ;;  %v531_v4 = vpop.permute.xlu0 %530 }
 0x11f   : > { %v657_v15 = vsel %vm649_vm6, %v647_v13, %v560_v3  ;;  %v646_v28 = vsel %vm639_vm5, %v636_v27, %v531_v4 }
 0x122   : > { %v475_v8 = vpop.permute.xlu1 %474  ;;  %v446_v10 = vpop.permute.xlu0 %445 }
 0x123   : > { %v625_v43 = vsel %vm619_vm4, %v615_v40, %v475_v8  ;;  %v614_v47 = vsel %vm609_vm1, %v604_v45, %v446_v10 }
 0x126   : > { %v587_v16 = vpop.permute.xlu1 %586  ;;  %v558_v17 = vpop.permute.xlu0 %557 }
 0x127   : > { %v667_v18 = vsel %vm659_vm7, %v657_v15, %v587_v16  ;;  %v656_v29 = vsel %vm649_vm6, %v646_v28, %v558_v17  ;;  %v622_v15 = vsel %vm619_vm4, %v3698_v30, %v3765_v38 }
 0x128   : > { %3238 = vmatprep.subr.mxu0 %v667_v18  ;;  %3259 = vmatprep.subr.mxu1 %v667_v18 }
 0x129   : > { %3239 = vmatpush3.msra.mxu0 %v667_v18  ;;  %3260 = vmatpush3.msra.mxu1 %v667_v18 }
 0x12a   : > { %v502_v14 = vpop.permute.xlu1 %501  ;;  %v417_v20 = vpop.permute.xlu0 %416 }
 0x12b   : > { %v635_v44 = vsel %vm629_vm3, %v625_v43, %v502_v14  ;;  %v603_v63 = vsel %vm599_vm0, %v3686_v25, %v417_v20  ;;  %v3860_v43 = vld [vmem:[%s4195_s7] sm:$0xff] }
 0x12e   : > { %v473_v23 = vpop.permute.xlu1 %472  ;;  %v529_v24 = vpop.permute.xlu0 %528 }
 0x12f   : > { %v645_v46 = vsel %vm639_vm5, %v635_v44, %v529_v24  ;;  %v624_v19 = vsel %vm619_vm4, %v614_v47, %v473_v23  ;;  %v3865_v44 = vld [vmem:[%s4194_s6] sm:$0xff] }
 0x132   : > { %v585_v32 = vpop.permute.xlu1 %584  ;;  %v444_v35 = vpop.permute.xlu0 %443 }
 0x133   : > { %v666_v36 = vsel %vm659_vm7, %v656_v29, %v585_v32  ;;  %v613_v0 = vsel %vm609_vm1, %v603_v63, %v444_v35 }
 0x134   : > { %3240 = vmatprep.subr.mxu0 %v666_v36  ;;  %3261 = vmatprep.subr.mxu1 %v666_v36 }
 0x135   : > { %3241 = vmatpush3.msra.mxu0 %v666_v36  ;;  %3262 = vmatpush3.msra.mxu1 %v666_v36 }
 0x136   : > { %v500_v33 = vpop.permute.xlu1 %499  ;;  %v556_v37 = vpop.permute.xlu0 %555 }
 0x137   : > { %v655_v48 = vsel %vm649_vm6, %v645_v46, %v556_v37  ;;  %v634_v52 = vsel %vm629_vm3, %v624_v19, %v500_v33  ;;  %v3886_v19 = vld [vmem:[%s4193_s5] sm:$0xff] }
 0x13a   : > { %v527_v41 = vpop.permute.xlu1 %526  ;;  %v471_v42 = vpop.permute.xlu0 %470 }
 0x13b   : > { %v644_v53 = vsel %vm639_vm5, %v634_v52, %v527_v41  ;;  %v623_v3 = vsel %vm619_vm4, %v613_v0, %v471_v42  ;;  %v343_v41 = vld [vmem:[%s4189_s1 + $0x8] sm:$0xff] }
 0x13c   : > { %v345_v42 = vld [vmem:[%s4190_s2 + $0x8] sm:$0xff] }
 0x13e   : > { %v554_v49 = vpop.permute.xlu1 %553  ;;  %v583_v50 = vpop.permute.xlu0 %582 }
 0x13f   : > { %v665_v51 = vsel %vm659_vm7, %v655_v48, %v583_v50  ;;  %v654_v31 = vsel %vm649_vm6, %v644_v53, %v554_v49  ;;  %v352_v49 = vld [vmem:[%s4192_s4] sm:$0xff]  ;;  %v353_v50 = vld [vmem:[%s4192_s4 + $0x8] sm:$0xff] }
 0x140   : > { %3242 = vmatprep.subr.mxu0 %v665_v51  ;;  %3263 = vmatprep.subr.mxu1 %v665_v51 }
 0x141   : > { %3243 = vmatpush3.msra.mxu0 %v665_v51  ;;  %3264 = vmatpush3.msra.mxu1 %v665_v51 }
 0x142   : > { %v581_v54 = vpop.permute.xlu1 %580  ;;  %v498_v55 = vpop.permute.xlu0 %497 }
 0x143   : > { %v664_v56 = vsel %vm659_vm7, %v654_v31, %v581_v54  ;;  %v633_v4 = vsel %vm629_vm3, %v623_v3, %v498_v55 }
 0x144   : > { %3244 = vmatprep.subr.mxu0 %v664_v56  ;;  %3265 = vmatprep.subr.mxu1 %v664_v56 }
 0x145   : > { %3245 = vmatpush3.msra.mxu0 %v664_v56  ;;  %3266 = vmatpush3.msra.mxu1 %v664_v56 }
 0x146   : > { %v496_v57 = vpop.permute.xlu1 %495  ;;  %v525_v58 = vpop.permute.xlu0 %524 }
 0x147   : > { %v643_v6 = vsel %vm639_vm5, %v633_v4, %v525_v58  ;;  %v632_v17 = vsel %vm629_vm3, %v622_v15, %v496_v57 }
 0x14a   : > { %v411_v59 = vpop.permute.xlu1 %410  ;;  %v440_v60 = vpop.permute.xlu0 %439 }
 0x14b   : > { %v611_v23 = vsel %vm609_vm1, %v601_v21, %v440_v60  ;;  %v600_v30 = vsel %vm599_vm0, %v3648_v9, %v411_v59 }
 0x14e   : > { %v523_v61 = vpop.permute.xlu1 %522  ;;  %v552_v62 = vpop.permute.xlu0 %551 }
 0x14f   : > { %v653_v7 = vsel %vm649_vm6, %v643_v6, %v552_v62  ;;  %v642_v18 = vsel %vm639_vm5, %v632_v17, %v523_v61 }
 0x152   : > { %v438_v1 = vpop.permute.xlu1 %437  ;;  %v467_v2 = vpop.permute.xlu0 %466 }
 0x153   : > { %v621_v38 = vsel %vm619_vm4, %v611_v23, %v467_v2  ;;  %v610_v28 = vsel %vm609_vm1, %v600_v30, %v438_v1  ;;  %v3911_v1 = vld [vmem:[%s4193_s5 + $0x8] sm:$0xff] }
 0x156   : > { %v550_v8 = vpop.permute.xlu1 %549  ;;  %v579_v10 = vpop.permute.xlu0 %578 }
 0x157   : > { %v663_v11 = vsel %vm659_vm7, %v653_v7, %v579_v10  ;;  %v652_v14 = vsel %vm649_vm6, %v642_v18, %v550_v8 }
 0x158   : > { %3246 = vmatprep.subr.mxu0 %v663_v11  ;;  %3267 = vmatprep.subr.mxu1 %v663_v11 }
 0x159   : > { %3247 = vmatpush3.msra.mxu0 %v663_v11  ;;  %3268 = vmatpush3.msra.mxu1 %v663_v11 }
 0x15a   : > { %v521_v25 = vpop.permute.xlu1 %520  ;;  %v494_v12 = vpop.permute.xlu0 %493 }
 0x15b   : > { %v631_v26 = vsel %vm629_vm3, %v621_v38, %v494_v12 }
 0x15c   : > { %v641_v34 = vsel %vm639_vm5, %v631_v26, %v521_v25 }
 0x15e   : > { %v465_v13 = vpop.permute.xlu0 %464  ;;  %v492_v16 = vpop.permute.xlu1 %491 }
 0x15f   : > { %v620_v5 = vsel %vm619_vm4, %v610_v28, %v465_v13 }
 0x160   : > { %v630_v36 = vsel %vm629_vm3, %v620_v5, %v492_v16 }
 0x162   : > { %v577_v20 = vpop.permute.xlu0 %576  ;;  %v519_v24 = vpop.permute.xlu1 %518 }
 0x163   : > { %v662_v22 = vsel %vm659_vm7, %v652_v14, %v577_v20  ;;  %v640_v33 = vsel %vm639_vm5, %v630_v36, %v519_v24 }
 0x164   : > { %3248 = vmatprep.subr.mxu0 %v662_v22  ;;  %3269 = vmatprep.subr.mxu1 %v662_v22 }
 0x165   : > { %3249 = vmatpush3.msra.mxu0 %v662_v22  ;;  %3270 = vmatpush3.msra.mxu1 %v662_v22 }
 0x166   : > { %v548_v27 = vpop.permute.xlu0 %547  ;;  %v546_v35 = vpop.permute.xlu1 %545 }
 0x167   : > { %v651_v29 = vsel %vm649_vm6, %v641_v34, %v548_v27  ;;  %v650_v37 = vsel %vm649_vm6, %v640_v33, %v546_v35 }
 0x16a   : > { %v575_v32 = vpop.permute.xlu0 %574 }
 0x16b   : > { %v661_v9 = vsel %vm659_vm7, %v651_v29, %v575_v32 }
 0x16c   : > { %3250 = vmatprep.subr.mxu0 %v661_v9  ;;  %3271 = vmatprep.subr.mxu1 %v661_v9 }
 0x16d   : > { %3251 = vmatpush3.msra.mxu0 %v661_v9  ;;  %3272 = vmatpush3.msra.mxu1 %v661_v9 }
 0x16e   : > { %v573_v39 = vpop.permute.xlu0 %572 }
 0x16f   : > { %v660_v40 = vsel %vm659_vm7, %v650_v37, %v573_v39 }
 0x170   : > { %3252 = vmatprep.subr.mxu0 %v660_v40  ;;  %3273 = vmatprep.subr.mxu1 %v660_v40 }
 0x171   : > { %3253 = vmatpush3.msra.mxu0 %v660_v40  ;;  %3274 = vmatpush3.msra.mxu1 %v660_v40 }
 0x172   : > { %3255 = vmatmul.mubr.msk.f32.vlgmr.msra.gmra.mxu0 %vm669_vm2, %v343_v41  ;;  %3276 = vmatmul.mubr.msk.f32.vlgmr.msra.gmra.mxu1 %vm669_vm2, %v345_v42 }
 0x173   : > { %3278 = vmatprep.subr.mxu0 %v3860_v43  ;;  %3283 = vmatprep.subr.mxu1 %v3865_v44  ;;  %v3890_v51 = vpop.permute.xlu1 %1001 }
 0x174   : > { %3284 = vmatpush3.msra.mxu1 %v3865_v44  ;;  %3279 = vmatpush3.msra.mxu0 %v3860_v43 }
 0x175   : > { %3295 = vmatprep.subr.mxu1 %v3860_v43 }
 0x17b   : > { %v3892_v52 = vpop.permute.xlu0 %996 }
 0x232   : > { %v3256_v45 = vpop.f32.mrf.mxu0  ;;  %v3277_v46 = vpop.f32.mrf.mxu1 }
 0x233   : > { %1120 = vrot.lane.b32.xlu0 %v3277_v46, %s3524_s20 }
 0x234   : > { %v742_v47 = vpop.f32.mrf.mxu0  ;;  %v823_v48 = vpop.f32.mrf.mxu1 }
 0x235   : > { %1118 = vrot.lane.b32.xlu1 %v823_v48, %s3524_s20  ;;  %3280 = vmatprep.mubr.msk.f32.mxu0 %vm599_vm0, %v823_v48 }
 0x236   : > { %3285 = vmatprep.mubr.msk.f32.mxu1 %vm599_vm0, %v742_v47  ;;  %3281 = vmatmul.mubr.msk.f32.vlgmr.msra.gmra.mxu0 %vm599_vm0, %v3277_v46 }
 0x237   : > { %3286 = vmatmul.mubr.msk.f32.vlgmr.msra.gmra.mxu1 %vm599_vm0, %v3256_v45  ;;  %1383 = vrot.lane.b32.xlu0 %v823_v48, %s3525_s21 }
 0x238   : > { %3296 = vmatpush3.msra.mxu1 %v3860_v43  ;;  %3292 = vmatprep.mubr.msk.f32.mxu0 %vm609_vm1, %v3886_v19 }
 0x239   : > { %1201 = vrot.lane.b32.xlu1 %v742_v47, %s3524_s20 }
 0x23b   : > { %1385 = vrot.lane.b32.xlu0 %v3277_v46, %s3525_s21 }
 0x23d   : > { %1203 = vrot.lane.b32.xlu1 %v3256_v45, %s3524_s20  ;;  %s3990_s20 = scalar_lea.vmem %s4196_s8, %s3133_s17 }
 0x23f   : > { %1648 = vrot.lane.b32.xlu0 %v823_v48, %s3526_s22 }
 0x241   : > { %1466 = vrot.lane.b32.xlu1 %v742_v47, %s3525_s21 }
 0x243   : > { %1650 = vrot.lane.b32.xlu0 %v3277_v46, %s3526_s22 }
 0x245   : > { %1468 = vrot.lane.b32.xlu1 %v3256_v45, %s3525_s21 }
 0x247   : > { %1913 = vrot.lane.b32.xlu0 %v823_v48, %s3527_s23 }
 0x249   : > { %1731 = vrot.lane.b32.xlu1 %v742_v47, %s3526_s22 }
 0x24b   : > { %1915 = vrot.lane.b32.xlu0 %v3277_v46, %s3527_s23 }
 0x24d   : > { %1733 = vrot.lane.b32.xlu1 %v3256_v45, %s3526_s22 }
 0x24f   : > { %2178 = vrot.lane.b32.xlu0 %v823_v48, %s3528_s24 }
 0x251   : > { %1996 = vrot.lane.b32.xlu1 %v742_v47, %s3527_s23 }
 0x253   : > { %2180 = vrot.lane.b32.xlu0 %v3277_v46, %s3528_s24 }
 0x255   : > { %1998 = vrot.lane.b32.xlu1 %v3256_v45, %s3527_s23 }
 0x257   : > { %2443 = vrot.lane.b32.xlu0 %v823_v48, %s3529_s25 }
 0x259   : > { %2261 = vrot.lane.b32.xlu1 %v742_v47, %s3528_s24 }
 0x25b   : > { %2445 = vrot.lane.b32.xlu0 %v3277_v46, %s3529_s25 }
 0x25d   : > { %2263 = vrot.lane.b32.xlu1 %v3256_v45, %s3528_s24 }
 0x25f   : > { %2708 = vrot.lane.b32.xlu0 %v823_v48, %s3530_s26 }
 0x261   : > { %2526 = vrot.lane.b32.xlu1 %v742_v47, %s3529_s25 }
 0x263   : > { %2710 = vrot.lane.b32.xlu0 %v3277_v46, %s3530_s26 }
 0x265   : > { %2528 = vrot.lane.b32.xlu1 %v3256_v45, %s3529_s25 }
 0x267   : > { %1010 = vperm.xlu0 %3457, %v352_v49  }
 0x269   : > { %2791 = vrot.lane.b32.xlu1 %v742_v47, %s3530_s26 }
 0x26d   : > { %2793 = vrot.lane.b32.xlu1 %v3256_v45, %s3530_s26 }
 0x271   : > { %1015 = vperm.xlu1 %3456, %v353_v50  }
 0x2a5   : > { %v1121_v31 = vpop.permute.xlu0 %1120 }
 0x2a7   : > { %v1119_v53 = vpop.permute.xlu1 %1118 }
 0x2a8   : > { %3297 = vmatprep.mubr.msk.f32.mxu1 %vm599_vm0, %v1119_v53 }
 0x2a9   : > { %3298 = vmatmul.mubr.msk.f32.vlgmr.msra.gmra.mxu1 %vm599_vm0, %v1121_v31  ;;  %v1384_v2 = vpop.permute.xlu0 %1383 }
 0x2aa   : > { %3309 = vmatprep.mubr.msk.f32.mxu1 %vm609_vm1, %v3886_v19 }
 0x2ab   : > { %v1202_v0 = vpop.permute.xlu1 %1201 }
 0x2ad   : > { %v1386_v4 = vpop.permute.xlu0 %1385 }
 0x2af   : > { %v1204_v3 = vpop.permute.xlu1 %1203 }
 0x2b1   : > { %v1649_v10 = vpop.permute.xlu0 %1648 }
 0x2b3   : > { %v1467_v6 = vpop.permute.xlu1 %1466 }
 0x2b5   : > { %v3929_v25 = vpop.permute.xlu0 %1650 }
 0x2b7   : > { %v1469_v7 = vpop.permute.xlu1 %1468 }
 0x2b9   : > { %v3933_v13 = vpop.permute.xlu0 %1913 }
 0x2bb   : > { %v3925_v8 = vpop.permute.xlu1 %1731 }
 0x2bd   : > { %v3937_v16 = vpop.permute.xlu0 %1915 }
 0x2bf   : > { %v3927_v11 = vpop.permute.xlu1 %1733 }
 0x2c1   : > { %v3941_v18 = vpop.permute.xlu0 %2178 }
 0x2c3   : > { %v3931_v12 = vpop.permute.xlu1 %1996 }
 0x2c5   : > { %v3945_v20 = vpop.permute.xlu0 %2180 }
 0x2c7   : > { %v3935_v15 = vpop.permute.xlu1 %1998 }
 0x2c9   : > { %v3949_v22 = vpop.permute.xlu0 %2443 }
 0x2cb   : > { %v3939_v17 = vpop.permute.xlu1 %2261 }
 0x2cd   : > { %v3953_v30 = vpop.permute.xlu0 %2445 }
 0x2cf   : > { %v3943_v14 = vpop.permute.xlu1 %2263 }
 0x2d1   : > { %v3957_v24 = vpop.permute.xlu0 %2708 }
 0x2d3   : > { %v3947_v21 = vpop.permute.xlu1 %2526 }
 0x2d5   : > { %v3961_v27 = vpop.permute.xlu0 %2710 }
 0x2d7   : > { %v3951_v23 = vpop.permute.xlu1 %2528 }
 0x2db   : > { %v3955_v38 = vpop.permute.xlu1 %2791 }
 0x2df   : > { %v3959_v26 = vpop.permute.xlu1 %2793 }
 0x2e2   : > { %v3966_v35 = vpop.permute.xlu0 %1010 }
 0x2ec   : > { %v3963_v28 = vpop.permute.xlu1 %1015 }
 0x2f6   : > { %v3282_v54 = vpop.f32.mrf.mxu0 }
 0x2f7   : > { %v3287_v55 = vpop.f32.mrf.mxu1 }
 0x2f8   : > { %v991_v56 = vadd.f32 %v3287_v55, %v3282_v54  ;;  %v904_v57 = vpop.f32.mrf.mxu0 }
 0x2f9   : > { %v985_v58 = vpop.f32.mrf.mxu1 }
 0x2fa   : > { %v3899_v59 = vadd.f32 %v3890_v51, %v991_v56  ;;  %v986_v60 = vadd.f32 %v985_v58, %v904_v57 }
 0x2fc   : > { %v3902_v61 = vadd.f32 %v3892_v52, %v986_v60  ;;  %v1007_v62 = vmul.f32 %v3899_v59, %v3899_v59 }
 0x2fe   : > { %3288 = vmatprep.subr.mxu0 %v1007_v62  ;;  %v1006_v63 = vmul.f32 %v3902_v61, %v3902_v61 }
 0x2ff   : > { %3289 = vmatpush3.msra.mxu0 %v1007_v62 }
 0x300   : > { %3290 = vmatprep.subr.mxu0 %v1006_v63 }
 0x301   : > { %3291 = vmatpush3.msra.mxu0 %v1006_v63 }
 0x302   : > { %3293 = vmatmul.mubr.msk.f32.vlgmr.msra.gmra.mxu0 %vm609_vm1, %v3911_v1  ;;  %3300 = vmatprep.subr.mxu0 %v3865_v44 }
 0x303   : > { %3301 = vmatpush3.msra.mxu0 %v3865_v44  ;;  %3302 = vmatprep.mubr.msk.f32.mxu0 %vm599_vm0, %v1202_v0 }
 0x304   : > { %3312 = vmatprep.subr.mxu0 %v3860_v43 }
 0x306   : > { %3303 = vmatmul.mubr.msk.f32.vlgmr.msra.gmra.mxu0 %vm599_vm0, %v1204_v3 }
 0x307   : > { %3314 = vmatprep.mubr.msk.f32.mxu0 %vm599_vm0, %v1384_v2  ;;  %3313 = vmatpush3.msra.mxu0 %v3860_v43 }
 0x30a   : > { %3315 = vmatmul.mubr.msk.f32.vlgmr.msra.gmra.mxu0 %vm599_vm0, %v1386_v4 }
 0x30b   : > { %3326 = vmatprep.mubr.msk.f32.mxu0 %vm609_vm1, %v3886_v19 }
 0x369   : > { %v3299_v29 = vpop.f32.mrf.mxu1 }
 0x36b   : > { %v1192_v37 = vpop.f32.mrf.mxu1 }
 0x3c2   : > { %v3294_v5 = vpop.f32.mrf.mxu0 }
 0x3c3   : > { %v1096_v34 = vadd.f32 %v3294_v5, %v3963_v28 }
 0x3c4   : > { %v1090_v32 = vpop.f32.mrf.mxu0 }
 0x3c5   : > { %3458 = vrsqrt.f32 %v1096_v34  ;;  %v1091_v9 = vadd.f32 %v1090_v32, %v3966_v35  ;;  %vm1108_vm8 = vcmp.eq.f32.partialorder %v1096_v34, inf  ;;  %v1111_v49 = vand.u32 2147483648, %v1096_v34 }
 0x3c6   : > { %v3304_v36 = vpop.f32.mrf.mxu0  ;;  %vm1110_vm9 = vcmp.eq.f32.partialorder %v1096_v34, 0.0 }
 0x3c7   : > { %v1281_v33 = vadd.f32 %v3304_v36, %v3299_v29  ;;  %3460 = vrsqrt.f32 %v1091_v9  ;;  %vm1101_vm10 = vcmp.eq.f32.partialorder %v1091_v9, inf  ;;  %v1104_v56 = vand.u32 2147483648, %v1091_v9 }
 0x3c8   : > { %v1275_v39 = vpop.f32.mrf.mxu0  ;;  %vm1103_vm11 = vcmp.eq.f32.partialorder %v1091_v9, 0.0 }
 0x3c9   : > { %v3970_v40 = vadd.f32 %v1281_v33, %v3890_v51  ;;  %v1276_v41 = vadd.f32 %v1275_v39, %v1192_v37 }
 0x3ca   : > { %v3316_v63 = vpop.f32.mrf.mxu0 }
 0x3cb   : > { %v3973_v42 = vadd.f32 %v1276_v41, %v3892_v52  ;;  %v1287_v45 = vmul.f32 %v3970_v40, %v3970_v40 }
 0x3cd   : > { %3305 = vmatprep.subr.mxu1 %v1287_v45  ;;  %v1286_v46 = vmul.f32 %v3973_v42, %v3973_v42 }
 0x3ce   : > { %3306 = vmatpush3.msra.mxu1 %v1287_v45 }
 0x3cf   : > { %3307 = vmatprep.subr.mxu1 %v1286_v46 }
 0x3d0   : > { %3308 = vmatpush3.msra.mxu1 %v1286_v46 }
 0x3d1   : > { %3310 = vmatmul.mubr.msk.f32.vlgmr.msra.gmra.mxu1 %vm609_vm1, %v3911_v1  ;;  %3317 = vmatprep.subr.mxu1 %v3865_v44 }
 0x3d2   : > { %v3459_v47 = vpop.eup %3458  ;;  %3318 = vmatpush3.msra.mxu1 %v3865_v44  ;;  %3319 = vmatprep.mubr.msk.f32.mxu1 %vm599_vm0, %v1467_v6  ;;  %v1457_v6 = vpop.f32.mrf.mxu0 }
 0x3d3   : > { %v1107_v48 = vmul.f32 %v3459_v47, %v1096_v34  ;;  %3329 = vmatprep.subr.mxu1 %v3860_v43 }
 0x3d4   : > { %v3461_v50 = vpop.eup %3460 }
 0x3d5   : > { %v1109_v53 = vsel %vm1108_vm8, %v1096_v34, %v1107_v48  ;;  %3320 = vmatmul.mubr.msk.f32.vlgmr.msra.gmra.mxu1 %vm599_vm0, %v1469_v7  ;;  %v1100_v54 = vmul.f32 %v3461_v50, %v1091_v9 }
 0x3d6   : > { %v1112_v31 = vsel %vm1110_vm9, %v1111_v49, %v1109_v53  ;;  %3331 = vmatprep.mubr.msk.f32.mxu1 %vm599_vm0, %v1649_v10  ;;  %3330 = vmatpush3.msra.mxu1 %v3860_v43 }
 0x3d7   : > { %v1114_v55 = vmul.f32 %v1112_v31, %v3899_v59  ;;  %v1102_v57 = vsel %vm1101_vm10, %v1091_v9, %v1100_v54 }
 0x3d8   : > { %v1105_v58 = vsel %vm1103_vm11, %v1104_v56, %v1102_v57 }
 0x3d9   : > { %3074 = vst.msk [vmem:[%s3990_s20 + $0x8] sm:$0xff] %vm609_vm1, %v1114_v55  ;;  %3332 = vmatmul.mubr.msk.f32.vlgmr.msra.gmra.mxu1 %vm599_vm0, %v3929_v25  ;;  %v1113_v60 = vmul.f32 %v1105_v58, %v3902_v61 }
 0x3da   : > { %3343 = vmatprep.mubr.msk.f32.mxu1 %vm609_vm1, %v3886_v19 }
 0x3db   : > { %1115 = vst.msk [vmem:[%s3990_s20] sm:$0xff] %vm609_vm1, %v1113_v60 }
 0x491   : > { %v3311_v62 = vpop.f32.mrf.mxu1 }
 0x492   : > { %v1360_v59 = vadd.f32 %v3311_v62, %v3963_v28 }
 0x493   : > { %v1354_v0 = vpop.f32.mrf.mxu1 }
 0x494   : > { %3462 = vrsqrt.f32 %v1360_v59  ;;  %v1355_v2 = vadd.f32 %v1354_v0, %v3966_v35  ;;  %vm1372_vm12 = vcmp.eq.f32.partialorder %v1360_v59, inf  ;;  %v1375_v9 = vand.u32 2147483648, %v1360_v59 }
 0x495   : > { %v3321_v3 = vpop.f32.mrf.mxu1  ;;  %vm1374_vm13 = vcmp.eq.f32.partialorder %v1360_v59, 0.0 }
 0x496   : > { %v1546_v4 = vadd.f32 %v3321_v3, %v3316_v63  ;;  %3464 = vrsqrt.f32 %v1355_v2  ;;  %vm1365_vm14 = vcmp.eq.f32.partialorder %v1355_v2, inf  ;;  %v1368_v41 = vand.u32 2147483648, %v1355_v2 }
 0x497   : > { %v1540_v7 = vpop.f32.mrf.mxu1  ;;  %vm1367_vm15 = vcmp.eq.f32.partialorder %v1355_v2, 0.0 }
 0x498   : > { %v4007_v61 = vadd.f32 %v1546_v4, %v3890_v51  ;;  %v1541_v10 = vadd.f32 %v1540_v7, %v1457_v6 }
 0x499   : > { %v3333_v47 = vpop.f32.mrf.mxu1 }
 0x49a   : > { %v4010_v25 = vadd.f32 %v1541_v10, %v3892_v52  ;;  %v1552_v5 = vmul.f32 %v4007_v61, %v4007_v61 }
 0x49b   : > { %v1722_v31 = vpop.f32.mrf.mxu1 }
 0x49c   : > { %3322 = vmatprep.subr.mxu0 %v1552_v5  ;;  %v1551_v34 = vmul.f32 %v4010_v25, %v4010_v25 }
 0x49d   : > { %3323 = vmatpush3.msra.mxu0 %v1552_v5 }
 0x49e   : > { %3324 = vmatprep.subr.mxu0 %v1551_v34 }
 0x49f   : > { %3325 = vmatpush3.msra.mxu0 %v1551_v34 }
 0x4a0   : > { %3327 = vmatmul.mubr.msk.f32.vlgmr.msra.gmra.mxu0 %vm609_vm1, %v3911_v1  ;;  %3334 = vmatprep.subr.mxu0 %v3865_v44 }
 0x4a1   : > { %v3463_v29 = vpop.eup %3462  ;;  %3335 = vmatpush3.msra.mxu0 %v3865_v44  ;;  %3336 = vmatprep.mubr.msk.f32.mxu0 %vm599_vm0, %v3925_v8 }
 0x4a2   : > { %v1371_v32 = vmul.f32 %v3463_v29, %v1360_v59  ;;  %3346 = vmatprep.subr.mxu0 %v3860_v43 }
 0x4a3   : > { %v3465_v36 = vpop.eup %3464 }
 0x4a4   : > { %v1373_v33 = vsel %vm1372_vm12, %v1360_v59, %v1371_v32  ;;  %3337 = vmatmul.mubr.msk.f32.vlgmr.msra.gmra.mxu0 %vm599_vm0, %v3927_v11  ;;  %v1364_v39 = vmul.f32 %v3465_v36, %v1355_v2 }
 0x4a5   : > { %v1376_v37 = vsel %vm1374_vm13, %v1375_v9, %v1373_v33  ;;  %3348 = vmatprep.mubr.msk.f32.mxu0 %vm599_vm0, %v3933_v13  ;;  %3347 = vmatpush3.msra.mxu0 %v3860_v43 }
 0x4a6   : > { %v1378_v8 = vmul.f32 %v1376_v37, %v3970_v40  ;;  %v1366_v45 = vsel %vm1365_vm14, %v1355_v2, %v1364_v39 }
 0x4a7   : > { %v1369_v46 = vsel %vm1367_vm15, %v1368_v41, %v1366_v45 }
 0x4a8   : > { %3082 = vst.msk [vmem:[%s3990_s20 + $0x18] sm:$0xff] %vm609_vm1, %v1378_v8  ;;  %3349 = vmatmul.mubr.msk.f32.vlgmr.msra.gmra.mxu0 %vm599_vm0, %v3937_v16  ;;  %v1377_v11 = vmul.f32 %v1369_v46, %v3973_v42 }
 0x4a9   : > { %3360 = vmatprep.mubr.msk.f32.mxu0 %vm609_vm1, %v3886_v19 }
 0x4aa   : > { %3081 = vst.msk [vmem:[%s3990_s20 + $0x10] sm:$0xff] %vm609_vm1, %v1377_v11 }
 0x560   : > { %v3328_v13 = vpop.f32.mrf.mxu0 }
 0x561   : > { %v1625_v40 = vadd.f32 %v3328_v13, %v3963_v28 }
 0x562   : > { %v1619_v48 = vpop.f32.mrf.mxu0 }
 0x563   : > { %3466 = vrsqrt.f32 %v1625_v40  ;;  %v1620_v49 = vadd.f32 %v1619_v48, %v3966_v35  ;;  %vm1637_vm2 = vcmp.eq.f32.partialorder %v1625_v40, inf  ;;  %v1640_v62 = vand.u32 2147483648, %v1625_v40 }
 0x564   : > { %v3338_v50 = vpop.f32.mrf.mxu0  ;;  %vm1639_vm3 = vcmp.eq.f32.partialorder %v1625_v40, 0.0 }
 0x565   : > { %v1811_v53 = vadd.f32 %v3338_v50, %v3333_v47  ;;  %3468 = vrsqrt.f32 %v1620_v49  ;;  %vm1630_vm4 = vcmp.eq.f32.partialorder %v1620_v49, inf  ;;  %v1633_v3 = vand.u32 2147483648, %v1620_v49 }
 0x566   : > { %v1805_v16 = vpop.f32.mrf.mxu0  ;;  %vm1632_vm5 = vcmp.eq.f32.partialorder %v1620_v49, 0.0 }
 0x567   : > { %v4041_v42 = vadd.f32 %v1811_v53, %v3890_v51  ;;  %v1806_v54 = vadd.f32 %v1805_v16, %v1722_v31 }
 0x569   : > { %v4044_v55 = vadd.f32 %v1806_v54, %v3892_v52  ;;  %v1817_v56 = vmul.f32 %v4041_v42, %v4041_v42 }
 0x56b   : > { %3339 = vmatprep.subr.mxu1 %v1817_v56  ;;  %v1816_v57 = vmul.f32 %v4044_v55, %v4044_v55 }
 0x56c   : > { %3340 = vmatpush3.msra.mxu1 %v1817_v56 }
 0x56d   : > { %3341 = vmatprep.subr.mxu1 %v1816_v57 }
 0x56e   : > { %3342 = vmatpush3.msra.mxu1 %v1816_v57 }
 0x56f   : > { %3344 = vmatmul.mubr.msk.f32.vlgmr.msra.gmra.mxu1 %vm609_vm1, %v3911_v1  ;;  %3351 = vmatprep.subr.mxu1 %v3865_v44 }
 0x570   : > { %v3467_v58 = vpop.eup %3466  ;;  %3352 = vmatpush3.msra.mxu1 %v3865_v44  ;;  %3353 = vmatprep.mubr.msk.f32.mxu1 %vm599_vm0, %v3931_v12 }
 0x571   : > { %v1636_v60 = vmul.f32 %v3467_v58, %v1625_v40  ;;  %3363 = vmatprep.subr.mxu1 %v3860_v43 }
 0x572   : > { %v3469_v59 = vpop.eup %3468 }
 0x573   : > { %v1638_v63 = vsel %vm1637_vm2, %v1625_v40, %v1636_v60  ;;  %3354 = vmatmul.mubr.msk.f32.vlgmr.msra.gmra.mxu1 %vm599_vm0, %v3935_v15  ;;  %v1629_v2 = vmul.f32 %v3469_v59, %v1620_v49 }
 0x574   : > { %v1641_v0 = vsel %vm1639_vm3, %v1640_v62, %v1638_v63  ;;  %3365 = vmatprep.mubr.msk.f32.mxu1 %vm599_vm0, %v3941_v18  ;;  %3364 = vmatpush3.msra.mxu1 %v3860_v43 }
 0x575   : > { %v1643_v12 = vmul.f32 %v1641_v0, %v4007_v61  ;;  %v1631_v4 = vsel %vm1630_vm4, %v1620_v49, %v1629_v2  ;;  %v3350_v61 = vpop.f32.mrf.mxu0 }
 0x576   : > { %v1634_v6 = vsel %vm1632_vm5, %v1633_v3, %v1631_v4 }
 0x577   : > { %3090 = vst.msk [vmem:[%s3990_s20 + $0x28] sm:$0xff] %vm609_vm1, %v1643_v12  ;;  %3366 = vmatmul.mubr.msk.f32.vlgmr.msra.gmra.mxu1 %vm599_vm0, %v3945_v20  ;;  %v1642_v15 = vmul.f32 %v1634_v6, %v4010_v25  ;;  %v1987_v32 = vpop.f32.mrf.mxu0 }
 0x578   : > { %3377 = vmatprep.mubr.msk.f32.mxu1 %vm609_vm1, %v3886_v19 }
 0x579   : > { %3089 = vst.msk [vmem:[%s3990_s20 + $0x20] sm:$0xff] %vm609_vm1, %v1642_v15 }
 0x62f   : > { %v3345_v18 = vpop.f32.mrf.mxu1 }
 0x630   : > { %v1890_v7 = vadd.f32 %v3345_v18, %v3963_v28 }
 0x631   : > { %v1884_v10 = vpop.f32.mrf.mxu1 }
 0x632   : > { %3470 = vrsqrt.f32 %v1890_v7  ;;  %v1885_v5 = vadd.f32 %v1884_v10, %v3966_v35  ;;  %vm1902_vm6 = vcmp.eq.f32.partialorder %v1890_v7, inf  ;;  %v1905_v41 = vand.u32 2147483648, %v1890_v7 }
 0x633   : > { %v3355_v34 = vpop.f32.mrf.mxu1  ;;  %vm1904_vm7 = vcmp.eq.f32.partialorder %v1890_v7, 0.0 }
 0x634   : > { %v2076_v29 = vadd.f32 %v3355_v34, %v3350_v61  ;;  %3472 = vrsqrt.f32 %v1885_v5  ;;  %vm1895_vm8 = vcmp.eq.f32.partialorder %v1885_v5, inf  ;;  %v1898_v40 = vand.u32 2147483648, %v1885_v5 }
 0x635   : > { %v2070_v20 = vpop.f32.mrf.mxu1  ;;  %vm1897_vm9 = vcmp.eq.f32.partialorder %v1885_v5, 0.0 }
 0x636   : > { %v4075_v25 = vadd.f32 %v2076_v29, %v3890_v51  ;;  %v2071_v9 = vadd.f32 %v2070_v20, %v1987_v32 }
 0x637   : > { %v3367_v50 = vpop.f32.mrf.mxu1 }
 0x638   : > { %v4078_v36 = vadd.f32 %v2071_v9, %v3892_v52  ;;  %v2082_v33 = vmul.f32 %v4075_v25, %v4075_v25 }
 0x639   : > { %v2252_v54 = vpop.f32.mrf.mxu1 }
 0x63a   : > { %3356 = vmatprep.subr.mxu0 %v2082_v33  ;;  %v2081_v37 = vmul.f32 %v4078_v36, %v4078_v36 }
 0x63b   : > { %3357 = vmatpush3.msra.mxu0 %v2082_v33 }
 0x63c   : > { %3358 = vmatprep.subr.mxu0 %v2081_v37 }
 0x63d   : > { %3359 = vmatpush3.msra.mxu0 %v2081_v37 }
 0x63e   : > { %3361 = vmatmul.mubr.msk.f32.vlgmr.msra.gmra.mxu0 %vm609_vm1, %v3911_v1  ;;  %3368 = vmatprep.subr.mxu0 %v3865_v44 }
 0x63f   : > { %v3471_v39 = vpop.eup %3470  ;;  %3369 = vmatpush3.msra.mxu0 %v3865_v44  ;;  %3370 = vmatprep.mubr.msk.f32.mxu0 %vm599_vm0, %v3939_v17 }
 0x640   : > { %v1901_v8 = vmul.f32 %v3471_v39, %v1890_v7  ;;  %3380 = vmatprep.subr.mxu0 %v3860_v43 }
 0x641   : > { %v3473_v45 = vpop.eup %3472 }
 0x642   : > { %v1903_v46 = vsel %vm1902_vm6, %v1890_v7, %v1901_v8  ;;  %3371 = vmatmul.mubr.msk.f32.vlgmr.msra.gmra.mxu0 %vm599_vm0, %v3943_v14  ;;  %v1894_v13 = vmul.f32 %v3473_v45, %v1885_v5 }
 0x643   : > { %v1906_v11 = vsel %vm1904_vm7, %v1905_v41, %v1903_v46  ;;  %3382 = vmatprep.mubr.msk.f32.mxu0 %vm599_vm0, %v3949_v22  ;;  %3381 = vmatpush3.msra.mxu0 %v3860_v43 }
 0x644   : > { %v1908_v17 = vmul.f32 %v1906_v11, %v4041_v42  ;;  %v1896_v47 = vsel %vm1895_vm8, %v1885_v5, %v1894_v13 }
 0x645   : > { %v1899_v48 = vsel %vm1897_vm9, %v1898_v40, %v1896_v47 }
 0x646   : > { %3098 = vst.msk [vmem:[%s3990_s20 + $0x38] sm:$0xff] %vm609_vm1, %v1908_v17  ;;  %3383 = vmatmul.mubr.msk.f32.vlgmr.msra.gmra.mxu0 %vm599_vm0, %v3953_v30  ;;  %v1907_v14 = vmul.f32 %v1899_v48, %v4044_v55 }
 0x647   : > { %3394 = vmatprep.mubr.msk.f32.mxu0 %vm609_vm1, %v3886_v19 }
 0x648   : > { %3097 = vst.msk [vmem:[%s3990_s20 + $0x30] sm:$0xff] %vm609_vm1, %v1907_v14 }
 0x6fe   : > { %v3362_v22 = vpop.f32.mrf.mxu0 }
 0x6ff   : > { %v2155_v49 = vadd.f32 %v3362_v22, %v3963_v28 }
 0x700   : > { %v2149_v53 = vpop.f32.mrf.mxu0 }
 0x701   : > { %3474 = vrsqrt.f32 %v2155_v49  ;;  %v2150_v31 = vadd.f32 %v2149_v53, %v3966_v35  ;;  %vm2167_vm10 = vcmp.eq.f32.partialorder %v2155_v49, inf  ;;  %v2170_v63 = vand.u32 2147483648, %v2155_v49 }
 0x702   : > { %v3372_v16 = vpop.f32.mrf.mxu0  ;;  %vm2169_vm11 = vcmp.eq.f32.partialorder %v2155_v49, 0.0 }
 0x703   : > { %v2341_v42 = vadd.f32 %v3372_v16, %v3367_v50  ;;  %3476 = vrsqrt.f32 %v2150_v31  ;;  %vm2160_vm12 = vcmp.eq.f32.partialorder %v2150_v31, inf  ;;  %v2163_v4 = vand.u32 2147483648, %v2150_v31 }
 0x704   : > { %v2335_v30 = vpop.f32.mrf.mxu0  ;;  %vm2162_vm13 = vcmp.eq.f32.partialorder %v2150_v31, 0.0 }
 0x705   : > { %v4109_v55 = vadd.f32 %v2341_v42, %v3890_v51  ;;  %v2336_v56 = vadd.f32 %v2335_v30, %v2252_v54 }
 0x706   : > { %v3384_v18 = vpop.f32.mrf.mxu0 }
 0x707   : > { %v4112_v57 = vadd.f32 %v2336_v56, %v3892_v52  ;;  %v2347_v58 = vmul.f32 %v4109_v55, %v4109_v55 }
 0x708   : > { %v2517_v34 = vpop.f32.mrf.mxu0 }
 0x709   : > { %3373 = vmatprep.subr.mxu1 %v2347_v58  ;;  %v2346_v60 = vmul.f32 %v4112_v57, %v4112_v57 }
 0x70a   : > { %3374 = vmatpush3.msra.mxu1 %v2347_v58 }
 0x70b   : > { %3375 = vmatprep.subr.mxu1 %v2346_v60 }
 0x70c   : > { %3376 = vmatpush3.msra.mxu1 %v2346_v60 }
 0x70d   : > { %3378 = vmatmul.mubr.msk.f32.vlgmr.msra.gmra.mxu1 %vm609_vm1, %v3911_v1  ;;  %3385 = vmatprep.subr.mxu1 %v3865_v44 }
 0x70e   : > { %v3475_v62 = vpop.eup %3474  ;;  %3386 = vmatpush3.msra.mxu1 %v3865_v44  ;;  %3387 = vmatprep.mubr.msk.f32.mxu1 %vm599_vm0, %v3947_v21 }
 0x70f   : > { %v2166_v59 = vmul.f32 %v3475_v62, %v2155_v49  ;;  %3397 = vmatprep.subr.mxu1 %v3860_v43 }
 0x710   : > { %v3477_v0 = vpop.eup %3476 }
 0x711   : > { %v2168_v2 = vsel %vm2167_vm10, %v2155_v49, %v2166_v59  ;;  %3388 = vmatmul.mubr.msk.f32.vlgmr.msra.gmra.mxu1 %vm599_vm0, %v3951_v23  ;;  %v2159_v3 = vmul.f32 %v3477_v0, %v2150_v31 }
 0x712   : > { %v2171_v12 = vsel %vm2169_vm11, %v2170_v63, %v2168_v2  ;;  %3399 = vmatprep.mubr.msk.f32.mxu1 %vm599_vm0, %v3957_v24  ;;  %3398 = vmatpush3.msra.mxu1 %v3860_v43 }
 0x713   : > { %v2173_v21 = vmul.f32 %v2171_v12, %v4075_v25  ;;  %v2161_v6 = vsel %vm2160_vm12, %v2150_v31, %v2159_v3 }
 0x714   : > { %v2164_v15 = vsel %vm2162_vm13, %v2163_v4, %v2161_v6 }
 0x715   : > { %3106 = vst.msk [vmem:[%s3990_s20 + $0x48] sm:$0xff] %vm609_vm1, %v2173_v21  ;;  %3400 = vmatmul.mubr.msk.f32.vlgmr.msra.gmra.mxu1 %vm599_vm0, %v3961_v27  ;;  %v2172_v23 = vmul.f32 %v2164_v15, %v4078_v36 }
 0x716   : > { %3411 = vmatprep.mubr.msk.f32.mxu1 %vm609_vm1, %v3886_v19 }
 0x717   : > { %3105 = vst.msk [vmem:[%s3990_s20 + $0x40] sm:$0xff] %vm609_vm1, %v2172_v23 }
 0x7cd   : > { %v3379_v43 = vpop.f32.mrf.mxu1 }
 0x7ce   : > { %v2420_v24 = vadd.f32 %v3379_v43, %v3963_v28 }
 0x7cf   : > { %v2414_v7 = vpop.f32.mrf.mxu1 }
 0x7d0   : > { %3478 = vrsqrt.f32 %v2420_v24  ;;  %v2415_v61 = vadd.f32 %v2414_v7, %v3966_v35  ;;  %vm2432_vm14 = vcmp.eq.f32.partialorder %v2420_v24, inf  ;;  %v2435_v33 = vand.u32 2147483648, %v2420_v24 }
 0x7d1   : > { %v3389_v10 = vpop.f32.mrf.mxu1  ;;  %vm2434_vm15 = vcmp.eq.f32.partialorder %v2420_v24, 0.0 }
 0x7d2   : > { %v2606_v5 = vadd.f32 %v3389_v10, %v3384_v18  ;;  %3480 = vrsqrt.f32 %v2415_v61  ;;  %vm2425_vm2 = vcmp.eq.f32.partialorder %v2415_v61, inf  ;;  %vm2427_vm3 = vcmp.eq.f32.partialorder %v2415_v61, 0.0 }
 0x7d3   : > { %v2600_v27 = vpop.f32.mrf.mxu1 }
 0x7d4   : > { %v2610_v29 = vadd.f32 %v2606_v5, %v3890_v51  ;;  %v2601_v32 = vadd.f32 %v2600_v27, %v2517_v34 }
 0x7d5   : > { %v3401_v40 = vpop.f32.mrf.mxu1 }
 0x7d6   : > { %v4144_v19 = vadd.f32 %v2601_v32, %v3892_v52  ;;  %v2612_v20 = vmul.f32 %v2610_v29, %v2610_v29 }
 0x7d7   : > { %v2782_v22 = vpop.f32.mrf.mxu1 }
 0x7d8   : > { %3390 = vmatprep.subr.mxu0 %v2612_v20  ;;  %v2611_v25 = vmul.f32 %v4144_v19, %v4144_v19 }
 0x7d9   : > { %3391 = vmatpush3.msra.mxu0 %v2612_v20 }
 0x7da   : > { %3392 = vmatprep.subr.mxu0 %v2611_v25 }
 0x7db   : > { %3393 = vmatpush3.msra.mxu0 %v2611_v25 }
 0x7dc   : > { %3395 = vmatmul.mubr.msk.f32.vlgmr.msra.gmra.mxu0 %vm609_vm1, %v3911_v1  ;;  %3402 = vmatprep.subr.mxu0 %v3865_v44 }
 0x7dd   : > { %v3479_v9 = vpop.eup %3478  ;;  %3403 = vmatpush3.msra.mxu0 %v3865_v44  ;;  %3404 = vmatprep.mubr.msk.f32.mxu0 %vm599_vm0, %v3955_v38  ;;  %v2428_v44 = vand.u32 2147483648, %v2415_v61 }
 0x7de   : > { %v2431_v36 = vmul.f32 %v3479_v9, %v2420_v24 }
 0x7df   : > { %v3481_v37 = vpop.eup %3480 }
 0x7e0   : > { %v2433_v39 = vsel %vm2432_vm14, %v2420_v24, %v2431_v36  ;;  %3405 = vmatmul.mubr.msk.f32.vlgmr.msra.gmra.mxu0 %vm599_vm0, %v3959_v26  ;;  %v2424_v41 = vmul.f32 %v3481_v37, %v2415_v61 }
 0x7e1   : > { %v2436_v8 = vsel %vm2434_vm15, %v2435_v33, %v2433_v39 }
 0x7e2   : > { %v2438_v45 = vmul.f32 %v2436_v8, %v4109_v55  ;;  %v2426_v46 = vsel %vm2425_vm2, %v2415_v61, %v2424_v41 }
 0x7e3   : > { %v2429_v38 = vsel %vm2427_vm3, %v2428_v44, %v2426_v46 }
 0x7e4   : > { %3114 = vst.msk [vmem:[%s3990_s20 + $0x58] sm:$0xff] %vm609_vm1, %v2438_v45  ;;  %v2437_v11 = vmul.f32 %v2429_v38, %v4112_v57 }
 0x7e6   : > { %3113 = vst.msk [vmem:[%s3990_s20 + $0x50] sm:$0xff] %vm609_vm1, %v2437_v11 }
 0x89c   : > { %v3396_v13 = vpop.f32.mrf.mxu0 }
 0x89d   : > { %v2685_v17 = vadd.f32 %v3396_v13, %v3963_v28 }
 0x89e   : > { %v2679_v26 = vpop.f32.mrf.mxu0 }
 0x89f   : > { %3482 = vrsqrt.f32 %v2685_v17  ;;  %v2680_v47 = vadd.f32 %v2679_v26, %v3966_v35  ;;  %vm2697_vm0 = vcmp.eq.f32.partialorder %v2685_v17, inf  ;;  %v2700_v55 = vand.u32 2147483648, %v2685_v17 }
 0x8a0   : > { %v3406_v48 = vpop.f32.mrf.mxu0  ;;  %vm2699_vm4 = vcmp.eq.f32.partialorder %v2685_v17, 0.0 }
 0x8a1   : > { %v2871_v14 = vadd.f32 %v3406_v48, %v3401_v40  ;;  %3484 = vrsqrt.f32 %v2680_v47  ;;  %vm2690_vm5 = vcmp.eq.f32.partialorder %v2680_v47, inf  ;;  %v2693_v60 = vand.u32 2147483648, %v2680_v47 }
 0x8a2   : > { %v2865_v49 = vpop.f32.mrf.mxu0  ;;  %vm2692_vm6 = vcmp.eq.f32.partialorder %v2680_v47, 0.0 }
 0x8a3   : > { %v2875_v50 = vadd.f32 %v2871_v14, %v3890_v51  ;;  %v2866_v53 = vadd.f32 %v2865_v49, %v2782_v22 }
 0x8a5   : > { %v2874_v31 = vadd.f32 %v2866_v53, %v3892_v52  ;;  %v2877_v16 = vmul.f32 %v2875_v50, %v2875_v50 }
 0x8a7   : > { %3407 = vmatprep.subr.mxu1 %v2877_v16  ;;  %v2876_v42 = vmul.f32 %v2874_v31, %v2874_v31 }
 0x8a8   : > { %3408 = vmatpush3.msra.mxu1 %v2877_v16 }
 0x8a9   : > { %3409 = vmatprep.subr.mxu1 %v2876_v42 }
 0x8aa   : > { %3410 = vmatpush3.msra.mxu1 %v2876_v42 }
 0x8ab   : > { %3412 = vmatmul.mubr.msk.f32.vlgmr.msra.gmra.mxu1 %vm609_vm1, %v3911_v1 }
 0x8ac   : > { %v3483_v54 = vpop.eup %3482 }
 0x8ad   : > { %v2696_v30 = vmul.f32 %v3483_v54, %v2685_v17 }
 0x8ae   : > { %v3485_v56 = vpop.eup %3484 }
 0x8af   : > { %v2698_v51 = vsel %vm2697_vm0, %v2685_v17, %v2696_v30  ;;  %v2689_v52 = vmul.f32 %v3485_v56, %v2680_v47 }
 0x8b0   : > { %v2701_v57 = vsel %vm2699_vm4, %v2700_v55, %v2698_v51 }
 0x8b1   : > { %v2703_v58 = vmul.f32 %v2701_v57, %v2610_v29  ;;  %v2691_v62 = vsel %vm2690_vm5, %v2680_v47, %v2689_v52 }
 0x8b2   : > { %v2694_v59 = vsel %vm2692_vm6, %v2693_v60, %v2691_v62 }
 0x8b3   : > { %3122 = vst.msk [vmem:[%s3990_s20 + $0x68] sm:$0xff] %vm609_vm1, %v2703_v58  ;;  %v2702_v1 = vmul.f32 %v2694_v59, %v4144_v19 }
 0x8b5   : > { %3121 = vst.msk [vmem:[%s3990_s20 + $0x60] sm:$0xff] %vm609_vm1, %v2702_v1 }
 0x96b   : > { %v3413_v63 = vpop.f32.mrf.mxu1 }
 0x96c   : > { %v2950_v0 = vadd.f32 %v3413_v63, %v3963_v28 }
 0x96d   : > { %v2944_v2 = vpop.f32.mrf.mxu1 }
 0x96e   : > { %3486 = vrsqrt.f32 %v2950_v0  ;;  %v2945_v12 = vadd.f32 %v2944_v2, %v3966_v35  ;;  %vm2962_vm7 = vcmp.eq.f32.partialorder %v2950_v0, inf  ;;  %v2965_v4 = vand.u32 2147483648, %v2950_v0 }
 0x96f   : > { %vm2964_vm8 = vcmp.eq.f32.partialorder %v2950_v0, 0.0 }
 0x970   : > { %3488 = vrsqrt.f32 %v2945_v12  ;;  %vm2955_vm9 = vcmp.eq.f32.partialorder %v2945_v12, inf  ;;  %v2958_v18 = vand.u32 2147483648, %v2945_v12  ;;  %vm2957_vm10 = vcmp.eq.f32.partialorder %v2945_v12, 0.0 }
 0x97b   : > { %v3487_v3 = vpop.eup %3486 }
 0x97c   : > { %v2961_v21 = vmul.f32 %v3487_v3, %v2950_v0 }
 0x97d   : > { %v3489_v6 = vpop.eup %3488 }
 0x97e   : > { %v2963_v15 = vsel %vm2962_vm7, %v2950_v0, %v2961_v21  ;;  %v2954_v43 = vmul.f32 %v3489_v6, %v2945_v12 }
 0x97f   : > { %v2966_v23 = vsel %vm2964_vm8, %v2965_v4, %v2963_v15 }
 0x980   : > { %v2968_v24 = vmul.f32 %v2966_v23, %v2875_v50  ;;  %v2956_v28 = vsel %vm2955_vm9, %v2945_v12, %v2954_v43 }
 0x981   : > { %v2959_v35 = vsel %vm2957_vm10, %v2958_v18, %v2956_v28 }
 0x982   : > { %3130 = vst.msk [vmem:[%s3990_s20 + $0x78] sm:$0xff] %vm609_vm1, %v2968_v24  ;;  %v2967_v7 = vmul.f32 %v2959_v35, %v2874_v31 }
 0x984   : > { %3129 = vst.msk [vmem:[%s3990_s20 + $0x70] sm:$0xff] %vm609_vm1, %v2967_v7 }
 0x985 PF: > { %s18_s29 = sadd.s32 1, %s3512_s29   ;;  %s4197_s27 = smov %s3508_s28 }
 0x986   : > { %p15_p5 = scmp.ge.s32.totalorder %s18_s29, 4   ;;  %s4198_s28 = smov %s4200_s30 }
 0x988   :  { %17 = sbr.rel (!%p15_p5) target bundleno = 2 (0x2), region = 98 }

// kernel: image_synthesis_forward.7
= control target key start
LH: loop header
LB: loop body
LE: loop exit
PB: predicated region body
PF: predicated region fallthrough
CT: control target
= control target key end

     0   :  { %s3164_s27 = smov 0   ;;  %s3166_s28 = smov 0   ;;  %s3955_s0 = inlined_call_operand.vmem [shape: f32[2,66,8,66], index: 0, kind: input, shape index: {}]   ;;  %s3956_s1 = inlined_call_operand.vmem [shape: f32[16,72], index: 1, kind: input, shape index: {}]   ;;  %s3957_s2 = inlined_call_operand.vmem [shape: f32[16,72], index: 2, kind: input, shape index: {}]   ;;  %s3958_s3 = inlined_call_operand.vmem [shape: f32[16,1], index: 3, kind: input, shape index: {}]   ;;  %s3959_s4 = inlined_call_operand.vmem [shape: f32[16,1], index: 4, kind: input, shape index: {}]   ;;  %s3960_s5 = inlined_call_operand.vmem [shape: f32[16,16], index: 5, kind: input, shape index: {}]   ;;  %s3961_s6 = inlined_call_operand.vmem [shape: f32[64,128], index: 6, kind: input, shape index: {}]   ;;  %s3962_s7 = inlined_call_operand.vmem [shape: f32[64,128], index: 7, kind: input, shape index: {}]   ;;  %s3963_s8 = inlined_call_operand.vmem [shape: f32[2,128,8,128], index: 8, kind: output, shape index: {}]  }
   0x1   :  { %s3168_s29 = smov 0   ;;  %s3170_s30 = smov 0  }
   0x2   :  { %s3172_s4 = smov 0  }
   0x3 LB: > { %s27_s5 = sadd.s32 1, %s3104_s29  ;;  %s30_s9 = sadd.s32 1, %s3108_s30  ;;  %s3112_s4 = sphi %s3172_s4, %s18_s4   ;;  %s3108_s30 = sphi %s3170_s30, %s3967_s30   ;;  %s3104_s29 = sphi %s3168_s29, %s3966_s29   ;;  %s3100_s28 = sphi %s3166_s28, %s3965_s28   ;;  %s3096_s27 = sphi %s3164_s27, %s3964_s27  }
   0x4   : > { %p28_p0 = scmp.ge.s32.totalorder %s27_s5, 8  ;;  %p2417_p1 = scmp.ge.s32.totalorder %s3112_s4, 1 }
   0x5   : > { %p276_p2 = scmp.lt.s32.totalorder %s3112_s4, 17 }
   0x6   : > { %s3969_s5 = smov (%p28_p0, %s27_s5), 0  ;;  %s3971_s9 = smov (!%p28_p0, %s30_s9), %s3108_s30 }
   0x7   : > { %p277_p3 = pnand %p2417_p1, %p276_p2  ;;  %p32_p4 = scmp.ge.s32.totalorder %s3971_s9, 2 }
   0x8   : > { %p314_p5 = scmp.lt.s32.totalorder (!%p277_p3), %s3100_s28, 1  ;;  %s2497_s11 = sshll.u32 (!%p277_p3), %s3096_s27, 6 }
   0x9   : > { %s3973_s9 = smov (%p32_p4, %s3971_s9), 0  ;;  %280 = sbr.rel (%p277_p3) target bundleno = 987 (0x3db), region = 52 }
   0xa   : > { %s3114_s16 = smov (!%p277_p3), 126   ;;  %s3115_s17 = smov (!%p277_p3), 127  }
   0xb   : > { %s3116_s18 = smov (!%p277_p3), 64  }
   0xe   : > { %s3975_s28 = smov (!%p314_p5, %s3100_s28), 1  ;;  %v3117_v23 = vmov 0.0   ;;  %vm513_vm0 = vcmask 523264   ;;  %v3362_v61 = vld [vmem:[%s3956_s1] sm:$0xff]  ;;  %vm541_vm1 = vcmask 588800  }
   0xf   : > { %s2962_s10 = smul.u32 528, %s3975_s28  ;;  %612 = vmatprep.mubr.f32.mxu0 %v3117_v23  ;;  %689 = vmatprep.mubr.f32.mxu1 %v3117_v23 }
  0x11   : > { %s318_s14 = scalar_lea.vmem %s3955_s0, %s2962_s10 }
  0x12   : > { %s331_s15 = scalar_lea.vmem %s318_s14, %s2497_s11 }
  0x13   : > { %v3203_v0 = vld [vmem:[%s331_s15 + $0x28] sm:$0xff]  ;;  %v3205_v1 = vld [vmem:[%s331_s15 + $0x20] sm:$0xff]  ;;  %v3209_v2 = vld [vmem:[%s331_s15 + $0x18] sm:$0xff] }
  0x14   : > { %402 = vrot.lane.b32.xlu0 %v3203_v0, %s3114_s16  ;;  %395 = vrot.lane.b32.xlu1 %v3205_v1, %s3114_s16  ;;  %v3211_v3 = vld [vmem:[%s331_s15 + $0x10] sm:$0xff]  ;;  %v3215_v4 = vld [vmem:[%s331_s15 + $0x8] sm:$0xff] }
  0x15   : > { %v3228_v5 = vld [vmem:[%s331_s15] sm:$0xff]  ;;  %v3233_v6 = vld [vmem:[%s331_s15 + $0x48] sm:$0xff]  ;;  %v3236_v7 = vld [vmem:[%s331_s15 + $0x38] sm:$0xff] }
  0x16   : > { %v3239_v8 = vld [vmem:[%s331_s15 + $0x40] sm:$0xff]  ;;  %v3242_v9 = vld [vmem:[%s331_s15 + $0x30] sm:$0xff] }
  0x18   : > { %388 = vrot.lane.b32.xlu0 %v3209_v2, %s3114_s16  ;;  %380 = vrot.lane.b32.xlu1 %v3211_v3, %s3114_s16 }
  0x1c   : > { %378 = vrot.lane.b32.xlu0 %v3215_v4, %s3114_s16  ;;  %400 = vrot.lane.b32.xlu1 %v3203_v0, %s3115_s17 }
  0x20   : > { %386 = vrot.lane.b32.xlu0 %v3209_v2, %s3115_s17  ;;  %391 = vrot.lane.b32.xlu1 %v3205_v1, %s3115_s17 }
  0x24   : > { %371 = vrot.lane.b32.xlu0 %v3211_v3, %s3115_s17  ;;  %369 = vrot.lane.b32.xlu1 %v3215_v4, %s3115_s17 }
  0x28   : > { %376 = vrot.lane.b32.xlu0 %v3228_v5, %s3114_s16  ;;  %461 = vrot.lane.b32.xlu1 %v3203_v0, %s3116_s18 }
  0x2c   : > { %430 = vrot.lane.b32.xlu0 %v3233_v6, %s3114_s16 }
  0x30   : > { %416 = vrot.lane.b32.xlu0 %v3236_v7, %s3114_s16 }
  0x34   : > { %423 = vrot.lane.b32.xlu0 %v3239_v8, %s3114_s16 }
  0x38   : > { %409 = vrot.lane.b32.xlu0 %v3242_v9, %s3114_s16 }
  0x3c   : > { %367 = vrot.lane.b32.xlu0 %v3228_v5, %s3115_s17 }
  0x40   : > { %428 = vrot.lane.b32.xlu0 %v3233_v6, %s3115_s17 }
  0x86   : > { %v3249_v10 = vpop.permute.xlu0 %402  ;;  %v396_v11 = vpop.permute.xlu1 %395 }
  0x87   : > { %469 = vrot.lane.b32.xlu0 %v3249_v10, %s3116_s18 }
  0x8a   : > { %v389_v12 = vpop.permute.xlu0 %388  ;;  %v381_v15 = vpop.permute.xlu1 %380 }
  0x8b   : > { %448 = vrot.lane.b32.xlu1 %v389_v12, %s3116_s18  ;;  %467 = vrot.lane.b32.xlu0 %v396_v11, %s3116_s18 }
  0x8e   : > { %v379_v13 = vpop.permute.xlu0 %378  ;;  %v3273_v18 = vpop.permute.xlu1 %400 }
  0x8f   : > { %436 = vrot.lane.b32.xlu1 %v3209_v2, %s3116_s18  ;;  %414 = vrot.lane.b32.xlu0 %v3236_v7, %s3115_s17 }
  0x92   : > { %v3259_v14 = vpop.permute.xlu0 %386  ;;  %v392_v21 = vpop.permute.xlu1 %391 }
  0x93   : > { %459 = vrot.lane.b32.xlu1 %v3205_v1, %s3116_s18  ;;  %419 = vrot.lane.b32.xlu0 %v3239_v8, %s3115_s17 }
  0x96   : > { %v3265_v16 = vpop.permute.xlu0 %371  ;;  %v370_v25 = vpop.permute.xlu1 %369 }
  0x97   : > { %446 = vrot.lane.b32.xlu1 %v381_v15, %s3116_s18  ;;  %405 = vrot.lane.b32.xlu0 %v3242_v9, %s3115_s17 }
  0x9a   : > { %v377_v17 = vpop.permute.xlu0 %376  ;;  %v462_v28 = vpop.permute.xlu1 %461 }
  0x9b   : > { %444 = vrot.lane.b32.xlu1 %v379_v13, %s3116_s18  ;;  %432 = vrot.lane.b32.xlu0 %v3215_v4, %s3116_s18  ;;  %v3348_v55 = vsel %vm513_vm0, %v3205_v1, %v462_v28 }
  0x9e   : > { %v431_v19 = vpop.permute.xlu0 %430 }
  0x9f   : > { %465 = vrot.lane.b32.xlu1 %v3273_v18, %s3116_s18 }
  0xa2   : > { %v3277_v20 = vpop.permute.xlu0 %416 }
  0xa3   : > { %442 = vrot.lane.b32.xlu1 %v3259_v14, %s3116_s18  ;;  %487 = vrot.lane.b32.xlu0 %v3277_v20, %s3116_s18 }
  0xa6   : > { %v3283_v22 = vpop.permute.xlu0 %423 }
  0xa7   : > { %463 = vrot.lane.b32.xlu1 %v392_v21, %s3116_s18 }
  0xaa   : > { %v3288_v24 = vpop.permute.xlu0 %409 }
  0xab   : > { %440 = vrot.lane.b32.xlu1 %v3265_v16, %s3116_s18  ;;  %485 = vrot.lane.b32.xlu0 %v3288_v24, %s3116_s18 }
  0xae   : > { %v368_v26 = vpop.permute.xlu0 %367 }
  0xaf   : > { %438 = vrot.lane.b32.xlu1 %v370_v25, %s3116_s18 }
  0xb2   : > { %v429_v27 = vpop.permute.xlu0 %428 }
  0xb3   : > { %434 = vrot.lane.b32.xlu1 %v3211_v3, %s3116_s18 }
  0xb7   : > { %505 = vrot.lane.b32.xlu1 %v431_v19, %s3116_s18 }
  0xbb   : > { %503 = vrot.lane.b32.xlu1 %v3283_v22, %s3116_s18 }
  0xbf   : > { %501 = vrot.lane.b32.xlu1 %v429_v27, %s3116_s18 }
  0xf9   : > { %v470_v29 = vpop.permute.xlu0 %469 }
  0xfa   : > { %v3302_v30 = vsel %vm513_vm0, %v396_v11, %v470_v29 }
  0xfb   : > { %562 = vmatprep.subr.mxu0 %v3302_v30 }
  0xfd   : > { %v449_v31 = vpop.permute.xlu1 %448  ;;  %v468_v32 = vpop.permute.xlu0 %467 }
  0xfe   : > { %v3306_v33 = vsel %vm513_vm0, %v381_v15, %v449_v31  ;;  %v3309_v34 = vsel %vm513_vm0, %v389_v12, %v468_v32  ;;  %v3460_v31 = vld [vmem:[%s3962_s7 + $0x20] sm:$0xff]  ;;  %v3486_v32 = vld [vmem:[%s3962_s7 + $0x10] sm:$0xff] }
  0xff   : > { %563 = vmatpush1.msra.mxu0 %v3306_v33 }
 0x100   : > { %564 = vmatprep.subr.mxu0 %v3309_v34 }
 0x101   : > { %v437_v35 = vpop.permute.xlu1 %436  ;;  %v3313_v36 = vpop.permute.xlu0 %414 }
 0x102   : > { %483 = vrot.lane.b32.xlu0 %v3313_v36, %s3116_s18  ;;  %v516_v57 = vsel %vm513_vm0, %v3211_v3, %v437_v35  ;;  %v3380_v3 = vld [vmem:[%s3956_s1 + $0x8] sm:$0xff]  ;;  %v3519_v35 = vld [vmem:[%s3961_s6 + $0x30] sm:$0xff] }
 0x105   : > { %v460_v37 = vpop.permute.xlu1 %459  ;;  %v3317_v38 = vpop.permute.xlu0 %419 }
 0x106   : > { %499 = vrot.lane.b32.xlu1 %v3317_v38, %s3116_s18  ;;  %v523_v56 = vsel %vm513_vm0, %v3209_v2, %v460_v37  ;;  %v3536_v37 = vld [vmem:[%s3961_s6 + $0x20] sm:$0xff] }
 0x109   : > { %v447_v39 = vpop.permute.xlu1 %446  ;;  %v3321_v40 = vpop.permute.xlu0 %405 }
 0x10a   : > { %481 = vrot.lane.b32.xlu0 %v3321_v40, %s3116_s18  ;;  %v521_v41 = vsel %vm513_vm0, %v379_v13, %v447_v39  ;;  %497 = vrot.lane.b32.xlu1 %v3233_v6, %s3116_s18  ;;  %v3559_v39 = vld [vmem:[%s3961_s6 + $0x8] sm:$0xff] }
 0x10b   : > { %565 = vmatpush1.msra.mxu0 %v521_v41 }
 0x10c   : > { %566 = vmatprep.subr.mxu0 %v3306_v33 }
 0x10d   : > { %v445_v42 = vpop.permute.xlu1 %444  ;;  %v433_v53 = vpop.permute.xlu0 %432 }
 0x10e   : > { %479 = vrot.lane.b32.xlu0 %v3236_v7, %s3116_s18  ;;  %v520_v43 = vsel %vm513_vm0, %v377_v17, %v445_v42  ;;  %495 = vrot.lane.b32.xlu1 %v3239_v8, %s3116_s18  ;;  %v514_v60 = vsel %vm513_vm0, %v3228_v5, %v433_v53 }
 0x10f   : > { %567 = vmatpush1.msra.mxu0 %v520_v43 }
 0x111   : > { %v466_v44 = vpop.permute.xlu1 %465 }
 0x112   : > { %v3335_v45 = vsel %vm513_vm0, %v392_v21, %v466_v44  ;;  %477 = vrot.lane.b32.xlu0 %v3242_v9, %s3116_s18 }
 0x113   : > { %568 = vmatprep.subr.mxu0 %v3335_v45 }
 0x115   : > { %v443_v46 = vpop.permute.xlu1 %442  ;;  %v488_v62 = vpop.permute.xlu0 %487 }
 0x116   : > { %v519_v47 = vsel %vm513_vm0, %v3265_v16, %v443_v46  ;;  %v3373_v2 = vsel %vm513_vm0, %v3288_v24, %v488_v62 }
 0x117   : > { %569 = vmatpush1.msra.mxu0 %v519_v47 }
 0x119   : > { %v464_v48 = vpop.permute.xlu1 %463 }
 0x11a   : > { %v525_v49 = vsel %vm513_vm0, %v3259_v14, %v464_v48  ;;  %v3419_v14 = vld [vmem:[%s3957_s2 + $0x8] sm:$0xff] }
 0x11b   : > { %570 = vmatprep.subr.mxu0 %v525_v49 }
 0x11d   : > { %v441_v50 = vpop.permute.xlu1 %440 }
 0x11e   : > { %v518_v51 = vsel %vm513_vm0, %v370_v25, %v441_v50 }
 0x11f   : > { %571 = vmatpush1.msra.mxu0 %v518_v51 }
 0x120   : > { %572 = vmatprep.subr.mxu0 %v519_v47 }
 0x121   : > { %v439_v52 = vpop.permute.xlu1 %438 }
 0x122   : > { %v517_v54 = vsel %vm513_vm0, %v368_v26, %v439_v52 }
 0x123   : > { %573 = vmatpush1.msra.mxu0 %v517_v54 }
 0x124   : > { %574 = vmatprep.subr.mxu0 %v3348_v55 }
 0x125   : > { %v435_v58 = vpop.permute.xlu1 %434  ;;  %575 = vmatpush1.msra.mxu0 %v516_v57 }
 0x126   : > { %576 = vmatprep.subr.mxu0 %v523_v56  ;;  %v515_v59 = vsel %vm513_vm0, %v3215_v4, %v435_v58  ;;  %v486_v4 = vpop.permute.xlu0 %485 }
 0x127   : > { %577 = vmatpush1.msra.mxu0 %v515_v59  ;;  %v3395_v11 = vsel %vm513_vm0, %v3249_v10, %v486_v4  ;;  %v3411_v10 = vld [vmem:[%s3957_s2] sm:$0xff] }
 0x128   : > { %578 = vmatprep.subr.mxu0 %v516_v57 }
 0x129   : > { %v506_v63 = vpop.permute.xlu1 %505  ;;  %579 = vmatpush1.msra.mxu0 %v514_v60 }
 0x12a   : > { %2424 = vmatmul.mubr.msk.f32.vlgmr.msra.gmra.mxu0 %vm541_vm1, %v3362_v61  ;;  %722 = vmatprep.subr.mxu0 %v3302_v30  ;;  %v3369_v1 = vsel %vm513_vm0, %v3283_v22, %v506_v63 }
 0x12b   : > { %639 = vmatprep.subr.mxu1 %v3369_v1  ;;  %723 = vmatpush1.msra.mxu0 %v3306_v33 }
 0x12c   : > { %640 = vmatpush1.msra.mxu1 %v3373_v2  ;;  %724 = vmatprep.subr.mxu0 %v3309_v34  ;;  %v3513_v34 = vld [vmem:[%s3961_s6 + $0x38] sm:$0xff] }
 0x12d   : > { %v504_v5 = vpop.permute.xlu1 %503  ;;  %618 = vmatprep.mubr.f32.mxu0 %v3117_v23  ;;  %725 = vmatpush1.msra.mxu0 %v521_v41  ;;  %v3118_v41 = vmov 0  }
 0x12e   : > { %2425 = vmatmul.mubr.msk.f32.gmra.mxu0 %vm541_vm1, %v3380_v3  ;;  %726 = vmatprep.subr.mxu0 %v3306_v33  ;;  %v3390_v6 = vsel %vm513_vm0, %v3277_v20, %v504_v5  ;;  %v3495_v33 = vld [vmem:[%s3962_s7 + $0x8] sm:$0xff] }
 0x12f   : > { %641 = vmatprep.subr.mxu1 %v3390_v6  ;;  %727 = vmatpush1.msra.mxu0 %v520_v43 }
 0x130   : > { %642 = vmatpush1.msra.mxu1 %v3395_v11  ;;  %728 = vmatprep.subr.mxu0 %v3335_v45 }
 0x131   : > { %v502_v12 = vpop.permute.xlu1 %501  ;;  %643 = vmatprep.subr.mxu1 %v3373_v2  ;;  %729 = vmatpush1.msra.mxu0 %v519_v47 }
 0x132   : > { %644 = vmatpush1.msra.mxu1 %v3302_v30  ;;  %730 = vmatprep.subr.mxu0 %v525_v49  ;;  %v3403_v13 = vsel %vm513_vm0, %v3317_v38, %v502_v12  ;;  %v3552_v38 = vld [vmem:[%s3961_s6 + $0x10] sm:$0xff] }
 0x133   : > { %645 = vmatprep.subr.mxu1 %v3403_v13  ;;  %731 = vmatpush1.msra.mxu0 %v518_v51 }
 0x134   : > { %732 = vmatprep.subr.mxu0 %v519_v47  ;;  %772 = vmatprep.mubr.f32.mxu0 %v3117_v23 }
 0x135   : > { %733 = vmatpush1.msra.mxu0 %v517_v54  ;;  %3009 = vset.pattern.permute.xlu0 %v3118_v41  ;;  %v347_v54 = vld [vmem:[%s3958_s3 + $0x8] sm:$0xff] }
 0x136   : > { %734 = vmatprep.subr.mxu0 %v3348_v55  ;;  %3008 = vset.pattern.permute.xlu1 %v3118_v41 }
 0x137   : > { %735 = vmatpush1.msra.mxu0 %v516_v57 }
 0x138   : > { %736 = vmatprep.subr.mxu0 %v523_v56 }
 0x139   : > { %737 = vmatpush1.msra.mxu0 %v515_v59 }
 0x13a   : > { %738 = vmatprep.subr.mxu0 %v516_v57 }
 0x13b   : > { %739 = vmatpush1.msra.mxu0 %v514_v60 }
 0x13c   : > { %2428 = vmatmul.mubr.msk.f32.vlgmr.msra.gmra.mxu0 %vm541_vm1, %v3411_v10 }
 0x13d   : > { %778 = vmatprep.mubr.f32.mxu0 %v3117_v23 }
 0x140   : > { %2429 = vmatmul.mubr.msk.f32.gmra.mxu0 %vm541_vm1, %v3419_v14 }
 0x174   : > { %v484_v15 = vpop.permute.xlu0 %483 }
 0x175   : > { %v532_v16 = vsel %vm513_vm0, %v3321_v40, %v484_v15  ;;  %v3566_v40 = vld [vmem:[%s3961_s6] sm:$0xff] }
 0x176   : > { %646 = vmatpush1.msra.mxu1 %v532_v16 }
 0x178   : > { %v500_v17 = vpop.permute.xlu1 %499 }
 0x179   : > { %v537_v19 = vsel %vm513_vm0, %v3313_v36, %v500_v17  ;;  %v3529_v36 = vld [vmem:[%s3961_s6 + $0x28] sm:$0xff] }
 0x17a   : > { %647 = vmatprep.subr.mxu1 %v537_v19 }
 0x17c   : > { %v482_v20 = vpop.permute.xlu0 %481  ;;  %v498_v21 = vpop.permute.xlu1 %497 }
 0x17d   : > { %v531_v22 = vsel %vm513_vm0, %v3273_v18, %v482_v20  ;;  %v536_v24 = vsel %vm513_vm0, %v3239_v8, %v498_v21  ;;  %v3439_v18 = vld [vmem:[%s3962_s7 + $0x38] sm:$0xff]  ;;  %v3444_v8 = vld [vmem:[%s3962_s7 + $0x30] sm:$0xff] }
 0x17e   : > { %648 = vmatpush1.msra.mxu1 %v531_v22  ;;  %2658 = vmatprep.subr.mxu0 %v3439_v18 }
 0x17f   : > { %649 = vmatprep.subr.mxu1 %v532_v16  ;;  %2659 = vmatpush3.msra.mxu0 %v3439_v18 }
 0x180   : > { %650 = vmatpush1.msra.mxu1 %v3335_v45  ;;  %v480_v25 = vpop.permute.xlu0 %479  ;;  %v496_v26 = vpop.permute.xlu1 %495  ;;  %2660 = vmatprep.subr.mxu0 %v3444_v8 }
 0x181   : > { %v530_v27 = vsel %vm513_vm0, %v3242_v9, %v480_v25  ;;  %651 = vmatprep.subr.mxu1 %v536_v24  ;;  %v535_v28 = vsel %vm513_vm0, %v3236_v7, %v496_v26  ;;  %v3451_v7 = vld [vmem:[%s3962_s7 + $0x28] sm:$0xff]  ;;  %2661 = vmatpush3.msra.mxu0 %v3444_v8 }
 0x182   : > { %652 = vmatpush1.msra.mxu1 %v530_v27  ;;  %2662 = vmatprep.subr.mxu0 %v3451_v7 }
 0x183   : > { %653 = vmatprep.subr.mxu1 %v535_v28  ;;  %2663 = vmatpush3.msra.mxu0 %v3451_v7 }
 0x184   : > { %v478_v9 = vpop.permute.xlu0 %477  ;;  %2664 = vmatprep.subr.mxu0 %v3460_v31 }
 0x185   : > { %v529_v29 = vsel %vm513_vm0, %v3203_v0, %v478_v9  ;;  %v3472_v0 = vld [vmem:[%s3962_s7 + $0x18] sm:$0xff]  ;;  %2665 = vmatpush3.msra.mxu0 %v3460_v31 }
 0x186   : > { %654 = vmatpush1.msra.mxu1 %v529_v29  ;;  %2666 = vmatprep.subr.mxu0 %v3472_v0 }
 0x187   : > { %655 = vmatprep.subr.mxu1 %v530_v27  ;;  %2667 = vmatpush3.msra.mxu0 %v3472_v0 }
 0x188   : > { %656 = vmatpush1.msra.mxu1 %v3348_v55  ;;  %2668 = vmatprep.subr.mxu0 %v3486_v32 }
 0x189   : > { %2426 = vmatmul.mubr.msk.f32.vlgmr.msra.gmra.mxu1 %vm541_vm1, %v3362_v61  ;;  %799 = vmatprep.subr.mxu1 %v3369_v1  ;;  %v346_v61 = vld [vmem:[%s3958_s3] sm:$0xff] }
 0x18a   : > { %800 = vmatpush1.msra.mxu1 %v3373_v2  ;;  %695 = vmatprep.mubr.f32.mxu1 %v3117_v23 }
 0x18b   : > { %801 = vmatprep.subr.mxu1 %v3390_v6  ;;  %2669 = vmatpush3.msra.mxu0 %v3486_v32 }
 0x18c   : > { %802 = vmatpush1.msra.mxu1 %v3395_v11  ;;  %2670 = vmatprep.subr.mxu0 %v3495_v33 }
 0x18d   : > { %2427 = vmatmul.mubr.msk.f32.gmra.mxu1 %vm541_vm1, %v3380_v3  ;;  %803 = vmatprep.subr.mxu1 %v3373_v2 }
 0x18e   : > { %804 = vmatpush1.msra.mxu1 %v3302_v30  ;;  %849 = vmatprep.mubr.f32.mxu1 %v3117_v23  ;;  %v3502_v30 = vld [vmem:[%s3962_s7] sm:$0xff] }
 0x18f   : > { %805 = vmatprep.subr.mxu1 %v3403_v13  ;;  %2671 = vmatpush3.msra.mxu0 %v3495_v33 }
 0x190   : > { %806 = vmatpush1.msra.mxu1 %v532_v16  ;;  %2672 = vmatprep.subr.mxu0 %v3502_v30 }
 0x191   : > { %807 = vmatprep.subr.mxu1 %v537_v19  ;;  %2673 = vmatpush3.msra.mxu0 %v3502_v30 }
 0x192   : > { %808 = vmatpush1.msra.mxu1 %v531_v22  ;;  %2696 = vmatprep.subr.mxu0 %v3439_v18 }
 0x193   : > { %809 = vmatprep.subr.mxu1 %v532_v16 }
 0x194   : > { %810 = vmatpush1.msra.mxu1 %v3335_v45 }
 0x195   : > { %811 = vmatprep.subr.mxu1 %v536_v24 }
 0x196   : > { %812 = vmatpush1.msra.mxu1 %v530_v27 }
 0x197   : > { %813 = vmatprep.subr.mxu1 %v535_v28 }
 0x198   : > { %814 = vmatpush1.msra.mxu1 %v529_v29 }
 0x199   : > { %815 = vmatprep.subr.mxu1 %v530_v27 }
 0x19a   : > { %816 = vmatpush1.msra.mxu1 %v3348_v55 }
 0x19b   : > { %2430 = vmatmul.mubr.msk.f32.vlgmr.msra.gmra.mxu1 %vm541_vm1, %v3411_v10  ;;  %2677 = vmatprep.subr.mxu1 %v3513_v34 }
 0x19c   : > { %855 = vmatprep.mubr.f32.mxu1 %v3117_v23  ;;  %2678 = vmatpush3.msra.mxu1 %v3513_v34  ;;  %v3545_v23 = vld [vmem:[%s3961_s6 + $0x18] sm:$0xff] }
 0x19d   : > { %2679 = vmatprep.subr.mxu1 %v3519_v35 }
 0x19e   : > { %2680 = vmatpush3.msra.mxu1 %v3519_v35 }
 0x19f   : > { %2431 = vmatmul.mubr.msk.f32.gmra.mxu1 %vm541_vm1, %v3419_v14  ;;  %2681 = vmatprep.subr.mxu1 %v3529_v36 }
 0x1a0   : > { %2682 = vmatpush3.msra.mxu1 %v3529_v36 }
 0x1a1   : > { %2683 = vmatprep.subr.mxu1 %v3536_v37 }
 0x1a2   : > { %2684 = vmatpush3.msra.mxu1 %v3536_v37 }
 0x1a3   : > { %2685 = vmatprep.subr.mxu1 %v3545_v23 }
 0x1a4   : > { %2686 = vmatpush3.msra.mxu1 %v3545_v23 }
 0x1a5   : > { %2687 = vmatprep.subr.mxu1 %v3552_v38 }
 0x1a6   : > { %2688 = vmatpush3.msra.mxu1 %v3552_v38 }
 0x1a7   : > { %2689 = vmatprep.subr.mxu1 %v3559_v39 }
 0x1a8   : > { %2690 = vmatpush3.msra.mxu1 %v3559_v39 }
 0x1a9   : > { %2691 = vmatprep.subr.mxu1 %v3566_v40 }
 0x1aa   : > { %2692 = vmatpush3.msra.mxu1 %v3566_v40 }
 0x1ab   : > { %2715 = vmatprep.subr.mxu1 %v3513_v34 }
 0x1ea   : > { %v614_v42 = vpop.f32.mrf.mxu0 }
 0x1eb   : > { %1134 = vrot.lane.b32.xlu0 %v614_v42, %s3116_s18  ;;  %2693 = vmatprep.mubr.msk.f32.mxu1 %vm513_vm0, %v614_v42 }
 0x1ec   : > { %v3575_v43 = vpop.f32.mrf.mxu0 }
 0x1ee   : > { %v620_v44 = vpop.f32.mrf.mxu0 }
 0x1ef   : > { %1136 = vrot.lane.b32.xlu0 %v620_v44, %s3116_s18  ;;  %2694 = vmatmul.mubr.msk.f32.vlgmr.msra.gmra.mxu1 %vm513_vm0, %v620_v44 }
 0x1f0   : > { %2716 = vmatpush3.msra.mxu1 %v3513_v34  ;;  %v3587_v45 = vpop.f32.mrf.mxu0 }
 0x1f1   : > { %2717 = vmatprep.subr.mxu1 %v3519_v35 }
 0x1f2   : > { %2718 = vmatpush3.msra.mxu1 %v3519_v35 }
 0x1f3   : > { %1498 = vrot.lane.b32.xlu0 %v3575_v43, %s3116_s18  ;;  %2719 = vmatprep.subr.mxu1 %v3529_v36 }
 0x1f4   : > { %2720 = vmatpush3.msra.mxu1 %v3529_v36 }
 0x1f5   : > { %2721 = vmatprep.subr.mxu1 %v3536_v37 }
 0x1f6   : > { %2722 = vmatpush3.msra.mxu1 %v3536_v37 }
 0x1f7   : > { %1500 = vrot.lane.b32.xlu0 %v3587_v45, %s3116_s18  ;;  %2723 = vmatprep.subr.mxu1 %v3545_v23 }
 0x1f8   : > { %2724 = vmatpush3.msra.mxu1 %v3545_v23 }
 0x1f9   : > { %2725 = vmatprep.subr.mxu1 %v3552_v38 }
 0x1fa   : > { %2726 = vmatpush3.msra.mxu1 %v3552_v38 }
 0x1fb   : > { %2727 = vmatprep.subr.mxu1 %v3559_v39 }
 0x1fc   : > { %v774_v46 = vpop.f32.mrf.mxu0  ;;  %2728 = vmatpush3.msra.mxu1 %v3559_v39 }
 0x1fd   : > { %1051 = vrot.lane.b32.xlu1 %v774_v46, %s3116_s18  ;;  %2674 = vmatprep.mubr.msk.f32.mxu0 %vm513_vm0, %v774_v46 }
 0x1fe   : > { %v3600_v47 = vpop.f32.mrf.mxu0  ;;  %2729 = vmatprep.subr.mxu1 %v3566_v40 }
 0x1ff   : > { %2730 = vmatpush3.msra.mxu1 %v3566_v40 }
 0x200   : > { %v780_v48 = vpop.f32.mrf.mxu0  ;;  %2753 = vmatprep.subr.mxu1 %v3513_v34 }
 0x201   : > { %1053 = vrot.lane.b32.xlu1 %v780_v48, %s3116_s18  ;;  %2675 = vmatmul.mubr.msk.f32.vlgmr.msra.gmra.mxu0 %vm513_vm0, %v780_v48 }
 0x202   : > { %2697 = vmatpush3.msra.mxu0 %v3439_v18  ;;  %v3613_v49 = vpop.f32.mrf.mxu0 }
 0x203   : > { %2698 = vmatprep.subr.mxu0 %v3444_v8 }
 0x204   : > { %2699 = vmatpush3.msra.mxu0 %v3444_v8 }
 0x205   : > { %1415 = vrot.lane.b32.xlu1 %v3600_v47, %s3116_s18  ;;  %2700 = vmatprep.subr.mxu0 %v3451_v7 }
 0x206   : > { %2701 = vmatpush3.msra.mxu0 %v3451_v7 }
 0x207   : > { %2702 = vmatprep.subr.mxu0 %v3460_v31 }
 0x208   : > { %2703 = vmatpush3.msra.mxu0 %v3460_v31 }
 0x209   : > { %1417 = vrot.lane.b32.xlu1 %v3613_v49, %s3116_s18  ;;  %2704 = vmatprep.subr.mxu0 %v3472_v0 }
 0x20a   : > { %2705 = vmatpush3.msra.mxu0 %v3472_v0 }
 0x20b   : > { %2706 = vmatprep.subr.mxu0 %v3486_v32 }
 0x20c   : > { %2707 = vmatpush3.msra.mxu0 %v3486_v32 }
 0x20d   : > { %2708 = vmatprep.subr.mxu0 %v3495_v33 }
 0x20e   : > { %2709 = vmatpush3.msra.mxu0 %v3495_v33 }
 0x20f   : > { %2710 = vmatprep.subr.mxu0 %v3502_v30 }
 0x210   : > { %2711 = vmatpush3.msra.mxu0 %v3502_v30 }
 0x211   : > { %2734 = vmatprep.subr.mxu0 %v3439_v18 }
 0x249   : > { %v3629_v50 = vpop.f32.mrf.mxu1 }
 0x24a   : > { %1862 = vrot.lane.b32.xlu0 %v3629_v50, %s3116_s18 }
 0x24b   : > { %v3633_v51 = vpop.f32.mrf.mxu1 }
 0x24d   : > { %v3635_v52 = vpop.f32.mrf.mxu1 }
 0x24e   : > { %1864 = vrot.lane.b32.xlu0 %v3635_v52, %s3116_s18 }
 0x24f   : > { %v3641_v53 = vpop.f32.mrf.mxu1 }
 0x252   : > { %2226 = vrot.lane.b32.xlu0 %v3633_v51, %s3116_s18 }
 0x256   : > { %2228 = vrot.lane.b32.xlu0 %v3641_v53, %s3116_s18 }
 0x25a   : > { %1031 = vperm.xlu0 %3009, %v347_v54  }
 0x25b   : > { %v3648_v55 = vpop.f32.mrf.mxu1 }
 0x25c   : > { %1779 = vrot.lane.b32.xlu1 %v3648_v55, %s3116_s18 }
 0x25d   : > { %v3652_v56 = vpop.f32.mrf.mxu1  ;;  %v1135_v57 = vpop.permute.xlu0 %1134 }
 0x25e   : > { %2731 = vmatprep.mubr.msk.f32.mxu1 %vm513_vm0, %v1135_v57 }
 0x25f   : > { %v3655_v58 = vpop.f32.mrf.mxu1 }
 0x260   : > { %1781 = vrot.lane.b32.xlu1 %v3655_v58, %s3116_s18 }
 0x261   : > { %v1137_v59 = vpop.permute.xlu0 %1136  ;;  %v3668_v60 = vpop.f32.mrf.mxu1 }
 0x262   : > { %2732 = vmatmul.mubr.msk.f32.vlgmr.msra.gmra.mxu1 %vm513_vm0, %v1137_v59 }
 0x263   : > { %2754 = vmatpush3.msra.mxu1 %v3513_v34  ;;  %2769 = vmatprep.mubr.msk.f32.mxu1 %vm513_vm0, %v3575_v43 }
 0x264   : > { %2755 = vmatprep.subr.mxu1 %v3519_v35  ;;  %2143 = vrot.lane.b32.xlu1 %v3652_v56, %s3116_s18 }
 0x265   : > { %2756 = vmatpush3.msra.mxu1 %v3519_v35  ;;  %v1499_v63 = vpop.permute.xlu0 %1498 }
 0x266   : > { %2757 = vmatprep.subr.mxu1 %v3529_v36 }
 0x267   : > { %2758 = vmatpush3.msra.mxu1 %v3529_v36 }
 0x268   : > { %2759 = vmatprep.subr.mxu1 %v3536_v37  ;;  %2145 = vrot.lane.b32.xlu1 %v3668_v60, %s3116_s18  ;;  %s2419_s18 = sshll.u32 %s3096_s27, 4  ;;  %s2420_s27 = sshll.u32 %s3975_s28, 7 }
 0x269   : > { %2760 = vmatpush3.msra.mxu1 %v3536_v37  ;;  %v1501_v2 = vpop.permute.xlu0 %1500  ;;  %p322_p6 = scmp.lt.s32.totalorder %s2419_s18, 127 }
 0x26a   : > { %2761 = vmatprep.subr.mxu1 %v3545_v23 }
 0x26b   : > { %2762 = vmatpush3.msra.mxu1 %v3545_v23  ;;  %s3977_s18 = smov (!%p322_p6, %s2419_s18), 127 }
 0x26c   : > { %2763 = vmatprep.subr.mxu1 %v3552_v38  ;;  %1026 = vperm.xlu1 %3008, %v346_v61   ;;  %s325_s14 = sadd.s32 %s2420_s27, %s3977_s18 }
 0x26d   : > { %2764 = vmatpush3.msra.mxu1 %v3552_v38  ;;  %s2421_s15 = sshll.u32 %s325_s14, 3 }
 0x26e   : > { %2765 = vmatprep.subr.mxu1 %v3559_v39  ;;  %s3908_s17 = scalar_lea.vmem %s3963_s8, %s2421_s15 }
 0x26f   : > { %2766 = vmatpush3.msra.mxu1 %v3559_v39  ;;  %v1052_v62 = vpop.permute.xlu1 %1051 }
 0x270   : > { %2767 = vmatprep.subr.mxu1 %v3566_v40  ;;  %2712 = vmatprep.mubr.msk.f32.mxu0 %vm513_vm0, %v1052_v62 }
 0x271   : > { %2768 = vmatpush3.msra.mxu1 %v3566_v40 }
 0x272   : > { %2770 = vmatmul.mubr.msk.f32.vlgmr.msra.gmra.mxu1 %vm513_vm0, %v3587_v45  ;;  %2791 = vmatprep.subr.mxu1 %v3513_v34 }
 0x273   : > { %2792 = vmatpush3.msra.mxu1 %v3513_v34  ;;  %v1054_v1 = vpop.permute.xlu1 %1053  ;;  %2807 = vmatprep.mubr.msk.f32.mxu1 %vm513_vm0, %v1499_v63 }
 0x274   : > { %2793 = vmatprep.subr.mxu1 %v3519_v35  ;;  %2713 = vmatmul.mubr.msk.f32.vlgmr.msra.gmra.mxu0 %vm513_vm0, %v1054_v1 }
 0x275   : > { %2735 = vmatpush3.msra.mxu0 %v3439_v18  ;;  %2794 = vmatpush3.msra.mxu1 %v3519_v35 }
 0x276   : > { %2736 = vmatprep.subr.mxu0 %v3444_v8  ;;  %2750 = vmatprep.mubr.msk.f32.mxu0 %vm513_vm0, %v3600_v47 }
 0x277   : > { %2795 = vmatprep.subr.mxu1 %v3529_v36  ;;  %2737 = vmatpush3.msra.mxu0 %v3444_v8  ;;  %v1416_v3 = vpop.permute.xlu1 %1415 }
 0x278   : > { %2796 = vmatpush3.msra.mxu1 %v3529_v36  ;;  %2738 = vmatprep.subr.mxu0 %v3451_v7 }
 0x279   : > { %2797 = vmatprep.subr.mxu1 %v3536_v37  ;;  %2739 = vmatpush3.msra.mxu0 %v3451_v7 }
 0x27a   : > { %2798 = vmatpush3.msra.mxu1 %v3536_v37  ;;  %2740 = vmatprep.subr.mxu0 %v3460_v31 }
 0x27b   : > { %2799 = vmatprep.subr.mxu1 %v3545_v23  ;;  %2741 = vmatpush3.msra.mxu0 %v3460_v31  ;;  %v1418_v4 = vpop.permute.xlu1 %1417 }
 0x27c   : > { %2800 = vmatpush3.msra.mxu1 %v3545_v23  ;;  %2742 = vmatprep.subr.mxu0 %v3472_v0 }
 0x27d   : > { %2801 = vmatprep.subr.mxu1 %v3552_v38  ;;  %2743 = vmatpush3.msra.mxu0 %v3472_v0 }
 0x27e   : > { %2802 = vmatpush3.msra.mxu1 %v3552_v38  ;;  %2744 = vmatprep.subr.mxu0 %v3486_v32 }
 0x27f   : > { %2803 = vmatprep.subr.mxu1 %v3559_v39  ;;  %2745 = vmatpush3.msra.mxu0 %v3486_v32 }
 0x280   : > { %2804 = vmatpush3.msra.mxu1 %v3559_v39  ;;  %2746 = vmatprep.subr.mxu0 %v3495_v33 }
 0x281   : > { %2805 = vmatprep.subr.mxu1 %v3566_v40  ;;  %2747 = vmatpush3.msra.mxu0 %v3495_v33 }
 0x282   : > { %2806 = vmatpush3.msra.mxu1 %v3566_v40  ;;  %2748 = vmatprep.subr.mxu0 %v3502_v30 }
 0x283   : > { %2808 = vmatmul.mubr.msk.f32.vlgmr.msra.gmra.mxu1 %vm513_vm0, %v1501_v2  ;;  %2829 = vmatprep.subr.mxu1 %v3513_v34 }
 0x284   : > { %2749 = vmatpush3.msra.mxu0 %v3502_v30  ;;  %2830 = vmatpush3.msra.mxu1 %v3513_v34 }
 0x285   : > { %2845 = vmatprep.mubr.msk.f32.mxu1 %vm513_vm0, %v3629_v50  ;;  %2751 = vmatmul.mubr.msk.f32.vlgmr.msra.gmra.mxu0 %vm513_vm0, %v3613_v49 }
 0x286   : > { %2772 = vmatprep.subr.mxu0 %v3439_v18  ;;  %2831 = vmatprep.subr.mxu1 %v3519_v35 }
 0x287   : > { %2773 = vmatpush3.msra.mxu0 %v3439_v18  ;;  %2832 = vmatpush3.msra.mxu1 %v3519_v35 }
 0x288   : > { %2774 = vmatprep.subr.mxu0 %v3444_v8  ;;  %2833 = vmatprep.subr.mxu1 %v3529_v36 }
 0x289   : > { %2775 = vmatpush3.msra.mxu0 %v3444_v8  ;;  %2834 = vmatpush3.msra.mxu1 %v3529_v36 }
 0x28a   : > { %2776 = vmatprep.subr.mxu0 %v3451_v7  ;;  %2835 = vmatprep.subr.mxu1 %v3536_v37 }
 0x28b   : > { %2777 = vmatpush3.msra.mxu0 %v3451_v7  ;;  %2836 = vmatpush3.msra.mxu1 %v3536_v37 }
 0x28c   : > { %2778 = vmatprep.subr.mxu0 %v3460_v31  ;;  %2837 = vmatprep.subr.mxu1 %v3545_v23 }
 0x28d   : > { %2779 = vmatpush3.msra.mxu0 %v3460_v31  ;;  %2838 = vmatpush3.msra.mxu1 %v3545_v23 }
 0x28e   : > { %2780 = vmatprep.subr.mxu0 %v3472_v0  ;;  %2839 = vmatprep.subr.mxu1 %v3552_v38 }
 0x28f   : > { %2781 = vmatpush3.msra.mxu0 %v3472_v0  ;;  %2840 = vmatpush3.msra.mxu1 %v3552_v38 }
 0x290   : > { %2782 = vmatprep.subr.mxu0 %v3486_v32  ;;  %2841 = vmatprep.subr.mxu1 %v3559_v39 }
 0x291   : > { %2783 = vmatpush3.msra.mxu0 %v3486_v32  ;;  %2842 = vmatpush3.msra.mxu1 %v3559_v39 }
 0x292   : > { %2784 = vmatprep.subr.mxu0 %v3495_v33  ;;  %2788 = vmatprep.mubr.msk.f32.mxu0 %vm513_vm0, %v1416_v3 }
 0x293   : > { %2843 = vmatprep.subr.mxu1 %v3566_v40  ;;  %2785 = vmatpush3.msra.mxu0 %v3495_v33 }
 0x294   : > { %2844 = vmatpush3.msra.mxu1 %v3566_v40  ;;  %2786 = vmatprep.subr.mxu0 %v3502_v30 }
 0x295   : > { %2846 = vmatmul.mubr.msk.f32.vlgmr.msra.gmra.mxu1 %vm513_vm0, %v3635_v52  ;;  %2787 = vmatpush3.msra.mxu0 %v3502_v30 }
 0x296   : > { %2789 = vmatmul.mubr.msk.f32.vlgmr.msra.gmra.mxu0 %vm513_vm0, %v1418_v4  ;;  %2810 = vmatprep.subr.mxu0 %v3439_v18 }
 0x297   : > { %2811 = vmatpush3.msra.mxu0 %v3439_v18  ;;  %2826 = vmatprep.mubr.msk.f32.mxu0 %vm513_vm0, %v3648_v55 }
 0x298   : > { %2812 = vmatprep.subr.mxu0 %v3444_v8  ;;  %2867 = vmatprep.subr.mxu1 %v3513_v34 }
 0x299   : > { %2813 = vmatpush3.msra.mxu0 %v3444_v8  ;;  %2868 = vmatpush3.msra.mxu1 %v3513_v34 }
 0x29a   : > { %2814 = vmatprep.subr.mxu0 %v3451_v7  ;;  %2869 = vmatprep.subr.mxu1 %v3519_v35 }
 0x29b   : > { %2815 = vmatpush3.msra.mxu0 %v3451_v7  ;;  %2870 = vmatpush3.msra.mxu1 %v3519_v35 }
 0x29c   : > { %2816 = vmatprep.subr.mxu0 %v3460_v31  ;;  %2871 = vmatprep.subr.mxu1 %v3529_v36 }
 0x29d   : > { %2817 = vmatpush3.msra.mxu0 %v3460_v31  ;;  %2872 = vmatpush3.msra.mxu1 %v3529_v36 }
 0x29e   : > { %2818 = vmatprep.subr.mxu0 %v3472_v0  ;;  %2873 = vmatprep.subr.mxu1 %v3536_v37 }
 0x29f   : > { %2819 = vmatpush3.msra.mxu0 %v3472_v0  ;;  %2874 = vmatpush3.msra.mxu1 %v3536_v37 }
 0x2a0   : > { %2820 = vmatprep.subr.mxu0 %v3486_v32  ;;  %2875 = vmatprep.subr.mxu1 %v3545_v23 }
 0x2a1   : > { %2821 = vmatpush3.msra.mxu0 %v3486_v32  ;;  %2876 = vmatpush3.msra.mxu1 %v3545_v23 }
 0x2a2   : > { %2822 = vmatprep.subr.mxu0 %v3495_v33  ;;  %2877 = vmatprep.subr.mxu1 %v3552_v38 }
 0x2a3   : > { %2823 = vmatpush3.msra.mxu0 %v3495_v33  ;;  %2878 = vmatpush3.msra.mxu1 %v3552_v38 }
 0x2a4   : > { %2824 = vmatprep.subr.mxu0 %v3502_v30  ;;  %2879 = vmatprep.subr.mxu1 %v3559_v39 }
 0x2a5   : > { %2825 = vmatpush3.msra.mxu0 %v3502_v30  ;;  %2880 = vmatpush3.msra.mxu1 %v3559_v39 }
 0x2a6   : > { %2827 = vmatmul.mubr.msk.f32.vlgmr.msra.gmra.mxu0 %vm513_vm0, %v3655_v58  ;;  %2881 = vmatprep.subr.mxu1 %v3566_v40 }
 0x2a7   : > { %2882 = vmatpush3.msra.mxu1 %v3566_v40  ;;  %2848 = vmatprep.subr.mxu0 %v3439_v18 }
 0x2a8   : > { %2905 = vmatprep.subr.mxu1 %v3513_v34  ;;  %2849 = vmatpush3.msra.mxu0 %v3439_v18 }
 0x2a9   : > { %2850 = vmatprep.subr.mxu0 %v3444_v8 }
 0x2aa   : > { %2851 = vmatpush3.msra.mxu0 %v3444_v8 }
 0x2ab   : > { %2852 = vmatprep.subr.mxu0 %v3451_v7 }
 0x2ac   : > { %2853 = vmatpush3.msra.mxu0 %v3451_v7 }
 0x2ad   : > { %2854 = vmatprep.subr.mxu0 %v3460_v31 }
 0x2ae   : > { %2855 = vmatpush3.msra.mxu0 %v3460_v31 }
 0x2af   : > { %2856 = vmatprep.subr.mxu0 %v3472_v0  ;;  %v2695_v13 = vpop.f32.mrf.mxu1 }
 0x2b0   : > { %2857 = vmatpush3.msra.mxu0 %v3472_v0 }
 0x2b1   : > { %2858 = vmatprep.subr.mxu0 %v3486_v32  ;;  %v1015_v22 = vpop.f32.mrf.mxu1 }
 0x2b2   : > { %2859 = vmatpush3.msra.mxu0 %v3486_v32 }
 0x2b3   : > { %2860 = vmatprep.subr.mxu0 %v3495_v33 }
 0x2b4   : > { %2861 = vmatpush3.msra.mxu0 %v3495_v33 }
 0x2b5   : > { %2862 = vmatprep.subr.mxu0 %v3502_v30 }
 0x2b6   : > { %2863 = vmatpush3.msra.mxu0 %v3502_v30 }
 0x2b7   : > { %2886 = vmatprep.subr.mxu0 %v3439_v18 }
 0x2bc   : > { %v1863_v5 = vpop.permute.xlu0 %1862 }
 0x2bd   : > { %2883 = vmatprep.mubr.msk.f32.mxu1 %vm513_vm0, %v1863_v5 }
 0x2c0   : > { %v1865_v6 = vpop.permute.xlu0 %1864 }
 0x2c1   : > { %2884 = vmatmul.mubr.msk.f32.vlgmr.msra.gmra.mxu1 %vm513_vm0, %v1865_v6  ;;  %v2676_v14 = vpop.f32.mrf.mxu0 }
 0x2c2   : > { %2906 = vmatpush3.msra.mxu1 %v3513_v34  ;;  %2921 = vmatprep.mubr.msk.f32.mxu1 %vm513_vm0, %v3633_v51  ;;  %v1021_v16 = vadd.f32 %v2695_v13, %v2676_v14 }
 0x2c3   : > { %2907 = vmatprep.subr.mxu1 %v3519_v35  ;;  %v934_v24 = vpop.f32.mrf.mxu0 }
 0x2c4   : > { %2908 = vmatpush3.msra.mxu1 %v3519_v35  ;;  %v2227_v11 = vpop.permute.xlu0 %2226  ;;  %v1016_v26 = vadd.f32 %v1015_v22, %v934_v24 }
 0x2c5   : > { %2909 = vmatprep.subr.mxu1 %v3529_v36 }
 0x2c6   : > { %2910 = vmatpush3.msra.mxu1 %v3529_v36 }
 0x2c7   : > { %2911 = vmatprep.subr.mxu1 %v3536_v37 }
 0x2c8   : > { %2912 = vmatpush3.msra.mxu1 %v3536_v37  ;;  %v2229_v10 = vpop.permute.xlu0 %2228 }
 0x2c9   : > { %2913 = vmatprep.subr.mxu1 %v3545_v23 }
 0x2ca   : > { %2914 = vmatpush3.msra.mxu1 %v3545_v23 }
 0x2cb   : > { %2915 = vmatprep.subr.mxu1 %v3552_v38 }
 0x2cc   : > { %2916 = vmatpush3.msra.mxu1 %v3552_v38 }
 0x2cd   : > { %2917 = vmatprep.subr.mxu1 %v3559_v39 }
 0x2ce   : > { %2918 = vmatpush3.msra.mxu1 %v3559_v39  ;;  %v1780_v12 = vpop.permute.xlu1 %1779 }
 0x2cf   : > { %2919 = vmatprep.subr.mxu1 %v3566_v40  ;;  %2864 = vmatprep.mubr.msk.f32.mxu0 %vm513_vm0, %v1780_v12 }
 0x2d0   : > { %2920 = vmatpush3.msra.mxu1 %v3566_v40 }
 0x2d1   : > { %2922 = vmatmul.mubr.msk.f32.vlgmr.msra.gmra.mxu1 %vm513_vm0, %v3641_v53  ;;  %2943 = vmatprep.subr.mxu1 %v3513_v34 }
 0x2d2   : > { %2944 = vmatpush3.msra.mxu1 %v3513_v34  ;;  %2959 = vmatprep.mubr.msk.f32.mxu1 %vm513_vm0, %v2227_v11  ;;  %v1782_v15 = vpop.permute.xlu1 %1781 }
 0x2d3   : > { %2945 = vmatprep.subr.mxu1 %v3519_v35  ;;  %2865 = vmatmul.mubr.msk.f32.vlgmr.msra.gmra.mxu0 %vm513_vm0, %v1782_v15 }
 0x2d4   : > { %2887 = vmatpush3.msra.mxu0 %v3439_v18  ;;  %2946 = vmatpush3.msra.mxu1 %v3519_v35 }
 0x2d5   : > { %2888 = vmatprep.subr.mxu0 %v3444_v8  ;;  %2902 = vmatprep.mubr.msk.f32.mxu0 %vm513_vm0, %v3652_v56  ;;  %v3851_v17 = vpop.permute.xlu0 %1031 }
 0x2d6   : > { %2947 = vmatprep.subr.mxu1 %v3529_v36  ;;  %2889 = vmatpush3.msra.mxu0 %v3444_v8  ;;  %v1035_v19 = vadd.f32 %v3851_v17, %v1021_v16  ;;  %v2144_v21 = vpop.permute.xlu1 %2143 }
 0x2d7   : > { %2948 = vmatpush3.msra.mxu1 %v3529_v36  ;;  %2890 = vmatprep.subr.mxu0 %v3451_v7 }
 0x2d8   : > { %2949 = vmatprep.subr.mxu1 %v3536_v37  ;;  %2891 = vmatpush3.msra.mxu0 %v3451_v7  ;;  %v2437_v20 = vmul.f32 -1.442695, %v1035_v19 }
 0x2d9   : > { %2950 = vmatpush3.msra.mxu1 %v3536_v37  ;;  %2892 = vmatprep.subr.mxu0 %v3460_v31 }
 0x2da   : > { %2951 = vmatprep.subr.mxu1 %v3545_v23  ;;  %2893 = vmatpush3.msra.mxu0 %v3460_v31  ;;  %3010 = vpow2.f32 %v2437_v20  ;;  %v2146_v25 = vpop.permute.xlu1 %2145 }
 0x2db   : > { %2952 = vmatpush3.msra.mxu1 %v3545_v23  ;;  %2894 = vmatprep.subr.mxu0 %v3472_v0 }
 0x2dc   : > { %2953 = vmatprep.subr.mxu1 %v3552_v38  ;;  %2895 = vmatpush3.msra.mxu0 %v3472_v0 }
 0x2dd   : > { %2954 = vmatpush3.msra.mxu1 %v3552_v38  ;;  %2896 = vmatprep.subr.mxu0 %v3486_v32 }
 0x2de   : > { %2955 = vmatprep.subr.mxu1 %v3559_v39  ;;  %2897 = vmatpush3.msra.mxu0 %v3486_v32 }
 0x2df   : > { %2956 = vmatpush3.msra.mxu1 %v3559_v39  ;;  %2898 = vmatprep.subr.mxu0 %v3495_v33 }
 0x2e0   : > { %2957 = vmatprep.subr.mxu1 %v3566_v40  ;;  %2899 = vmatpush3.msra.mxu0 %v3495_v33 }
 0x2e1   : > { %2958 = vmatpush3.msra.mxu1 %v3566_v40  ;;  %2900 = vmatprep.subr.mxu0 %v3502_v30 }
 0x2e2   : > { %2960 = vmatmul.mubr.msk.f32.vlgmr.msra.gmra.mxu1 %vm513_vm0, %v2229_v10  ;;  %2901 = vmatpush3.msra.mxu0 %v3502_v30 }
 0x2e3   : > { %2903 = vmatmul.mubr.msk.f32.vlgmr.msra.gmra.mxu0 %vm513_vm0, %v3668_v60  ;;  %2924 = vmatprep.subr.mxu0 %v3439_v18 }
 0x2e4   : > { %2925 = vmatpush3.msra.mxu0 %v3439_v18  ;;  %2940 = vmatprep.mubr.msk.f32.mxu0 %vm513_vm0, %v2144_v21 }
 0x2e5   : > { %2926 = vmatprep.subr.mxu0 %v3444_v8 }
 0x2e6   : > { %2927 = vmatpush3.msra.mxu0 %v3444_v8 }
 0x2e7   : > { %v3011_v27 = vpop.eup %3010  ;;  %2928 = vmatprep.subr.mxu0 %v3451_v7  ;;  %v3889_v28 = vpop.permute.xlu1 %1026 }
 0x2e8   : > { %v1043_v9 = vadd.f32 1.0, %v3011_v27  ;;  %v1034_v29 = vadd.f32 %v3889_v28, %v1016_v26  ;;  %2929 = vmatpush3.msra.mxu0 %v3451_v7 }
 0x2e9   : > { %2930 = vmatprep.subr.mxu0 %v3460_v31 }
 0x2ea   : > { %3012 = vrcp.f32 %v1043_v9  ;;  %v2436_v18 = vmul.f32 -1.442695, %v1034_v29  ;;  %2931 = vmatpush3.msra.mxu0 %v3460_v31 }
 0x2eb   : > { %2932 = vmatprep.subr.mxu0 %v3472_v0 }
 0x2ec   : > { %3014 = vpow2.f32 %v2436_v18  ;;  %2933 = vmatpush3.msra.mxu0 %v3472_v0 }
 0x2ed   : > { %2934 = vmatprep.subr.mxu0 %v3486_v32 }
 0x2ee   : > { %2935 = vmatpush3.msra.mxu0 %v3486_v32 }
 0x2ef   : > { %2936 = vmatprep.subr.mxu0 %v3495_v33 }
 0x2f0   : > { %2937 = vmatpush3.msra.mxu0 %v3495_v33 }
 0x2f1   : > { %2938 = vmatprep.subr.mxu0 %v3502_v30 }
 0x2f2   : > { %2939 = vmatpush3.msra.mxu0 %v3502_v30 }
 0x2f3   : > { %2941 = vmatmul.mubr.msk.f32.vlgmr.msra.gmra.mxu0 %vm513_vm0, %v2146_v25 }
 0x2f7   : > { %v3013_v8 = vpop.eup %3012 }
 0x2f8   : > { %2438 = vst [vmem:[%s3908_s17 + $0x8] sm:$0xff] %v3013_v8 }
 0x2f9   : > { %v3015_v7 = vpop.eup %3014 }
 0x2fa   : > { %v1042_v31 = vadd.f32 1.0, %v3015_v7 }
 0x2fc   : > { %3016 = vrcp.f32 %v1042_v31 }
 0x309   : > { %v3017_v0 = vpop.eup %3016 }
 0x30a   : > { %1048 = vst [vmem:[%s3908_s17] sm:$0xff] %v3017_v0 }
 0x322   : > { %v2733_v32 = vpop.f32.mrf.mxu1 }
 0x324   : > { %v1208_v30 = vpop.f32.mrf.mxu1 }
 0x332   : > { %v2771_v40 = vpop.f32.mrf.mxu1 }
 0x334   : > { %v2714_v33 = vpop.f32.mrf.mxu0  ;;  %v1388_v43 = vpop.f32.mrf.mxu1 }
 0x335   : > { %v1214_v34 = vadd.f32 %v2733_v32, %v2714_v33 }
 0x336   : > { %v1125_v35 = vpop.f32.mrf.mxu0 }
 0x337   : > { %v1218_v36 = vadd.f32 %v1214_v34, %v3851_v17  ;;  %v1209_v37 = vadd.f32 %v1208_v30, %v1125_v35 }
 0x339   : > { %v2444_v23 = vmul.f32 -1.442695, %v1218_v36  ;;  %v1217_v38 = vadd.f32 %v1209_v37, %v3889_v28 }
 0x33b   : > { %3018 = vpow2.f32 %v2444_v23  ;;  %v2443_v39 = vmul.f32 -1.442695, %v1217_v38 }
 0x33d   : > { %3020 = vpow2.f32 %v2443_v39 }
 0x343   : > { %v2809_v54 = vpop.f32.mrf.mxu1 }
 0x345   : > { %v2752_v41 = vpop.f32.mrf.mxu0  ;;  %v1572_v58 = vpop.f32.mrf.mxu1 }
 0x346   : > { %v1394_v42 = vadd.f32 %v2771_v40, %v2752_v41 }
 0x347   : > { %v1307_v44 = vpop.f32.mrf.mxu0 }
 0x348   : > { %v3019_v45 = vpop.eup %3018  ;;  %v1398_v46 = vadd.f32 %v1394_v42, %v3851_v17  ;;  %v1389_v47 = vadd.f32 %v1388_v43, %v1307_v44 }
 0x349   : > { %v1226_v48 = vadd.f32 1.0, %v3019_v45 }
 0x34a   : > { %v3021_v49 = vpop.eup %3020  ;;  %v2452_v50 = vmul.f32 -1.442695, %v1398_v46  ;;  %v1397_v51 = vadd.f32 %v1389_v47, %v3889_v28 }
 0x34b   : > { %3022 = vrcp.f32 %v1226_v48  ;;  %v1225_v52 = vadd.f32 1.0, %v3021_v49 }
 0x34c   : > { %3024 = vpow2.f32 %v2452_v50  ;;  %v2451_v53 = vmul.f32 -1.442695, %v1397_v51 }
 0x34d   : > { %3026 = vrcp.f32 %v1225_v52 }
 0x34e   : > { %3028 = vpow2.f32 %v2451_v53 }
 0x355   : > { %v2847_v11 = vpop.f32.mrf.mxu1 }
 0x356   : > { %v2790_v55 = vpop.f32.mrf.mxu0 }
 0x357   : > { %v1578_v56 = vadd.f32 %v2809_v54, %v2790_v55  ;;  %v1752_v10 = vpop.f32.mrf.mxu1 }
 0x358   : > { %v3023_v57 = vpop.eup %3022  ;;  %v1489_v59 = vpop.f32.mrf.mxu0 }
 0x359   : > { %v3025_v60 = vpop.eup %3024  ;;  %2446 = vst [vmem:[%s3908_s17 + $0x18] sm:$0xff] %v3023_v57  ;;  %v1582_v61 = vadd.f32 %v1578_v56, %v3851_v17  ;;  %v1573_v62 = vadd.f32 %v1572_v58, %v1489_v59 }
 0x35a   : > { %v3027_v63 = vpop.eup %3026  ;;  %v1406_v1 = vadd.f32 1.0, %v3025_v60 }
 0x35b   : > { %v3029_v2 = vpop.eup %3028  ;;  %2445 = vst [vmem:[%s3908_s17 + $0x10] sm:$0xff] %v3027_v63  ;;  %v2460_v3 = vmul.f32 -1.442695, %v1582_v61  ;;  %v1581_v4 = vadd.f32 %v1573_v62, %v3889_v28 }
 0x35c   : > { %3030 = vrcp.f32 %v1406_v1  ;;  %v1405_v5 = vadd.f32 1.0, %v3029_v2 }
 0x35d   : > { %3032 = vpow2.f32 %v2460_v3  ;;  %v2459_v6 = vmul.f32 -1.442695, %v1581_v4 }
 0x35e   : > { %3034 = vrcp.f32 %v1405_v5 }
 0x35f   : > { %3036 = vpow2.f32 %v2459_v6 }
 0x366   : > { %v2828_v12 = vpop.f32.mrf.mxu0 }
 0x367   : > { %v1758_v13 = vadd.f32 %v2847_v11, %v2828_v12 }
 0x368   : > { %v1671_v14 = vpop.f32.mrf.mxu0 }
 0x369   : > { %v3031_v15 = vpop.eup %3030  ;;  %v1762_v16 = vadd.f32 %v1758_v13, %v3851_v17  ;;  %v1753_v19 = vadd.f32 %v1752_v10, %v1671_v14 }
 0x36a   : > { %v3033_v20 = vpop.eup %3032  ;;  %2454 = vst [vmem:[%s3908_s17 + $0x28] sm:$0xff] %v3031_v15 }
 0x36b   : > { %v3035_v21 = vpop.eup %3034  ;;  %v1590_v22 = vadd.f32 1.0, %v3033_v20  ;;  %v2468_v24 = vmul.f32 -1.442695, %v1762_v16  ;;  %v1761_v25 = vadd.f32 %v1753_v19, %v3889_v28 }
 0x36c   : > { %v3037_v26 = vpop.eup %3036  ;;  %2453 = vst [vmem:[%s3908_s17 + $0x20] sm:$0xff] %v3035_v21 }
 0x36d   : > { %3038 = vrcp.f32 %v1590_v22  ;;  %v1589_v27 = vadd.f32 1.0, %v3037_v26  ;;  %v2467_v9 = vmul.f32 -1.442695, %v1761_v25 }
 0x36e   : > { %3040 = vpow2.f32 %v2468_v24 }
 0x36f   : > { %3042 = vrcp.f32 %v1589_v27 }
 0x370   : > { %3044 = vpow2.f32 %v2467_v9 }
 0x37a   : > { %v3039_v29 = vpop.eup %3038 }
 0x37b   : > { %v3041_v18 = vpop.eup %3040  ;;  %2462 = vst [vmem:[%s3908_s17 + $0x38] sm:$0xff] %v3039_v29 }
 0x37c   : > { %v3043_v8 = vpop.eup %3042  ;;  %v1770_v7 = vadd.f32 1.0, %v3041_v18 }
 0x37d   : > { %v3045_v31 = vpop.eup %3044  ;;  %2461 = vst [vmem:[%s3908_s17 + $0x30] sm:$0xff] %v3043_v8 }
 0x37e   : > { %3046 = vrcp.f32 %v1770_v7  ;;  %v1769_v0 = vadd.f32 1.0, %v3045_v31 }
 0x380   : > { %3048 = vrcp.f32 %v1769_v0 }
 0x381   : > { %v2885_v34 = vpop.f32.mrf.mxu1 }
 0x383   : > { %v1936_v36 = vpop.f32.mrf.mxu1 }
 0x38b   : > { %v3047_v32 = vpop.eup %3046 }
 0x38c   : > { %2470 = vst [vmem:[%s3908_s17 + $0x48] sm:$0xff] %v3047_v32 }
 0x38d   : > { %v3049_v33 = vpop.eup %3048 }
 0x38e   : > { %2469 = vst [vmem:[%s3908_s17 + $0x40] sm:$0xff] %v3049_v33 }
 0x391   : > { %v2923_v42 = vpop.f32.mrf.mxu1 }
 0x393   : > { %v2866_v30 = vpop.f32.mrf.mxu0  ;;  %v2116_v45 = vpop.f32.mrf.mxu1 }
 0x394   : > { %v1942_v35 = vadd.f32 %v2885_v34, %v2866_v30 }
 0x395   : > { %v1853_v37 = vpop.f32.mrf.mxu0 }
 0x396   : > { %v1946_v23 = vadd.f32 %v1942_v35, %v3851_v17  ;;  %v1937_v38 = vadd.f32 %v1936_v36, %v1853_v37 }
 0x398   : > { %v2476_v39 = vmul.f32 -1.442695, %v1946_v23  ;;  %v1945_v40 = vadd.f32 %v1937_v38, %v3889_v28 }
 0x39a   : > { %3050 = vpow2.f32 %v2476_v39  ;;  %v2475_v41 = vmul.f32 -1.442695, %v1945_v40 }
 0x39c   : > { %3052 = vpow2.f32 %v2475_v41 }
 0x3a2   : > { %v2961_v56 = vpop.f32.mrf.mxu1 }
 0x3a3   : > { %v2904_v43 = vpop.f32.mrf.mxu0 }
 0x3a4   : > { %v2122_v44 = vadd.f32 %v2923_v42, %v2904_v43  ;;  %v2300_v59 = vpop.f32.mrf.mxu1 }
 0x3a5   : > { %v2035_v46 = vpop.f32.mrf.mxu0 }
 0x3a6   : > { %v2126_v47 = vadd.f32 %v2122_v44, %v3851_v17  ;;  %v2117_v48 = vadd.f32 %v2116_v45, %v2035_v46 }
 0x3a7   : > { %v3051_v49 = vpop.eup %3050 }
 0x3a8   : > { %v1954_v50 = vadd.f32 1.0, %v3051_v49  ;;  %v2484_v51 = vmul.f32 -1.442695, %v2126_v47  ;;  %v2125_v52 = vadd.f32 %v2117_v48, %v3889_v28 }
 0x3a9   : > { %v3053_v53 = vpop.eup %3052 }
 0x3aa   : > { %3054 = vrcp.f32 %v1954_v50  ;;  %v1953_v54 = vadd.f32 1.0, %v3053_v53  ;;  %v2483_v55 = vmul.f32 -1.442695, %v2125_v52 }
 0x3ab   : > { %3056 = vpow2.f32 %v2484_v51 }
 0x3ac   : > { %3058 = vrcp.f32 %v1953_v54 }
 0x3ad   : > { %3060 = vpow2.f32 %v2483_v55 }
 0x3b3   : > { %v2942_v57 = vpop.f32.mrf.mxu0 }
 0x3b4   : > { %v2306_v58 = vadd.f32 %v2961_v56, %v2942_v57 }
 0x3b5   : > { %v2217_v60 = vpop.f32.mrf.mxu0 }
 0x3b6   : > { %v2310_v61 = vadd.f32 %v2306_v58, %v3851_v17  ;;  %v2301_v62 = vadd.f32 %v2300_v59, %v2217_v60 }
 0x3b7   : > { %v3055_v63 = vpop.eup %3054 }
 0x3b8   : > { %v3057_v1 = vpop.eup %3056  ;;  %2478 = vst [vmem:[%s3908_s17 + $0x58] sm:$0xff] %v3055_v63  ;;  %v2492_v2 = vmul.f32 -1.442695, %v2310_v61  ;;  %v2309_v3 = vadd.f32 %v2301_v62, %v3889_v28 }
 0x3b9   : > { %v3059_v4 = vpop.eup %3058  ;;  %v2134_v5 = vadd.f32 1.0, %v3057_v1 }
 0x3ba   : > { %v3061_v6 = vpop.eup %3060  ;;  %2477 = vst [vmem:[%s3908_s17 + $0x50] sm:$0xff] %v3059_v4  ;;  %3062 = vpow2.f32 %v2492_v2  ;;  %v2491_v11 = vmul.f32 -1.442695, %v2309_v3 }
 0x3bb   : > { %3064 = vrcp.f32 %v2134_v5  ;;  %v2133_v12 = vadd.f32 1.0, %v3061_v6 }
 0x3bc   : > { %3066 = vpow2.f32 %v2491_v11 }
 0x3bd   : > { %3068 = vrcp.f32 %v2133_v12 }
 0x3c7   : > { %v3063_v17 = vpop.eup %3062 }
 0x3c8   : > { %v3065_v13 = vpop.eup %3064  ;;  %v2318_v10 = vadd.f32 1.0, %v3063_v17 }
 0x3c9   : > { %v3067_v14 = vpop.eup %3066  ;;  %2486 = vst [vmem:[%s3908_s17 + $0x68] sm:$0xff] %v3065_v13 }
 0x3ca   : > { %v3069_v15 = vpop.eup %3068  ;;  %3070 = vrcp.f32 %v2318_v10  ;;  %v2317_v28 = vadd.f32 1.0, %v3067_v14 }
 0x3cb   : > { %2485 = vst [vmem:[%s3908_s17 + $0x60] sm:$0xff] %v3069_v15 }
 0x3cc   : > { %3072 = vrcp.f32 %v2317_v28 }
 0x3d7   : > { %v3071_v16 = vpop.eup %3070 }
 0x3d8   : > { %2494 = vst [vmem:[%s3908_s17 + $0x78] sm:$0xff] %v3071_v16 }
 0x3d9   : > { %v3073_v19 = vpop.eup %3072 }
 0x3da   : > { %2493 = vst [vmem:[%s3908_s17 + $0x70] sm:$0xff] %v3073_v19 }
 0x3db PF: > { %s18_s4 = sadd.s32 1, %s3112_s4   ;;  %s3964_s27 = smov %s3104_s29 }
 0x3dc   : > { %p15_p7 = scmp.ge.s32.totalorder %s18_s4, 18   ;;  %s3965_s28 = smov %s3108_s30 }
 0x3dd   : > { %s3966_s29 = smov %s3969_s5  ;;  %s3967_s30 = smov %s3973_s9 }
 0x3de   :  { %17 = sbr.rel (!%p15_p7) target bundleno = 3 (0x3), region = 98 }

</bundles_post_ra>
